<compile_context>
chip_gen: v5e
topology: v5e:2x2
jax: 0.10.0
libtpu: 0.0.40
codegen_flags: <defaults>
</compile_context>

<pallas_src>
import functools
import math

import jax
import jax.numpy as jnp
from jax.experimental import pallas as pl
from jax.experimental.pallas import tpu as pltpu

EPS = 0.001
LANE = 128


def _rup(x, m):
    return (x + m - 1) // m * m


def _tpu_defaults():
    """Per-generation scoped-VMEM budget and row-tile cap (v5e/v6e: 128 MiB
    physical VMEM -> big tiles; v7x: 64 MiB per TC -> conservative)."""
    cap = 0
    try:
        cap = int(pltpu.get_tpu_info().vmem_capacity_bytes)
    except Exception:
        cap = 0
    if cap >= 96 * 1024 * 1024:
        return min(cap - 32 * 1024 * 1024, 96 * 1024 * 1024), 1024
    return 40 * 1024 * 1024, 512


_VMEM_LIMIT, _MAX_TILE_ROWS = _tpu_defaults()


def _cparams(dims):
    return pltpu.CompilerParams(dimension_semantics=dims,
                                vmem_limit_bytes=_VMEM_LIMIT)


# ----------------------------- Pallas kernels ------------------------------ #

def _conv_taps_matmul(x_ref, w_ref, *, stride, th, wo, cinp, cop):
    """3x3 conv for one (sample, row-band): unrolled 9-tap loop of bf16 MXU
    matmuls with f32 accumulation.  Taps are contiguous slices of the
    per-sample phase planes resident in VMEM; weights are VMEM-resident."""
    tr = th * wo
    b = pl.program_id(1)
    acc = jnp.zeros((tr, cop), jnp.float32)
    for kh in range(3):
        for kw in range(3):
            ph = (kh % stride) * stride + (kw % stride)      # static phase id
            r0 = b * th + kh // stride                        # dynamic row off
            c0 = kw // stride                                 # static col off
            band = x_ref[ph, pl.ds(r0, th), :, :]             # (th, wp, cinp)
            tap = band[:, c0:c0 + wo, :]                      # (th, wo, cinp)
            acc += jnp.dot(tap.reshape(tr, cinp), w_ref[kh * 3 + kw],
                           preferred_element_type=jnp.float32)
    return acc


def _write_stats(st_ref, z):
    # Per-grid-step partial BN statistics (sum / sum-of-squares) -> (1,2,Cop).
    s = jnp.sum(z, axis=0, keepdims=True)
    q = jnp.sum(z * z, axis=0, keepdims=True)
    st_ref[...] = jnp.concatenate([s, q], axis=0)[None]


def _conv_stats_kernel(x_ref, w_ref, y_ref, st_ref, *,
                       stride, th, wo, cinp, cop):
    y = _conv_taps_matmul(x_ref, w_ref, stride=stride, th=th, wo=wo,
                          cinp=cinp, cop=cop)
    y_ref[...] = y
    _write_stats(st_ref, y)


def _conv_add_stats_kernel(x_ref, w_ref, r_ref, y_ref, st_ref, *,
                           stride, th, wo, cinp, cop):
    # conv + fused residual add + partial BN stats.
    z = _conv_taps_matmul(x_ref, w_ref, stride=stride, th=th, wo=wo,
                          cinp=cinp, cop=cop) + r_ref[...]
    y_ref[...] = z
    _write_stats(st_ref, z)


def _conv_ds_add_stats_kernel(x_ref, w_ref, xs_ref, wds_ref, y_ref, st_ref, *,
                              stride, th, wo, cinp, cop):
    # conv + fused strided 1x1 downsample matmul + residual add + BN stats.
    res = jnp.dot(xs_ref[...], wds_ref[...],
                  preferred_element_type=jnp.float32)
    z = _conv_taps_matmul(x_ref, w_ref, stride=stride, th=th, wo=wo,
                          cinp=cinp, cop=cop) + res
    y_ref[...] = z
    _write_stats(st_ref, z)


def _bn_relu_kernel(x_ref, s_ref, q_ref, g_ref, b_ref, o_ref, *, inv_n):
    # pass 2 of training-mode BN: apply batch statistics + ReLU (row-parallel).
    # Padded channels have gamma=beta=sum=sumsq=0 -> output stays exactly 0.
    mean = s_ref[...] * inv_n
    var = jnp.maximum(q_ref[...] * inv_n - mean * mean, 0.0)
    scale = g_ref[...] * jax.lax.rsqrt(var + EPS)
    shift = b_ref[...] - mean * scale
    o_ref[...] = jnp.maximum(x_ref[...] * scale + shift,
                             0.0).astype(o_ref.dtype)


# ----------------------------- wrapper helpers ----------------------------- #

def _conv_phases(x_nhwc, stride, cinp):
    """Zero-pad (spatial + channel) and split into stride^2 phase planes so
    every (kh,kw) tap is a contiguous slice of one phase inside the kernel.
    For stride=1 this is just the padded array (single phase)."""
    n, h, w, c = x_nhwc.shape
    s = stride
    ho = (h - 1) // s + 1
    wo = (w - 1) // s + 1
    xp = jnp.pad(x_nhwc,
                 ((0, 0), (1, 1), (1, 1), (0, cinp - c))).astype(jnp.bfloat16)
    hp = ho + 2 // s
    wp = wo + 2 // s
    if s == 1:
        return xp, (n, ho, wo, hp, wp)
    phases = []
    for r in range(s):
        for cph in range(s):
            v = xp[:, r::s, cph::s, :]
            v = v[:, :hp, :wp, :]
            dh, dw = hp - v.shape[1], wp - v.shape[2]
            if dh or dw:
                v = jnp.pad(v, ((0, 0), (0, dh), (0, dw), (0, 0)))
            phases.append(v)
    xph = jnp.stack(phases, axis=1).reshape(n * s * s, hp, wp, cinp)
    return xph, (n, ho, wo, hp, wp)


def _pick_th(ho, wo, max_rows):
    """Largest divisor of Ho whose row tile (th*Wo) is <= max_rows, preferring
    sublane-aligned (multiple-of-8) tiles."""
    divs = [t for t in range(1, ho + 1) if ho % t == 0]
    ok8 = [t for t in divs if t * wo <= max_rows and (t * wo) % 8 == 0]
    if ok8:
        return max(ok8)
    ok = [t for t in divs if t * wo <= max_rows]
    return max(ok) if ok else 1


def _conv3x3(x_nhwc, w_oihw, stride, *, residual=None, ds=None):
    """Fused 3x3 conv (+ optional residual add / strided 1x1 downsample) +
    per-tile BN statistics in a single gridded pallas_call."""
    cout, cin = w_oihw.shape[0], w_oihw.shape[1]
    cinp, cop = _rup(cin, LANE), _rup(cout, LANE)

    xph, (n, ho, wo, hp, wp) = _conv_phases(x_nhwc, stride, cinp)
    nphase = stride * stride
    th = _pick_th(ho, wo, _MAX_TILE_ROWS)
    nb = ho // th
    tr = th * wo
    rows = n * ho * wo

    # weights: (3,3,Cin,Cout) -> (9, Cinp, Cop), VMEM-resident (constant block)
    w = jnp.transpose(w_oihw, (2, 3, 1, 0))
    w = jnp.pad(w, ((0, 0), (0, 0), (0, cinp - cin), (0, cop - cout)))
    w = w.reshape(9, cinp, cop).astype(jnp.bfloat16)

    grid = (n, nb)
    x_spec = pl.BlockSpec((nphase, hp, wp, cinp), lambda i, b: (i, 0, 0, 0))
    w_spec = pl.BlockSpec((9, cinp, cop), lambda i, b: (0, 0, 0))

    def row_spec(width):
        return pl.BlockSpec((tr, width), lambda i, b: (i * nb + b, 0))

    st_spec = pl.BlockSpec((1, 2, cop), lambda i, b: (i * nb + b, 0, 0))

    kparams = dict(stride=stride, th=th, wo=wo, cinp=cinp, cop=cop)
    out_shape = (jax.ShapeDtypeStruct((rows, cop), jnp.float32),
                 jax.ShapeDtypeStruct((n * nb, 2, cop), jnp.float32))
    out_specs = (row_spec(cop), st_spec)

    if ds is not None:
        xs2d, wds = ds
        kern = functools.partial(_conv_ds_add_stats_kernel, **kparams)
        in_specs = [x_spec, w_spec, row_spec(xs2d.shape[1]),
                    pl.BlockSpec(wds.shape, lambda i, b: (0, 0))]
        args = (xph, w, xs2d, wds)
    elif residual is not None:
        kern = functools.partial(_conv_add_stats_kernel, **kparams)
        in_specs = [x_spec, w_spec, row_spec(cop)]
        args = (xph, w, residual)
    else:
        kern = functools.partial(_conv_stats_kernel, **kparams)
        in_specs = [x_spec, w_spec]
        args = (xph, w)

    y, st = pl.pallas_call(
        kern, out_shape=out_shape, grid=grid,
        in_specs=in_specs, out_specs=out_specs,
        compiler_params=_cparams(("parallel", "parallel")),
    )(*args)

    # tiny (tiles, 2, Cop) partial reduction in XLA
    s = jnp.sum(st[:, 0, :], axis=0, keepdims=True)
    q = jnp.sum(st[:, 1, :], axis=0, keepdims=True)
    return y, s, q, (n, ho, wo, rows, tr, cop)


def _bn_relu(x2d, s, q, gamma, beta, count, tr, out_dtype=jnp.bfloat16):
    rows, cop = x2d.shape
    c = gamma.shape[0]
    g = jnp.pad(gamma, (0, cop - c)).reshape(1, cop).astype(jnp.float32)
    b = jnp.pad(beta, (0, cop - c)).reshape(1, cop).astype(jnp.float32)
    kern = functools.partial(_bn_relu_kernel, inv_n=1.0 / float(count))

    def vec():
        return pl.BlockSpec((1, cop), lambda i: (0, 0))

    return pl.pallas_call(
        kern, out_shape=jax.ShapeDtypeStruct((rows, cop), out_dtype),
        grid=(rows // tr,),
        in_specs=[pl.BlockSpec((tr, cop), lambda i: (i, 0)),
                  vec(), vec(), vec(), vec()],
        out_specs=pl.BlockSpec((tr, cop), lambda i: (i, 0)),
        compiler_params=_cparams(("parallel",)),
    )(x2d, s, q, g, b)


# ------------------------------ forward pass ------------------------------- #

def resnet_layer_forward(x_nchw, params, stride):
    x = jnp.transpose(x_nchw, (0, 2, 3, 1)).astype(jnp.float32)   # NCHW->NHWC
    n0, h0, w0, cin = x.shape
    cout = params["conv1a"].shape[0]

    # out = relu(bn1a(conv1a(x)))    (conv fused with BN stats, then apply)
    y1, s1, q1, (n, ho, wo, rows, tr, cop) = _conv3x3(
        x, params["conv1a"], stride)
    a1 = _bn_relu(y1, s1, q1, params["bn1a_g"], params["bn1a_b"], rows, tr)
    a1_sp = a1.reshape(n, ho, wo, cop)       # bf16; padded channels exactly 0

    # out = conv2a(out) + residual ; BN stats of the sum (all fused)
    if stride == 1:
        res = jnp.pad(x.reshape(rows, cin), ((0, 0), (0, cop - cin)))
        z1, s2, q2, _ = _conv3x3(a1_sp, params["conv2a"], 1, residual=res)
    else:
        # TODO(synk): fold this strided gather into the kernel's input
        # index_map instead of XLA glue.
        cds = _rup(cin, LANE)
        xs = x[:, ::stride, ::stride, :].reshape(rows, cin)
        xs = jnp.pad(xs, ((0, 0), (0, cds - cin))).astype(jnp.bfloat16)
        wds = jnp.pad(params["downsample"].reshape(cout, cin).T,
                      ((0, cds - cin), (0, cop - cout))).astype(jnp.bfloat16)
        z1, s2, q2, _ = _conv3x3(a1_sp, params["conv2a"], 1, ds=(xs, wds))

    # out = relu(outbna(out))
    a2 = _bn_relu(z1, s2, q2, params["outbna_g"], params["outbna_b"], rows, tr)
    a2_sp = a2.reshape(n, ho, wo, cop)

    # out = relu(bn1b(conv1b(out)))
    y3, s3, q3, _ = _conv3x3(a2_sp, params["conv1b"], 1)
    a3 = _bn_relu(y3, s3, q3, params["bn1b_g"], params["bn1b_b"], rows, tr)
    a3_sp = a3.reshape(n, ho, wo, cop)

    # out = conv2b(out) + residual(z1) ; BN stats fused
    z2, s4, q4, _ = _conv3x3(a3_sp, params["conv2b"], 1, residual=z1)

    # out = relu(outbnb(out))   (final stage kept f32)
    a4 = _bn_relu(z2, s4, q4, params["outbnb_g"], params["outbnb_b"], rows, tr,
                  out_dtype=jnp.float32)

    out = a4[:, :cout].reshape(n, ho, wo, cout)
    return jnp.transpose(out, (0, 3, 1, 2))                       # NHWC->NCHW


# -------------------- pure-JAX reference (matched bf16 MXU) ----------------- #

def _ref_conv(x, w, stride, pad):
    return jax.lax.conv_general_dilated(
        x.astype(jnp.bfloat16), w.astype(jnp.bfloat16),
        (stride, stride), ((pad, pad), (pad, pad)),
        dimension_numbers=("NCHW", "OIHW", "NCHW"),
        preferred_element_type=jnp.float32)


def _ref_bn_relu(x, g, b):
    mean = jnp.mean(x, axis=(0, 2, 3), keepdims=True)
    var = jnp.mean(jnp.square(x - mean), axis=(0, 2, 3), keepdims=True)
    y = (x - mean) * jax.lax.rsqrt(var + EPS)
    y = y * g.reshape(1, -1, 1, 1) + b.reshape(1, -1, 1, 1)
    return jnp.maximum(y, 0.0)


def resnet_layer_reference(x, p, stride):
    out = _ref_bn_relu(_ref_conv(x, p["conv1a"], stride, 1),
                       p["bn1a_g"], p["bn1a_b"])
    out = _ref_conv(out, p["conv2a"], 1, 1)
    residual = x if stride == 1 else _ref_conv(x, p["downsample"], stride, 0)
    out = out + residual
    residual = out
    out = _ref_bn_relu(out, p["outbna_g"], p["outbna_b"])
    out = _ref_bn_relu(_ref_conv(out, p["conv1b"], 1, 1),
                       p["bn1b_g"], p["bn1b_b"])
    out = _ref_conv(out, p["conv2b"], 1, 1)
    out = out + residual
    out = _ref_bn_relu(out, p["outbnb_g"], p["outbnb_b"])
    return out


# ----------------------------------- main ----------------------------------- #

def _init_params(key, inplanes, outplanes):
    ks = jax.random.split(key, 16)

    def conv_w(k, cout, cin, kh, kw):
        fan_in = cin * kh * kw
        return (jax.random.normal(k, (cout, cin, kh, kw), jnp.float32)
                / math.sqrt(fan_in))

    def bn_gb(kg, kb, c):
        g = 1.0 + 0.1 * jax.random.normal(kg, (c,), jnp.float32)
        b = 0.1 * jax.random.normal(kb, (c,), jnp.float32)
        return g, b

    p = {}
    p["conv1a"] = conv_w(ks[0], outplanes, inplanes, 3, 3)
    p["bn1a_g"], p["bn1a_b"] = bn_gb(ks[1], ks[2], outplanes)
    p["conv2a"] = conv_w(ks[3], outplanes, outplanes, 3, 3)
    p["downsample"] = conv_w(ks[4], outplanes, inplanes, 1, 1)
    p["outbna_g"], p["outbna_b"] = bn_gb(ks[5], ks[6], outplanes)
    p["conv1b"] = conv_w(ks[7], outplanes, outplanes, 3, 3)
    p["bn1b_g"], p["bn1b_b"] = bn_gb(ks[8], ks[9], outplanes)
    p["conv2b"] = conv_w(ks[10], outplanes, outplanes, 3, 3)
    p["outbnb_g"], p["outbnb_b"] = bn_gb(ks[11], ks[12], outplanes)
    return p


def _run_case(inplanes, outplanes, stride, n, h, w, key):
    kx, kp = jax.random.split(key)
    x = jax.random.normal(kx, (n, inplanes, h, w), jnp.float32)   # NCHW input
    params = _init_params(kp, inplanes, outplanes)

    fwd = jax.jit(resnet_layer_forward, static_argnames=("stride",))
    out = jax.block_until_ready(fwd(x, params, stride=stride))

    ref = jax.block_until_ready(resnet_layer_reference(x, params, stride))
    assert out.shape == ref.shape, (out.shape, ref.shape)
    max_err = float(jnp.max(jnp.abs(out - ref)))
    assert jnp.allclose(out, ref, rtol=5e-3, atol=5e-3), max_err


if __name__ == "__main__":
    key = jax.random.PRNGKey(0)
    k1, k2 = jax.random.split(key)
    # strided block (1x1 downsample residual path)
    _run_case(4, 8, 2, 2, 16, 16, k1)
    # identity-residual block (stride 1)
    _run_case(8, 8, 1, 2, 16, 16, k2)
    print("KERNEL_OK")
</pallas_src>

<mosaic_0001>
module attributes {stable_mosaic.version = 11 : i64} {
  func.func @_conv_stats_kernel(%arg0: i32, %arg1: i32, %arg2: memref<4x9x9x128xbf16, #tpu.memory_space<vmem>>, %arg3: memref<9x128x128xbf16, #tpu.memory_space<vmem>>, %arg4: memref<64x128xf32, #tpu.memory_space<vmem>>, %arg5: memref<1x2x128xf32, #tpu.memory_space<vmem>>) attributes {dimension_semantics = [#tpu.dimension_semantics<parallel>, #tpu.dimension_semantics<parallel>], iteration_bounds = array<i64: 2, 1>, scalar_prefetch = 0 : i64, scratch_operands = 0 : i64, tpu.core_type = #tpu.core_type<tc>, window_params = [{transform_indices = @transform_0, window_bounds = array<i64: 4, 9, 9, 128>}, {pipeline_mode = #tpu.pipeline_mode<synchronous>, transform_indices = @transform_1, window_bounds = array<i64: 9, 128, 128>}, {transform_indices = @transform_2, window_bounds = array<i64: 64, 128>}, {transform_indices = @transform_3, window_bounds = array<i64: 1, 2, 128>}]} {
    %cst = arith.constant 0.000000e+00 : f32
    %0 = vector.broadcast %cst : f32 to vector<64x128xf32>
    %c8_i32 = arith.constant 8 : i32
    %1 = arith.muli %arg1, %c8_i32 : i32
    %c0_i32 = arith.constant 0 : i32
    %2 = arith.addi %1, %c0_i32 : i32
    %c0 = arith.constant 0 : index
    %3 = arith.index_cast %2 : i32 to index
    %c0_0 = arith.constant 0 : index
    %c0_1 = arith.constant 0 : index
    %4 = vector.load %arg2[%c0, %3, %c0_0, %c0_1] : memref<4x9x9x128xbf16, #tpu.memory_space<vmem>>, vector<1x8x9x128xbf16>
    %5 = vector.shape_cast %4 : vector<1x8x9x128xbf16> to vector<8x9x128xbf16>
    %6 = vector.extract_strided_slice %5 {offsets = [0, 0, 0], sizes = [8, 8, 128], strides = [1, 1, 1]} : vector<8x9x128xbf16> to vector<8x8x128xbf16>
    %7 = vector.shape_cast %6 : vector<8x8x128xbf16> to vector<64x128xbf16>
    %c0_2 = arith.constant 0 : index
    %c0_3 = arith.constant 0 : index
    %c0_4 = arith.constant 0 : index
    %8 = vector.load %arg3[%c0_2, %c0_3, %c0_4] : memref<9x128x128xbf16, #tpu.memory_space<vmem>>, vector<1x128x128xbf16>
    %9 = vector.shape_cast %8 : vector<1x128x128xbf16> to vector<128x128xbf16>
    %cst_5 = arith.constant dense<0.000000e+00> : vector<64x128xf32>
    %10 = tpu.matmul %7, %9, %cst_5 {dimension_numbers = #tpu.dot_dimension_numbers<[1], [0], [0], [1], [0, 0, 1, 1], [], []>} : vector<64x128xbf16>, vector<128x128xbf16>, vector<64x128xf32> -> vector<64x128xf32>
    %11 = arith.addf %0, %10 : vector<64x128xf32>
    %c8_i32_6 = arith.constant 8 : i32
    %12 = arith.muli %arg1, %c8_i32_6 : i32
    %c0_i32_7 = arith.constant 0 : i32
    %13 = arith.addi %12, %c0_i32_7 : i32
    %c1 = arith.constant 1 : index
    %14 = arith.index_cast %13 : i32 to index
    %c0_8 = arith.constant 0 : index
    %c0_9 = arith.constant 0 : index
    %15 = vector.load %arg2[%c1, %14, %c0_8, %c0_9] : memref<4x9x9x128xbf16, #tpu.memory_space<vmem>>, vector<1x8x9x128xbf16>
    %16 = vector.shape_cast %15 : vector<1x8x9x128xbf16> to vector<8x9x128xbf16>
    %17 = vector.extract_strided_slice %16 {offsets = [0, 0, 0], sizes = [8, 8, 128], strides = [1, 1, 1]} : vector<8x9x128xbf16> to vector<8x8x128xbf16>
    %18 = vector.shape_cast %17 : vector<8x8x128xbf16> to vector<64x128xbf16>
    %c1_10 = arith.constant 1 : index
    %c0_11 = arith.constant 0 : index
    %c0_12 = arith.constant 0 : index
    %19 = vector.load %arg3[%c1_10, %c0_11, %c0_12] : memref<9x128x128xbf16, #tpu.memory_space<vmem>>, vector<1x128x128xbf16>
    %20 = vector.shape_cast %19 : vector<1x128x128xbf16> to vector<128x128xbf16>
    %cst_13 = arith.constant dense<0.000000e+00> : vector<64x128xf32>
    %21 = tpu.matmul %18, %20, %cst_13 {dimension_numbers = #tpu.dot_dimension_numbers<[1], [0], [0], [1], [0, 0, 1, 1], [], []>} : vector<64x128xbf16>, vector<128x128xbf16>, vector<64x128xf32> -> vector<64x128xf32>
    %22 = arith.addf %11, %21 : vector<64x128xf32>
    %c8_i32_14 = arith.constant 8 : i32
    %23 = arith.muli %arg1, %c8_i32_14 : i32
    %c0_i32_15 = arith.constant 0 : i32
    %24 = arith.addi %23, %c0_i32_15 : i32
    %c0_16 = arith.constant 0 : index
    %25 = arith.index_cast %24 : i32 to index
    %c0_17 = arith.constant 0 : index
    %c0_18 = arith.constant 0 : index
    %26 = vector.load %arg2[%c0_16, %25, %c0_17, %c0_18] : memref<4x9x9x128xbf16, #tpu.memory_space<vmem>>, vector<1x8x9x128xbf16>
    %27 = vector.shape_cast %26 : vector<1x8x9x128xbf16> to vector<8x9x128xbf16>
    %28 = vector.extract_strided_slice %27 {offsets = [0, 1, 0], sizes = [8, 8, 128], strides = [1, 1, 1]} : vector<8x9x128xbf16> to vector<8x8x128xbf16>
    %29 = vector.shape_cast %28 : vector<8x8x128xbf16> to vector<64x128xbf16>
    %c2 = arith.constant 2 : index
    %c0_19 = arith.constant 0 : index
    %c0_20 = arith.constant 0 : index
    %30 = vector.load %arg3[%c2, %c0_19, %c0_20] : memref<9x128x128xbf16, #tpu.memory_space<vmem>>, vector<1x128x128xbf16>
    %31 = vector.shape_cast %30 : vector<1x128x128xbf16> to vector<128x128xbf16>
    %cst_21 = arith.constant dense<0.000000e+00> : vector<64x128xf32>
    %32 = tpu.matmul %29, %31, %cst_21 {dimension_numbers = #tpu.dot_dimension_numbers<[1], [0], [0], [1], [0, 0, 1, 1], [], []>} : vector<64x128xbf16>, vector<128x128xbf16>, vector<64x128xf32> -> vector<64x128xf32>
    %33 = arith.addf %22, %32 : vector<64x128xf32>
    %c8_i32_22 = arith.constant 8 : i32
    %34 = arith.muli %arg1, %c8_i32_22 : i32
    %c0_i32_23 = arith.constant 0 : i32
    %35 = arith.addi %34, %c0_i32_23 : i32
    %c2_24 = arith.constant 2 : index
    %36 = arith.index_cast %35 : i32 to index
    %c0_25 = arith.constant 0 : index
    %c0_26 = arith.constant 0 : index
    %37 = vector.load %arg2[%c2_24, %36, %c0_25, %c0_26] : memref<4x9x9x128xbf16, #tpu.memory_space<vmem>>, vector<1x8x9x128xbf16>
    %38 = vector.shape_cast %37 : vector<1x8x9x128xbf16> to vector<8x9x128xbf16>
    %39 = vector.extract_strided_slice %38 {offsets = [0, 0, 0], sizes = [8, 8, 128], strides = [1, 1, 1]} : vector<8x9x128xbf16> to vector<8x8x128xbf16>
    %40 = vector.shape_cast %39 : vector<8x8x128xbf16> to vector<64x128xbf16>
    %c3 = arith.constant 3 : index
    %c0_27 = arith.constant 0 : index
    %c0_28 = arith.constant 0 : index
    %41 = vector.load %arg3[%c3, %c0_27, %c0_28] : memref<9x128x128xbf16, #tpu.memory_space<vmem>>, vector<1x128x128xbf16>
    %42 = vector.shape_cast %41 : vector<1x128x128xbf16> to vector<128x128xbf16>
    %cst_29 = arith.constant dense<0.000000e+00> : vector<64x128xf32>
    %43 = tpu.matmul %40, %42, %cst_29 {dimension_numbers = #tpu.dot_dimension_numbers<[1], [0], [0], [1], [0, 0, 1, 1], [], []>} : vector<64x128xbf16>, vector<128x128xbf16>, vector<64x128xf32> -> vector<64x128xf32>
    %44 = arith.addf %33, %43 : vector<64x128xf32>
    %c8_i32_30 = arith.constant 8 : i32
    %45 = arith.muli %arg1, %c8_i32_30 : i32
    %c0_i32_31 = arith.constant 0 : i32
    %46 = arith.addi %45, %c0_i32_31 : i32
    %c3_32 = arith.constant 3 : index
    %47 = arith.index_cast %46 : i32 to index
    %c0_33 = arith.constant 0 : index
    %c0_34 = arith.constant 0 : index
    %48 = vector.load %arg2[%c3_32, %47, %c0_33, %c0_34] : memref<4x9x9x128xbf16, #tpu.memory_space<vmem>>, vector<1x8x9x128xbf16>
    %49 = vector.shape_cast %48 : vector<1x8x9x128xbf16> to vector<8x9x128xbf16>
    %50 = vector.extract_strided_slice %49 {offsets = [0, 0, 0], sizes = [8, 8, 128], strides = [1, 1, 1]} : vector<8x9x128xbf16> to vector<8x8x128xbf16>
    %51 = vector.shape_cast %50 : vector<8x8x128xbf16> to vector<64x128xbf16>
    %c4 = arith.constant 4 : index
    %c0_35 = arith.constant 0 : index
    %c0_36 = arith.constant 0 : index
    %52 = vector.load %arg3[%c4, %c0_35, %c0_36] : memref<9x128x128xbf16, #tpu.memory_space<vmem>>, vector<1x128x128xbf16>
    %53 = vector.shape_cast %52 : vector<1x128x128xbf16> to vector<128x128xbf16>
    %cst_37 = arith.constant dense<0.000000e+00> : vector<64x128xf32>
    %54 = tpu.matmul %51, %53, %cst_37 {dimension_numbers = #tpu.dot_dimension_numbers<[1], [0], [0], [1], [0, 0, 1, 1], [], []>} : vector<64x128xbf16>, vector<128x128xbf16>, vector<64x128xf32> -> vector<64x128xf32>
    %55 = arith.addf %44, %54 : vector<64x128xf32>
    %c8_i32_38 = arith.constant 8 : i32
    %56 = arith.muli %arg1, %c8_i32_38 : i32
    %c0_i32_39 = arith.constant 0 : i32
    %57 = arith.addi %56, %c0_i32_39 : i32
    %c2_40 = arith.constant 2 : index
    %58 = arith.index_cast %57 : i32 to index
    %c0_41 = arith.constant 0 : index
    %c0_42 = arith.constant 0 : index
    %59 = vector.load %arg2[%c2_40, %58, %c0_41, %c0_42] : memref<4x9x9x128xbf16, #tpu.memory_space<vmem>>, vector<1x8x9x128xbf16>
    %60 = vector.shape_cast %59 : vector<1x8x9x128xbf16> to vector<8x9x128xbf16>
    %61 = vector.extract_strided_slice %60 {offsets = [0, 1, 0], sizes = [8, 8, 128], strides = [1, 1, 1]} : vector<8x9x128xbf16> to vector<8x8x128xbf16>
    %62 = vector.shape_cast %61 : vector<8x8x128xbf16> to vector<64x128xbf16>
    %c5 = arith.constant 5 : index
    %c0_43 = arith.constant 0 : index
    %c0_44 = arith.constant 0 : index
    %63 = vector.load %arg3[%c5, %c0_43, %c0_44] : memref<9x128x128xbf16, #tpu.memory_space<vmem>>, vector<1x128x128xbf16>
    %64 = vector.shape_cast %63 : vector<1x128x128xbf16> to vector<128x128xbf16>
    %cst_45 = arith.constant dense<0.000000e+00> : vector<64x128xf32>
    %65 = tpu.matmul %62, %64, %cst_45 {dimension_numbers = #tpu.dot_dimension_numbers<[1], [0], [0], [1], [0, 0, 1, 1], [], []>} : vector<64x128xbf16>, vector<128x128xbf16>, vector<64x128xf32> -> vector<64x128xf32>
    %66 = arith.addf %55, %65 : vector<64x128xf32>
    %c8_i32_46 = arith.constant 8 : i32
    %67 = arith.muli %arg1, %c8_i32_46 : i32
    %c1_i32 = arith.constant 1 : i32
    %68 = arith.addi %67, %c1_i32 : i32
    %c0_47 = arith.constant 0 : index
    %69 = arith.index_cast %68 : i32 to index
    %c0_48 = arith.constant 0 : index
    %c0_49 = arith.constant 0 : index
    %70 = vector.load %arg2[%c0_47, %69, %c0_48, %c0_49] : memref<4x9x9x128xbf16, #tpu.memory_space<vmem>>, vector<1x8x9x128xbf16>
    %71 = vector.shape_cast %70 : vector<1x8x9x128xbf16> to vector<8x9x128xbf16>
    %72 = vector.extract_strided_slice %71 {offsets = [0, 0, 0], sizes = [8, 8, 128], strides = [1, 1, 1]} : vector<8x9x128xbf16> to vector<8x8x128xbf16>
    %73 = vector.shape_cast %72 : vector<8x8x128xbf16> to vector<64x128xbf16>
    %c6 = arith.constant 6 : index
    %c0_50 = arith.constant 0 : index
    %c0_51 = arith.constant 0 : index
    %74 = vector.load %arg3[%c6, %c0_50, %c0_51] : memref<9x128x128xbf16, #tpu.memory_space<vmem>>, vector<1x128x128xbf16>
    %75 = vector.shape_cast %74 : vector<1x128x128xbf16> to vector<128x128xbf16>
    %cst_52 = arith.constant dense<0.000000e+00> : vector<64x128xf32>
    %76 = tpu.matmul %73, %75, %cst_52 {dimension_numbers = #tpu.dot_dimension_numbers<[1], [0], [0], [1], [0, 0, 1, 1], [], []>} : vector<64x128xbf16>, vector<128x128xbf16>, vector<64x128xf32> -> vector<64x128xf32>
    %77 = arith.addf %66, %76 : vector<64x128xf32>
    %c8_i32_53 = arith.constant 8 : i32
    %78 = arith.muli %arg1, %c8_i32_53 : i32
    %c1_i32_54 = arith.constant 1 : i32
    %79 = arith.addi %78, %c1_i32_54 : i32
    %c1_55 = arith.constant 1 : index
    %80 = arith.index_cast %79 : i32 to index
    %c0_56 = arith.constant 0 : index
    %c0_57 = arith.constant 0 : index
    %81 = vector.load %arg2[%c1_55, %80, %c0_56, %c0_57] : memref<4x9x9x128xbf16, #tpu.memory_space<vmem>>, vector<1x8x9x128xbf16>
    %82 = vector.shape_cast %81 : vector<1x8x9x128xbf16> to vector<8x9x128xbf16>
    %83 = vector.extract_strided_slice %82 {offsets = [0, 0, 0], sizes = [8, 8, 128], strides = [1, 1, 1]} : vector<8x9x128xbf16> to vector<8x8x128xbf16>
    %84 = vector.shape_cast %83 : vector<8x8x128xbf16> to vector<64x128xbf16>
    %c7 = arith.constant 7 : index
    %c0_58 = arith.constant 0 : index
    %c0_59 = arith.constant 0 : index
    %85 = vector.load %arg3[%c7, %c0_58, %c0_59] : memref<9x128x128xbf16, #tpu.memory_space<vmem>>, vector<1x128x128xbf16>
    %86 = vector.shape_cast %85 : vector<1x128x128xbf16> to vector<128x128xbf16>
    %cst_60 = arith.constant dense<0.000000e+00> : vector<64x128xf32>
    %87 = tpu.matmul %84, %86, %cst_60 {dimension_numbers = #tpu.dot_dimension_numbers<[1], [0], [0], [1], [0, 0, 1, 1], [], []>} : vector<64x128xbf16>, vector<128x128xbf16>, vector<64x128xf32> -> vector<64x128xf32>
    %88 = arith.addf %77, %87 : vector<64x128xf32>
    %c8_i32_61 = arith.constant 8 : i32
    %89 = arith.muli %arg1, %c8_i32_61 : i32
    %c1_i32_62 = arith.constant 1 : i32
    %90 = arith.addi %89, %c1_i32_62 : i32
    %c0_63 = arith.constant 0 : index
    %91 = arith.index_cast %90 : i32 to index
    %c0_64 = arith.constant 0 : index
    %c0_65 = arith.constant 0 : index
    %92 = vector.load %arg2[%c0_63, %91, %c0_64, %c0_65] : memref<4x9x9x128xbf16, #tpu.memory_space<vmem>>, vector<1x8x9x128xbf16>
    %93 = vector.shape_cast %92 : vector<1x8x9x128xbf16> to vector<8x9x128xbf16>
    %94 = vector.extract_strided_slice %93 {offsets = [0, 1, 0], sizes = [8, 8, 128], strides = [1, 1, 1]} : vector<8x9x128xbf16> to vector<8x8x128xbf16>
    %95 = vector.shape_cast %94 : vector<8x8x128xbf16> to vector<64x128xbf16>
    %c8 = arith.constant 8 : index
    %c0_66 = arith.constant 0 : index
    %c0_67 = arith.constant 0 : index
    %96 = vector.load %arg3[%c8, %c0_66, %c0_67] : memref<9x128x128xbf16, #tpu.memory_space<vmem>>, vector<1x128x128xbf16>
    %97 = vector.shape_cast %96 : vector<1x128x128xbf16> to vector<128x128xbf16>
    %cst_68 = arith.constant dense<0.000000e+00> : vector<64x128xf32>
    %98 = tpu.matmul %95, %97, %cst_68 {dimension_numbers = #tpu.dot_dimension_numbers<[1], [0], [0], [1], [0, 0, 1, 1], [], []>} : vector<64x128xbf16>, vector<128x128xbf16>, vector<64x128xf32> -> vector<64x128xf32>
    %99 = arith.addf %88, %98 : vector<64x128xf32>
    %c0_69 = arith.constant 0 : index
    %c0_70 = arith.constant 0 : index
    %100 = vector.load %arg4[%c0_69, %c0_70] : memref<64x128xf32, #tpu.memory_space<vmem>>, vector<64x128xf32>
    tpu.vector_store %arg4[%c0_69, %c0_70], %99 {strides = array<i32>} : memref<64x128xf32, #tpu.memory_space<vmem>>, vector<64x128xf32>,
    %cst_71 = arith.constant dense<0.000000e+00> : vector<128xf32>
    %101 = vector.multi_reduction <add>, %99, %cst_71 [0] : vector<64x128xf32> to vector<128xf32>
    %102 = vector.shape_cast %101 : vector<128xf32> to vector<1x128xf32>
    %103 = arith.mulf %99, %99 : vector<64x128xf32>
    %cst_72 = arith.constant dense<0.000000e+00> : vector<128xf32>
    %104 = vector.multi_reduction <add>, %103, %cst_72 [0] : vector<64x128xf32> to vector<128xf32>
    %105 = vector.shape_cast %104 : vector<128xf32> to vector<1x128xf32>
    %106 = tpu.concatenate %102, %105 in 0 : vector<1x128xf32>, vector<1x128xf32> -> vector<2x128xf32>
    %107 = vector.shape_cast %106 : vector<2x128xf32> to vector<1x2x128xf32>
    %c0_73 = arith.constant 0 : index
    %c0_74 = arith.constant 0 : index
    %c0_75 = arith.constant 0 : index
    %108 = vector.load %arg5[%c0_73, %c0_74, %c0_75] : memref<1x2x128xf32, #tpu.memory_space<vmem>>, vector<1x2x128xf32>
    tpu.vector_store %arg5[%c0_73, %c0_74, %c0_75], %107 {strides = array<i32>} : memref<1x2x128xf32, #tpu.memory_space<vmem>>, vector<1x2x128xf32>,
    return
  }
  func.func @transform_0(%arg0: i32, %arg1: i32) -> (i32, i32, i32, i32) {
    %c0_i32 = arith.constant 0 : i32
    %c0_i32_0 = arith.constant 0 : i32
    %c0_i32_1 = arith.constant 0 : i32
    %c0_i32_2 = arith.constant 0 : i32
    return %arg0, %c0_i32, %c0_i32_0, %c0_i32_1 : i32, i32, i32, i32
  }
  func.func @transform_1(%arg0: i32, %arg1: i32) -> (i32, i32, i32) {
    %c0_i32 = arith.constant 0 : i32
    %c0_i32_0 = arith.constant 0 : i32
    %c0_i32_1 = arith.constant 0 : i32
    %c0_i32_2 = arith.constant 0 : i32
    return %c0_i32, %c0_i32_0, %c0_i32_1 : i32, i32, i32
  }
  func.func @transform_2(%arg0: i32, %arg1: i32) -> (i32, i32) {
    %c1_i32 = arith.constant 1 : i32
    %0 = arith.muli %arg0, %c1_i32 : i32
    %1 = arith.addi %0, %arg1 : i32
    %c0_i32 = arith.constant 0 : i32
    %c0_i32_0 = arith.constant 0 : i32
    return %1, %c0_i32 : i32, i32
  }
  func.func @transform_3(%arg0: i32, %arg1: i32) -> (i32, i32, i32) {
    %c1_i32 = arith.constant 1 : i32
    %0 = arith.muli %arg0, %c1_i32 : i32
    %1 = arith.addi %0, %arg1 : i32
    %c0_i32 = arith.constant 0 : i32
    %c0_i32_0 = arith.constant 0 : i32
    %c0_i32_1 = arith.constant 0 : i32
    return %1, %c0_i32, %c0_i32_0 : i32, i32, i32
  }
}

module attributes {stable_mosaic.version = 11 : i64} {
  func.func @_bn_relu_kernel(%arg0: i32, %arg1: memref<64x128xf32, #tpu.memory_space<vmem>>, %arg2: memref<1x128xf32, #tpu.memory_space<vmem>>, %arg3: memref<1x128xf32, #tpu.memory_space<vmem>>, %arg4: memref<1x128xf32, #tpu.memory_space<vmem>>, %arg5: memref<1x128xf32, #tpu.memory_space<vmem>>, %arg6: memref<64x128xbf16, #tpu.memory_space<vmem>>) attributes {dimension_semantics = [#tpu.dimension_semantics<parallel>], iteration_bounds = array<i64: 2>, scalar_prefetch = 0 : i64, scratch_operands = 0 : i64, tpu.core_type = #tpu.core_type<tc>, window_params = [{transform_indices = @transform_0, window_bounds = array<i64: 64, 128>}, {pipeline_mode = #tpu.pipeline_mode<synchronous>, transform_indices = @transform_1, window_bounds = array<i64: 1, 128>}, {pipeline_mode = #tpu.pipeline_mode<synchronous>, transform_indices = @transform_2, window_bounds = array<i64: 1, 128>}, {pipeline_mode = #tpu.pipeline_mode<synchronous>, transform_indices = @transform_3, window_bounds = array<i64: 1, 128>}, {pipeline_mode = #tpu.pipeline_mode<synchronous>, transform_indices = @transform_4, window_bounds = array<i64: 1, 128>}, {transform_indices = @transform_5, window_bounds = array<i64: 64, 128>}]} {
    %c0 = arith.constant 0 : index
    %c0_0 = arith.constant 0 : index
    %0 = vector.load %arg2[%c0, %c0_0] : memref<1x128xf32, #tpu.memory_space<vmem>>, vector<1x128xf32>
    %cst = arith.constant 7.812500e-03 : f32
    %1 = vector.broadcast %cst : f32 to vector<1x128xf32>
    %2 = arith.mulf %0, %1 : vector<1x128xf32>
    %c0_1 = arith.constant 0 : index
    %c0_2 = arith.constant 0 : index
    %3 = vector.load %arg3[%c0_1, %c0_2] : memref<1x128xf32, #tpu.memory_space<vmem>>, vector<1x128xf32>
    %cst_3 = arith.constant 7.812500e-03 : f32
    %4 = vector.broadcast %cst_3 : f32 to vector<1x128xf32>
    %5 = arith.mulf %3, %4 : vector<1x128xf32>
    %6 = arith.mulf %2, %2 : vector<1x128xf32>
    %7 = arith.subf %5, %6 : vector<1x128xf32>
    %cst_4 = arith.constant 0.000000e+00 : f32
    %8 = vector.broadcast %cst_4 : f32 to vector<1x128xf32>
    %9 = arith.maximumf %7, %8 : vector<1x128xf32>
    %c0_5 = arith.constant 0 : index
    %c0_6 = arith.constant 0 : index
    %10 = vector.load %arg4[%c0_5, %c0_6] : memref<1x128xf32, #tpu.memory_space<vmem>>, vector<1x128xf32>
    %cst_7 = arith.constant 1.000000e-03 : f32
    %11 = vector.broadcast %cst_7 : f32 to vector<1x128xf32>
    %12 = arith.addf %9, %11 : vector<1x128xf32>
    %13 = math.rsqrt %12 : vector<1x128xf32>
    %14 = arith.mulf %10, %13 : vector<1x128xf32>
    %c0_8 = arith.constant 0 : index
    %c0_9 = arith.constant 0 : index
    %15 = vector.load %arg5[%c0_8, %c0_9] : memref<1x128xf32, #tpu.memory_space<vmem>>, vector<1x128xf32>
    %16 = arith.mulf %2, %14 : vector<1x128xf32>
    %17 = arith.subf %15, %16 : vector<1x128xf32>
    %c0_10 = arith.constant 0 : index
    %c0_11 = arith.constant 0 : index
    %18 = vector.load %arg1[%c0_10, %c0_11] : memref<64x128xf32, #tpu.memory_space<vmem>>, vector<64x128xf32>
    %19 = vector.broadcast %14 : vector<1x128xf32> to vector<64x128xf32>
    %20 = arith.mulf %18, %19 : vector<64x128xf32>
    %21 = vector.broadcast %17 : vector<1x128xf32> to vector<64x128xf32>
    %22 = arith.addf %20, %21 : vector<64x128xf32>
    %cst_12 = arith.constant 0.000000e+00 : f32
    %23 = vector.broadcast %cst_12 : f32 to vector<64x128xf32>
    %24 = arith.maximumf %22, %23 : vector<64x128xf32>
    %25 = arith.truncf %24 : vector<64x128xf32> to vector<64x128xbf16>
    %c0_13 = arith.constant 0 : index
    %c0_14 = arith.constant 0 : index
    %26 = vector.load %arg6[%c0_13, %c0_14] : memref<64x128xbf16, #tpu.memory_space<vmem>>, vector<64x128xbf16>
    tpu.vector_store %arg6[%c0_13, %c0_14], %25 {strides = array<i32>} : memref<64x128xbf16, #tpu.memory_space<vmem>>, vector<64x128xbf16>,
    return
  }
  func.func @transform_0(%arg0: i32) -> (i32, i32) {
    %c0_i32 = arith.constant 0 : i32
    %c0_i32_0 = arith.constant 0 : i32
    return %arg0, %c0_i32 : i32, i32
  }
  func.func @transform_1(%arg0: i32) -> (i32, i32) {
    %c0_i32 = arith.constant 0 : i32
    %c0_i32_0 = arith.constant 0 : i32
    %c0_i32_1 = arith.constant 0 : i32
    return %c0_i32, %c0_i32_0 : i32, i32
  }
  func.func @transform_2(%arg0: i32) -> (i32, i32) {
    %c0_i32 = arith.constant 0 : i32
    %c0_i32_0 = arith.constant 0 : i32
    %c0_i32_1 = arith.constant 0 : i32
    return %c0_i32, %c0_i32_0 : i32, i32
  }
  func.func @transform_3(%arg0: i32) -> (i32, i32) {
    %c0_i32 = arith.constant 0 : i32
    %c0_i32_0 = arith.constant 0 : i32
    %c0_i32_1 = arith.constant 0 : i32
    return %c0_i32, %c0_i32_0 : i32, i32
  }
  func.func @transform_4(%arg0: i32) -> (i32, i32) {
    %c0_i32 = arith.constant 0 : i32
    %c0_i32_0 = arith.constant 0 : i32
    %c0_i32_1 = arith.constant 0 : i32
    return %c0_i32, %c0_i32_0 : i32, i32
  }
  func.func @transform_5(%arg0: i32) -> (i32, i32) {
    %c0_i32 = arith.constant 0 : i32
    %c0_i32_0 = arith.constant 0 : i32
    return %arg0, %c0_i32 : i32, i32
  }
}

module attributes {stable_mosaic.version = 11 : i64} {
  func.func @_conv_ds_add_stats_kernel(%arg0: i32, %arg1: i32, %arg2: memref<1x10x10x128xbf16, #tpu.memory_space<vmem>>, %arg3: memref<9x128x128xbf16, #tpu.memory_space<vmem>>, %arg4: memref<64x128xbf16, #tpu.memory_space<vmem>>, %arg5: memref<128x128xbf16, #tpu.memory_space<vmem>>, %arg6: memref<64x128xf32, #tpu.memory_space<vmem>>, %arg7: memref<1x2x128xf32, #tpu.memory_space<vmem>>) attributes {dimension_semantics = [#tpu.dimension_semantics<parallel>, #tpu.dimension_semantics<parallel>], iteration_bounds = array<i64: 2, 1>, scalar_prefetch = 0 : i64, scratch_operands = 0 : i64, tpu.core_type = #tpu.core_type<tc>, window_params = [{transform_indices = @transform_0, window_bounds = array<i64: 1, 10, 10, 128>}, {pipeline_mode = #tpu.pipeline_mode<synchronous>, transform_indices = @transform_1, window_bounds = array<i64: 9, 128, 128>}, {transform_indices = @transform_2, window_bounds = array<i64: 64, 128>}, {pipeline_mode = #tpu.pipeline_mode<synchronous>, transform_indices = @transform_3, window_bounds = array<i64: 128, 128>}, {transform_indices = @transform_4, window_bounds = array<i64: 64, 128>}, {transform_indices = @transform_5, window_bounds = array<i64: 1, 2, 128>}]} {
    %c0 = arith.constant 0 : index
    %c0_0 = arith.constant 0 : index
    %0 = vector.load %arg4[%c0, %c0_0] : memref<64x128xbf16, #tpu.memory_space<vmem>>, vector<64x128xbf16>
    %c0_1 = arith.constant 0 : index
    %c0_2 = arith.constant 0 : index
    %1 = vector.load %arg5[%c0_1, %c0_2] : memref<128x128xbf16, #tpu.memory_space<vmem>>, vector<128x128xbf16>
    %cst = arith.constant dense<0.000000e+00> : vector<64x128xf32>
    %2 = tpu.matmul %0, %1, %cst {dimension_numbers = #tpu.dot_dimension_numbers<[1], [0], [0], [1], [0, 0, 1, 1], [], []>} : vector<64x128xbf16>, vector<128x128xbf16>, vector<64x128xf32> -> vector<64x128xf32>
    %cst_3 = arith.constant 0.000000e+00 : f32
    %3 = vector.broadcast %cst_3 : f32 to vector<64x128xf32>
    %c8_i32 = arith.constant 8 : i32
    %4 = arith.muli %arg1, %c8_i32 : i32
    %c0_i32 = arith.constant 0 : i32
    %5 = arith.addi %4, %c0_i32 : i32
    %c0_4 = arith.constant 0 : index
    %6 = arith.index_cast %5 : i32 to index
    %c0_5 = arith.constant 0 : index
    %c0_6 = arith.constant 0 : index
    %7 = vector.load %arg2[%c0_4, %6, %c0_5, %c0_6] : memref<1x10x10x128xbf16, #tpu.memory_space<vmem>>, vector<1x8x10x128xbf16>
    %8 = vector.shape_cast %7 : vector<1x8x10x128xbf16> to vector<8x10x128xbf16>
    %9 = vector.extract_strided_slice %8 {offsets = [0, 0, 0], sizes = [8, 8, 128], strides = [1, 1, 1]} : vector<8x10x128xbf16> to vector<8x8x128xbf16>
    %10 = vector.shape_cast %9 : vector<8x8x128xbf16> to vector<64x128xbf16>
    %c0_7 = arith.constant 0 : index
    %c0_8 = arith.constant 0 : index
    %c0_9 = arith.constant 0 : index
    %11 = vector.load %arg3[%c0_7, %c0_8, %c0_9] : memref<9x128x128xbf16, #tpu.memory_space<vmem>>, vector<1x128x128xbf16>
    %12 = vector.shape_cast %11 : vector<1x128x128xbf16> to vector<128x128xbf16>
    %cst_10 = arith.constant dense<0.000000e+00> : vector<64x128xf32>
    %13 = tpu.matmul %10, %12, %cst_10 {dimension_numbers = #tpu.dot_dimension_numbers<[1], [0], [0], [1], [0, 0, 1, 1], [], []>} : vector<64x128xbf16>, vector<128x128xbf16>, vector<64x128xf32> -> vector<64x128xf32>
    %14 = arith.addf %3, %13 : vector<64x128xf32>
    %c8_i32_11 = arith.constant 8 : i32
    %15 = arith.muli %arg1, %c8_i32_11 : i32
    %c0_i32_12 = arith.constant 0 : i32
    %16 = arith.addi %15, %c0_i32_12 : i32
    %c0_13 = arith.constant 0 : index
    %17 = arith.index_cast %16 : i32 to index
    %c0_14 = arith.constant 0 : index
    %c0_15 = arith.constant 0 : index
    %18 = vector.load %arg2[%c0_13, %17, %c0_14, %c0_15] : memref<1x10x10x128xbf16, #tpu.memory_space<vmem>>, vector<1x8x10x128xbf16>
    %19 = vector.shape_cast %18 : vector<1x8x10x128xbf16> to vector<8x10x128xbf16>
    %20 = vector.extract_strided_slice %19 {offsets = [0, 1, 0], sizes = [8, 8, 128], strides = [1, 1, 1]} : vector<8x10x128xbf16> to vector<8x8x128xbf16>
    %21 = vector.shape_cast %20 : vector<8x8x128xbf16> to vector<64x128xbf16>
    %c1 = arith.constant 1 : index
    %c0_16 = arith.constant 0 : index
    %c0_17 = arith.constant 0 : index
    %22 = vector.load %arg3[%c1, %c0_16, %c0_17] : memref<9x128x128xbf16, #tpu.memory_space<vmem>>, vector<1x128x128xbf16>
    %23 = vector.shape_cast %22 : vector<1x128x128xbf16> to vector<128x128xbf16>
    %cst_18 = arith.constant dense<0.000000e+00> : vector<64x128xf32>
    %24 = tpu.matmul %21, %23, %cst_18 {dimension_numbers = #tpu.dot_dimension_numbers<[1], [0], [0], [1], [0, 0, 1, 1], [], []>} : vector<64x128xbf16>, vector<128x128xbf16>, vector<64x128xf32> -> vector<64x128xf32>
    %25 = arith.addf %14, %24 : vector<64x128xf32>
    %c8_i32_19 = arith.constant 8 : i32
    %26 = arith.muli %arg1, %c8_i32_19 : i32
    %c0_i32_20 = arith.constant 0 : i32
    %27 = arith.addi %26, %c0_i32_20 : i32
    %c0_21 = arith.constant 0 : index
    %28 = arith.index_cast %27 : i32 to index
    %c0_22 = arith.constant 0 : index
    %c0_23 = arith.constant 0 : index
    %29 = vector.load %arg2[%c0_21, %28, %c0_22, %c0_23] : memref<1x10x10x128xbf16, #tpu.memory_space<vmem>>, vector<1x8x10x128xbf16>
    %30 = vector.shape_cast %29 : vector<1x8x10x128xbf16> to vector<8x10x128xbf16>
    %31 = vector.extract_strided_slice %30 {offsets = [0, 2, 0], sizes = [8, 8, 128], strides = [1, 1, 1]} : vector<8x10x128xbf16> to vector<8x8x128xbf16>
    %32 = vector.shape_cast %31 : vector<8x8x128xbf16> to vector<64x128xbf16>
    %c2 = arith.constant 2 : index
    %c0_24 = arith.constant 0 : index
    %c0_25 = arith.constant 0 : index
    %33 = vector.load %arg3[%c2, %c0_24, %c0_25] : memref<9x128x128xbf16, #tpu.memory_space<vmem>>, vector<1x128x128xbf16>
    %34 = vector.shape_cast %33 : vector<1x128x128xbf16> to vector<128x128xbf16>
    %cst_26 = arith.constant dense<0.000000e+00> : vector<64x128xf32>
    %35 = tpu.matmul %32, %34, %cst_26 {dimension_numbers = #tpu.dot_dimension_numbers<[1], [0], [0], [1], [0, 0, 1, 1], [], []>} : vector<64x128xbf16>, vector<128x128xbf16>, vector<64x128xf32> -> vector<64x128xf32>
    %36 = arith.addf %25, %35 : vector<64x128xf32>
    %c8_i32_27 = arith.constant 8 : i32
    %37 = arith.muli %arg1, %c8_i32_27 : i32
    %c1_i32 = arith.constant 1 : i32
    %38 = arith.addi %37, %c1_i32 : i32
    %c0_28 = arith.constant 0 : index
    %39 = arith.index_cast %38 : i32 to index
    %c0_29 = arith.constant 0 : index
    %c0_30 = arith.constant 0 : index
    %40 = vector.load %arg2[%c0_28, %39, %c0_29, %c0_30] : memref<1x10x10x128xbf16, #tpu.memory_space<vmem>>, vector<1x8x10x128xbf16>
    %41 = vector.shape_cast %40 : vector<1x8x10x128xbf16> to vector<8x10x128xbf16>
    %42 = vector.extract_strided_slice %41 {offsets = [0, 0, 0], sizes = [8, 8, 128], strides = [1, 1, 1]} : vector<8x10x128xbf16> to vector<8x8x128xbf16>
    %43 = vector.shape_cast %42 : vector<8x8x128xbf16> to vector<64x128xbf16>
    %c3 = arith.constant 3 : index
    %c0_31 = arith.constant 0 : index
    %c0_32 = arith.constant 0 : index
    %44 = vector.load %arg3[%c3, %c0_31, %c0_32] : memref<9x128x128xbf16, #tpu.memory_space<vmem>>, vector<1x128x128xbf16>
    %45 = vector.shape_cast %44 : vector<1x128x128xbf16> to vector<128x128xbf16>
    %cst_33 = arith.constant dense<0.000000e+00> : vector<64x128xf32>
    %46 = tpu.matmul %43, %45, %cst_33 {dimension_numbers = #tpu.dot_dimension_numbers<[1], [0], [0], [1], [0, 0, 1, 1], [], []>} : vector<64x128xbf16>, vector<128x128xbf16>, vector<64x128xf32> -> vector<64x128xf32>
    %47 = arith.addf %36, %46 : vector<64x128xf32>
    %c8_i32_34 = arith.constant 8 : i32
    %48 = arith.muli %arg1, %c8_i32_34 : i32
    %c1_i32_35 = arith.constant 1 : i32
    %49 = arith.addi %48, %c1_i32_35 : i32
    %c0_36 = arith.constant 0 : index
    %50 = arith.index_cast %49 : i32 to index
    %c0_37 = arith.constant 0 : index
    %c0_38 = arith.constant 0 : index
    %51 = vector.load %arg2[%c0_36, %50, %c0_37, %c0_38] : memref<1x10x10x128xbf16, #tpu.memory_space<vmem>>, vector<1x8x10x128xbf16>
    %52 = vector.shape_cast %51 : vector<1x8x10x128xbf16> to vector<8x10x128xbf16>
    %53 = vector.extract_strided_slice %52 {offsets = [0, 1, 0], sizes = [8, 8, 128], strides = [1, 1, 1]} : vector<8x10x128xbf16> to vector<8x8x128xbf16>
    %54 = vector.shape_cast %53 : vector<8x8x128xbf16> to vector<64x128xbf16>
    %c4 = arith.constant 4 : index
    %c0_39 = arith.constant 0 : index
    %c0_40 = arith.constant 0 : index
    %55 = vector.load %arg3[%c4, %c0_39, %c0_40] : memref<9x128x128xbf16, #tpu.memory_space<vmem>>, vector<1x128x128xbf16>
    %56 = vector.shape_cast %55 : vector<1x128x128xbf16> to vector<128x128xbf16>
    %cst_41 = arith.constant dense<0.000000e+00> : vector<64x128xf32>
    %57 = tpu.matmul %54, %56, %cst_41 {dimension_numbers = #tpu.dot_dimension_numbers<[1], [0], [0], [1], [0, 0, 1, 1], [], []>} : vector<64x128xbf16>, vector<128x128xbf16>, vector<64x128xf32> -> vector<64x128xf32>
    %58 = arith.addf %47, %57 : vector<64x128xf32>
    %c8_i32_42 = arith.constant 8 : i32
    %59 = arith.muli %arg1, %c8_i32_42 : i32
    %c1_i32_43 = arith.constant 1 : i32
    %60 = arith.addi %59, %c1_i32_43 : i32
    %c0_44 = arith.constant 0 : index
    %61 = arith.index_cast %60 : i32 to index
    %c0_45 = arith.constant 0 : index
    %c0_46 = arith.constant 0 : index
    %62 = vector.load %arg2[%c0_44, %61, %c0_45, %c0_46] : memref<1x10x10x128xbf16, #tpu.memory_space<vmem>>, vector<1x8x10x128xbf16>
    %63 = vector.shape_cast %62 : vector<1x8x10x128xbf16> to vector<8x10x128xbf16>
    %64 = vector.extract_strided_slice %63 {offsets = [0, 2, 0], sizes = [8, 8, 128], strides = [1, 1, 1]} : vector<8x10x128xbf16> to vector<8x8x128xbf16>
    %65 = vector.shape_cast %64 : vector<8x8x128xbf16> to vector<64x128xbf16>
    %c5 = arith.constant 5 : index
    %c0_47 = arith.constant 0 : index
    %c0_48 = arith.constant 0 : index
    %66 = vector.load %arg3[%c5, %c0_47, %c0_48] : memref<9x128x128xbf16, #tpu.memory_space<vmem>>, vector<1x128x128xbf16>
    %67 = vector.shape_cast %66 : vector<1x128x128xbf16> to vector<128x128xbf16>
    %cst_49 = arith.constant dense<0.000000e+00> : vector<64x128xf32>
    %68 = tpu.matmul %65, %67, %cst_49 {dimension_numbers = #tpu.dot_dimension_numbers<[1], [0], [0], [1], [0, 0, 1, 1], [], []>} : vector<64x128xbf16>, vector<128x128xbf16>, vector<64x128xf32> -> vector<64x128xf32>
    %69 = arith.addf %58, %68 : vector<64x128xf32>
    %c8_i32_50 = arith.constant 8 : i32
    %70 = arith.muli %arg1, %c8_i32_50 : i32
    %c2_i32 = arith.constant 2 : i32
    %71 = arith.addi %70, %c2_i32 : i32
    %c0_51 = arith.constant 0 : index
    %72 = arith.index_cast %71 : i32 to index
    %c0_52 = arith.constant 0 : index
    %c0_53 = arith.constant 0 : index
    %73 = vector.load %arg2[%c0_51, %72, %c0_52, %c0_53] : memref<1x10x10x128xbf16, #tpu.memory_space<vmem>>, vector<1x8x10x128xbf16>
    %74 = vector.shape_cast %73 : vector<1x8x10x128xbf16> to vector<8x10x128xbf16>
    %75 = vector.extract_strided_slice %74 {offsets = [0, 0, 0], sizes = [8, 8, 128], strides = [1, 1, 1]} : vector<8x10x128xbf16> to vector<8x8x128xbf16>
    %76 = vector.shape_cast %75 : vector<8x8x128xbf16> to vector<64x128xbf16>
    %c6 = arith.constant 6 : index
    %c0_54 = arith.constant 0 : index
    %c0_55 = arith.constant 0 : index
    %77 = vector.load %arg3[%c6, %c0_54, %c0_55] : memref<9x128x128xbf16, #tpu.memory_space<vmem>>, vector<1x128x128xbf16>
    %78 = vector.shape_cast %77 : vector<1x128x128xbf16> to vector<128x128xbf16>
    %cst_56 = arith.constant dense<0.000000e+00> : vector<64x128xf32>
    %79 = tpu.matmul %76, %78, %cst_56 {dimension_numbers = #tpu.dot_dimension_numbers<[1], [0], [0], [1], [0, 0, 1, 1], [], []>} : vector<64x128xbf16>, vector<128x128xbf16>, vector<64x128xf32> -> vector<64x128xf32>
    %80 = arith.addf %69, %79 : vector<64x128xf32>
    %c8_i32_57 = arith.constant 8 : i32
    %81 = arith.muli %arg1, %c8_i32_57 : i32
    %c2_i32_58 = arith.constant 2 : i32
    %82 = arith.addi %81, %c2_i32_58 : i32
    %c0_59 = arith.constant 0 : index
    %83 = arith.index_cast %82 : i32 to index
    %c0_60 = arith.constant 0 : index
    %c0_61 = arith.constant 0 : index
    %84 = vector.load %arg2[%c0_59, %83, %c0_60, %c0_61] : memref<1x10x10x128xbf16, #tpu.memory_space<vmem>>, vector<1x8x10x128xbf16>
    %85 = vector.shape_cast %84 : vector<1x8x10x128xbf16> to vector<8x10x128xbf16>
    %86 = vector.extract_strided_slice %85 {offsets = [0, 1, 0], sizes = [8, 8, 128], strides = [1, 1, 1]} : vector<8x10x128xbf16> to vector<8x8x128xbf16>
    %87 = vector.shape_cast %86 : vector<8x8x128xbf16> to vector<64x128xbf16>
    %c7 = arith.constant 7 : index
    %c0_62 = arith.constant 0 : index
    %c0_63 = arith.constant 0 : index
    %88 = vector.load %arg3[%c7, %c0_62, %c0_63] : memref<9x128x128xbf16, #tpu.memory_space<vmem>>, vector<1x128x128xbf16>
    %89 = vector.shape_cast %88 : vector<1x128x128xbf16> to vector<128x128xbf16>
    %cst_64 = arith.constant dense<0.000000e+00> : vector<64x128xf32>
    %90 = tpu.matmul %87, %89, %cst_64 {dimension_numbers = #tpu.dot_dimension_numbers<[1], [0], [0], [1], [0, 0, 1, 1], [], []>} : vector<64x128xbf16>, vector<128x128xbf16>, vector<64x128xf32> -> vector<64x128xf32>
    %91 = arith.addf %80, %90 : vector<64x128xf32>
    %c8_i32_65 = arith.constant 8 : i32
    %92 = arith.muli %arg1, %c8_i32_65 : i32
    %c2_i32_66 = arith.constant 2 : i32
    %93 = arith.addi %92, %c2_i32_66 : i32
    %c0_67 = arith.constant 0 : index
    %94 = arith.index_cast %93 : i32 to index
    %c0_68 = arith.constant 0 : index
    %c0_69 = arith.constant 0 : index
    %95 = vector.load %arg2[%c0_67, %94, %c0_68, %c0_69] : memref<1x10x10x128xbf16, #tpu.memory_space<vmem>>, vector<1x8x10x128xbf16>
    %96 = vector.shape_cast %95 : vector<1x8x10x128xbf16> to vector<8x10x128xbf16>
    %97 = vector.extract_strided_slice %96 {offsets = [0, 2, 0], sizes = [8, 8, 128], strides = [1, 1, 1]} : vector<8x10x128xbf16> to vector<8x8x128xbf16>
    %98 = vector.shape_cast %97 : vector<8x8x128xbf16> to vector<64x128xbf16>
    %c8 = arith.constant 8 : index
    %c0_70 = arith.constant 0 : index
    %c0_71 = arith.constant 0 : index
    %99 = vector.load %arg3[%c8, %c0_70, %c0_71] : memref<9x128x128xbf16, #tpu.memory_space<vmem>>, vector<1x128x128xbf16>
    %100 = vector.shape_cast %99 : vector<1x128x128xbf16> to vector<128x128xbf16>
    %cst_72 = arith.constant dense<0.000000e+00> : vector<64x128xf32>
    %101 = tpu.matmul %98, %100, %cst_72 {dimension_numbers = #tpu.dot_dimension_numbers<[1], [0], [0], [1], [0, 0, 1, 1], [], []>} : vector<64x128xbf16>, vector<128x128xbf16>, vector<64x128xf32> -> vector<64x128xf32>
    %102 = arith.addf %91, %101 : vector<64x128xf32>
    %103 = arith.addf %102, %2 : vector<64x128xf32>
    %c0_73 = arith.constant 0 : index
    %c0_74 = arith.constant 0 : index
    %104 = vector.load %arg6[%c0_73, %c0_74] : memref<64x128xf32, #tpu.memory_space<vmem>>, vector<64x128xf32>
    tpu.vector_store %arg6[%c0_73, %c0_74], %103 {strides = array<i32>} : memref<64x128xf32, #tpu.memory_space<vmem>>, vector<64x128xf32>,
    %cst_75 = arith.constant dense<0.000000e+00> : vector<128xf32>
    %105 = vector.multi_reduction <add>, %103, %cst_75 [0] : vector<64x128xf32> to vector<128xf32>
    %106 = vector.shape_cast %105 : vector<128xf32> to vector<1x128xf32>
    %107 = arith.mulf %103, %103 : vector<64x128xf32>
    %cst_76 = arith.constant dense<0.000000e+00> : vector<128xf32>
    %108 = vector.multi_reduction <add>, %107, %cst_76 [0] : vector<64x128xf32> to vector<128xf32>
    %109 = vector.shape_cast %108 : vector<128xf32> to vector<1x128xf32>
    %110 = tpu.concatenate %106, %109 in 0 : vector<1x128xf32>, vector<1x128xf32> -> vector<2x128xf32>
    %111 = vector.shape_cast %110 : vector<2x128xf32> to vector<1x2x128xf32>
    %c0_77 = arith.constant 0 : index
    %c0_78 = arith.constant 0 : index
    %c0_79 = arith.constant 0 : index
    %112 = vector.load %arg7[%c0_77, %c0_78, %c0_79] : memref<1x2x128xf32, #tpu.memory_space<vmem>>, vector<1x2x128xf32>
    tpu.vector_store %arg7[%c0_77, %c0_78, %c0_79], %111 {strides = array<i32>} : memref<1x2x128xf32, #tpu.memory_space<vmem>>, vector<1x2x128xf32>,
    return
  }
  func.func @transform_0(%arg0: i32, %arg1: i32) -> (i32, i32, i32, i32) {
    %c0_i32 = arith.constant 0 : i32
    %c0_i32_0 = arith.constant 0 : i32
    %c0_i32_1 = arith.constant 0 : i32
    %c0_i32_2 = arith.constant 0 : i32
    return %arg0, %c0_i32, %c0_i32_0, %c0_i32_1 : i32, i32, i32, i32
  }
  func.func @transform_1(%arg0: i32, %arg1: i32) -> (i32, i32, i32) {
    %c0_i32 = arith.constant 0 : i32
    %c0_i32_0 = arith.constant 0 : i32
    %c0_i32_1 = arith.constant 0 : i32
    %c0_i32_2 = arith.constant 0 : i32
    return %c0_i32, %c0_i32_0, %c0_i32_1 : i32, i32, i32
  }
  func.func @transform_2(%arg0: i32, %arg1: i32) -> (i32, i32) {
    %c1_i32 = arith.constant 1 : i32
    %0 = arith.muli %arg0, %c1_i32 : i32
    %1 = arith.addi %0, %arg1 : i32
    %c0_i32 = arith.constant 0 : i32
    %c0_i32_0 = arith.constant 0 : i32
    return %1, %c0_i32 : i32, i32
  }
  func.func @transform_3(%arg0: i32, %arg1: i32) -> (i32, i32) {
    %c0_i32 = arith.constant 0 : i32
    %c0_i32_0 = arith.constant 0 : i32
    %c0_i32_1 = arith.constant 0 : i32
    return %c0_i32, %c0_i32_0 : i32, i32
  }
  func.func @transform_4(%arg0: i32, %arg1: i32) -> (i32, i32) {
    %c1_i32 = arith.constant 1 : i32
    %0 = arith.muli %arg0, %c1_i32 : i32
    %1 = arith.addi %0, %arg1 : i32
    %c0_i32 = arith.constant 0 : i32
    %c0_i32_0 = arith.constant 0 : i32
    return %1, %c0_i32 : i32, i32
  }
  func.func @transform_5(%arg0: i32, %arg1: i32) -> (i32, i32, i32) {
    %c1_i32 = arith.constant 1 : i32
    %0 = arith.muli %arg0, %c1_i32 : i32
    %1 = arith.addi %0, %arg1 : i32
    %c0_i32 = arith.constant 0 : i32
    %c0_i32_0 = arith.constant 0 : i32
    %c0_i32_1 = arith.constant 0 : i32
    return %1, %c0_i32, %c0_i32_0 : i32, i32, i32
  }
}

module attributes {stable_mosaic.version = 11 : i64} {
  func.func @_conv_stats_kernel(%arg0: i32, %arg1: i32, %arg2: memref<1x10x10x128xbf16, #tpu.memory_space<vmem>>, %arg3: memref<9x128x128xbf16, #tpu.memory_space<vmem>>, %arg4: memref<64x128xf32, #tpu.memory_space<vmem>>, %arg5: memref<1x2x128xf32, #tpu.memory_space<vmem>>) attributes {dimension_semantics = [#tpu.dimension_semantics<parallel>, #tpu.dimension_semantics<parallel>], iteration_bounds = array<i64: 2, 1>, scalar_prefetch = 0 : i64, scratch_operands = 0 : i64, tpu.core_type = #tpu.core_type<tc>, window_params = [{transform_indices = @transform_0, window_bounds = array<i64: 1, 10, 10, 128>}, {pipeline_mode = #tpu.pipeline_mode<synchronous>, transform_indices = @transform_1, window_bounds = array<i64: 9, 128, 128>}, {transform_indices = @transform_2, window_bounds = array<i64: 64, 128>}, {transform_indices = @transform_3, window_bounds = array<i64: 1, 2, 128>}]} {
    %cst = arith.constant 0.000000e+00 : f32
    %0 = vector.broadcast %cst : f32 to vector<64x128xf32>
    %c8_i32 = arith.constant 8 : i32
    %1 = arith.muli %arg1, %c8_i32 : i32
    %c0_i32 = arith.constant 0 : i32
    %2 = arith.addi %1, %c0_i32 : i32
    %c0 = arith.constant 0 : index
    %3 = arith.index_cast %2 : i32 to index
    %c0_0 = arith.constant 0 : index
    %c0_1 = arith.constant 0 : index
    %4 = vector.load %arg2[%c0, %3, %c0_0, %c0_1] : memref<1x10x10x128xbf16, #tpu.memory_space<vmem>>, vector<1x8x10x128xbf16>
    %5 = vector.shape_cast %4 : vector<1x8x10x128xbf16> to vector<8x10x128xbf16>
    %6 = vector.extract_strided_slice %5 {offsets = [0, 0, 0], sizes = [8, 8, 128], strides = [1, 1, 1]} : vector<8x10x128xbf16> to vector<8x8x128xbf16>
    %7 = vector.shape_cast %6 : vector<8x8x128xbf16> to vector<64x128xbf16>
    %c0_2 = arith.constant 0 : index
    %c0_3 = arith.constant 0 : index
    %c0_4 = arith.constant 0 : index
    %8 = vector.load %arg3[%c0_2, %c0_3, %c0_4] : memref<9x128x128xbf16, #tpu.memory_space<vmem>>, vector<1x128x128xbf16>
    %9 = vector.shape_cast %8 : vector<1x128x128xbf16> to vector<128x128xbf16>
    %cst_5 = arith.constant dense<0.000000e+00> : vector<64x128xf32>
    %10 = tpu.matmul %7, %9, %cst_5 {dimension_numbers = #tpu.dot_dimension_numbers<[1], [0], [0], [1], [0, 0, 1, 1], [], []>} : vector<64x128xbf16>, vector<128x128xbf16>, vector<64x128xf32> -> vector<64x128xf32>
    %11 = arith.addf %0, %10 : vector<64x128xf32>
    %c8_i32_6 = arith.constant 8 : i32
    %12 = arith.muli %arg1, %c8_i32_6 : i32
    %c0_i32_7 = arith.constant 0 : i32
    %13 = arith.addi %12, %c0_i32_7 : i32
    %c0_8 = arith.constant 0 : index
    %14 = arith.index_cast %13 : i32 to index
    %c0_9 = arith.constant 0 : index
    %c0_10 = arith.constant 0 : index
    %15 = vector.load %arg2[%c0_8, %14, %c0_9, %c0_10] : memref<1x10x10x128xbf16, #tpu.memory_space<vmem>>, vector<1x8x10x128xbf16>
    %16 = vector.shape_cast %15 : vector<1x8x10x128xbf16> to vector<8x10x128xbf16>
    %17 = vector.extract_strided_slice %16 {offsets = [0, 1, 0], sizes = [8, 8, 128], strides = [1, 1, 1]} : vector<8x10x128xbf16> to vector<8x8x128xbf16>
    %18 = vector.shape_cast %17 : vector<8x8x128xbf16> to vector<64x128xbf16>
    %c1 = arith.constant 1 : index
    %c0_11 = arith.constant 0 : index
    %c0_12 = arith.constant 0 : index
    %19 = vector.load %arg3[%c1, %c0_11, %c0_12] : memref<9x128x128xbf16, #tpu.memory_space<vmem>>, vector<1x128x128xbf16>
    %20 = vector.shape_cast %19 : vector<1x128x128xbf16> to vector<128x128xbf16>
    %cst_13 = arith.constant dense<0.000000e+00> : vector<64x128xf32>
    %21 = tpu.matmul %18, %20, %cst_13 {dimension_numbers = #tpu.dot_dimension_numbers<[1], [0], [0], [1], [0, 0, 1, 1], [], []>} : vector<64x128xbf16>, vector<128x128xbf16>, vector<64x128xf32> -> vector<64x128xf32>
    %22 = arith.addf %11, %21 : vector<64x128xf32>
    %c8_i32_14 = arith.constant 8 : i32
    %23 = arith.muli %arg1, %c8_i32_14 : i32
    %c0_i32_15 = arith.constant 0 : i32
    %24 = arith.addi %23, %c0_i32_15 : i32
    %c0_16 = arith.constant 0 : index
    %25 = arith.index_cast %24 : i32 to index
    %c0_17 = arith.constant 0 : index
    %c0_18 = arith.constant 0 : index
    %26 = vector.load %arg2[%c0_16, %25, %c0_17, %c0_18] : memref<1x10x10x128xbf16, #tpu.memory_space<vmem>>, vector<1x8x10x128xbf16>
    %27 = vector.shape_cast %26 : vector<1x8x10x128xbf16> to vector<8x10x128xbf16>
    %28 = vector.extract_strided_slice %27 {offsets = [0, 2, 0], sizes = [8, 8, 128], strides = [1, 1, 1]} : vector<8x10x128xbf16> to vector<8x8x128xbf16>
    %29 = vector.shape_cast %28 : vector<8x8x128xbf16> to vector<64x128xbf16>
    %c2 = arith.constant 2 : index
    %c0_19 = arith.constant 0 : index
    %c0_20 = arith.constant 0 : index
    %30 = vector.load %arg3[%c2, %c0_19, %c0_20] : memref<9x128x128xbf16, #tpu.memory_space<vmem>>, vector<1x128x128xbf16>
    %31 = vector.shape_cast %30 : vector<1x128x128xbf16> to vector<128x128xbf16>
    %cst_21 = arith.constant dense<0.000000e+00> : vector<64x128xf32>
    %32 = tpu.matmul %29, %31, %cst_21 {dimension_numbers = #tpu.dot_dimension_numbers<[1], [0], [0], [1], [0, 0, 1, 1], [], []>} : vector<64x128xbf16>, vector<128x128xbf16>, vector<64x128xf32> -> vector<64x128xf32>
    %33 = arith.addf %22, %32 : vector<64x128xf32>
    %c8_i32_22 = arith.constant 8 : i32
    %34 = arith.muli %arg1, %c8_i32_22 : i32
    %c1_i32 = arith.constant 1 : i32
    %35 = arith.addi %34, %c1_i32 : i32
    %c0_23 = arith.constant 0 : index
    %36 = arith.index_cast %35 : i32 to index
    %c0_24 = arith.constant 0 : index
    %c0_25 = arith.constant 0 : index
    %37 = vector.load %arg2[%c0_23, %36, %c0_24, %c0_25] : memref<1x10x10x128xbf16, #tpu.memory_space<vmem>>, vector<1x8x10x128xbf16>
    %38 = vector.shape_cast %37 : vector<1x8x10x128xbf16> to vector<8x10x128xbf16>
    %39 = vector.extract_strided_slice %38 {offsets = [0, 0, 0], sizes = [8, 8, 128], strides = [1, 1, 1]} : vector<8x10x128xbf16> to vector<8x8x128xbf16>
    %40 = vector.shape_cast %39 : vector<8x8x128xbf16> to vector<64x128xbf16>
    %c3 = arith.constant 3 : index
    %c0_26 = arith.constant 0 : index
    %c0_27 = arith.constant 0 : index
    %41 = vector.load %arg3[%c3, %c0_26, %c0_27] : memref<9x128x128xbf16, #tpu.memory_space<vmem>>, vector<1x128x128xbf16>
    %42 = vector.shape_cast %41 : vector<1x128x128xbf16> to vector<128x128xbf16>
    %cst_28 = arith.constant dense<0.000000e+00> : vector<64x128xf32>
    %43 = tpu.matmul %40, %42, %cst_28 {dimension_numbers = #tpu.dot_dimension_numbers<[1], [0], [0], [1], [0, 0, 1, 1], [], []>} : vector<64x128xbf16>, vector<128x128xbf16>, vector<64x128xf32> -> vector<64x128xf32>
    %44 = arith.addf %33, %43 : vector<64x128xf32>
    %c8_i32_29 = arith.constant 8 : i32
    %45 = arith.muli %arg1, %c8_i32_29 : i32
    %c1_i32_30 = arith.constant 1 : i32
    %46 = arith.addi %45, %c1_i32_30 : i32
    %c0_31 = arith.constant 0 : index
    %47 = arith.index_cast %46 : i32 to index
    %c0_32 = arith.constant 0 : index
    %c0_33 = arith.constant 0 : index
    %48 = vector.load %arg2[%c0_31, %47, %c0_32, %c0_33] : memref<1x10x10x128xbf16, #tpu.memory_space<vmem>>, vector<1x8x10x128xbf16>
    %49 = vector.shape_cast %48 : vector<1x8x10x128xbf16> to vector<8x10x128xbf16>
    %50 = vector.extract_strided_slice %49 {offsets = [0, 1, 0], sizes = [8, 8, 128], strides = [1, 1, 1]} : vector<8x10x128xbf16> to vector<8x8x128xbf16>
    %51 = vector.shape_cast %50 : vector<8x8x128xbf16> to vector<64x128xbf16>
    %c4 = arith.constant 4 : index
    %c0_34 = arith.constant 0 : index
    %c0_35 = arith.constant 0 : index
    %52 = vector.load %arg3[%c4, %c0_34, %c0_35] : memref<9x128x128xbf16, #tpu.memory_space<vmem>>, vector<1x128x128xbf16>
    %53 = vector.shape_cast %52 : vector<1x128x128xbf16> to vector<128x128xbf16>
    %cst_36 = arith.constant dense<0.000000e+00> : vector<64x128xf32>
    %54 = tpu.matmul %51, %53, %cst_36 {dimension_numbers = #tpu.dot_dimension_numbers<[1], [0], [0], [1], [0, 0, 1, 1], [], []>} : vector<64x128xbf16>, vector<128x128xbf16>, vector<64x128xf32> -> vector<64x128xf32>
    %55 = arith.addf %44, %54 : vector<64x128xf32>
    %c8_i32_37 = arith.constant 8 : i32
    %56 = arith.muli %arg1, %c8_i32_37 : i32
    %c1_i32_38 = arith.constant 1 : i32
    %57 = arith.addi %56, %c1_i32_38 : i32
    %c0_39 = arith.constant 0 : index
    %58 = arith.index_cast %57 : i32 to index
    %c0_40 = arith.constant 0 : index
    %c0_41 = arith.constant 0 : index
    %59 = vector.load %arg2[%c0_39, %58, %c0_40, %c0_41] : memref<1x10x10x128xbf16, #tpu.memory_space<vmem>>, vector<1x8x10x128xbf16>
    %60 = vector.shape_cast %59 : vector<1x8x10x128xbf16> to vector<8x10x128xbf16>
    %61 = vector.extract_strided_slice %60 {offsets = [0, 2, 0], sizes = [8, 8, 128], strides = [1, 1, 1]} : vector<8x10x128xbf16> to vector<8x8x128xbf16>
    %62 = vector.shape_cast %61 : vector<8x8x128xbf16> to vector<64x128xbf16>
    %c5 = arith.constant 5 : index
    %c0_42 = arith.constant 0 : index
    %c0_43 = arith.constant 0 : index
    %63 = vector.load %arg3[%c5, %c0_42, %c0_43] : memref<9x128x128xbf16, #tpu.memory_space<vmem>>, vector<1x128x128xbf16>
    %64 = vector.shape_cast %63 : vector<1x128x128xbf16> to vector<128x128xbf16>
    %cst_44 = arith.constant dense<0.000000e+00> : vector<64x128xf32>
    %65 = tpu.matmul %62, %64, %cst_44 {dimension_numbers = #tpu.dot_dimension_numbers<[1], [0], [0], [1], [0, 0, 1, 1], [], []>} : vector<64x128xbf16>, vector<128x128xbf16>, vector<64x128xf32> -> vector<64x128xf32>
    %66 = arith.addf %55, %65 : vector<64x128xf32>
    %c8_i32_45 = arith.constant 8 : i32
    %67 = arith.muli %arg1, %c8_i32_45 : i32
    %c2_i32 = arith.constant 2 : i32
    %68 = arith.addi %67, %c2_i32 : i32
    %c0_46 = arith.constant 0 : index
    %69 = arith.index_cast %68 : i32 to index
    %c0_47 = arith.constant 0 : index
    %c0_48 = arith.constant 0 : index
    %70 = vector.load %arg2[%c0_46, %69, %c0_47, %c0_48] : memref<1x10x10x128xbf16, #tpu.memory_space<vmem>>, vector<1x8x10x128xbf16>
    %71 = vector.shape_cast %70 : vector<1x8x10x128xbf16> to vector<8x10x128xbf16>
    %72 = vector.extract_strided_slice %71 {offsets = [0, 0, 0], sizes = [8, 8, 128], strides = [1, 1, 1]} : vector<8x10x128xbf16> to vector<8x8x128xbf16>
    %73 = vector.shape_cast %72 : vector<8x8x128xbf16> to vector<64x128xbf16>
    %c6 = arith.constant 6 : index
    %c0_49 = arith.constant 0 : index
    %c0_50 = arith.constant 0 : index
    %74 = vector.load %arg3[%c6, %c0_49, %c0_50] : memref<9x128x128xbf16, #tpu.memory_space<vmem>>, vector<1x128x128xbf16>
    %75 = vector.shape_cast %74 : vector<1x128x128xbf16> to vector<128x128xbf16>
    %cst_51 = arith.constant dense<0.000000e+00> : vector<64x128xf32>
    %76 = tpu.matmul %73, %75, %cst_51 {dimension_numbers = #tpu.dot_dimension_numbers<[1], [0], [0], [1], [0, 0, 1, 1], [], []>} : vector<64x128xbf16>, vector<128x128xbf16>, vector<64x128xf32> -> vector<64x128xf32>
    %77 = arith.addf %66, %76 : vector<64x128xf32>
    %c8_i32_52 = arith.constant 8 : i32
    %78 = arith.muli %arg1, %c8_i32_52 : i32
    %c2_i32_53 = arith.constant 2 : i32
    %79 = arith.addi %78, %c2_i32_53 : i32
    %c0_54 = arith.constant 0 : index
    %80 = arith.index_cast %79 : i32 to index
    %c0_55 = arith.constant 0 : index
    %c0_56 = arith.constant 0 : index
    %81 = vector.load %arg2[%c0_54, %80, %c0_55, %c0_56] : memref<1x10x10x128xbf16, #tpu.memory_space<vmem>>, vector<1x8x10x128xbf16>
    %82 = vector.shape_cast %81 : vector<1x8x10x128xbf16> to vector<8x10x128xbf16>
    %83 = vector.extract_strided_slice %82 {offsets = [0, 1, 0], sizes = [8, 8, 128], strides = [1, 1, 1]} : vector<8x10x128xbf16> to vector<8x8x128xbf16>
    %84 = vector.shape_cast %83 : vector<8x8x128xbf16> to vector<64x128xbf16>
    %c7 = arith.constant 7 : index
    %c0_57 = arith.constant 0 : index
    %c0_58 = arith.constant 0 : index
    %85 = vector.load %arg3[%c7, %c0_57, %c0_58] : memref<9x128x128xbf16, #tpu.memory_space<vmem>>, vector<1x128x128xbf16>
    %86 = vector.shape_cast %85 : vector<1x128x128xbf16> to vector<128x128xbf16>
    %cst_59 = arith.constant dense<0.000000e+00> : vector<64x128xf32>
    %87 = tpu.matmul %84, %86, %cst_59 {dimension_numbers = #tpu.dot_dimension_numbers<[1], [0], [0], [1], [0, 0, 1, 1], [], []>} : vector<64x128xbf16>, vector<128x128xbf16>, vector<64x128xf32> -> vector<64x128xf32>
    %88 = arith.addf %77, %87 : vector<64x128xf32>
    %c8_i32_60 = arith.constant 8 : i32
    %89 = arith.muli %arg1, %c8_i32_60 : i32
    %c2_i32_61 = arith.constant 2 : i32
    %90 = arith.addi %89, %c2_i32_61 : i32
    %c0_62 = arith.constant 0 : index
    %91 = arith.index_cast %90 : i32 to index
    %c0_63 = arith.constant 0 : index
    %c0_64 = arith.constant 0 : index
    %92 = vector.load %arg2[%c0_62, %91, %c0_63, %c0_64] : memref<1x10x10x128xbf16, #tpu.memory_space<vmem>>, vector<1x8x10x128xbf16>
    %93 = vector.shape_cast %92 : vector<1x8x10x128xbf16> to vector<8x10x128xbf16>
    %94 = vector.extract_strided_slice %93 {offsets = [0, 2, 0], sizes = [8, 8, 128], strides = [1, 1, 1]} : vector<8x10x128xbf16> to vector<8x8x128xbf16>
    %95 = vector.shape_cast %94 : vector<8x8x128xbf16> to vector<64x128xbf16>
    %c8 = arith.constant 8 : index
    %c0_65 = arith.constant 0 : index
    %c0_66 = arith.constant 0 : index
    %96 = vector.load %arg3[%c8, %c0_65, %c0_66] : memref<9x128x128xbf16, #tpu.memory_space<vmem>>, vector<1x128x128xbf16>
    %97 = vector.shape_cast %96 : vector<1x128x128xbf16> to vector<128x128xbf16>
    %cst_67 = arith.constant dense<0.000000e+00> : vector<64x128xf32>
    %98 = tpu.matmul %95, %97, %cst_67 {dimension_numbers = #tpu.dot_dimension_numbers<[1], [0], [0], [1], [0, 0, 1, 1], [], []>} : vector<64x128xbf16>, vector<128x128xbf16>, vector<64x128xf32> -> vector<64x128xf32>
    %99 = arith.addf %88, %98 : vector<64x128xf32>
    %c0_68 = arith.constant 0 : index
    %c0_69 = arith.constant 0 : index
    %100 = vector.load %arg4[%c0_68, %c0_69] : memref<64x128xf32, #tpu.memory_space<vmem>>, vector<64x128xf32>
    tpu.vector_store %arg4[%c0_68, %c0_69], %99 {strides = array<i32>} : memref<64x128xf32, #tpu.memory_space<vmem>>, vector<64x128xf32>,
    %cst_70 = arith.constant dense<0.000000e+00> : vector<128xf32>
    %101 = vector.multi_reduction <add>, %99, %cst_70 [0] : vector<64x128xf32> to vector<128xf32>
    %102 = vector.shape_cast %101 : vector<128xf32> to vector<1x128xf32>
    %103 = arith.mulf %99, %99 : vector<64x128xf32>
    %cst_71 = arith.constant dense<0.000000e+00> : vector<128xf32>
    %104 = vector.multi_reduction <add>, %103, %cst_71 [0] : vector<64x128xf32> to vector<128xf32>
    %105 = vector.shape_cast %104 : vector<128xf32> to vector<1x128xf32>
    %106 = tpu.concatenate %102, %105 in 0 : vector<1x128xf32>, vector<1x128xf32> -> vector<2x128xf32>
    %107 = vector.shape_cast %106 : vector<2x128xf32> to vector<1x2x128xf32>
    %c0_72 = arith.constant 0 : index
    %c0_73 = arith.constant 0 : index
    %c0_74 = arith.constant 0 : index
    %108 = vector.load %arg5[%c0_72, %c0_73, %c0_74] : memref<1x2x128xf32, #tpu.memory_space<vmem>>, vector<1x2x128xf32>
    tpu.vector_store %arg5[%c0_72, %c0_73, %c0_74], %107 {strides = array<i32>} : memref<1x2x128xf32, #tpu.memory_space<vmem>>, vector<1x2x128xf32>,
    return
  }
  func.func @transform_0(%arg0: i32, %arg1: i32) -> (i32, i32, i32, i32) {
    %c0_i32 = arith.constant 0 : i32
    %c0_i32_0 = arith.constant 0 : i32
    %c0_i32_1 = arith.constant 0 : i32
    %c0_i32_2 = arith.constant 0 : i32
    return %arg0, %c0_i32, %c0_i32_0, %c0_i32_1 : i32, i32, i32, i32
  }
  func.func @transform_1(%arg0: i32, %arg1: i32) -> (i32, i32, i32) {
    %c0_i32 = arith.constant 0 : i32
    %c0_i32_0 = arith.constant 0 : i32
    %c0_i32_1 = arith.constant 0 : i32
    %c0_i32_2 = arith.constant 0 : i32
    return %c0_i32, %c0_i32_0, %c0_i32_1 : i32, i32, i32
  }
  func.func @transform_2(%arg0: i32, %arg1: i32) -> (i32, i32) {
    %c1_i32 = arith.constant 1 : i32
    %0 = arith.muli %arg0, %c1_i32 : i32
    %1 = arith.addi %0, %arg1 : i32
    %c0_i32 = arith.constant 0 : i32
    %c0_i32_0 = arith.constant 0 : i32
    return %1, %c0_i32 : i32, i32
  }
  func.func @transform_3(%arg0: i32, %arg1: i32) -> (i32, i32, i32) {
    %c1_i32 = arith.constant 1 : i32
    %0 = arith.muli %arg0, %c1_i32 : i32
    %1 = arith.addi %0, %arg1 : i32
    %c0_i32 = arith.constant 0 : i32
    %c0_i32_0 = arith.constant 0 : i32
    %c0_i32_1 = arith.constant 0 : i32
    return %1, %c0_i32, %c0_i32_0 : i32, i32, i32
  }
}

module attributes {stable_mosaic.version = 11 : i64} {
  func.func @_conv_add_stats_kernel(%arg0: i32, %arg1: i32, %arg2: memref<1x10x10x128xbf16, #tpu.memory_space<vmem>>, %arg3: memref<9x128x128xbf16, #tpu.memory_space<vmem>>, %arg4: memref<64x128xf32, #tpu.memory_space<vmem>>, %arg5: memref<64x128xf32, #tpu.memory_space<vmem>>, %arg6: memref<1x2x128xf32, #tpu.memory_space<vmem>>) attributes {dimension_semantics = [#tpu.dimension_semantics<parallel>, #tpu.dimension_semantics<parallel>], iteration_bounds = array<i64: 2, 1>, scalar_prefetch = 0 : i64, scratch_operands = 0 : i64, tpu.core_type = #tpu.core_type<tc>, window_params = [{transform_indices = @transform_0, window_bounds = array<i64: 1, 10, 10, 128>}, {pipeline_mode = #tpu.pipeline_mode<synchronous>, transform_indices = @transform_1, window_bounds = array<i64: 9, 128, 128>}, {transform_indices = @transform_2, window_bounds = array<i64: 64, 128>}, {transform_indices = @transform_3, window_bounds = array<i64: 64, 128>}, {transform_indices = @transform_4, window_bounds = array<i64: 1, 2, 128>}]} {
    %cst = arith.constant 0.000000e+00 : f32
    %0 = vector.broadcast %cst : f32 to vector<64x128xf32>
    %c8_i32 = arith.constant 8 : i32
    %1 = arith.muli %arg1, %c8_i32 : i32
    %c0_i32 = arith.constant 0 : i32
    %2 = arith.addi %1, %c0_i32 : i32
    %c0 = arith.constant 0 : index
    %3 = arith.index_cast %2 : i32 to index
    %c0_0 = arith.constant 0 : index
    %c0_1 = arith.constant 0 : index
    %4 = vector.load %arg2[%c0, %3, %c0_0, %c0_1] : memref<1x10x10x128xbf16, #tpu.memory_space<vmem>>, vector<1x8x10x128xbf16>
    %5 = vector.shape_cast %4 : vector<1x8x10x128xbf16> to vector<8x10x128xbf16>
    %6 = vector.extract_strided_slice %5 {offsets = [0, 0, 0], sizes = [8, 8, 128], strides = [1, 1, 1]} : vector<8x10x128xbf16> to vector<8x8x128xbf16>
    %7 = vector.shape_cast %6 : vector<8x8x128xbf16> to vector<64x128xbf16>
    %c0_2 = arith.constant 0 : index
    %c0_3 = arith.constant 0 : index
    %c0_4 = arith.constant 0 : index
    %8 = vector.load %arg3[%c0_2, %c0_3, %c0_4] : memref<9x128x128xbf16, #tpu.memory_space<vmem>>, vector<1x128x128xbf16>
    %9 = vector.shape_cast %8 : vector<1x128x128xbf16> to vector<128x128xbf16>
    %cst_5 = arith.constant dense<0.000000e+00> : vector<64x128xf32>
    %10 = tpu.matmul %7, %9, %cst_5 {dimension_numbers = #tpu.dot_dimension_numbers<[1], [0], [0], [1], [0, 0, 1, 1], [], []>} : vector<64x128xbf16>, vector<128x128xbf16>, vector<64x128xf32> -> vector<64x128xf32>
    %11 = arith.addf %0, %10 : vector<64x128xf32>
    %c8_i32_6 = arith.constant 8 : i32
    %12 = arith.muli %arg1, %c8_i32_6 : i32
    %c0_i32_7 = arith.constant 0 : i32
    %13 = arith.addi %12, %c0_i32_7 : i32
    %c0_8 = arith.constant 0 : index
    %14 = arith.index_cast %13 : i32 to index
    %c0_9 = arith.constant 0 : index
    %c0_10 = arith.constant 0 : index
    %15 = vector.load %arg2[%c0_8, %14, %c0_9, %c0_10] : memref<1x10x10x128xbf16, #tpu.memory_space<vmem>>, vector<1x8x10x128xbf16>
    %16 = vector.shape_cast %15 : vector<1x8x10x128xbf16> to vector<8x10x128xbf16>
    %17 = vector.extract_strided_slice %16 {offsets = [0, 1, 0], sizes = [8, 8, 128], strides = [1, 1, 1]} : vector<8x10x128xbf16> to vector<8x8x128xbf16>
    %18 = vector.shape_cast %17 : vector<8x8x128xbf16> to vector<64x128xbf16>
    %c1 = arith.constant 1 : index
    %c0_11 = arith.constant 0 : index
    %c0_12 = arith.constant 0 : index
    %19 = vector.load %arg3[%c1, %c0_11, %c0_12] : memref<9x128x128xbf16, #tpu.memory_space<vmem>>, vector<1x128x128xbf16>
    %20 = vector.shape_cast %19 : vector<1x128x128xbf16> to vector<128x128xbf16>
    %cst_13 = arith.constant dense<0.000000e+00> : vector<64x128xf32>
    %21 = tpu.matmul %18, %20, %cst_13 {dimension_numbers = #tpu.dot_dimension_numbers<[1], [0], [0], [1], [0, 0, 1, 1], [], []>} : vector<64x128xbf16>, vector<128x128xbf16>, vector<64x128xf32> -> vector<64x128xf32>
    %22 = arith.addf %11, %21 : vector<64x128xf32>
    %c8_i32_14 = arith.constant 8 : i32
    %23 = arith.muli %arg1, %c8_i32_14 : i32
    %c0_i32_15 = arith.constant 0 : i32
    %24 = arith.addi %23, %c0_i32_15 : i32
    %c0_16 = arith.constant 0 : index
    %25 = arith.index_cast %24 : i32 to index
    %c0_17 = arith.constant 0 : index
    %c0_18 = arith.constant 0 : index
    %26 = vector.load %arg2[%c0_16, %25, %c0_17, %c0_18] : memref<1x10x10x128xbf16, #tpu.memory_space<vmem>>, vector<1x8x10x128xbf16>
    %27 = vector.shape_cast %26 : vector<1x8x10x128xbf16> to vector<8x10x128xbf16>
    %28 = vector.extract_strided_slice %27 {offsets = [0, 2, 0], sizes = [8, 8, 128], strides = [1, 1, 1]} : vector<8x10x128xbf16> to vector<8x8x128xbf16>
    %29 = vector.shape_cast %28 : vector<8x8x128xbf16> to vector<64x128xbf16>
    %c2 = arith.constant 2 : index
    %c0_19 = arith.constant 0 : index
    %c0_20 = arith.constant 0 : index
    %30 = vector.load %arg3[%c2, %c0_19, %c0_20] : memref<9x128x128xbf16, #tpu.memory_space<vmem>>, vector<1x128x128xbf16>
    %31 = vector.shape_cast %30 : vector<1x128x128xbf16> to vector<128x128xbf16>
    %cst_21 = arith.constant dense<0.000000e+00> : vector<64x128xf32>
    %32 = tpu.matmul %29, %31, %cst_21 {dimension_numbers = #tpu.dot_dimension_numbers<[1], [0], [0], [1], [0, 0, 1, 1], [], []>} : vector<64x128xbf16>, vector<128x128xbf16>, vector<64x128xf32> -> vector<64x128xf32>
    %33 = arith.addf %22, %32 : vector<64x128xf32>
    %c8_i32_22 = arith.constant 8 : i32
    %34 = arith.muli %arg1, %c8_i32_22 : i32
    %c1_i32 = arith.constant 1 : i32
    %35 = arith.addi %34, %c1_i32 : i32
    %c0_23 = arith.constant 0 : index
    %36 = arith.index_cast %35 : i32 to index
    %c0_24 = arith.constant 0 : index
    %c0_25 = arith.constant 0 : index
    %37 = vector.load %arg2[%c0_23, %36, %c0_24, %c0_25] : memref<1x10x10x128xbf16, #tpu.memory_space<vmem>>, vector<1x8x10x128xbf16>
    %38 = vector.shape_cast %37 : vector<1x8x10x128xbf16> to vector<8x10x128xbf16>
    %39 = vector.extract_strided_slice %38 {offsets = [0, 0, 0], sizes = [8, 8, 128], strides = [1, 1, 1]} : vector<8x10x128xbf16> to vector<8x8x128xbf16>
    %40 = vector.shape_cast %39 : vector<8x8x128xbf16> to vector<64x128xbf16>
    %c3 = arith.constant 3 : index
    %c0_26 = arith.constant 0 : index
    %c0_27 = arith.constant 0 : index
    %41 = vector.load %arg3[%c3, %c0_26, %c0_27] : memref<9x128x128xbf16, #tpu.memory_space<vmem>>, vector<1x128x128xbf16>
    %42 = vector.shape_cast %41 : vector<1x128x128xbf16> to vector<128x128xbf16>
    %cst_28 = arith.constant dense<0.000000e+00> : vector<64x128xf32>
    %43 = tpu.matmul %40, %42, %cst_28 {dimension_numbers = #tpu.dot_dimension_numbers<[1], [0], [0], [1], [0, 0, 1, 1], [], []>} : vector<64x128xbf16>, vector<128x128xbf16>, vector<64x128xf32> -> vector<64x128xf32>
    %44 = arith.addf %33, %43 : vector<64x128xf32>
    %c8_i32_29 = arith.constant 8 : i32
    %45 = arith.muli %arg1, %c8_i32_29 : i32
    %c1_i32_30 = arith.constant 1 : i32
    %46 = arith.addi %45, %c1_i32_30 : i32
    %c0_31 = arith.constant 0 : index
    %47 = arith.index_cast %46 : i32 to index
    %c0_32 = arith.constant 0 : index
    %c0_33 = arith.constant 0 : index
    %48 = vector.load %arg2[%c0_31, %47, %c0_32, %c0_33] : memref<1x10x10x128xbf16, #tpu.memory_space<vmem>>, vector<1x8x10x128xbf16>
    %49 = vector.shape_cast %48 : vector<1x8x10x128xbf16> to vector<8x10x128xbf16>
    %50 = vector.extract_strided_slice %49 {offsets = [0, 1, 0], sizes = [8, 8, 128], strides = [1, 1, 1]} : vector<8x10x128xbf16> to vector<8x8x128xbf16>
    %51 = vector.shape_cast %50 : vector<8x8x128xbf16> to vector<64x128xbf16>
    %c4 = arith.constant 4 : index
    %c0_34 = arith.constant 0 : index
    %c0_35 = arith.constant 0 : index
    %52 = vector.load %arg3[%c4, %c0_34, %c0_35] : memref<9x128x128xbf16, #tpu.memory_space<vmem>>, vector<1x128x128xbf16>
    %53 = vector.shape_cast %52 : vector<1x128x128xbf16> to vector<128x128xbf16>
    %cst_36 = arith.constant dense<0.000000e+00> : vector<64x128xf32>
    %54 = tpu.matmul %51, %53, %cst_36 {dimension_numbers = #tpu.dot_dimension_numbers<[1], [0], [0], [1], [0, 0, 1, 1], [], []>} : vector<64x128xbf16>, vector<128x128xbf16>, vector<64x128xf32> -> vector<64x128xf32>
    %55 = arith.addf %44, %54 : vector<64x128xf32>
    %c8_i32_37 = arith.constant 8 : i32
    %56 = arith.muli %arg1, %c8_i32_37 : i32
    %c1_i32_38 = arith.constant 1 : i32
    %57 = arith.addi %56, %c1_i32_38 : i32
    %c0_39 = arith.constant 0 : index
    %58 = arith.index_cast %57 : i32 to index
    %c0_40 = arith.constant 0 : index
    %c0_41 = arith.constant 0 : index
    %59 = vector.load %arg2[%c0_39, %58, %c0_40, %c0_41] : memref<1x10x10x128xbf16, #tpu.memory_space<vmem>>, vector<1x8x10x128xbf16>
    %60 = vector.shape_cast %59 : vector<1x8x10x128xbf16> to vector<8x10x128xbf16>
    %61 = vector.extract_strided_slice %60 {offsets = [0, 2, 0], sizes = [8, 8, 128], strides = [1, 1, 1]} : vector<8x10x128xbf16> to vector<8x8x128xbf16>
    %62 = vector.shape_cast %61 : vector<8x8x128xbf16> to vector<64x128xbf16>
    %c5 = arith.constant 5 : index
    %c0_42 = arith.constant 0 : index
    %c0_43 = arith.constant 0 : index
    %63 = vector.load %arg3[%c5, %c0_42, %c0_43] : memref<9x128x128xbf16, #tpu.memory_space<vmem>>, vector<1x128x128xbf16>
    %64 = vector.shape_cast %63 : vector<1x128x128xbf16> to vector<128x128xbf16>
    %cst_44 = arith.constant dense<0.000000e+00> : vector<64x128xf32>
    %65 = tpu.matmul %62, %64, %cst_44 {dimension_numbers = #tpu.dot_dimension_numbers<[1], [0], [0], [1], [0, 0, 1, 1], [], []>} : vector<64x128xbf16>, vector<128x128xbf16>, vector<64x128xf32> -> vector<64x128xf32>
    %66 = arith.addf %55, %65 : vector<64x128xf32>
    %c8_i32_45 = arith.constant 8 : i32
    %67 = arith.muli %arg1, %c8_i32_45 : i32
    %c2_i32 = arith.constant 2 : i32
    %68 = arith.addi %67, %c2_i32 : i32
    %c0_46 = arith.constant 0 : index
    %69 = arith.index_cast %68 : i32 to index
    %c0_47 = arith.constant 0 : index
    %c0_48 = arith.constant 0 : index
    %70 = vector.load %arg2[%c0_46, %69, %c0_47, %c0_48] : memref<1x10x10x128xbf16, #tpu.memory_space<vmem>>, vector<1x8x10x128xbf16>
    %71 = vector.shape_cast %70 : vector<1x8x10x128xbf16> to vector<8x10x128xbf16>
    %72 = vector.extract_strided_slice %71 {offsets = [0, 0, 0], sizes = [8, 8, 128], strides = [1, 1, 1]} : vector<8x10x128xbf16> to vector<8x8x128xbf16>
    %73 = vector.shape_cast %72 : vector<8x8x128xbf16> to vector<64x128xbf16>
    %c6 = arith.constant 6 : index
    %c0_49 = arith.constant 0 : index
    %c0_50 = arith.constant 0 : index
    %74 = vector.load %arg3[%c6, %c0_49, %c0_50] : memref<9x128x128xbf16, #tpu.memory_space<vmem>>, vector<1x128x128xbf16>
    %75 = vector.shape_cast %74 : vector<1x128x128xbf16> to vector<128x128xbf16>
    %cst_51 = arith.constant dense<0.000000e+00> : vector<64x128xf32>
    %76 = tpu.matmul %73, %75, %cst_51 {dimension_numbers = #tpu.dot_dimension_numbers<[1], [0], [0], [1], [0, 0, 1, 1], [], []>} : vector<64x128xbf16>, vector<128x128xbf16>, vector<64x128xf32> -> vector<64x128xf32>
    %77 = arith.addf %66, %76 : vector<64x128xf32>
    %c8_i32_52 = arith.constant 8 : i32
    %78 = arith.muli %arg1, %c8_i32_52 : i32
    %c2_i32_53 = arith.constant 2 : i32
    %79 = arith.addi %78, %c2_i32_53 : i32
    %c0_54 = arith.constant 0 : index
    %80 = arith.index_cast %79 : i32 to index
    %c0_55 = arith.constant 0 : index
    %c0_56 = arith.constant 0 : index
    %81 = vector.load %arg2[%c0_54, %80, %c0_55, %c0_56] : memref<1x10x10x128xbf16, #tpu.memory_space<vmem>>, vector<1x8x10x128xbf16>
    %82 = vector.shape_cast %81 : vector<1x8x10x128xbf16> to vector<8x10x128xbf16>
    %83 = vector.extract_strided_slice %82 {offsets = [0, 1, 0], sizes = [8, 8, 128], strides = [1, 1, 1]} : vector<8x10x128xbf16> to vector<8x8x128xbf16>
    %84 = vector.shape_cast %83 : vector<8x8x128xbf16> to vector<64x128xbf16>
    %c7 = arith.constant 7 : index
    %c0_57 = arith.constant 0 : index
    %c0_58 = arith.constant 0 : index
    %85 = vector.load %arg3[%c7, %c0_57, %c0_58] : memref<9x128x128xbf16, #tpu.memory_space<vmem>>, vector<1x128x128xbf16>
    %86 = vector.shape_cast %85 : vector<1x128x128xbf16> to vector<128x128xbf16>
    %cst_59 = arith.constant dense<0.000000e+00> : vector<64x128xf32>
    %87 = tpu.matmul %84, %86, %cst_59 {dimension_numbers = #tpu.dot_dimension_numbers<[1], [0], [0], [1], [0, 0, 1, 1], [], []>} : vector<64x128xbf16>, vector<128x128xbf16>, vector<64x128xf32> -> vector<64x128xf32>
    %88 = arith.addf %77, %87 : vector<64x128xf32>
    %c8_i32_60 = arith.constant 8 : i32
    %89 = arith.muli %arg1, %c8_i32_60 : i32
    %c2_i32_61 = arith.constant 2 : i32
    %90 = arith.addi %89, %c2_i32_61 : i32
    %c0_62 = arith.constant 0 : index
    %91 = arith.index_cast %90 : i32 to index
    %c0_63 = arith.constant 0 : index
    %c0_64 = arith.constant 0 : index
    %92 = vector.load %arg2[%c0_62, %91, %c0_63, %c0_64] : memref<1x10x10x128xbf16, #tpu.memory_space<vmem>>, vector<1x8x10x128xbf16>
    %93 = vector.shape_cast %92 : vector<1x8x10x128xbf16> to vector<8x10x128xbf16>
    %94 = vector.extract_strided_slice %93 {offsets = [0, 2, 0], sizes = [8, 8, 128], strides = [1, 1, 1]} : vector<8x10x128xbf16> to vector<8x8x128xbf16>
    %95 = vector.shape_cast %94 : vector<8x8x128xbf16> to vector<64x128xbf16>
    %c8 = arith.constant 8 : index
    %c0_65 = arith.constant 0 : index
    %c0_66 = arith.constant 0 : index
    %96 = vector.load %arg3[%c8, %c0_65, %c0_66] : memref<9x128x128xbf16, #tpu.memory_space<vmem>>, vector<1x128x128xbf16>
    %97 = vector.shape_cast %96 : vector<1x128x128xbf16> to vector<128x128xbf16>
    %cst_67 = arith.constant dense<0.000000e+00> : vector<64x128xf32>
    %98 = tpu.matmul %95, %97, %cst_67 {dimension_numbers = #tpu.dot_dimension_numbers<[1], [0], [0], [1], [0, 0, 1, 1], [], []>} : vector<64x128xbf16>, vector<128x128xbf16>, vector<64x128xf32> -> vector<64x128xf32>
    %99 = arith.addf %88, %98 : vector<64x128xf32>
    %c0_68 = arith.constant 0 : index
    %c0_69 = arith.constant 0 : index
    %100 = vector.load %arg4[%c0_68, %c0_69] : memref<64x128xf32, #tpu.memory_space<vmem>>, vector<64x128xf32>
    %101 = arith.addf %99, %100 : vector<64x128xf32>
    %c0_70 = arith.constant 0 : index
    %c0_71 = arith.constant 0 : index
    %102 = vector.load %arg5[%c0_70, %c0_71] : memref<64x128xf32, #tpu.memory_space<vmem>>, vector<64x128xf32>
    tpu.vector_store %arg5[%c0_70, %c0_71], %101 {strides = array<i32>} : memref<64x128xf32, #tpu.memory_space<vmem>>, vector<64x128xf32>,
    %cst_72 = arith.constant dense<0.000000e+00> : vector<128xf32>
    %103 = vector.multi_reduction <add>, %101, %cst_72 [0] : vector<64x128xf32> to vector<128xf32>
    %104 = vector.shape_cast %103 : vector<128xf32> to vector<1x128xf32>
    %105 = arith.mulf %101, %101 : vector<64x128xf32>
    %cst_73 = arith.constant dense<0.000000e+00> : vector<128xf32>
    %106 = vector.multi_reduction <add>, %105, %cst_73 [0] : vector<64x128xf32> to vector<128xf32>
    %107 = vector.shape_cast %106 : vector<128xf32> to vector<1x128xf32>
    %108 = tpu.concatenate %104, %107 in 0 : vector<1x128xf32>, vector<1x128xf32> -> vector<2x128xf32>
    %109 = vector.shape_cast %108 : vector<2x128xf32> to vector<1x2x128xf32>
    %c0_74 = arith.constant 0 : index
    %c0_75 = arith.constant 0 : index
    %c0_76 = arith.constant 0 : index
    %110 = vector.load %arg6[%c0_74, %c0_75, %c0_76] : memref<1x2x128xf32, #tpu.memory_space<vmem>>, vector<1x2x128xf32>
    tpu.vector_store %arg6[%c0_74, %c0_75, %c0_76], %109 {strides = array<i32>} : memref<1x2x128xf32, #tpu.memory_space<vmem>>, vector<1x2x128xf32>,
    return
  }
  func.func @transform_0(%arg0: i32, %arg1: i32) -> (i32, i32, i32, i32) {
    %c0_i32 = arith.constant 0 : i32
    %c0_i32_0 = arith.constant 0 : i32
    %c0_i32_1 = arith.constant 0 : i32
    %c0_i32_2 = arith.constant 0 : i32
    return %arg0, %c0_i32, %c0_i32_0, %c0_i32_1 : i32, i32, i32, i32
  }
  func.func @transform_1(%arg0: i32, %arg1: i32) -> (i32, i32, i32) {
    %c0_i32 = arith.constant 0 : i32
    %c0_i32_0 = arith.constant 0 : i32
    %c0_i32_1 = arith.constant 0 : i32
    %c0_i32_2 = arith.constant 0 : i32
    return %c0_i32, %c0_i32_0, %c0_i32_1 : i32, i32, i32
  }
  func.func @transform_2(%arg0: i32, %arg1: i32) -> (i32, i32) {
    %c1_i32 = arith.constant 1 : i32
    %0 = arith.muli %arg0, %c1_i32 : i32
    %1 = arith.addi %0, %arg1 : i32
    %c0_i32 = arith.constant 0 : i32
    %c0_i32_0 = arith.constant 0 : i32
    return %1, %c0_i32 : i32, i32
  }
  func.func @transform_3(%arg0: i32, %arg1: i32) -> (i32, i32) {
    %c1_i32 = arith.constant 1 : i32
    %0 = arith.muli %arg0, %c1_i32 : i32
    %1 = arith.addi %0, %arg1 : i32
    %c0_i32 = arith.constant 0 : i32
    %c0_i32_0 = arith.constant 0 : i32
    return %1, %c0_i32 : i32, i32
  }
  func.func @transform_4(%arg0: i32, %arg1: i32) -> (i32, i32, i32) {
    %c1_i32 = arith.constant 1 : i32
    %0 = arith.muli %arg0, %c1_i32 : i32
    %1 = arith.addi %0, %arg1 : i32
    %c0_i32 = arith.constant 0 : i32
    %c0_i32_0 = arith.constant 0 : i32
    %c0_i32_1 = arith.constant 0 : i32
    return %1, %c0_i32, %c0_i32_0 : i32, i32, i32
  }
}

module attributes {stable_mosaic.version = 11 : i64} {
  func.func @_bn_relu_kernel(%arg0: i32, %arg1: memref<64x128xf32, #tpu.memory_space<vmem>>, %arg2: memref<1x128xf32, #tpu.memory_space<vmem>>, %arg3: memref<1x128xf32, #tpu.memory_space<vmem>>, %arg4: memref<1x128xf32, #tpu.memory_space<vmem>>, %arg5: memref<1x128xf32, #tpu.memory_space<vmem>>, %arg6: memref<64x128xf32, #tpu.memory_space<vmem>>) attributes {dimension_semantics = [#tpu.dimension_semantics<parallel>], iteration_bounds = array<i64: 2>, scalar_prefetch = 0 : i64, scratch_operands = 0 : i64, tpu.core_type = #tpu.core_type<tc>, window_params = [{transform_indices = @transform_0, window_bounds = array<i64: 64, 128>}, {pipeline_mode = #tpu.pipeline_mode<synchronous>, transform_indices = @transform_1, window_bounds = array<i64: 1, 128>}, {pipeline_mode = #tpu.pipeline_mode<synchronous>, transform_indices = @transform_2, window_bounds = array<i64: 1, 128>}, {pipeline_mode = #tpu.pipeline_mode<synchronous>, transform_indices = @transform_3, window_bounds = array<i64: 1, 128>}, {pipeline_mode = #tpu.pipeline_mode<synchronous>, transform_indices = @transform_4, window_bounds = array<i64: 1, 128>}, {transform_indices = @transform_5, window_bounds = array<i64: 64, 128>}]} {
    %c0 = arith.constant 0 : index
    %c0_0 = arith.constant 0 : index
    %0 = vector.load %arg2[%c0, %c0_0] : memref<1x128xf32, #tpu.memory_space<vmem>>, vector<1x128xf32>
    %cst = arith.constant 7.812500e-03 : f32
    %1 = vector.broadcast %cst : f32 to vector<1x128xf32>
    %2 = arith.mulf %0, %1 : vector<1x128xf32>
    %c0_1 = arith.constant 0 : index
    %c0_2 = arith.constant 0 : index
    %3 = vector.load %arg3[%c0_1, %c0_2] : memref<1x128xf32, #tpu.memory_space<vmem>>, vector<1x128xf32>
    %cst_3 = arith.constant 7.812500e-03 : f32
    %4 = vector.broadcast %cst_3 : f32 to vector<1x128xf32>
    %5 = arith.mulf %3, %4 : vector<1x128xf32>
    %6 = arith.mulf %2, %2 : vector<1x128xf32>
    %7 = arith.subf %5, %6 : vector<1x128xf32>
    %cst_4 = arith.constant 0.000000e+00 : f32
    %8 = vector.broadcast %cst_4 : f32 to vector<1x128xf32>
    %9 = arith.maximumf %7, %8 : vector<1x128xf32>
    %c0_5 = arith.constant 0 : index
    %c0_6 = arith.constant 0 : index
    %10 = vector.load %arg4[%c0_5, %c0_6] : memref<1x128xf32, #tpu.memory_space<vmem>>, vector<1x128xf32>
    %cst_7 = arith.constant 1.000000e-03 : f32
    %11 = vector.broadcast %cst_7 : f32 to vector<1x128xf32>
    %12 = arith.addf %9, %11 : vector<1x128xf32>
    %13 = math.rsqrt %12 : vector<1x128xf32>
    %14 = arith.mulf %10, %13 : vector<1x128xf32>
    %c0_8 = arith.constant 0 : index
    %c0_9 = arith.constant 0 : index
    %15 = vector.load %arg5[%c0_8, %c0_9] : memref<1x128xf32, #tpu.memory_space<vmem>>, vector<1x128xf32>
    %16 = arith.mulf %2, %14 : vector<1x128xf32>
    %17 = arith.subf %15, %16 : vector<1x128xf32>
    %c0_10 = arith.constant 0 : index
    %c0_11 = arith.constant 0 : index
    %18 = vector.load %arg1[%c0_10, %c0_11] : memref<64x128xf32, #tpu.memory_space<vmem>>, vector<64x128xf32>
    %19 = vector.broadcast %14 : vector<1x128xf32> to vector<64x128xf32>
    %20 = arith.mulf %18, %19 : vector<64x128xf32>
    %21 = vector.broadcast %17 : vector<1x128xf32> to vector<64x128xf32>
    %22 = arith.addf %20, %21 : vector<64x128xf32>
    %cst_12 = arith.constant 0.000000e+00 : f32
    %23 = vector.broadcast %cst_12 : f32 to vector<64x128xf32>
    %24 = arith.maximumf %22, %23 : vector<64x128xf32>
    %c0_13 = arith.constant 0 : index
    %c0_14 = arith.constant 0 : index
    %25 = vector.load %arg6[%c0_13, %c0_14] : memref<64x128xf32, #tpu.memory_space<vmem>>, vector<64x128xf32>
    tpu.vector_store %arg6[%c0_13, %c0_14], %24 {strides = array<i32>} : memref<64x128xf32, #tpu.memory_space<vmem>>, vector<64x128xf32>,
    return
  }
  func.func @transform_0(%arg0: i32) -> (i32, i32) {
    %c0_i32 = arith.constant 0 : i32
    %c0_i32_0 = arith.constant 0 : i32
    return %arg0, %c0_i32 : i32, i32
  }
  func.func @transform_1(%arg0: i32) -> (i32, i32) {
    %c0_i32 = arith.constant 0 : i32
    %c0_i32_0 = arith.constant 0 : i32
    %c0_i32_1 = arith.constant 0 : i32
    return %c0_i32, %c0_i32_0 : i32, i32
  }
  func.func @transform_2(%arg0: i32) -> (i32, i32) {
    %c0_i32 = arith.constant 0 : i32
    %c0_i32_0 = arith.constant 0 : i32
    %c0_i32_1 = arith.constant 0 : i32
    return %c0_i32, %c0_i32_0 : i32, i32
  }
  func.func @transform_3(%arg0: i32) -> (i32, i32) {
    %c0_i32 = arith.constant 0 : i32
    %c0_i32_0 = arith.constant 0 : i32
    %c0_i32_1 = arith.constant 0 : i32
    return %c0_i32, %c0_i32_0 : i32, i32
  }
  func.func @transform_4(%arg0: i32) -> (i32, i32) {
    %c0_i32 = arith.constant 0 : i32
    %c0_i32_0 = arith.constant 0 : i32
    %c0_i32_1 = arith.constant 0 : i32
    return %c0_i32, %c0_i32_0 : i32, i32
  }
  func.func @transform_5(%arg0: i32) -> (i32, i32) {
    %c0_i32 = arith.constant 0 : i32
    %c0_i32_0 = arith.constant 0 : i32
    return %arg0, %c0_i32 : i32, i32
  }
}

</mosaic_0001>

<bundles_post_ra>
// kernel: resnet_layer_forward.9
= control target key start
LH: loop header
LB: loop body
LE: loop exit
PB: predicated region body
PF: predicated region fallthrough
CT: control target
= control target key end

     0   :  { %s443_s18 = smov 0   ;;  %s476_s0 = inlined_call_operand.vmem [shape: f32[128,128], index: 0, kind: input, shape index: {}]   ;;  %s477_s1 = inlined_call_operand.vmem [shape: f32[1,128], index: 1, kind: input, shape index: {}]   ;;  %s478_s2 = inlined_call_operand.vmem [shape: f32[1,128], index: 2, kind: input, shape index: {}]   ;;  %s479_s3 = inlined_call_operand.vmem [shape: f32[1,128], index: 3, kind: input, shape index: {}]   ;;  %s480_s4 = inlined_call_operand.vmem [shape: f32[1,128], index: 4, kind: input, shape index: {}]   ;;  %s481_s5 = inlined_call_operand.vmem [shape: bf16[128,128], index: 5, kind: output, shape index: {}]  }
   0x1 LB: > { %s361_s19 = sadd.s32 4294967295, %s411_s18   ;;  %p365_p0 = scmp.ge.s32.totalorder %s411_s18, 1  ;;  %s411_s18 = sphi %s443_s18, %s15_s18  }
   0x2   : > { %p188_p1 = scmp.lt.s32.totalorder %s411_s18, 3 }
   0x4   : > { %p189_p2 = pnand %p365_p0, %p188_p1 }
   0x5   : > { %s366_s24 = sshll.u32 (!%p189_p2), %s361_s19, 3 }
   0x6   : > { %192 = sbr.rel (%p189_p2) target bundleno = 58 (0x3a), region = 40  ;;  %p217_p3 = scmp.lt.s32.totalorder (!%p189_p2), %s366_s24, 15 }
   0xb   : > { %v228_v0 = vld [vmem:[%s477_s1] sm:$0x1]  ;;  %s483_s24 = smov (!%p217_p3, %s366_s24), 15 }
   0xc   : > { %v230_v1 = vld [vmem:[%s478_s2] sm:$0x1]  ;;  %v229_v2 = vmul.f32 0.0078125, %v228_v0  ;;  %s367_s25 = sshll.u32 %s483_s24, 3  ;;  %s369_s8 = sshll.u32 %s483_s24, 2 }
   0xd   : > { %v231_v3 = vmul.f32 0.0078125, %v230_v1  ;;  %s220_s28 = scalar_lea.vmem %s476_s0, %s367_s25  ;;  %v235_v13 = vld [vmem:[%s479_s3] sm:$0x1]  ;;  %s226_s11 = scalar_lea.vmem %s481_s5, %s369_s8 }
   0xe   : > { %v232_v4 = vmul.f32 %v229_v2, %v229_v2  ;;  %v248_v17 = vld [vmem:[%s480_s4] sm:$0x1]  ;;  %v252_v19 = vld [vmem:[%s220_s28 + $0x8] sm:$0xff]  ;;  %v253_v20 = vld [vmem:[%s220_s28 + $0x10] sm:$0xff] }
   0xf   : > { %v251_v18 = vld [vmem:[%s220_s28] sm:$0xff]  ;;  %v254_v21 = vld [vmem:[%s220_s28 + $0x18] sm:$0xff]  ;;  %v256_v25 = vld [vmem:[%s220_s28 + $0x28] sm:$0xff] }
  0x10   : > { %v233_v5 = vsub.f32 %v231_v3, %v232_v4  ;;  %v255_v24 = vld [vmem:[%s220_s28 + $0x20] sm:$0xff]  ;;  %v257_v26 = vld [vmem:[%s220_s28 + $0x30] sm:$0xff]  ;;  %v258_v27 = vld [vmem:[%s220_s28 + $0x38] sm:$0xff] }
  0x12   : > { %v234_v6 = vmax.f32 %v233_v5, 0.0 }
  0x14   : > { %v236_v7 = vadd.f32 0.001, %v234_v6 }
  0x16   : > { %403 = vrsqrt.f32 %v236_v7  ;;  %vm243_vm0 = vweird.f32 %v236_v7 }
  0x1c   : > { %v404_v8 = vpop.eup %403 }
  0x1d   : > { %v238_v9 = vmul.f32 %v404_v8, %v236_v7  ;;  %vm244_vm1 = vweird.f32 %v404_v8 }
  0x1e   : > { %vm245_vm2 = vmor %vm243_vm0, %vm244_vm1 }
  0x1f   : > { %v239_v10 = vmul.f32 %v404_v8, %v238_v9 }
  0x21   : > { %v240_v11 = vmul.f32 0.5, %v239_v10 }
  0x23   : > { %v241_v12 = vsub.f32 1.5, %v240_v11 }
  0x25   : > { %v242_v14 = vmul.f32 %v404_v8, %v241_v12 }
  0x27   : > { %v246_v15 = vsel %vm245_vm2, %v404_v8, %v242_v14 }
  0x28   : > { %v247_v16 = vmul.f32 %v246_v15, %v235_v13 }
  0x2a   : > { %v249_v22 = vmul.f32 %v247_v16, %v229_v2  ;;  %v260_v23 = vperm.slane %v247_v16, 0 }
  0x2c   : > { %v250_v28 = vsub.f32 %v248_v17, %v249_v22  ;;  %v262_v29 = vmul.f32 %v260_v23, %v251_v18  ;;  %v263_v30 = vmul.f32 %v260_v23, %v252_v19  ;;  %v264_v31 = vmul.f32 %v260_v23, %v253_v20 }
  0x2d   : > { %v265_v32 = vmul.f32 %v260_v23, %v254_v21  ;;  %v266_v33 = vmul.f32 %v260_v23, %v255_v24  ;;  %v267_v34 = vmul.f32 %v260_v23, %v256_v25  ;;  %v268_v35 = vmul.f32 %v260_v23, %v257_v26 }
  0x2e   : > { %v271_v36 = vperm.slane %v250_v28, 0  ;;  %v269_v37 = vmul.f32 %v260_v23, %v258_v27 }
  0x30   : > { %v273_v38 = vadd.f32 %v271_v36, %v262_v29  ;;  %v274_v39 = vadd.f32 %v271_v36, %v263_v30  ;;  %v275_v40 = vadd.f32 %v271_v36, %v264_v31  ;;  %v276_v41 = vadd.f32 %v271_v36, %v265_v32 }
  0x31   : > { %v277_v42 = vadd.f32 %v271_v36, %v266_v33  ;;  %v278_v43 = vadd.f32 %v271_v36, %v267_v34  ;;  %v279_v44 = vadd.f32 %v271_v36, %v268_v35  ;;  %v280_v45 = vadd.f32 %v271_v36, %v269_v37 }
  0x32   : > { %v281_v46 = vmax.f32 %v273_v38, 0.0  ;;  %v282_v47 = vmax.f32 %v274_v39, 0.0  ;;  %v283_v48 = vmax.f32 %v275_v40, 0.0  ;;  %v284_v49 = vmax.f32 %v276_v41, 0.0 }
  0x33   : > { %v285_v50 = vmax.f32 %v277_v42, 0.0  ;;  %v286_v51 = vmax.f32 %v278_v43, 0.0  ;;  %v287_v52 = vmax.f32 %v279_v44, 0.0  ;;  %v288_v53 = vmax.f32 %v280_v45, 0.0 }
  0x34   : > { %v375_v54 = vpack.c.bf16 %v282_v47, %v281_v46  ;;  %v380_v55 = vpack.c.bf16 %v284_v49, %v283_v48 }
  0x35   : > { %v385_v56 = vpack.c.bf16 %v286_v51, %v285_v50  ;;  %v390_v57 = vpack.c.bf16 %v288_v53, %v287_v52 }
  0x36   : > { %376 = vst [vmem:[%s226_s11] sm:$0xff] %v375_v54  }
  0x37   : > { %392 = vst [vmem:[%s226_s11 + $0x8] sm:$0xff] %v380_v55  }
  0x38   : > { %393 = vst [vmem:[%s226_s11 + $0x10] sm:$0xff] %v385_v56  }
  0x39   : > { %394 = vst [vmem:[%s226_s11 + $0x18] sm:$0xff] %v390_v57  }
  0x3a PF: > { %s15_s18 = sadd.s32 1, %s411_s18  }
  0x3b   : > { %p12_p4 = scmp.ge.s32.totalorder %s15_s18, 4  }
  0x3d   :  { %14 = sbr.rel (!%p12_p4) target bundleno = 1 (0x1), region = 70 }

// kernel: resnet_layer_forward.8
= control target key start
LH: loop header
LB: loop body
LE: loop exit
PB: predicated region body
PF: predicated region fallthrough
CT: control target
= control target key end

     0   :  { %s2665_s12 = smov 0   ;;  %s2667_s13 = smov 0   ;;  %s3128_s0 = inlined_call_operand.vmem [shape: bf16[8,9,9,128], index: 0, kind: input, shape index: {}]   ;;  %s3129_s1 = inlined_call_operand.vmem [shape: bf16[9,128,128], index: 1, kind: input, shape index: {}]   ;;  %s3130_s2 = inlined_call_operand.vmem [shape: f32[128,128], index: 2, kind: output, shape index: {0}]   ;;  %s3131_s3 = inlined_call_operand.vmem [shape: f32[2,2,128], index: 3, kind: output, shape index: {1}]  }
   0x1   :  { %s2669_s14 = smov 0  }
   0x2 LB: > { %s26_s15 = sadd.s32 1, %s2639_s13  ;;  %p1908_p0 = scmp.ge.s32.totalorder %s2643_s14, 1  ;;  %s2643_s14 = sphi %s2669_s14, %s14_s14   ;;  %s2639_s13 = sphi %s2667_s13, %s3135_s13   ;;  %s2635_s12 = sphi %s2665_s12, %s3134_s12  }
   0x3   : > { %p28_p1 = scmp.ge.s32.totalorder %s26_s15, 2  ;;  %p158_p2 = scmp.lt.s32.totalorder %s2643_s14, 3 }
   0x5   : > { %s3137_s15 = smov (%p28_p1, %s26_s15), 0  ;;  %p159_p3 = pnand %p1908_p0, %p158_p2 }
   0x6   : > { %s1909_s18 = sshll.u32 (!%p159_p3), %s2635_s12, 2  ;;  %p205_p6 = scmp.lt.s32.totalorder (!%p159_p3), %s2635_s12, 1 }
   0x7   : > { %162 = sbr.rel (%p159_p3) target bundleno = 348 (0x15c), region = 28  ;;  %p190_p4 = scmp.lt.s32.totalorder (!%p159_p3), %s1909_s18, 7 }
   0xc   : > { %v2507_v0 = vld [vmem:[%s3129_s1 + $0x78] sm:$0xff]  ;;  %v2506_v2 = vld [vmem:[%s3129_s1 + $0x70] sm:$0xff]  ;;  %s3139_s18 = smov (!%p190_p4, %s1909_s18), 7  ;;  %v2505_v6 = vld [vmem:[%s3129_s1 + $0x68] sm:$0xff]  ;;  %vm476_vm0 = vsmask.f32 3328 }
   0xd   : > { %v2515_v1 = vld [vmem:[%s3129_s1 + $0xb8] sm:$0xff]  ;;  %2580 = vmatpush.bf16.msra.mxu1 %v2507_v0  ;;  %346 = vmatpush.bf16.msra.mxu0 %v2507_v0  ;;  %v2514_v3 = vld [vmem:[%s3129_s1 + $0xb0] sm:$0xff]  ;;  %s2596_s29 = smul.u32 72, %s3139_s18  ;;  %v2513_v7 = vld [vmem:[%s3129_s1 + $0xa8] sm:$0xff]  ;;  %vm477_vm1 = vsmask.f32 7440 }
   0xe   : > { %672 = vmatpush.bf16.msra.mxu2 %v2515_v1  ;;  %v2527_v4 = vld [vmem:[%s3129_s1 + $0xf8] sm:$0xff]  ;;  %v2526_v5 = vld [vmem:[%s3129_s1 + $0xf0] sm:$0xff]  ;;  %v2525_v8 = vld [vmem:[%s3129_s1 + $0xe8] sm:$0xff]  ;;  %vm1776_vm3 = vcmask 1040384  }
   0xf   : > { %817 = vmatpush.bf16.msra.mxu3 %v2527_v4  ;;  %s2713_s9 = scalar_lea.vmem %s3128_s0, %s2596_s29  ;;  %v2504_v10 = vld [vmem:[%s3129_s1 + $0x60] sm:$0xff]  ;;  %v2503_v23 = vld [vmem:[%s3129_s1 + $0x58] sm:$0xff]  ;;  %v2502_v31 = vld [vmem:[%s3129_s1 + $0x50] sm:$0xff] }
  0x10   : > { %v214_v9 = vld [vmem:[%s2713_s9] sm:$0xf]  ;;  %v216_v11 = vld [vmem:[%s2713_s9 + $0x8] sm:$0xf]  ;;  %v215_v16 = vld [vmem:[%s2713_s9 + $0x4] sm:$0x1] }
  0x11   : > { %2581 = vmatpush.bf16.msra.mxu1 %v2506_v2  ;;  %347 = vmatpush.bf16.msra.mxu0 %v2506_v2  ;;  %v2512_v12 = vld [vmem:[%s3129_s1 + $0xa0] sm:$0xff]  ;;  %v480_v13 = vshrl.u32 %v214_v9, 16  ;;  %v483_v14 = vshll.u32 %v214_v9, 16  ;;  %v494_v15 = vshrl.u32 %v216_v11, 16  ;;  %v217_v17 = vld [vmem:[%s2713_s9 + $0xc] sm:$0x1]  ;;  %vm2748_vm2 = vmor %vm476_vm0, %vm477_vm1 }
  0x12   : > { %673 = vmatpush.bf16.msra.mxu2 %v2514_v3  ;;  %v497_v18 = vshll.u32 %v216_v11, 16  ;;  %v2524_v19 = vld [vmem:[%s3129_s1 + $0xe0] sm:$0xff]  ;;  %v2511_v25 = vld [vmem:[%s3129_s1 + $0x98] sm:$0xff]  ;;  %v489_v27 = vshll.u32 %v215_v16, 16  ;;  %v503_v28 = vshll.u32 %v217_v17, 16  ;;  %v2510_v34 = vld [vmem:[%s3129_s1 + $0x90] sm:$0xff] }
  0x13   : > { %818 = vmatpush.bf16.msra.mxu3 %v2526_v5  ;;  %v482_v20 = vrot.slane %v480_v13, 4  ;;  %v485_v21 = vrot.slane %v483_v14, 5  ;;  %v496_v22 = vrot.slane %v494_v15, 4  ;;  %v2523_v30 = vld [vmem:[%s3129_s1 + $0xd8] sm:$0xff]  ;;  %v218_v32 = vld [vmem:[%s2713_s9 + $0x10] sm:$0xf] }
  0x14   : > { %v499_v24 = vrot.slane %v497_v18, 5  ;;  %v220_v33 = vld [vmem:[%s2713_s9 + $0x18] sm:$0xf]  ;;  %v491_v36 = vrot.slane %v489_v27, 5  ;;  %v505_v38 = vrot.slane %v503_v28, 5  ;;  %v2522_v40 = vld [vmem:[%s3129_s1 + $0xd0] sm:$0xff] }
  0x15   : > { %2582 = vmatpush.bf16.msra.mxu1 %v2505_v6  ;;  %348 = vmatpush.bf16.msra.mxu0 %v2505_v6  ;;  %v486_v26 = vor.u32 %v485_v21, %v482_v20  ;;  %v508_v41 = vshrl.u32 %v218_v32, 16  ;;  %v511_v42 = vshll.u32 %v218_v32, 16  ;;  %v522_v43 = vshrl.u32 %v220_v33, 16  ;;  %v2501_v45 = vld [vmem:[%s3129_s1 + $0x48] sm:$0xff]  ;;  %v2500_v49 = vld [vmem:[%s3129_s1 + $0x40] sm:$0xff]  ;;  %v2495_v63 = vld [vmem:[%s3129_s1 + $0x38] sm:$0xff] }
  0x16   : > { %674 = vmatpush.bf16.msra.mxu2 %v2513_v7  ;;  %v500_v29 = vor.u32 %v499_v24, %v496_v22  ;;  %v525_v44 = vshll.u32 %v220_v33, 16  ;;  %v2509_v46 = vld [vmem:[%s3129_s1 + $0x88] sm:$0xff]  ;;  %v2498_v51 = vld [vmem:[%s2713_s9 + $0x6c] sm:$0xf0]  ;;  %v219_v53 = vld [vmem:[%s2713_s9 + $0x14] sm:$0x1] }
  0x17   : > { %819 = vmatpush.bf16.msra.mxu3 %v2525_v8  ;;  %v487_v35 = vrot.slane %v486_v26, 4  ;;  %v1948_v50 = vld [vmem:[%s2713_s9 + $0x68] sm:$0xf]  ;;  %v510_v54 = vrot.slane %v508_v41, 4  ;;  %v513_v55 = vrot.slane %v511_v42, 5  ;;  %v524_v56 = vrot.slane %v522_v43, 4 }
  0x18   : > { %v501_v37 = vrot.slane %v500_v29, 4  ;;  %v2521_v52 = vld [vmem:[%s3129_s1 + $0xc8] sm:$0xff]  ;;  %v527_v57 = vrot.slane %v525_v44, 5  ;;  %v2496_v59 = vld [vmem:[%s2713_s9 + $0x4c] sm:$0xf0]  ;;  %v2508_v0 = vld [vmem:[%s3129_s1 + $0x80] sm:$0xff]  ;;  %v1949_v1 = vor.u32 %v2498_v51, %v1948_v50 }
  0x19   : > { %2583 = vmatpush.bf16.msra.mxu1 %v2504_v10  ;;  %349 = vmatpush.bf16.msra.mxu0 %v2504_v10  ;;  %v492_v47 = vsel %vm2748_vm2, %v487_v35, %v491_v36  ;;  %v1940_v58 = vld [vmem:[%s2713_s9 + $0x48] sm:$0xf]  ;;  %v221_v62 = vld [vmem:[%s2713_s9 + $0x1c] sm:$0x1]  ;;  %v517_v4 = vshll.u32 %v219_v53, 16  ;;  %v514_v6 = vor.u32 %v513_v55, %v510_v54  ;;  %v2520_v10 = vld [vmem:[%s3129_s1 + $0xc0] sm:$0xff] }
  0x1a   : > { %675 = vmatpush.bf16.msra.mxu2 %v2512_v12  ;;  %v506_v48 = vsel %vm2748_vm2, %v501_v37, %v505_v38  ;;  %v608_v60 = vunpack.c.l.b16 %v492_v47  ;;  %v2539_v2 = vld [vmem:[%s3129_s1 + $0x138] sm:$0xff]  ;;  %v1941_v5 = vor.u32 %v2496_v59, %v1940_v58  ;;  %v528_v7 = vor.u32 %v527_v57, %v524_v56  ;;  %v2116_v11 = vld [vmem:[%s2713_s9 + $0x90] sm:$0xf]  ;;  %v2493_v22 = vld [vmem:[%s3129_s1 + $0x28] sm:$0xff] }
  0x1b   : > { %820 = vmatpush.bf16.msra.mxu3 %v2524_v19  ;;  %v609_v61 = vunpack.c.l.b16 %v506_v48  ;;  %v2559_v3 = vld [vmem:[%s3129_s1 + $0x1b8] sm:$0xff]  ;;  %v531_v8 = vshll.u32 %v221_v62, 16  ;;  %v2494_v13 = vld [vmem:[%s3129_s1 + $0x30] sm:$0xff]  ;;  %v519_v16 = vrot.slane %v517_v4, 5  ;;  %v515_v19 = vrot.slane %v514_v6, 4  ;;  %v2537_v26 = vld [vmem:[%s3129_s1 + $0x128] sm:$0xff] }
  0x1c   : > { %v2516_v12 = vld [vmem:[%s2713_s9 + $0x94] sm:$0xf0]  ;;  %v2538_v15 = vld [vmem:[%s3129_s1 + $0x130] sm:$0xff]  ;;  %v529_v20 = vrot.slane %v528_v7, 4  ;;  %v222_v24 = vld [vmem:[%s2713_s9 + $0x20] sm:$0xf] }
  0x1d   : > { %2584 = vmatpush.bf16.msra.mxu1 %v2503_v23  ;;  %350 = vmatpush.bf16.msra.mxu0 %v2503_v23  ;;  %v616_v9 = vpack.c.b16 %v609_v61, %v608_v60  ;;  %v2571_v14 = vld [vmem:[%s3129_s1 + $0x1f8] sm:$0xff]  ;;  %v2558_v17 = vld [vmem:[%s3129_s1 + $0x1b0] sm:$0xff]  ;;  %v2117_v18 = vor.u32 %v2516_v12, %v2116_v11  ;;  %v533_v21 = vrot.slane %v531_v8, 5  ;;  %v2557_v27 = vld [vmem:[%s3129_s1 + $0x1a8] sm:$0xff]  ;;  %v520_v28 = vsel %vm2748_vm2, %v515_v19, %v519_v16 }
  0x1e   : > { %676 = vmatpush.bf16.msra.mxu2 %v2511_v25  ;;  %v2570_v23 = vld [vmem:[%s3129_s1 + $0x1f0] sm:$0xff]  ;;  %v224_v25 = vld [vmem:[%s2713_s9 + $0x28] sm:$0xf]  ;;  %v2536_v36 = vld [vmem:[%s3129_s1 + $0x120] sm:$0xff]  ;;  %v610_v42 = vunpack.c.l.b16 %v520_v28 }
  0x1f   : > { %821 = vmatpush.bf16.msra.mxu3 %v2523_v30  ;;  %v534_v29 = vsel %vm2748_vm2, %v529_v20, %v533_v21  ;;  %v536_v30 = vshrl.u32 %v222_v24, 16  ;;  %v550_v32 = vshrl.u32 %v224_v25, 16  ;;  %v553_v33 = vshll.u32 %v224_v25, 16  ;;  %v2569_v35 = vld [vmem:[%s3129_s1 + $0x1e8] sm:$0xff]  ;;  %v2556_v37 = vld [vmem:[%s3129_s1 + $0x1a0] sm:$0xff]  ;;  %v2490_v62 = vld [vmem:[%s3129_s1 + $0x10] sm:$0xff] }
  0x20   : > { %v1952_v38 = vld [vmem:[%s2713_s9 + $0x78] sm:$0xf]  ;;  %v611_v43 = vunpack.c.l.b16 %v534_v29  ;;  %v2497_v44 = vld [vmem:[%s2713_s9 + $0x5c] sm:$0xf0]  ;;  %v223_v50 = vld [vmem:[%s2713_s9 + $0x24] sm:$0x1] }
  0x21   : > { %2585 = vmatpush.bf16.msra.mxu1 %v2502_v31  ;;  %351 = vmatpush.bf16.msra.mxu0 %v2502_v31  ;;  %v539_v31 = vshll.u32 %v222_v24, 16  ;;  %v1944_v41 = vld [vmem:[%s2713_s9 + $0x58] sm:$0xf]  ;;  %v552_v47 = vrot.slane %v550_v32, 4  ;;  %v555_v48 = vrot.slane %v553_v33, 5  ;;  %v545_v59 = vshll.u32 %v223_v50, 16 }
  0x22   : > { %677 = vmatpush.bf16.msra.mxu2 %v2510_v34  ;;  %v2492_v34 = vld [vmem:[%s3129_s1 + $0x20] sm:$0xff]  ;;  %v225_v51 = vld [vmem:[%s2713_s9 + $0x2c] sm:$0x1]  ;;  %v1945_v54 = vor.u32 %v2497_v44, %v1944_v41  ;;  %v617_v55 = vpack.c.b16 %v611_v43, %v610_v42  ;;  %v2517_v57 = vld [vmem:[%s2713_s9 + $0xa4] sm:$0xf0] }
  0x23   : > { %822 = vmatpush.bf16.msra.mxu3 %v2522_v40  ;;  %v2499_v40 = vld [vmem:[%s2713_s9 + $0x7c] sm:$0xf0]  ;;  %v556_v60 = vor.u32 %v555_v48, %v552_v47  ;;  %v559_v61 = vshll.u32 %v225_v51, 16  ;;  %v2489_v6 = vld [vmem:[%s3129_s1 + $0x8] sm:$0xff]  ;;  %v2554_v11 = vld [vmem:[%s3129_s1 + $0x190] sm:$0xff] }
  0x24   : > { %v1953_v53 = vor.u32 %v2499_v40, %v1952_v38  ;;  %v2120_v56 = vld [vmem:[%s2713_s9 + $0xa0] sm:$0xf]  ;;  %v2533_v7 = vld [vmem:[%s3129_s1 + $0x108] sm:$0xff]  ;;  %v2547_v20 = vld [vmem:[%s3129_s1 + $0x178] sm:$0xff] }
  0x25   : > { %2586 = vmatpush.bf16.msra.mxu1 %v2501_v45  ;;  %352 = vmatpush.bf16.msra.mxu0 %v2501_v45  ;;  %v538_v45 = vrot.slane %v536_v30, 4  ;;  %v557_v4 = vrot.slane %v556_v60, 4  ;;  %v2568_v8 = vld [vmem:[%s3129_s1 + $0x1e0] sm:$0xff]  ;;  %v2484_v24 = vld [vmem:[%s2713_s9 + $0x4] sm:$0xf0]  ;;  %v2546_v33 = vld [vmem:[%s3129_s1 + $0x170] sm:$0xff] }
  0x26   : > { %678 = vmatpush.bf16.msra.mxu2 %v2509_v46  ;;  %v541_v46 = vrot.slane %v539_v31, 5  ;;  %v2532_v21 = vld [vmem:[%s3129_s1 + $0x100] sm:$0xff]  ;;  %v2188_v25 = vld [vmem:[%s2713_s9 + $0xd8] sm:$0xf]  ;;  %v2124_v40 = vld [vmem:[%s2713_s9 + $0xb0] sm:$0xf] }
  0x27   : > { %823 = vmatpush.bf16.msra.mxu3 %v2521_v52  ;;  %v2535_v52 = vld [vmem:[%s3129_s1 + $0x118] sm:$0xff]  ;;  %v2578_v42 = vld [vmem:[%s3129_s1 + $0x230] sm:$0xff]  ;;  %v2545_v47 = vld [vmem:[%s3129_s1 + $0x168] sm:$0xff] }
  0x28   : > { %v542_v58 = vor.u32 %v541_v46, %v538_v45  ;;  %v2518_v41 = vld [vmem:[%s2713_s9 + $0xb4] sm:$0xf0]  ;;  %v2553_v48 = vld [vmem:[%s3129_s1 + $0x188] sm:$0xff] }
  0x29   : > { %2587 = vmatpush.bf16.msra.mxu1 %v2500_v49  ;;  %353 = vmatpush.bf16.msra.mxu0 %v2500_v49  ;;  %v2491_v49 = vld [vmem:[%s3129_s1 + $0x18] sm:$0xff]  ;;  %v2577_v50 = vld [vmem:[%s3129_s1 + $0x228] sm:$0xff] }
  0x2a   : > { %679 = vmatpush.bf16.msra.mxu2 %v2508_v0  ;;  %v2121_v0 = vor.u32 %v2517_v57, %v2120_v56  ;;  %v2566_v56 = vld [vmem:[%s3129_s1 + $0x1d0] sm:$0xff]  ;;  %v2544_v57 = vld [vmem:[%s3129_s1 + $0x160] sm:$0xff] }
  0x2b   : > { %824 = vmatpush.bf16.msra.mxu3 %v2520_v10  ;;  %v228_v10 = vld [vmem:[%s2713_s9 + $0x38] sm:$0xf] }
  0x2c   : > { %364 = vmatmul.bf16.vlgmr.msra.gmra.mxu1 %v1949_v1  ;;  %354 = vmatmul.bf16.vlgmr.msra.gmra.mxu0 %v1941_v5  ;;  %v2555_v1 = vld [vmem:[%s3129_s1 + $0x198] sm:$0xff]  ;;  %v561_v5 = vrot.slane %v559_v61, 5  ;;  %v581_v19 = vshll.u32 %v228_v10, 16 }
  0x2d   : > { %447 = vmatpush.bf16.msrb.mxu1 %v2495_v63  ;;  %954 = vmatpush.bf16.msrb.mxu0 %v2539_v2  ;;  %v2534_v63 = vld [vmem:[%s3129_s1 + $0x110] sm:$0xff]  ;;  %v543_v2 = vrot.slane %v542_v58, 4  ;;  %v2576_v58 = vld [vmem:[%s3129_s1 + $0x220] sm:$0xff] }
  0x2e   : > { %1330 = vmatpush.bf16.msrb.mxu2 %v2559_v3  ;;  %825 = vmatmul.bf16.vlgmr.msra.gmra.mxu3 %v2117_v18  ;;  %v547_v3 = vrot.slane %v545_v59, 5  ;;  %v578_v18 = vshrl.u32 %v228_v10, 16  ;;  %v583_v32 = vrot.slane %v581_v19, 5  ;;  %v2565_v59 = vld [vmem:[%s3129_s1 + $0x1c8] sm:$0xff] }
  0x2f   : > { %680 = vmatmul.bf16.vlgmr.msra.gmra.mxu2 %v616_v9  ;;  %1467 = vmatpush.bf16.msrb.mxu3 %v2571_v14  ;;  %v226_v9 = vld [vmem:[%s2713_s9 + $0x30] sm:$0xf]  ;;  %v2567_v14 = vld [vmem:[%s3129_s1 + $0x1d8] sm:$0xff]  ;;  %v2519_v10 = vld [vmem:[%s2713_s9 + $0xc4] sm:$0xf0] }
  0x30   : > { %v548_v12 = vsel %vm2748_vm2, %v543_v2, %v547_v3  ;;  %v564_v16 = vshrl.u32 %v226_v9, 16  ;;  %v580_v31 = vrot.slane %v578_v18, 4  ;;  %v2529_v2 = vld [vmem:[%s2713_s9 + $0xec] sm:$0xf0]  ;;  %v1996_v18 = vld [vmem:[%s2713_s9 + $0x20] sm:$0xf] }
  0x31   : > { %448 = vmatpush.bf16.msrb.mxu1 %v2494_v13  ;;  %955 = vmatpush.bf16.msrb.mxu0 %v2538_v15  ;;  %v562_v13 = vsel %vm2748_vm2, %v557_v4, %v561_v5  ;;  %v2488_v15 = vld [vmem:[%s3129_s1] sm:$0xff]  ;;  %v2542_v5 = vld [vmem:[%s3129_s1 + $0x150] sm:$0xff]  ;;  %v2486_v19 = vld [vmem:[%s2713_s9 + $0x24] sm:$0xf0] }
  0x32   : > { %1331 = vmatpush.bf16.msrb.mxu2 %v2558_v17  ;;  %v567_v17 = vshll.u32 %v226_v9, 16  ;;  %v613_v28 = vunpack.c.l.b16 %v562_v13  ;;  %v566_v29 = vrot.slane %v564_v16, 4  ;;  %v584_v45 = vor.u32 %v583_v32, %v580_v31  ;;  %v2128_v9 = vld [vmem:[%s2713_s9 + $0xc0] sm:$0xf]  ;;  %v2575_v13 = vld [vmem:[%s3129_s1 + $0x218] sm:$0xff]  ;;  %v2574_v16 = vld [vmem:[%s3129_s1 + $0x210] sm:$0xff] }
  0x33   : > { %1468 = vmatpush.bf16.msrb.mxu3 %v2570_v23  ;;  %v2579_v23 = vld [vmem:[%s3129_s1 + $0x238] sm:$0xff]  ;;  %v2082_v31 = vld [vmem:[%s2713_s9 + $0x90] sm:$0xf] }
  0x34   : > { %v569_v30 = vrot.slane %v567_v17, 5  ;;  %v2573_v17 = vld [vmem:[%s3129_s1 + $0x208] sm:$0xff]  ;;  %v2084_v32 = vld [vmem:[%s2713_s9 + $0x98] sm:$0xf] }
  0x35   : > { %449 = vmatpush.bf16.msrb.mxu1 %v2493_v22  ;;  %956 = vmatpush.bf16.msrb.mxu0 %v2537_v26  ;;  %v1988_v22 = vld [vmem:[%s2713_s9] sm:$0xf] }
  0x36   : > { %1332 = vmatpush.bf16.msrb.mxu2 %v2557_v27  ;;  %v2528_v26 = vld [vmem:[%s2713_s9 + $0xdc] sm:$0xf0]  ;;  %v612_v27 = vunpack.c.l.b16 %v548_v12  ;;  %v570_v43 = vor.u32 %v569_v30, %v566_v29  ;;  %v2541_v12 = vld [vmem:[%s3129_s1 + $0x148] sm:$0xff] }
  0x37   : > { %1469 = vmatpush.bf16.msrb.mxu3 %v2569_v35  ;;  %v229_v35 = vld [vmem:[%s2713_s9 + $0x3c] sm:$0x1]  ;;  %v2572_v30 = vld [vmem:[%s3129_s1 + $0x200] sm:$0xff] }
  0x38   : > { %v618_v38 = vpack.c.b16 %v613_v28, %v612_v27  ;;  %v587_v46 = vshll.u32 %v229_v35, 16  ;;  %v571_v51 = vrot.slane %v570_v43, 4  ;;  %v2388_v27 = vld [vmem:[%s2713_s9 + $0x50] sm:$0xf]  ;;  %v2560_v28 = vld [vmem:[%s2713_s9 + $0x54] sm:$0xf0] }
  0x39   : > { %450 = vmatpush.bf16.msrb.mxu1 %v2492_v34  ;;  %957 = vmatpush.bf16.msrb.mxu0 %v2536_v36  ;;  %v227_v34 = vld [vmem:[%s2713_s9 + $0x34] sm:$0x1]  ;;  %v1989_v36 = vor.u32 %v2484_v24, %v1988_v22  ;;  %v2316_v22 = vld [vmem:[%s2713_s9 + $0x8] sm:$0xf]  ;;  %v1997_v24 = vor.u32 %v2486_v19, %v1996_v18  ;;  %v2389_v29 = vor.u32 %v2560_v28, %v2388_v27  ;;  %v992_v35 = vshrl.u32 %v2082_v31, 16 }
  0x3a   : > { %1333 = vmatpush.bf16.msrb.mxu2 %v2556_v37  ;;  %v2189_v37 = vor.u32 %v2528_v26, %v2188_v25  ;;  %v573_v44 = vshll.u32 %v227_v34, 16  ;;  %v2284_v34 = vld [vmem:[%s2713_s9 + $0x10] sm:$0xf]  ;;  %v2286_v18 = vld [vmem:[%s2713_s9 + $0x18] sm:$0xf] }
  0x3b   : > { %1470 = vmatpush.bf16.msrb.mxu3 %v2568_v8  ;;  %v1522_v43 = vshll.u32 %v2284_v34, 16  ;;  %v2288_v19 = vld [vmem:[%s2713_s9 + $0x20] sm:$0xf]  ;;  %v1533_v28 = vshrl.u32 %v2286_v18, 16 }
  0x3c   : > { %369 = vmatmul.bf16.gmra.mxu1 %v1953_v53  ;;  %359 = vmatmul.bf16.gmra.mxu0 %v1945_v54  ;;  %v585_v53 = vrot.slane %v584_v45, 4  ;;  %v589_v54 = vrot.slane %v587_v46, 5  ;;  %v2487_v45 = vld [vmem:[%s2713_s9 + $0x34] sm:$0xf0]  ;;  %v2200_v46 = vld [vmem:[%s2713_s9 + $0x108] sm:$0xf] }
  0x3d   : > { %451 = vmatpush.bf16.msrb.mxu1 %v2491_v49  ;;  %958 = vmatpush.bf16.msrb.mxu0 %v2535_v52  ;;  %v2125_v49 = vor.u32 %v2518_v41, %v2124_v40  ;;  %v575_v52 = vrot.slane %v573_v44, 5  ;;  %v2000_v44 = vld [vmem:[%s2713_s9 + $0x30] sm:$0xf] }
  0x3e   : > { %1334 = vmatpush.bf16.msrb.mxu2 %v2555_v1  ;;  %830 = vmatmul.bf16.gmra.mxu3 %v2121_v0  ;;  %v590_v61 = vsel %vm2748_vm2, %v585_v53, %v589_v54  ;;  %v2485_v0 = vld [vmem:[%s2713_s9 + $0x14] sm:$0xf0]  ;;  %v2192_v1 = vld [vmem:[%s2713_s9 + $0xe8] sm:$0xf] }
  0x3f   : > { %685 = vmatmul.bf16.gmra.mxu2 %v617_v55  ;;  %1471 = vmatpush.bf16.msrb.mxu3 %v2567_v14  ;;  %v2552_v55 = vld [vmem:[%s3129_s1 + $0x180] sm:$0xff]  ;;  %v576_v60 = vsel %vm2748_vm2, %v571_v51, %v575_v52  ;;  %v615_v4 = vunpack.c.l.b16 %v590_v61  ;;  %v994_v51 = vrot.slane %v992_v35, 4  ;;  %v2285_v61 = vld [vmem:[%s2713_s9 + $0x14] sm:$0x1] }
  0x40   : > { %v614_v3 = vunpack.c.l.b16 %v576_v60  ;;  %v2564_v14 = vld [vmem:[%s3129_s1 + $0x1c0] sm:$0xff]  ;;  %v2283_v60 = vld [vmem:[%s2713_s9 + $0xc] sm:$0x1] }
  0x41   : > { %452 = vmatpush.bf16.msrb.mxu1 %v2490_v62  ;;  %959 = vmatpush.bf16.msrb.mxu0 %v2534_v63  ;;  %v2543_v62 = vld [vmem:[%s3129_s1 + $0x158] sm:$0xff]  ;;  %v1992_v63 = vld [vmem:[%s2713_s9 + $0x10] sm:$0xf] }
  0x42   : > { %1335 = vmatpush.bf16.msrb.mxu2 %v2554_v11  ;;  %v619_v8 = vpack.c.b16 %v615_v4, %v614_v3  ;;  %v2129_v11 = vor.u32 %v2519_v10, %v2128_v9  ;;  %v1528_v10 = vshll.u32 %v2285_v61, 16 }
  0x43   : > { %1472 = vmatpush.bf16.msrb.mxu3 %v2566_v56 }
  0x45   : > { %453 = vmatpush.bf16.msrb.mxu1 %v2489_v6  ;;  %960 = vmatpush.bf16.msrb.mxu0 %v2533_v7  ;;  %v1993_v6 = vor.u32 %v2485_v0, %v1992_v63  ;;  %v2193_v7 = vor.u32 %v2529_v2, %v2192_v1 }
  0x46   : > { %1336 = vmatpush.bf16.msrb.mxu2 %v2553_v48  ;;  %v2320_v48 = vld [vmem:[%s2713_s9 + $0x18] sm:$0xf] }
  0x47   : > { %1473 = vmatpush.bf16.msrb.mxu3 %v2565_v59  ;;  %v1524_v59 = vrot.slane %v1522_v43, 5  ;;  %v1535_v43 = vrot.slane %v1533_v28, 4 }
  0x49   : > { %454 = vmatpush.bf16.msrb.mxu1 %v2488_v15  ;;  %961 = vmatpush.bf16.msrb.mxu0 %v2532_v21  ;;  %v2540_v15 = vld [vmem:[%s3129_s1 + $0x140] sm:$0xff] }
  0x4a   : > { %1337 = vmatpush.bf16.msrb.mxu2 %v2552_v55  ;;  %v2530_v21 = vld [vmem:[%s2713_s9 + $0xfc] sm:$0xf0] }
  0x4b   : > { %1474 = vmatpush.bf16.msrb.mxu3 %v2564_v14  ;;  %v2549_v55 = vld [vmem:[%s2713_s9 + $0x1c] sm:$0xf0]  ;;  %v2088_v14 = vld [vmem:[%s2713_s9 + $0xa8] sm:$0xf] }
  0x4c   : > { %455 = vmatmul.bf16.vlgmr.msrb.gmra.mxu1 %v1989_v36  ;;  %962 = vmatmul.bf16.vlgmr.msrb.gmra.mxu0 %v2189_v37  ;;  %v995_v36 = vshll.u32 %v2082_v31, 16  ;;  %v1006_v37 = vshrl.u32 %v2084_v32, 16  ;;  %v2321_v2 = vor.u32 %v2549_v55, %v2320_v48  ;;  %v1037_v27 = vshll.u32 %v2088_v14, 16 }
  0x4d   : > { %1184 = vmatpush.bf16.msra.mxu1 %v2547_v20  ;;  %1697 = vmatpush.bf16.msra.mxu0 %v2579_v23  ;;  %v2196_v20 = vld [vmem:[%s2713_s9 + $0xf8] sm:$0xf]  ;;  %v1550_v31 = vshll.u32 %v2288_v19, 16 }
  0x4e   : > { %835 = vmatmul.bf16.gmra.mxu3 %v2125_v49  ;;  %2588 = vmatpush.bf16.msra.mxu2 %v2579_v23  ;;  %v2548_v23 = vld [vmem:[%s2713_s9 + $0xc] sm:$0xf0]  ;;  %v2197_v25 = vor.u32 %v2530_v21, %v2196_v20  ;;  %v2083_v49 = vld [vmem:[%s2713_s9 + $0x94] sm:$0x1]  ;;  %v997_v52 = vrot.slane %v995_v36, 5  ;;  %v1008_v53 = vrot.slane %v1006_v37, 4 }
  0x4f   : > { %690 = vmatmul.bf16.gmra.mxu2 %v618_v38  ;;  %v2317_v26 = vor.u32 %v2548_v23, %v2316_v22  ;;  %v1009_v38 = vshll.u32 %v2084_v32, 16  ;;  %v1001_v63 = vshll.u32 %v2083_v49, 16  ;;  %v1530_v23 = vrot.slane %v1528_v10, 5  ;;  %v2087_v36 = vld [vmem:[%s2713_s9 + $0xa4] sm:$0x1] }
  0x50   : > { %v998_v3 = vor.u32 %v997_v52, %v994_v51  ;;  %v2287_v51 = vld [vmem:[%s2713_s9 + $0x1c] sm:$0x1]  ;;  %v2289_v52 = vld [vmem:[%s2713_s9 + $0x24] sm:$0x1] }
  0x51   : > { %1185 = vmatpush.bf16.msra.mxu1 %v2546_v33  ;;  %1698 = vmatpush.bf16.msra.mxu0 %v2578_v42  ;;  %v2282_v33 = vld [vmem:[%s2713_s9 + $0x8] sm:$0xf]  ;;  %v1011_v54 = vrot.slane %v1009_v38, 5 }
  0x52   : > { %2589 = vmatpush.bf16.msra.mxu2 %v2578_v42  ;;  %v1505_v40 = vshrl.u32 %v2282_v33, 16  ;;  %v1508_v41 = vshll.u32 %v2282_v33, 16  ;;  %v1519_v42 = vshrl.u32 %v2284_v34, 16 }
  0x53   : > { %v1012_v4 = vor.u32 %v1011_v54, %v1008_v53  ;;  %v2324_v53 = vld [vmem:[%s2713_s9 + $0x28] sm:$0xf]  ;;  %v2550_v54 = vld [vmem:[%s2713_s9 + $0x2c] sm:$0xf0] }
  0x54   : > { %v1507_v56 = vrot.slane %v1505_v40, 4 }
  0x55   : > { %1186 = vmatpush.bf16.msra.mxu1 %v2545_v47  ;;  %1699 = vmatpush.bf16.msra.mxu0 %v2577_v50  ;;  %v2531_v47 = vld [vmem:[%s2713_s9 + $0x10c] sm:$0xf0] }
  0x56   : > { %2590 = vmatpush.bf16.msra.mxu2 %v2577_v50  ;;  %v2085_v50 = vld [vmem:[%s2713_s9 + $0x9c] sm:$0x1]  ;;  %v2201_v1 = vor.u32 %v2531_v47, %v2200_v46  ;;  %v1552_v46 = vrot.slane %v1550_v31, 5 }
  0x57   : > { %v1015_v0 = vshll.u32 %v2085_v50, 16 }
  0x59   : > { %1187 = vmatpush.bf16.msra.mxu1 %v2544_v57  ;;  %1700 = vmatpush.bf16.msra.mxu0 %v2576_v58  ;;  %v1510_v57 = vrot.slane %v1508_v41, 5  ;;  %v1039_v41 = vrot.slane %v1037_v27, 5 }
  0x5a   : > { %2591 = vmatpush.bf16.msra.mxu2 %v2576_v58  ;;  %v1521_v58 = vrot.slane %v1519_v42, 4  ;;  %v2089_v42 = vld [vmem:[%s2713_s9 + $0xac] sm:$0x1] }
  0x5c   : > { %460 = vmatmul.bf16.gmra.mxu1 %v1993_v6  ;;  %967 = vmatmul.bf16.gmra.mxu0 %v2193_v7  ;;  %v2561_v6 = vld [vmem:[%s2713_s9 + $0x64] sm:$0xf0]  ;;  %v1511_v7 = vor.u32 %v1510_v57, %v1507_v56  ;;  %v1525_v9 = vor.u32 %v1524_v59, %v1521_v58  ;;  %v1029_v56 = vshll.u32 %v2087_v36, 16  ;;  %v1043_v58 = vshll.u32 %v2089_v42, 16  ;;  %v2091_v42 = vld [vmem:[%s2713_s9 + $0xb4] sm:$0x1] }
  0x5d   : > { %1188 = vmatpush.bf16.msra.mxu1 %v2543_v62  ;;  %1701 = vmatpush.bf16.msra.mxu0 %v2575_v13  ;;  %v2001_v62 = vor.u32 %v2487_v45, %v2000_v44 }
  0x5e   : > { %840 = vmatmul.bf16.gmra.mxu3 %v2129_v11  ;;  %2592 = vmatpush.bf16.msra.mxu2 %v2575_v13  ;;  %v1003_v11 = vrot.slane %v1001_v63, 5  ;;  %v2086_v13 = vld [vmem:[%s2713_s9 + $0xa0] sm:$0xf]  ;;  %v1512_v20 = vrot.slane %v1511_v7, 4  ;;  %v1526_v22 = vrot.slane %v1525_v9, 4  ;;  %v1045_v7 = vrot.slane %v1043_v58, 5 }
  0x5f   : > { %695 = vmatmul.bf16.gmra.mxu2 %v619_v8  ;;  %v1514_v8 = vshll.u32 %v2283_v60, 16  ;;  %v1542_v60 = vshll.u32 %v2287_v51, 16  ;;  %v2328_v51 = vld [vmem:[%s2713_s9 + $0x38] sm:$0xf]  ;;  %v2295_v58 = vld [vmem:[%s2713_s9 + $0x3c] sm:$0x1] }
  0x60   : > { %v1531_v35 = vsel %vm2748_vm2, %v1526_v22, %v1530_v23 }
  0x61   : > { %1189 = vmatpush.bf16.msra.mxu1 %v2542_v5  ;;  %1702 = vmatpush.bf16.msra.mxu0 %v2574_v16  ;;  %v2392_v5 = vld [vmem:[%s2713_s9 + $0x60] sm:$0xf]  ;;  %v1516_v21 = vrot.slane %v1514_v8, 5  ;;  %v1634_v50 = vunpack.c.l.b16 %v1531_v35  ;;  %v1544_v9 = vrot.slane %v1542_v60, 5 }
  0x62   : > { %2593 = vmatpush.bf16.msra.mxu2 %v2574_v16  ;;  %v1013_v16 = vrot.slane %v1012_v4, 4 }
  0x63   : > { %v1517_v34 = vsel %vm2748_vm2, %v1512_v20, %v1516_v21  ;;  %v2294_v21 = vld [vmem:[%s2713_s9 + $0x38] sm:$0xf] }
  0x64   : > { %v1633_v49 = vunpack.c.l.b16 %v1517_v34  ;;  %v1592_v34 = vshll.u32 %v2294_v21, 16 }
  0x65   : > { %1190 = vmatpush.bf16.msra.mxu1 %v2541_v12  ;;  %1703 = vmatpush.bf16.msra.mxu0 %v2573_v17  ;;  %v1017_v12 = vrot.slane %v1015_v0, 5 }
  0x66   : > { %2594 = vmatpush.bf16.msra.mxu2 %v2573_v17  ;;  %v2393_v17 = vor.u32 %v2561_v6, %v2392_v5  ;;  %v1641_v0 = vpack.c.b16 %v1634_v50, %v1633_v49  ;;  %v1031_v5 = vrot.slane %v1029_v56, 5  ;;  %v2551_v56 = vld [vmem:[%s2713_s9 + $0x3c] sm:$0xf0] }
  0x67   : > { %v1018_v33 = vsel %vm2748_vm2, %v1013_v16, %v1017_v12  ;;  %v2090_v12 = vld [vmem:[%s2713_s9 + $0xb0] sm:$0xf] }
  0x68   : > { %v1121_v48 = vunpack.c.l.b16 %v1018_v33  ;;  %v2292_v16 = vld [vmem:[%s2713_s9 + $0x30] sm:$0xf]  ;;  %v1051_v20 = vshll.u32 %v2090_v12, 16  ;;  %v1589_v33 = vshrl.u32 %v2294_v21, 16 }
  0x69   : > { %1191 = vmatpush.bf16.msra.mxu1 %v2540_v15  ;;  %1704 = vmatpush.bf16.msra.mxu0 %v2572_v30  ;;  %v999_v15 = vrot.slane %v998_v3, 4  ;;  %v2562_v3 = vld [vmem:[%s2713_s9 + $0x74] sm:$0xf0] }
  0x6a   : > { %2595 = vmatpush.bf16.msra.mxu2 %v2572_v30  ;;  %v1547_v30 = vshrl.u32 %v2288_v19, 16  ;;  %v1048_v19 = vshrl.u32 %v2090_v12, 16  ;;  %v1053_v36 = vrot.slane %v1051_v20, 5 }
  0x6b   : > { %v1004_v32 = vsel %vm2748_vm2, %v999_v15, %v1003_v11  ;;  %v2290_v15 = vld [vmem:[%s2713_s9 + $0x28] sm:$0xf] }
  0x6c   : > { %465 = vmatmul.bf16.gmra.mxu1 %v1997_v24  ;;  %972 = vmatmul.bf16.gmra.mxu0 %v2197_v25  ;;  %v1020_v24 = vshrl.u32 %v2086_v13, 16  ;;  %v1023_v25 = vshll.u32 %v2086_v13, 16  ;;  %v1549_v45 = vrot.slane %v1547_v30, 4  ;;  %v1120_v47 = vunpack.c.l.b16 %v1004_v32 }
  0x6d   : > { %v1561_v27 = vshrl.u32 %v2290_v15, 16  ;;  %v1564_v28 = vshll.u32 %v2290_v15, 16  ;;  %v1578_v30 = vshll.u32 %v2292_v16, 16  ;;  %v1050_v35 = vrot.slane %v1048_v19, 4 }
  0x6e   : > { %1475 = vmatmul.bf16.vlgmr.msrb.gmra.mxu3 %v2389_v29  ;;  %v1536_v29 = vshll.u32 %v2286_v18, 16  ;;  %v1022_v37 = vrot.slane %v1020_v24, 4  ;;  %v1025_v38 = vrot.slane %v1023_v25, 5  ;;  %v1553_v61 = vor.u32 %v1552_v46, %v1549_v45  ;;  %v2291_v46 = vld [vmem:[%s2713_s9 + $0x2c] sm:$0x1] }
  0x6f   : > { %1338 = vmatmul.bf16.vlgmr.msrb.gmra.mxu2 %v2317_v26  ;;  %v1034_v26 = vshrl.u32 %v2088_v14, 16  ;;  %v1128_v63 = vpack.c.b16 %v1121_v48, %v1120_v47  ;;  %v2092_v14 = vld [vmem:[%s2713_s9 + $0xb8] sm:$0xf]  ;;  %v1563_v47 = vrot.slane %v1561_v27, 4  ;;  %v1566_v48 = vrot.slane %v1564_v28, 5 }
  0x70   : > { %v1538_v44 = vrot.slane %v1536_v29, 5  ;;  %v1026_v55 = vor.u32 %v1025_v38, %v1022_v37  ;;  %v1554_v10 = vrot.slane %v1553_v61, 4  ;;  %v1062_v24 = vshrl.u32 %v2092_v14, 16  ;;  %v2096_v27 = vld [vmem:[%s2713_s9 + $0xc8] sm:$0xf] }
  0x71   : > { %v1036_v40 = vrot.slane %v1034_v26, 4  ;;  %v1065_v25 = vshll.u32 %v2092_v14, 16  ;;  %v2296_v26 = vld [vmem:[%s2713_s9 + $0x40] sm:$0xf]  ;;  %v1575_v29 = vshrl.u32 %v2292_v16, 16  ;;  %v1580_v50 = vrot.slane %v1578_v30, 5 }
  0x72   : > { %v1539_v59 = vor.u32 %v1538_v44, %v1535_v43  ;;  %v1027_v4 = vrot.slane %v1026_v55, 4  ;;  %v1603_v37 = vshrl.u32 %v2296_v26, 16  ;;  %v1606_v38 = vshll.u32 %v2296_v26, 16  ;;  %v2093_v43 = vld [vmem:[%s2713_s9 + $0xbc] sm:$0x1] }
  0x73   : > { %v1040_v57 = vor.u32 %v1039_v41, %v1036_v40  ;;  %v1064_v44 = vrot.slane %v1062_v24, 4  ;;  %v1067_v45 = vrot.slane %v1065_v25, 5  ;;  %v1577_v49 = vrot.slane %v1575_v29, 4  ;;  %v2094_v24 = vld [vmem:[%s2713_s9 + $0xc0] sm:$0xf] }
  0x74   : > { %v1540_v8 = vrot.slane %v1539_v59, 4  ;;  %v1605_v59 = vrot.slane %v1603_v37, 4  ;;  %v1608_v60 = vrot.slane %v1606_v38, 5  ;;  %v1057_v61 = vshll.u32 %v2091_v42, 16 }
  0x75   : > { %v1041_v6 = vrot.slane %v1040_v57, 4  ;;  %v1054_v57 = vor.u32 %v1053_v36, %v1050_v35  ;;  %v1090_v35 = vshrl.u32 %v2096_v27, 16  ;;  %v1093_v36 = vshll.u32 %v2096_v27, 16 }
  0x76   : > { %v1545_v22 = vsel %vm2748_vm2, %v1540_v8, %v1544_v9  ;;  %v2563_v8 = vld [vmem:[%s2713_s9 + $0x84] sm:$0xf0]  ;;  %v1609_v12 = vor.u32 %v1608_v60, %v1605_v59  ;;  %v1059_v14 = vrot.slane %v1057_v61, 5 }
  0x77   : > { %v1046_v18 = vsel %vm2748_vm2, %v1041_v6, %v1045_v7  ;;  %v1635_v40 = vunpack.c.l.b16 %v1545_v22  ;;  %v2329_v6 = vor.u32 %v2551_v56, %v2328_v51  ;;  %v2400_v7 = vld [vmem:[%s2713_s9 + $0x80] sm:$0xf] }
  0x78   : > { %v1123_v32 = vunpack.c.l.b16 %v1046_v18  ;;  %v2401_v18 = vor.u32 %v2563_v8, %v2400_v7  ;;  %v1610_v25 = vrot.slane %v1609_v12, 4 }
  0x7c   : > { %470 = vmatmul.bf16.gmra.mxu1 %v2001_v62  ;;  %977 = vmatmul.bf16.gmra.mxu0 %v2201_v1  ;;  %v1556_v62 = vshll.u32 %v2289_v52, 16  ;;  %v2325_v1 = vor.u32 %v2550_v54, %v2324_v53  ;;  %v2293_v52 = vld [vmem:[%s2713_s9 + $0x34] sm:$0x1]  ;;  %v1591_v53 = vrot.slane %v1589_v33, 4  ;;  %v1594_v54 = vrot.slane %v1592_v34, 5 }
  0x7d   : > { %v1079_v34 = vshll.u32 %v2094_v24, 16 }
  0x7e   : > { %1480 = vmatmul.bf16.gmra.mxu3 %v2393_v17  ;;  %v1558_v11 = vrot.slane %v1556_v62, 5  ;;  %v1032_v17 = vsel %vm2748_vm2, %v1027_v4, %v1031_v5  ;;  %v1068_v62 = vor.u32 %v1067_v45, %v1064_v44  ;;  %v1581_v4 = vor.u32 %v1580_v50, %v1577_v49  ;;  %v2097_v50 = vld [vmem:[%s2713_s9 + $0xcc] sm:$0x1] }
  0x7f   : > { %1343 = vmatmul.bf16.gmra.mxu2 %v2321_v2  ;;  %v2396_v2 = vld [vmem:[%s2713_s9 + $0x70] sm:$0xf]  ;;  %v1122_v31 = vunpack.c.l.b16 %v1032_v17  ;;  %v1584_v5 = vshll.u32 %v2293_v52, 16  ;;  %v1595_v9 = vor.u32 %v1594_v54, %v1591_v53  ;;  %v1095_v49 = vrot.slane %v1093_v36, 5 }
  0x80   : > { %v2397_v13 = vor.u32 %v2562_v3, %v2396_v2  ;;  %v1559_v23 = vsel %vm2748_vm2, %v1554_v10, %v1558_v11  ;;  %v1567_v3 = vor.u32 %v1566_v48, %v1563_v47  ;;  %v1598_v10 = vshll.u32 %v2295_v58, 16 }
  0x81   : > { %v1636_v41 = vunpack.c.l.b16 %v1559_v23  ;;  %v1129_v55 = vpack.c.b16 %v1123_v32, %v1122_v31  ;;  %v1055_v11 = vrot.slane %v1054_v57, 4  ;;  %v1069_v15 = vrot.slane %v1068_v62, 4 }
  0x82   : > { %v1568_v19 = vrot.slane %v1567_v3, 4  ;;  %v1582_v20 = vrot.slane %v1581_v4, 4  ;;  %v1586_v21 = vrot.slane %v1584_v5, 5  ;;  %v1596_v22 = vrot.slane %v1595_v9, 4 }
  0x83   : > { %v1642_v2 = vpack.c.b16 %v1636_v41, %v1635_v40  ;;  %v1600_v23 = vrot.slane %v1598_v10, 5  ;;  %v1060_v28 = vsel %vm2748_vm2, %v1055_v11, %v1059_v14  ;;  %v1076_v32 = vshrl.u32 %v2094_v24, 16 }
  0x84   : > { %v1587_v31 = vsel %vm2748_vm2, %v1582_v20, %v1586_v21  ;;  %v1124_v38 = vunpack.c.l.b16 %v1060_v28  ;;  %v1081_v47 = vrot.slane %v1079_v34, 5  ;;  %v1092_v48 = vrot.slane %v1090_v35, 4 }
  0x85   : > { %v1601_v33 = vsel %vm2748_vm2, %v1596_v22, %v1600_v23  ;;  %v1638_v42 = vunpack.c.l.b16 %v1587_v31  ;;  %v1078_v44 = vrot.slane %v1076_v32, 4  ;;  %v1099_v59 = vshll.u32 %v2097_v50, 16 }
  0x86   : > { %v1096_v58 = vor.u32 %v1095_v49, %v1092_v48 }
  0x87   : > { %v1082_v57 = vor.u32 %v1081_v47, %v1078_v44 }
  0x88   : > { %v1097_v62 = vrot.slane %v1096_v58, 4 }
  0x89   : > { %v1083_v60 = vrot.slane %v1082_v57, 4 }
  0x8c   : > { %1192 = vmatmul.bf16.vlgmr.msra.gmra.mxu1 %v1128_v63  ;;  %1705 = vmatmul.bf16.vlgmr.msra.gmra.mxu0 %v1641_v0  ;;  %v1071_v63 = vshll.u32 %v2093_v43, 16  ;;  %v1570_v0 = vshll.u32 %v2291_v46, 16  ;;  %v1639_v43 = vunpack.c.l.b16 %v1601_v33  ;;  %v2095_v46 = vld [vmem:[%s2713_s9 + $0xc4] sm:$0x1] }
  0x8d   : > { %v1085_v53 = vshll.u32 %v2095_v46, 16 }
  0x8e   : > { %1485 = vmatmul.bf16.gmra.mxu3 %v2397_v13  ;;  %v1073_v16 = vrot.slane %v1071_v63, 5  ;;  %v1572_v17 = vrot.slane %v1570_v0, 5  ;;  %v1101_v63 = vrot.slane %v1099_v59, 5 }
  0x8f   : > { %1348 = vmatmul.bf16.gmra.mxu2 %v2325_v1  ;;  %v2297_v1 = vld [vmem:[%s2713_s9 + $0x44] sm:$0x1]  ;;  %v1087_v61 = vrot.slane %v1085_v53, 5  ;;  %s1911_s9 = sshll.u32 %s2635_s12, 3  ;;  %s3143_s12 = smov (!%p205_p6, %s2635_s12), 1 }
  0x90   : > { %v1612_v13 = vshll.u32 %v2297_v1, 16  ;;  %v1074_v29 = vsel %vm2748_vm2, %v1069_v15, %v1073_v16  ;;  %v1573_v30 = vsel %vm2748_vm2, %v1568_v19, %v1572_v17  ;;  %v1102_v4 = vsel %vm2748_vm2, %v1097_v62, %v1101_v63  ;;  %p198_p5 = scmp.lt.s32.totalorder %s1911_s9, 15  ;;  %s1913_s10 = sshll.u32 %s3143_s12, 1 }
  0x91   : > { %v1125_v40 = vunpack.c.l.b16 %v1074_v29  ;;  %v1637_v41 = vunpack.c.l.b16 %v1573_v30  ;;  %v1088_v3 = vsel %vm2748_vm2, %v1083_v60, %v1087_v61  ;;  %v1127_v7 = vunpack.c.l.b16 %v1102_v4  ;;  %s208_s17 = scalar_lea.vmem %s3131_s3, %s1913_s10 }
  0x92   : > { %v1614_v26 = vrot.slane %v1612_v13, 5  ;;  %s3141_s9 = smov (!%p198_p5, %s1911_s9), 15 }
  0x93   : > { %v1130_v51 = vpack.c.b16 %v1125_v40, %v1124_v38  ;;  %v1643_v52 = vpack.c.b16 %v1638_v42, %v1637_v41  ;;  %s1912_s5 = sshll.u32 %s3141_s9, 3 }
  0x94   : > { %v1615_v37 = vsel %vm2748_vm2, %v1610_v25, %v1614_v26  ;;  %s3089_s8 = scalar_lea.vmem %s3130_s2, %s1912_s5 }
  0x95   : > { %v1640_v45 = vunpack.c.l.b16 %v1615_v37 }
  0x97   : > { %v1644_v56 = vpack.c.b16 %v1640_v45, %v1639_v43 }
  0x9c   : > { %1197 = vmatmul.bf16.gmra.mxu1 %v1129_v55  ;;  %1710 = vmatmul.bf16.gmra.mxu0 %v1642_v2 }
  0x9e   : > { %1490 = vmatmul.bf16.gmra.mxu3 %v2401_v18 }
  0x9f   : > { %1353 = vmatmul.bf16.gmra.mxu2 %v2329_v6  ;;  %v1126_v6 = vunpack.c.l.b16 %v1088_v3 }
  0xa1   : > { %v1131_v8 = vpack.c.b16 %v1127_v7, %v1126_v6 }
  0xa9   : > { %v365_v54 = vpop.f32.mrf.mxu1  ;;  %v355_v55 = vpop.f32.mrf.mxu0 }
  0xac   : > { %1202 = vmatmul.bf16.gmra.mxu1 %v1130_v51  ;;  %1715 = vmatmul.bf16.gmra.mxu0 %v1643_v52 }
  0xaf   : > { %1720 = vmatmul.bf16.vlgmr.msra.gmra.mxu2 %v1644_v56 }
  0xb1   : > { %v367_v1 = vpop.f32.mrf.mxu1  ;;  %v357_v2 = vpop.f32.mrf.mxu0 }
  0xb2   : > { %v681_v0 = vpop.f32.mrf.mxu2  ;;  %v826_v5 = vpop.f32.mrf.mxu3 }
  0xb9   : > { %v370_v10 = vpop.f32.mrf.mxu1  ;;  %v360_v11 = vpop.f32.mrf.mxu0 }
  0xba   : > { %v683_v9 = vpop.f32.mrf.mxu2  ;;  %v828_v12 = vpop.f32.mrf.mxu3 }
  0xbc   : > { %1207 = vmatmul.bf16.gmra.mxu1 %v1131_v8 }
  0xc1   : > { %v372_v14 = vpop.f32.mrf.mxu1  ;;  %v362_v15 = vpop.f32.mrf.mxu0 }
  0xc2   : > { %v686_v13 = vpop.f32.mrf.mxu2  ;;  %v3055_v16 = vpop.f32.mrf.mxu3 }
  0xc9   : > { %v456_v18 = vpop.f32.mrf.mxu1  ;;  %v963_v19 = vpop.f32.mrf.mxu0 }
  0xca   : > { %v688_v17 = vpop.f32.mrf.mxu2  ;;  %v457_v20 = vadd.f32 %v456_v18, %v355_v55  ;;  %v3057_v21 = vpop.f32.mrf.mxu3 }
  0xcc   : > { %v701_v39 = vadd.f32 %v681_v0, %v457_v20 }
  0xce   : > { %v846_v62 = vadd.f32 %v826_v5, %v701_v39 }
  0xd0   : > { %v983_v0 = vadd.f32 %v963_v19, %v846_v62 }
  0xd1   : > { %v458_v23 = vpop.f32.mrf.mxu1  ;;  %v965_v24 = vpop.f32.mrf.mxu0 }
  0xd2   : > { %v691_v22 = vpop.f32.mrf.mxu2  ;;  %v459_v25 = vadd.f32 %v458_v23, %v357_v2  ;;  %v3059_v27 = vpop.f32.mrf.mxu3 }
  0xd4   : > { %v702_v26 = vadd.f32 %v683_v9, %v459_v25 }
  0xd6   : > { %v847_v7 = vadd.f32 %v828_v12, %v702_v26 }
  0xd8   : > { %v984_v5 = vadd.f32 %v965_v24, %v847_v7 }
  0xd9   : > { %v461_v29 = vpop.f32.mrf.mxu1  ;;  %v968_v30 = vpop.f32.mrf.mxu0 }
  0xda   : > { %v693_v28 = vpop.f32.mrf.mxu2  ;;  %v462_v31 = vadd.f32 %v461_v29, %v360_v11  ;;  %v3061_v34 = vpop.f32.mrf.mxu3 }
  0xdc   : > { %v703_v32 = vadd.f32 %v686_v13, %v462_v31 }
  0xe1   : > { %v463_v35 = vpop.f32.mrf.mxu1  ;;  %v3063_v36 = vpop.f32.mrf.mxu0 }
  0xe2   : > { %v696_v33 = vpop.f32.mrf.mxu2  ;;  %v464_v37 = vadd.f32 %v463_v35, %v362_v15  ;;  %v3067_v44 = vpop.f32.mrf.mxu3 }
  0xe4   : > { %v704_v38 = vadd.f32 %v688_v17, %v464_v37  ;;  %v848_v17 = vadd.f32 %v3055_v16, %v703_v32 }
  0xe6   : > { %v985_v20 = vadd.f32 %v968_v30, %v848_v17  ;;  %v849_v29 = vadd.f32 %v3057_v21, %v704_v38 }
  0xe8   : > { %v986_v32 = vadd.f32 %v3063_v36, %v849_v29 }
  0xe9   : > { %v466_v41 = vpop.f32.mrf.mxu1  ;;  %v3065_v42 = vpop.f32.mrf.mxu0 }
  0xea   : > { %v698_v40 = vpop.f32.mrf.mxu2  ;;  %v467_v43 = vadd.f32 %v466_v41, %v365_v54  ;;  %v3075_v51 = vpop.f32.mrf.mxu3 }
  0xec   : > { %v3069_v45 = vadd.f32 %v691_v22, %v467_v43 }
  0xf1   : > { %v468_v47 = vpop.f32.mrf.mxu1  ;;  %v3071_v48 = vpop.f32.mrf.mxu0 }
  0xf2   : > { %v1339_v46 = vpop.f32.mrf.mxu2  ;;  %v469_v49 = vadd.f32 %v468_v47, %v367_v1  ;;  %v1476_v57 = vpop.f32.mrf.mxu3 }
  0xf4   : > { %v3073_v50 = vadd.f32 %v693_v28, %v469_v49  ;;  %v850_v49 = vadd.f32 %v3059_v27, %v3069_v45 }
  0xf9   : > { %v471_v53 = vpop.f32.mrf.mxu1  ;;  %v3077_v55 = vpop.f32.mrf.mxu0 }
  0xfa   : > { %v1341_v52 = vpop.f32.mrf.mxu2  ;;  %v472_v56 = vadd.f32 %v471_v53, %v370_v10  ;;  %v1478_v1 = vpop.f32.mrf.mxu3 }
  0xfc   : > { %v3079_v54 = vadd.f32 %v696_v33, %v472_v56  ;;  %v987_v56 = vadd.f32 %v3065_v42, %v850_v49 }
 0x101   : > { %v473_v59 = vpop.f32.mrf.mxu1  ;;  %v3081_v60 = vpop.f32.mrf.mxu0 }
 0x102   : > { %v1344_v58 = vpop.f32.mrf.mxu2  ;;  %v474_v61 = vadd.f32 %v473_v59, %v372_v14  ;;  %v1481_v15 = vpop.f32.mrf.mxu3 }
 0x104   : > { %v3084_v63 = vadd.f32 %v698_v40, %v474_v61 }
 0x109   : > { %v1193_v2 = vpop.f32.mrf.mxu1  ;;  %v1706_v3 = vpop.f32.mrf.mxu0 }
 0x10a   : > { %v1213_v4 = vadd.f32 %v1193_v2, %v983_v0  ;;  %v1346_v6 = vpop.f32.mrf.mxu2  ;;  %v1483_v35 = vpop.f32.mrf.mxu3 }
 0x10c   : > { %v1359_v8 = vadd.f32 %v1339_v46, %v1213_v4 }
 0x10e   : > { %v1496_v9 = vadd.f32 %v1476_v57, %v1359_v8 }
 0x110   : > { %v1726_v10 = vadd.f32 %v1706_v3, %v1496_v9 }
 0x111   : > { %v1195_v11 = vpop.f32.mrf.mxu1  ;;  %v1708_v13 = vpop.f32.mrf.mxu0 }
 0x112   : > { %1734 = vst [vmem:[%s3089_s8] sm:$0xff] %v1726_v10  ;;  %v1214_v14 = vadd.f32 %v1195_v11, %v984_v5  ;;  %v1349_v18 = vpop.f32.mrf.mxu2  ;;  %v1755_v25 = vmul.f32 %v1726_v10, %v1726_v10  ;;  %v1486_v53 = vpop.f32.mrf.mxu3 }
 0x114   : > { %v1360_v12 = vadd.f32 %v1341_v52, %v1214_v14 }
 0x116   : > { %v1497_v19 = vadd.f32 %v1478_v1, %v1360_v12  ;;  %v851_v1 = vadd.f32 %v3061_v34, %v3073_v50 }
 0x118   : > { %v1727_v39 = vadd.f32 %v1708_v13, %v1497_v19  ;;  %v988_v3 = vadd.f32 %v3071_v48, %v851_v1 }
 0x119   : > { %v1198_v22 = vpop.f32.mrf.mxu1  ;;  %v1711_v23 = vpop.f32.mrf.mxu0 }
 0x11a   : > { %1735 = vst [vmem:[%s3089_s8 + $0x8] sm:$0xff] %v1727_v39  ;;  %v1742_v24 = vadd.f32 %v1727_v39, %v1726_v10  ;;  %v1756_v26 = vmul.f32 %v1727_v39, %v1727_v39  ;;  %v1215_v28 = vadd.f32 %v1198_v22, %v985_v20  ;;  %v1351_v16 = vpop.f32.mrf.mxu2  ;;  %v1488_v42 = vpop.f32.mrf.mxu3  ;;  %v852_v10 = vadd.f32 %v3067_v44, %v3079_v54 }
 0x11b   : > { %v853_v20 = vadd.f32 %v3075_v51, %v3084_v63 }
 0x11c   : > { %v1763_v31 = vadd.f32 %v1756_v26, %v1755_v25  ;;  %v1361_v33 = vadd.f32 %v1344_v58, %v1215_v28  ;;  %v989_v14 = vadd.f32 %v3077_v55, %v852_v10 }
 0x11e   : > { %v1498_v37 = vadd.f32 %v1481_v15, %v1361_v33 }
 0x120   : > { %v1728_v40 = vadd.f32 %v1711_v23, %v1498_v37  ;;  %v990_v23 = vadd.f32 %v3081_v60, %v853_v20 }
 0x121   : > { %v1200_v30 = vpop.f32.mrf.mxu1  ;;  %v1713_v41 = vpop.f32.mrf.mxu0 }
 0x122   : > { %1736 = vst [vmem:[%s3089_s8 + $0x10] sm:$0xff] %v1728_v40  ;;  %v1743_v43 = vadd.f32 %v1742_v24, %v1728_v40  ;;  %v1757_v46 = vmul.f32 %v1728_v40, %v1728_v40  ;;  %v1216_v47 = vadd.f32 %v1200_v30, %v986_v32  ;;  %v1354_v36 = vpop.f32.mrf.mxu2  ;;  %v1491_v19 = vpop.f32.mrf.mxu3 }
 0x124   : > { %v1764_v52 = vadd.f32 %v1763_v31, %v1757_v46  ;;  %v1362_v21 = vadd.f32 %v1346_v6, %v1216_v47 }
 0x126   : > { %v1499_v38 = vadd.f32 %v1483_v35, %v1362_v21 }
 0x128   : > { %v1729_v57 = vadd.f32 %v1713_v41, %v1499_v38 }
 0x129   : > { %v1203_v58 = vpop.f32.mrf.mxu1  ;;  %v1716_v0 = vpop.f32.mrf.mxu0 }
 0x12a   : > { %1737 = vst [vmem:[%s3089_s8 + $0x18] sm:$0xff] %v1729_v57  ;;  %v1744_v59 = vadd.f32 %v1743_v43, %v1729_v57  ;;  %v1758_v61 = vmul.f32 %v1729_v57, %v1729_v57  ;;  %v1217_v62 = vadd.f32 %v1203_v58, %v987_v56  ;;  %v1356_v5 = vpop.f32.mrf.mxu2  ;;  %v1493_v33 = vpop.f32.mrf.mxu3 }
 0x12c   : > { %v1765_v2 = vadd.f32 %v1764_v52, %v1758_v61  ;;  %v1363_v27 = vadd.f32 %v1349_v18, %v1217_v62 }
 0x12e   : > { %v1500_v45 = vadd.f32 %v1486_v53, %v1363_v27 }
 0x130   : > { %v1730_v4 = vadd.f32 %v1716_v0, %v1500_v45 }
 0x131   : > { %v1205_v6 = vpop.f32.mrf.mxu1  ;;  %v1718_v34 = vpop.f32.mrf.mxu0 }
 0x132   : > { %1738 = vst [vmem:[%s3089_s8 + $0x20] sm:$0xff] %v1730_v4  ;;  %v1745_v7 = vadd.f32 %v1744_v59, %v1730_v4  ;;  %v1759_v8 = vmul.f32 %v1730_v4, %v1730_v4  ;;  %v1218_v9 = vadd.f32 %v1205_v6, %v988_v3  ;;  %v1721_v44 = vpop.f32.mrf.mxu2 }
 0x134   : > { %v1766_v11 = vadd.f32 %v1765_v2, %v1759_v8  ;;  %v1364_v13 = vadd.f32 %v1351_v16, %v1218_v9 }
 0x136   : > { %v1501_v50 = vadd.f32 %v1488_v42, %v1364_v13 }
 0x138   : > { %v1731_v48 = vadd.f32 %v1718_v34, %v1501_v50 }
 0x139   : > { %v1208_v15 = vpop.f32.mrf.mxu1 }
 0x13a   : > { %1739 = vst [vmem:[%s3089_s8 + $0x28] sm:$0xff] %v1731_v48  ;;  %v1746_v17 = vadd.f32 %v1745_v7, %v1731_v48  ;;  %v1760_v12 = vmul.f32 %v1731_v48, %v1731_v48  ;;  %v1219_v18 = vadd.f32 %v1208_v15, %v989_v14  ;;  %v1723_v51 = vpop.f32.mrf.mxu2 }
 0x13c   : > { %v1767_v39 = vadd.f32 %v1766_v11, %v1760_v12  ;;  %v1365_v22 = vadd.f32 %v1354_v36, %v1219_v18 }
 0x13e   : > { %v1502_v54 = vadd.f32 %v1491_v19, %v1365_v22 }
 0x140   : > { %v1732_v25 = vadd.f32 %v1721_v44, %v1502_v54 }
 0x141   : > { %v1210_v55 = vpop.f32.mrf.mxu1 }
 0x142   : > { %1740 = vst [vmem:[%s3089_s8 + $0x30] sm:$0xff] %v1732_v25  ;;  %v1747_v24 = vadd.f32 %v1746_v17, %v1732_v25  ;;  %v1761_v26 = vmul.f32 %v1732_v25, %v1732_v25  ;;  %v1220_v28 = vadd.f32 %v1210_v55, %v990_v23 }
 0x144   : > { %v1768_v29 = vadd.f32 %v1767_v39, %v1761_v26  ;;  %v1366_v31 = vadd.f32 %v1356_v5, %v1220_v28 }
 0x146   : > { %v1503_v35 = vadd.f32 %v1493_v33, %v1366_v31 }
 0x148   : > { %v1733_v63 = vadd.f32 %v1723_v51, %v1503_v35 }
 0x14a   : > { %1741 = vst [vmem:[%s3089_s8 + $0x38] sm:$0xff] %v1733_v63  ;;  %v1748_v37 = vadd.f32 %v1747_v24, %v1733_v63  ;;  %v1762_v16 = vmul.f32 %v1733_v63, %v1733_v63 }
 0x14c   : > { %v1749_v32 = vrot.slane %v1748_v37, 4  ;;  %v1769_v40 = vadd.f32 %v1768_v29, %v1762_v16 }
 0x14e   : > { %v1750_v60 = vadd.f32 %v1749_v32, %v1748_v37  ;;  %v1770_v30 = vrot.slane %v1769_v40, 4 }
 0x150   : > { %v1751_v41 = vrot.slane %v1750_v60, 2  ;;  %v1771_v43 = vadd.f32 %v1770_v30, %v1769_v40 }
 0x152   : > { %v1752_v46 = vadd.f32 %v1751_v41, %v1750_v60  ;;  %v1772_v47 = vrot.slane %v1771_v43, 2 }
 0x154   : > { %v1753_v49 = vrot.slane %v1752_v46, 1  ;;  %v1773_v52 = vadd.f32 %v1772_v47, %v1771_v43 }
 0x156   : > { %v1774_v21 = vrot.slane %v1773_v52, 1  ;;  %v1754_v38 = vadd.f32 %v1753_v49, %v1752_v46 }
 0x158   : > { %v1775_v53 = vadd.f32 %v1774_v21, %v1773_v52 }
 0x15a   : > { %v1777_v56 = vsel %vm1776_vm3, %v1754_v38, %v1775_v53 }
 0x15b   : > { %1778 = vst [vmem:[%s208_s17] sm:$0x3] %v1777_v56 }
 0x15c PF: > { %s14_s14 = sadd.s32 1, %s2643_s14   ;;  %s3134_s12 = smov %s2639_s13 }
 0x15d   : > { %p11_p7 = scmp.ge.s32.totalorder %s14_s14, 4   ;;  %s3135_s13 = smov %s3137_s15 }
 0x15f   :  { %13 = sbr.rel (!%p11_p7) target bundleno = 2 (0x2), region = 84 }

// kernel: resnet_layer_forward.12
= control target key start
LH: loop header
LB: loop body
LE: loop exit
PB: predicated region body
PF: predicated region fallthrough
CT: control target
= control target key end

     0   :  { %s2653_s12 = smov 0   ;;  %s2655_s13 = smov 0   ;;  %s3397_s0 = inlined_call_operand.vmem [shape: bf16[2,10,10,128], index: 0, kind: input, shape index: {}]   ;;  %s3398_s1 = inlined_call_operand.vmem [shape: bf16[9,128,128], index: 1, kind: input, shape index: {}]   ;;  %s3399_s2 = inlined_call_operand.vmem [shape: f32[128,128], index: 2, kind: output, shape index: {0}]   ;;  %s3400_s3 = inlined_call_operand.vmem [shape: f32[2,2,128], index: 3, kind: output, shape index: {1}]  }
   0x1   :  { %s2657_s14 = smov 0  }
   0x2 LB: > { %s26_s15 = sadd.s32 1, %s2627_s13  ;;  %p1957_p0 = scmp.ge.s32.totalorder %s2631_s14, 1  ;;  %s2631_s14 = sphi %s2657_s14, %s14_s14   ;;  %s2627_s13 = sphi %s2655_s13, %s3406_s13   ;;  %s2623_s12 = sphi %s2653_s12, %s3405_s12  }
   0x3   : > { %p28_p1 = scmp.ge.s32.totalorder %s26_s15, 2  ;;  %p156_p2 = scmp.lt.s32.totalorder %s2631_s14, 3 }
   0x5   : > { %s3408_s15 = smov (%p28_p1, %s26_s15), 0  ;;  %p157_p3 = pnand %p1957_p0, %p156_p2 }
   0x6   : > { %p186_p4 = scmp.lt.s32.totalorder (!%p157_p3), %s2623_s12, 1 }
   0x7   : > { %160 = sbr.rel (%p157_p3) target bundleno = 348 (0x15c), region = 28 }
   0xc   : > { %v2503_v0 = vld [vmem:[%s3398_s1 + $0x78] sm:$0xff]  ;;  %v2502_v2 = vld [vmem:[%s3398_s1 + $0x70] sm:$0xff]  ;;  %s2684_s22 = scalar_select %p186_p4, %s2623_s12, 1  ;;  %v2501_v6 = vld [vmem:[%s3398_s1 + $0x68] sm:$0xff]  ;;  %vm241_vm0 = vsmask.f32 3328 }
   0xd   : > { %v2511_v1 = vld [vmem:[%s3398_s1 + $0xb8] sm:$0xff]  ;;  %2568 = vmatpush.bf16.msra.mxu1 %v2503_v0  ;;  %437 = vmatpush.bf16.msra.mxu0 %v2503_v0  ;;  %v2510_v3 = vld [vmem:[%s3398_s1 + $0xb0] sm:$0xff]  ;;  %v2509_v7 = vld [vmem:[%s3398_s1 + $0xa8] sm:$0xff]  ;;  %vm242_vm1 = vsmask.f32 7440  ;;  %vm575_vm2 = vcmask 1042432  }
   0xe   : > { %691 = vmatpush.bf16.msra.mxu2 %v2511_v1  ;;  %v2523_v4 = vld [vmem:[%s3398_s1 + $0xf8] sm:$0xff]  ;;  %s2584_s27 = smul.u32 80, %s2684_s22  ;;  %v2522_v5 = vld [vmem:[%s3398_s1 + $0xf0] sm:$0xff]  ;;  %v2500_v11 = vld [vmem:[%s3398_s1 + $0x60] sm:$0xff]  ;;  %vm576_vm3 = vcmask 1046532   ;;  %s1961_s19 = sshll.u32 %s2684_s22, 1 }
   0xf   : > { %837 = vmatpush.bf16.msra.mxu3 %v2523_v4  ;;  %v2521_v17 = vld [vmem:[%s3398_s1 + $0xe8] sm:$0xff]  ;;  %v2508_v20 = vld [vmem:[%s3398_s1 + $0xa0] sm:$0xff]  ;;  %v2499_v38 = vld [vmem:[%s3398_s1 + $0x58] sm:$0xff]  ;;  %vm1838_vm6 = vcmask 1040384   ;;  %s203_s23 = scalar_lea.vmem %s3400_s3, %s1961_s19 }
  0x10   : > { %s2705_s9 = scalar_lea.vmem %s3397_s0, %s2584_s27  ;;  %v2520_v34 = vld [vmem:[%s3398_s1 + $0xe0] sm:$0xff]  ;;  %v2507_v43 = vld [vmem:[%s3398_s1 + $0x98] sm:$0xff]  ;;  %vm2760_vm4 = vmor %vm241_vm0, %vm242_vm1 }
  0x11   : > { %2569 = vmatpush.bf16.msra.mxu1 %v2502_v2  ;;  %438 = vmatpush.bf16.msra.mxu0 %v2502_v2  ;;  %v2708_v8 = vld [vmem:[%s2705_s9 + $0x20] sm:$0xf]  ;;  %v2711_v9 = vld [vmem:[%s2705_s9 + $0x24] sm:$0x1]  ;;  %v2714_v10 = vld [vmem:[%s2705_s9 + $0x28] sm:$0xf] }
  0x12   : > { %692 = vmatpush.bf16.msra.mxu2 %v2510_v3  ;;  %v2720_v12 = vld [vmem:[%s2705_s9 + $0x2c] sm:$0x1]  ;;  %v301_v13 = vshrl.u32 %v2708_v8, 16  ;;  %v304_v14 = vshll.u32 %v2708_v8, 16  ;;  %v310_v15 = vshll.u32 %v2711_v9, 16  ;;  %v315_v16 = vshrl.u32 %v2714_v10, 16  ;;  %vm2770_vm5 = vmor %vm575_vm2, %vm576_vm3 }
  0x13   : > { %838 = vmatpush.bf16.msra.mxu3 %v2522_v5  ;;  %v318_v18 = vshll.u32 %v2714_v10, 16  ;;  %v2731_v19 = vld [vmem:[%s2705_s9] sm:$0xf]  ;;  %v210_v24 = vld [vmem:[%s2705_s9 + $0x4] sm:$0x1]  ;;  %v324_v26 = vshll.u32 %v2720_v12, 16 }
  0x14   : > { %v303_v21 = vrot.slane %v301_v13, 4  ;;  %v306_v22 = vrot.slane %v304_v14, 5  ;;  %v317_v23 = vrot.slane %v315_v16, 4  ;;  %v2739_v27 = vld [vmem:[%s2705_s9 + $0x8] sm:$0xf]  ;;  %v312_v30 = vrot.slane %v310_v15, 5 }
  0x15   : > { %2570 = vmatpush.bf16.msra.mxu1 %v2501_v6  ;;  %439 = vmatpush.bf16.msra.mxu0 %v2501_v6  ;;  %v320_v25 = vrot.slane %v318_v18, 5  ;;  %v2742_v28 = vld [vmem:[%s2705_s9 + $0xc] sm:$0x1]  ;;  %v245_v31 = vshrl.u32 %v2731_v19, 16  ;;  %v248_v32 = vshll.u32 %v2731_v19, 16  ;;  %v254_v35 = vshll.u32 %v210_v24, 16 }
  0x16   : > { %693 = vmatpush.bf16.msra.mxu2 %v2509_v7  ;;  %v307_v29 = vor.u32 %v306_v22, %v303_v21  ;;  %v259_v36 = vshrl.u32 %v2739_v27, 16  ;;  %v262_v37 = vshll.u32 %v2739_v27, 16  ;;  %v268_v42 = vshll.u32 %v2742_v28, 16  ;;  %v2519_v54 = vld [vmem:[%s3398_s1 + $0xd8] sm:$0xff]  ;;  %v2775_v56 = vld [vmem:[%s2705_s9 + $0x30] sm:$0xf] }
  0x17   : > { %839 = vmatpush.bf16.msra.mxu3 %v2521_v17  ;;  %v321_v33 = vor.u32 %v320_v25, %v317_v23  ;;  %v247_v40 = vrot.slane %v245_v31, 4  ;;  %v250_v41 = vrot.slane %v248_v32, 5  ;;  %v326_v46 = vrot.slane %v324_v26, 5  ;;  %v2498_v57 = vld [vmem:[%s3398_s1 + $0x50] sm:$0xff]  ;;  %v2790_v2 = vld [vmem:[%s2705_s9 + $0x38] sm:$0xf] }
  0x18   : > { %v308_v39 = vrot.slane %v307_v29, 4  ;;  %v261_v47 = vrot.slane %v259_v36, 4  ;;  %v264_v48 = vrot.slane %v262_v37, 5  ;;  %v2058_v50 = vrot.slane %v2731_v19, 9  ;;  %v2506_v61 = vld [vmem:[%s3398_s1 + $0x90] sm:$0xff]  ;;  %v2497_v13 = vld [vmem:[%s3398_s1 + $0x48] sm:$0xff] }
  0x19   : > { %2571 = vmatpush.bf16.msra.mxu1 %v2500_v11  ;;  %440 = vmatpush.bf16.msra.mxu0 %v2500_v11  ;;  %v322_v45 = vrot.slane %v321_v33, 4  ;;  %v251_v49 = vor.u32 %v250_v41, %v247_v40  ;;  %v580_v51 = vrot.slane %v210_v24, 5  ;;  %v256_v52 = vrot.slane %v254_v35, 5  ;;  %v2799_v6 = vld [vmem:[%s2705_s9 + $0x10] sm:$0xf]  ;;  %v2505_v16 = vld [vmem:[%s3398_s1 + $0x88] sm:$0xff] }
  0x1a   : > { %694 = vmatpush.bf16.msra.mxu2 %v2508_v20  ;;  %v265_v53 = vor.u32 %v264_v48, %v261_v47  ;;  %v313_v58 = vsel %vm2760_vm4, %v308_v39, %v312_v30  ;;  %v270_v60 = vrot.slane %v268_v42, 5  ;;  %v2059_v0 = vrot.slane %v2739_v27, 9  ;;  %v2518_v11 = vld [vmem:[%s3398_s1 + $0xd0] sm:$0xff]  ;;  %v2827_v23 = vld [vmem:[%s2705_s9 + $0x18] sm:$0xf]  ;;  %v2517_v31 = vld [vmem:[%s3398_s1 + $0xc8] sm:$0xff] }
  0x1b   : > { %840 = vmatpush.bf16.msra.mxu3 %v2520_v34  ;;  %v252_v59 = vrot.slane %v251_v49, 4  ;;  %v327_v62 = vsel %vm2760_vm4, %v322_v45, %v326_v46  ;;  %v584_v1 = vrot.slane %v2742_v28, 5  ;;  %v2794_v3 = vsel %vm2770_vm5, %v2058_v50, %v580_v51  ;;  %v2823_v21 = vld [vmem:[%s2705_s9 + $0x34] sm:$0x1]  ;;  %v2831_v26 = vld [vmem:[%s2705_s9 + $0x3c] sm:$0x1] }
  0x1c   : > { %v266_v63 = vrot.slane %v265_v53, 4  ;;  %v329_v4 = vshrl.u32 %v2775_v56, 16  ;;  %v332_v5 = vshll.u32 %v2775_v56, 16  ;;  %v2809_v14 = vunpack.c.l.b16 %v313_v58  ;;  %v2838_v34 = vld [vmem:[%s2705_s9 + $0x14] sm:$0x1]  ;;  %v2496_v36 = vld [vmem:[%s3398_s1 + $0x40] sm:$0xff] }
  0x1d   : > { %2572 = vmatpush.bf16.msra.mxu1 %v2499_v38  ;;  %441 = vmatpush.bf16.msra.mxu0 %v2499_v38  ;;  %v257_v7 = vsel %vm2760_vm4, %v252_v59, %v256_v52  ;;  %v2811_v15 = vunpack.c.l.b16 %v327_v62  ;;  %v343_v18 = vshrl.u32 %v2790_v2, 16  ;;  %v585_v19 = vsel %vm2770_vm5, %v2059_v0, %v584_v1  ;;  %v2495_v41 = vld [vmem:[%s3398_s1 + $0x38] sm:$0xff]  ;;  %v2504_v42 = vld [vmem:[%s3398_s1 + $0x80] sm:$0xff]  ;;  %v2148_v59 = vld [vmem:[%s2705_s9 + $0x8] sm:$0xf] }
  0x1e   : > { %695 = vmatpush.bf16.msra.mxu2 %v2507_v43  ;;  %v271_v17 = vsel %vm2760_vm4, %v266_v63, %v270_v60  ;;  %v627_v20 = vunpack.c.l.b16 %v2794_v3  ;;  %v346_v22 = vshll.u32 %v2790_v2, 16  ;;  %v273_v24 = vshrl.u32 %v2799_v6, 16  ;;  %v2854_v46 = vld [vmem:[%s2705_s9 + $0x1c] sm:$0x1]  ;;  %v2512_v60 = vld [vmem:[%s2705_s9 + $0xc] sm:$0xf0] }
  0x1f   : > { %841 = vmatpush.bf16.msra.mxu3 %v2519_v54  ;;  %v373_v25 = vunpack.c.l.b16 %v257_v7  ;;  %v331_v27 = vrot.slane %v329_v4, 4  ;;  %v334_v28 = vrot.slane %v332_v5, 5  ;;  %v276_v29 = vshll.u32 %v2799_v6, 16  ;;  %v2531_v47 = vld [vmem:[%s3398_s1 + $0x138] sm:$0xff]  ;;  %v2516_v62 = vld [vmem:[%s3398_s1 + $0xc0] sm:$0xff]  ;;  %v2494_v1 = vld [vmem:[%s3398_s1 + $0x30] sm:$0xff] }
  0x20   : > { %v374_v30 = vunpack.c.l.b16 %v271_v17  ;;  %v345_v32 = vrot.slane %v343_v18, 4  ;;  %v348_v33 = vrot.slane %v346_v22, 5  ;;  %v275_v35 = vrot.slane %v273_v24, 4  ;;  %v2551_v49 = vld [vmem:[%s3398_s1 + $0x1b8] sm:$0xff]  ;;  %v2530_v5 = vld [vmem:[%s3398_s1 + $0x130] sm:$0xff] }
  0x21   : > { %2573 = vmatpush.bf16.msra.mxu1 %v2498_v57  ;;  %442 = vmatpush.bf16.msra.mxu0 %v2498_v57  ;;  %v628_v37 = vunpack.c.l.b16 %v585_v19  ;;  %v278_v38 = vrot.slane %v276_v29, 5  ;;  %v287_v39 = vshrl.u32 %v2827_v23, 16  ;;  %v290_v40 = vshll.u32 %v2827_v23, 16  ;;  %v2559_v4 = vld [vmem:[%s3398_s1 + $0x1f8] sm:$0xff]  ;;  %v2886_v24 = vld [vmem:[%s2705_s9 + $0x8] sm:$0xf] }
  0x22   : > { %696 = vmatpush.bf16.msra.mxu2 %v2506_v61  ;;  %v338_v43 = vshll.u32 %v2823_v21, 16  ;;  %v352_v45 = vshll.u32 %v2831_v26, 16  ;;  %v335_v48 = vor.u32 %v334_v28, %v331_v27  ;;  %v282_v50 = vshll.u32 %v2838_v34, 16  ;;  %v2894_v29 = vld [vmem:[%s2705_s9 + $0x10] sm:$0xf] }
  0x23   : > { %842 = vmatpush.bf16.msra.mxu3 %v2518_v11  ;;  %v289_v51 = vrot.slane %v287_v39, 4  ;;  %v292_v52 = vrot.slane %v290_v40, 5  ;;  %v383_v53 = vpack.c.b16 %v2811_v15, %v2809_v14  ;;  %v381_v54 = vpack.c.b16 %v374_v30, %v373_v25  ;;  %v2550_v15 = vld [vmem:[%s3398_s1 + $0x1b0] sm:$0xff]  ;;  %v2493_v25 = vld [vmem:[%s3398_s1 + $0x28] sm:$0xff]  ;;  %v2492_v40 = vld [vmem:[%s3398_s1 + $0x20] sm:$0xff] }
  0x24   : > { %v349_v57 = vor.u32 %v348_v33, %v345_v32  ;;  %v279_v58 = vor.u32 %v278_v38, %v275_v35  ;;  %v635_v61 = vpack.c.b16 %v628_v37, %v627_v20  ;;  %v296_v0 = vshll.u32 %v2854_v46, 16  ;;  %v2529_v30 = vld [vmem:[%s3398_s1 + $0x128] sm:$0xff] }
  0x25   : > { %2574 = vmatpush.bf16.msra.mxu1 %v2497_v13  ;;  %443 = vmatpush.bf16.msra.mxu0 %v2497_v13  ;;  %v293_v63 = vor.u32 %v292_v52, %v289_v51  ;;  %v340_v3 = vrot.slane %v338_v43, 5  ;;  %v336_v7 = vrot.slane %v335_v48, 4  ;;  %v354_v11 = vrot.slane %v352_v45, 5 }
  0x26   : > { %697 = vmatpush.bf16.msra.mxu2 %v2505_v16  ;;  %v284_v13 = vrot.slane %v282_v50, 5  ;;  %v2149_v14 = vor.u32 %v2512_v60, %v2148_v59  ;;  %v350_v16 = vrot.slane %v349_v57, 4  ;;  %v280_v17 = vrot.slane %v279_v58, 4  ;;  %v2491_v59 = vld [vmem:[%s3398_s1 + $0x18] sm:$0xff]  ;;  %v2940_v60 = vld [vmem:[%s2705_s9 + $0x14] sm:$0x1] }
  0x27   : > { %843 = vmatpush.bf16.msra.mxu3 %v2517_v31  ;;  %v2060_v18 = vrot.slane %v2799_v6, 9  ;;  %v588_v19 = vrot.slane %v2838_v34, 5  ;;  %v294_v20 = vrot.slane %v293_v63, 4  ;;  %v298_v22 = vrot.slane %v296_v0, 5  ;;  %v2558_v6 = vld [vmem:[%s3398_s1 + $0x1f0] sm:$0xff] }
  0x28   : > { %v2061_v27 = vrot.slane %v2827_v23, 9  ;;  %v592_v28 = vrot.slane %v2854_v46, 5  ;;  %v341_v31 = vsel %vm2760_vm4, %v336_v7, %v340_v3  ;;  %v2549_v23 = vld [vmem:[%s3398_s1 + $0x1a8] sm:$0xff]  ;;  %v355_v32 = vsel %vm2760_vm4, %v350_v16, %v354_v11  ;;  %v2528_v46 = vld [vmem:[%s3398_s1 + $0x120] sm:$0xff]  ;;  %v2152_v3 = vld [vmem:[%s2705_s9 + $0x18] sm:$0xf] }
  0x29   : > { %2575 = vmatpush.bf16.msra.mxu1 %v2496_v36  ;;  %444 = vmatpush.bf16.msra.mxu0 %v2496_v36  ;;  %v285_v33 = vsel %vm2760_vm4, %v280_v17, %v284_v13  ;;  %v589_v34 = vsel %vm2770_vm5, %v2060_v18, %v588_v19  ;;  %v875_v35 = vshrl.u32 %v2886_v24, 16  ;;  %v299_v36 = vsel %vm2760_vm4, %v294_v20, %v298_v22  ;;  %v2490_v13 = vld [vmem:[%s3398_s1 + $0x10] sm:$0xff]  ;;  %v2547_v17 = vld [vmem:[%s3398_s1 + $0x198] sm:$0xff] }
  0x2a   : > { %698 = vmatpush.bf16.msra.mxu2 %v2504_v42  ;;  %v878_v37 = vshll.u32 %v2886_v24, 16  ;;  %v889_v38 = vshrl.u32 %v2894_v29, 16  ;;  %v892_v39 = vshll.u32 %v2894_v29, 16  ;;  %v2557_v42 = vld [vmem:[%s3398_s1 + $0x1e8] sm:$0xff]  ;;  %v379_v43 = vunpack.c.l.b16 %v341_v31  ;;  %v2959_v18 = vld [vmem:[%s2705_s9 + $0x18] sm:$0xf] }
  0x2b   : > { %844 = vmatpush.bf16.msra.mxu3 %v2516_v62  ;;  %v380_v45 = vunpack.c.l.b16 %v355_v32  ;;  %v375_v48 = vunpack.c.l.b16 %v285_v33  ;;  %v629_v50 = vunpack.c.l.b16 %v589_v34  ;;  %v877_v51 = vrot.slane %v875_v35, 4  ;;  %v2546_v32 = vld [vmem:[%s3398_s1 + $0x190] sm:$0xff]  ;;  %v2525_v33 = vld [vmem:[%s3398_s1 + $0x108] sm:$0xff] }
  0x2c   : > { %455 = vmatmul.bf16.vlgmr.msra.gmra.mxu1 %v383_v53  ;;  %445 = vmatmul.bf16.vlgmr.msra.gmra.mxu0 %v381_v54  ;;  %v2934_v53 = vld [vmem:[%s2705_s9 + $0xc] sm:$0x1]  ;;  %v880_v54 = vrot.slane %v878_v37, 5  ;;  %v891_v57 = vrot.slane %v889_v38, 4  ;;  %v894_v58 = vrot.slane %v892_v39, 5  ;;  %v898_v11 = vshll.u32 %v2940_v60, 16 }
  0x2d   : > { %538 = vmatpush.bf16.msrb.mxu1 %v2495_v41  ;;  %1067 = vmatpush.bf16.msrb.mxu0 %v2531_v47  ;;  %v593_v41 = vsel %vm2770_vm5, %v2061_v27, %v592_v28  ;;  %v2548_v47 = vld [vmem:[%s3398_s1 + $0x1a0] sm:$0xff]  ;;  %v384_v62 = vpack.c.b16 %v380_v45, %v379_v43  ;;  %v884_v0 = vshll.u32 %v2934_v53, 16  ;;  %v2489_v28 = vld [vmem:[%s3398_s1 + $0x8] sm:$0xff]  ;;  %v2063_v31 = vrot.slane %v2714_v10, 9 }
  0x2e   : > { %1371 = vmatpush.bf16.msrb.mxu2 %v2551_v49  ;;  %845 = vmatmul.bf16.vlgmr.msra.gmra.mxu3 %v2149_v14  ;;  %v376_v49 = vunpack.c.l.b16 %v299_v36  ;;  %v630_v52 = vunpack.c.l.b16 %v593_v41  ;;  %v895_v7 = vor.u32 %v894_v58, %v891_v57  ;;  %v2526_v14 = vld [vmem:[%s3398_s1 + $0x110] sm:$0xff]  ;;  %v900_v22 = vrot.slane %v898_v11, 5  ;;  %v2556_v27 = vld [vmem:[%s3398_s1 + $0x1e0] sm:$0xff] }
  0x2f   : > { %699 = vmatmul.bf16.vlgmr.msra.gmra.mxu2 %v635_v61  ;;  %1601 = vmatpush.bf16.msrb.mxu3 %v2559_v4  ;;  %v2527_v61 = vld [vmem:[%s3398_s1 + $0x118] sm:$0xff]  ;;  %v2513_v4 = vld [vmem:[%s2705_s9 + $0x1c] sm:$0xf0]  ;;  %v886_v16 = vrot.slane %v884_v0, 5  ;;  %v903_v34 = vshrl.u32 %v2959_v18, 16 }
  0x30   : > { %v382_v63 = vpack.c.b16 %v376_v49, %v375_v48  ;;  %v896_v20 = vrot.slane %v895_v7, 4  ;;  %v2488_v37 = vld [vmem:[%s3398_s1] sm:$0xff]  ;;  %v3010_v48 = vld [vmem:[%s3398_s1 + $0x238] sm:$0xff]  ;;  %v2514_v11 = vld [vmem:[%s2705_s9 + $0x2c] sm:$0xf0] }
  0x31   : > { %539 = vmatpush.bf16.msrb.mxu1 %v2494_v1  ;;  %1068 = vmatpush.bf16.msrb.mxu0 %v2530_v5  ;;  %v636_v1 = vpack.c.b16 %v630_v52, %v629_v50  ;;  %v881_v5 = vor.u32 %v880_v54, %v877_v51  ;;  %v2524_v41 = vld [vmem:[%s3398_s1 + $0x100] sm:$0xff]  ;;  %v905_v43 = vrot.slane %v903_v34, 4  ;;  %v2484_v54 = vld [vmem:[%s2705_s9 + $0x4] sm:$0xf0]  ;;  %v604_v34 = vrot.slane %v2823_v21, 5 }
  0x32   : > { %1372 = vmatpush.bf16.msrb.mxu2 %v2550_v15  ;;  %v2153_v15 = vor.u32 %v2513_v4, %v2152_v3  ;;  %v901_v36 = vsel %vm2760_vm4, %v896_v20, %v900_v22  ;;  %v3013_v49 = vld [vmem:[%s2705_s9 + $0x24] sm:$0x1]  ;;  %v2012_v52 = vld [vmem:[%s2705_s9] sm:$0xf]  ;;  %v2156_v3 = vld [vmem:[%s2705_s9 + $0x28] sm:$0xf] }
  0x33   : > { %1602 = vmatpush.bf16.msrb.mxu3 %v2558_v6  ;;  %v882_v19 = vrot.slane %v881_v5, 4  ;;  %v2062_v6 = vrot.slane %v2708_v8, 9  ;;  %v906_v8 = vshll.u32 %v2959_v18, 16  ;;  %v2013_v0 = vor.u32 %v2484_v54, %v2012_v52  ;;  %v3025_v5 = vld [vmem:[%s2705_s9 + $0x28] sm:$0xf] }
  0x34   : > { %v2545_v20 = vld [vmem:[%s3398_s1 + $0x188] sm:$0xff]  ;;  %v931_v22 = vshrl.u32 %v3025_v5, 16  ;;  %v2485_v52 = vld [vmem:[%s2705_s9 + $0x14] sm:$0xf0] }
  0x35   : > { %540 = vmatpush.bf16.msrb.mxu1 %v2493_v25  ;;  %1069 = vmatpush.bf16.msrb.mxu0 %v2529_v30  ;;  %v2962_v25 = vld [vmem:[%s2705_s9 + $0x20] sm:$0xf]  ;;  %v596_v30 = vrot.slane %v2711_v9, 5  ;;  %v2555_v9 = vld [vmem:[%s3398_s1 + $0x1d8] sm:$0xff]  ;;  %v887_v35 = vsel %vm2760_vm4, %v882_v19, %v886_v16  ;;  %v908_v45 = vrot.slane %v906_v8, 5  ;;  %v2537_v16 = vld [vmem:[%s3398_s1 + $0x168] sm:$0xff] }
  0x36   : > { %1373 = vmatpush.bf16.msrb.mxu2 %v2549_v23  ;;  %v600_v23 = vrot.slane %v2720_v12, 5  ;;  %v917_v10 = vshrl.u32 %v2962_v25, 16  ;;  %v920_v12 = vshll.u32 %v2962_v25, 16  ;;  %v2065_v8 = vrot.slane %v2790_v2, 9  ;;  %v2553_v2 = vld [vmem:[%s3398_s1 + $0x1c8] sm:$0xff] }
  0x37   : > { %1603 = vmatpush.bf16.msrb.mxu3 %v2557_v42  ;;  %v597_v38 = vsel %vm2770_vm5, %v2062_v6, %v596_v30  ;;  %v3005_v42 = vld [vmem:[%s2705_s9 + $0x1c] sm:$0x1] }
  0x38   : > { %v601_v39 = vsel %vm2770_vm5, %v2063_v31, %v600_v23  ;;  %v919_v50 = vrot.slane %v917_v10, 4  ;;  %v922_v51 = vrot.slane %v920_v12, 5  ;;  %v631_v57 = vunpack.c.l.b16 %v597_v38  ;;  %v3050_v23 = vld [vmem:[%s3398_s1 + $0x228] sm:$0xff]  ;;  %v2544_v10 = vld [vmem:[%s3398_s1 + $0x180] sm:$0xff] }
  0x39   : > { %541 = vmatpush.bf16.msrb.mxu1 %v2492_v40  ;;  %1070 = vmatpush.bf16.msrb.mxu0 %v2528_v46  ;;  %v2539_v40 = vld [vmem:[%s3398_s1 + $0x178] sm:$0xff]  ;;  %v1003_v46 = vunpack.c.l.b16 %v887_v35  ;;  %v632_v58 = vunpack.c.l.b16 %v601_v39  ;;  %v2536_v12 = vld [vmem:[%s3398_s1 + $0x160] sm:$0xff]  ;;  %v933_v35 = vrot.slane %v931_v22, 4  ;;  %v3074_v38 = vld [vmem:[%s2705_s9 + $0x2c] sm:$0x1] }
  0x3a   : > { %1374 = vmatpush.bf16.msrb.mxu2 %v2548_v47  ;;  %v1004_v47 = vunpack.c.l.b16 %v901_v36  ;;  %v923_v4 = vor.u32 %v922_v51, %v919_v50  ;;  %v3077_v39 = vld [vmem:[%s2705_s9 + $0x34] sm:$0x1]  ;;  %v2535_v50 = vld [vmem:[%s3398_s1 + $0x158] sm:$0xff]  ;;  %v940_v54 = vshll.u32 %v3074_v38, 16 }
  0x3b   : > { %1604 = vmatpush.bf16.msrb.mxu3 %v2556_v27  ;;  %v637_v7 = vpack.c.b16 %v632_v58, %v631_v57  ;;  %v934_v27 = vshll.u32 %v3025_v5, 16  ;;  %v954_v58 = vshll.u32 %v3077_v39, 16  ;;  %v2160_v22 = vld [vmem:[%s2705_s9 + $0x38] sm:$0xf] }
  0x3c   : > { %460 = vmatmul.bf16.gmra.mxu1 %v384_v62  ;;  %450 = vmatmul.bf16.gmra.mxu0 %v382_v63  ;;  %v909_v62 = vor.u32 %v908_v45, %v905_v43  ;;  %v926_v63 = vshll.u32 %v3013_v49, 16  ;;  %v924_v6 = vrot.slane %v923_v4, 4  ;;  %v2016_v45 = vld [vmem:[%s2705_s9 + $0x10] sm:$0xf] }
  0x3d   : > { %542 = vmatpush.bf16.msrb.mxu1 %v2491_v59  ;;  %1071 = vmatpush.bf16.msrb.mxu0 %v2527_v61  ;;  %v912_v59 = vshll.u32 %v3005_v42, 16  ;;  %v2538_v61 = vld [vmem:[%s3398_s1 + $0x170] sm:$0xff]  ;;  %v2017_v4 = vor.u32 %v2485_v52, %v2016_v45 }
  0x3e   : > { %1375 = vmatpush.bf16.msrb.mxu2 %v2547_v17  ;;  %850 = vmatmul.bf16.gmra.mxu3 %v2153_v15  ;;  %v910_v17 = vrot.slane %v909_v62, 4  ;;  %v928_v19 = vrot.slane %v926_v63, 5  ;;  %v3101_v63 = vld [vmem:[%s2705_s9 + $0x18] sm:$0xf] }
  0x3f   : > { %704 = vmatmul.bf16.gmra.mxu2 %v636_v1  ;;  %1605 = vmatpush.bf16.msrb.mxu3 %v2555_v9  ;;  %v1011_v1 = vpack.c.b16 %v1004_v47, %v1003_v46  ;;  %v914_v15 = vrot.slane %v912_v59, 5  ;;  %v608_v9 = vrot.slane %v2831_v26, 5  ;;  %v3097_v59 = vld [vmem:[%s2705_s9 + $0x10] sm:$0xf] }
  0x40   : > { %v929_v26 = vsel %vm2760_vm4, %v924_v6, %v928_v19  ;;  %v1426_v19 = vshll.u32 %v3101_v63, 16  ;;  %v3117_v6 = vld [vmem:[%s2705_s9 + $0x1c] sm:$0x1] }
  0x41   : > { %543 = vmatpush.bf16.msrb.mxu1 %v2490_v13  ;;  %1072 = vmatpush.bf16.msrb.mxu0 %v2526_v14  ;;  %v3031_v13 = vld [vmem:[%s3398_s1 + $0x230] sm:$0xff]  ;;  %v915_v21 = vsel %vm2760_vm4, %v910_v17, %v914_v15  ;;  %v609_v43 = vsel %vm2770_vm5, %v2065_v8, %v608_v9  ;;  %v1006_v47 = vunpack.c.l.b16 %v929_v26  ;;  %v942_v15 = vrot.slane %v940_v54, 5  ;;  %v3124_v8 = vld [vmem:[%s2705_s9 + $0x40] sm:$0xf]  ;;  %v2533_v9 = vld [vmem:[%s3398_s1 + $0x148] sm:$0xff] }
  0x42   : > { %1376 = vmatpush.bf16.msrb.mxu2 %v2546_v32  ;;  %v3034_v14 = vld [vmem:[%s2705_s9 + $0x30] sm:$0xf]  ;;  %v1005_v46 = vunpack.c.l.b16 %v915_v21  ;;  %v634_v62 = vunpack.c.l.b16 %v609_v43  ;;  %v956_v17 = vrot.slane %v954_v58, 5  ;;  %v973_v45 = vshrl.u32 %v3124_v8, 16 }
  0x43   : > { %v945_v30 = vshrl.u32 %v3034_v14, 16  ;;  %v948_v31 = vshll.u32 %v3034_v14, 16  ;;  %v2554_v32 = vld [vmem:[%s3398_s1 + $0x1d0] sm:$0xff] }
  0x44   : > { %1606 = vmatpush.bf16.msrb.mxu3 %v2554_v32 }
  0x45   : > { %544 = vmatpush.bf16.msrb.mxu1 %v2489_v28  ;;  %1073 = vmatpush.bf16.msrb.mxu0 %v2525_v33  ;;  %v2157_v28 = vor.u32 %v2514_v11, %v2156_v3  ;;  %v2064_v33 = vrot.slane %v2775_v56, 9  ;;  %v936_v56 = vrot.slane %v934_v27, 5  ;;  %v947_v36 = vrot.slane %v945_v30, 4  ;;  %v2534_v11 = vld [vmem:[%s3398_s1 + $0x150] sm:$0xff]  ;;  %v2515_v27 = vld [vmem:[%s2705_s9 + $0x3c] sm:$0xf0] }
  0x46   : > { %1377 = vmatpush.bf16.msrb.mxu2 %v2545_v20  ;;  %v1423_v3 = vshrl.u32 %v3101_v63, 16 }
  0x47   : > { %v937_v51 = vor.u32 %v936_v56, %v933_v35  ;;  %v1428_v56 = vrot.slane %v1426_v19, 5  ;;  %v3175_v19 = vld [vmem:[%s2705_s9 + $0x44] sm:$0x1] }
  0x48   : > { %1607 = vmatpush.bf16.msrb.mxu3 %v2553_v2  ;;  %v1425_v32 = vrot.slane %v1423_v3, 4  ;;  %v1118_v2 = vrot.slane %v2940_v60, 5  ;;  %v3150_v60 = vld [vmem:[%s3398_s1 + $0x210] sm:$0xff] }
  0x49   : > { %545 = vmatpush.bf16.msrb.mxu1 %v2488_v37  ;;  %1074 = vmatpush.bf16.msrb.mxu0 %v2524_v41  ;;  %v950_v37 = vrot.slane %v948_v31, 5  ;;  %v605_v41 = vsel %vm2770_vm5, %v2064_v33, %v604_v34  ;;  %v1114_v33 = vrot.slane %v2934_v53, 5  ;;  %v3121_v34 = vld [vmem:[%s2705_s9 + $0x38] sm:$0xf]  ;;  %v2552_v53 = vld [vmem:[%s3398_s1 + $0x1c0] sm:$0xff] }
  0x4a   : > { %1378 = vmatpush.bf16.msrb.mxu2 %v2544_v10  ;;  %v3132_v10 = vld [vmem:[%s3398_s1 + $0x218] sm:$0xff]  ;;  %v1429_v43 = vor.u32 %v1428_v56, %v1425_v32 }
  0x4b   : > { %v951_v57 = vor.u32 %v950_v37, %v947_v36  ;;  %v1432_v36 = vshll.u32 %v3117_v6, 16  ;;  %v959_v37 = vshrl.u32 %v3121_v34, 16 }
  0x4c   : > { %546 = vmatmul.bf16.vlgmr.msrb.gmra.mxu1 %v2013_v0  ;;  %1075 = vmatmul.bf16.vlgmr.msrb.gmra.mxu0 %v1011_v1  ;;  %v1409_v0 = vshrl.u32 %v3097_v59, 16  ;;  %v1412_v1 = vshll.u32 %v3097_v59, 16 }
  0x4d   : > { %1225 = vmatpush.bf16.msra.mxu1 %v2539_v40  ;;  %1759 = vmatpush.bf16.msra.mxu0 %v3010_v48  ;;  %v3082_v40 = vld [vmem:[%s3398_s1 + $0x220] sm:$0xff] }
  0x4e   : > { %855 = vmatmul.bf16.gmra.mxu3 %v2157_v28  ;;  %2576 = vmatpush.bf16.msra.mxu2 %v3010_v48  ;;  %v1012_v48 = vpack.c.b16 %v1006_v47, %v1005_v46  ;;  %v3114_v28 = vld [vmem:[%s2705_s9 + $0x14] sm:$0x1]  ;;  %v1411_v30 = vrot.slane %v1409_v0, 4  ;;  %v1414_v31 = vrot.slane %v1412_v1, 5  ;;  %v976_v46 = vshll.u32 %v3124_v8, 16  ;;  %v2532_v47 = vld [vmem:[%s3398_s1 + $0x140] sm:$0xff] }
  0x4f   : > { %709 = vmatmul.bf16.gmra.mxu2 %v637_v7  ;;  %v938_v7 = vrot.slane %v937_v51, 4  ;;  %v1418_v35 = vshll.u32 %v3114_v28, 16  ;;  %1608 = vmatpush.bf16.msrb.mxu3 %v2552_v53  ;;  %v2243_v51 = vrot.slane %v2894_v29, 9  ;;  %v1430_v0 = vrot.slane %v1429_v43, 4  ;;  %v2540_v53 = vld [vmem:[%s2705_s9 + $0x14] sm:$0xf0] }
  0x50   : > { %v1434_v1 = vrot.slane %v1432_v36, 5  ;;  %v961_v29 = vrot.slane %v959_v37, 4  ;;  %v3199_v43 = vld [vmem:[%s2705_s9 + $0x24] sm:$0x1] }
  0x51   : > { %1226 = vmatpush.bf16.msra.mxu1 %v2538_v61  ;;  %1760 = vmatpush.bf16.msra.mxu0 %v3031_v13  ;;  %v633_v61 = vunpack.c.l.b16 %v605_v41  ;;  %v943_v21 = vsel %vm2760_vm4, %v938_v7, %v942_v15  ;;  %v962_v41 = vshll.u32 %v3121_v34, 16  ;;  %v1420_v58 = vrot.slane %v1418_v35, 5 }
  0x52   : > { %2577 = vmatpush.bf16.msra.mxu2 %v3031_v13  ;;  %v2161_v13 = vor.u32 %v2515_v27, %v2160_v22  ;;  %v1007_v52 = vunpack.c.l.b16 %v943_v21  ;;  %v975_v15 = vrot.slane %v973_v45, 4  ;;  %v3182_v27 = vld [vmem:[%s2705_s9 + $0x20] sm:$0xf]  ;;  %v982_v21 = vshll.u32 %v3175_v19, 16 }
  0x53   : > { %v638_v20 = vpack.c.b16 %v634_v62, %v633_v61  ;;  %v2020_v61 = vld [vmem:[%s2705_s9 + $0x20] sm:$0xf]  ;;  %v2486_v62 = vld [vmem:[%s2705_s9 + $0x24] sm:$0xf0]  ;;  %v1437_v32 = vshrl.u32 %v3182_v27, 16 }
  0x55   : > { %1227 = vmatpush.bf16.msra.mxu1 %v2537_v16  ;;  %1761 = vmatpush.bf16.msra.mxu0 %v3050_v23  ;;  %v952_v16 = vrot.slane %v951_v57, 4 }
  0x56   : > { %2578 = vmatpush.bf16.msra.mxu2 %v3050_v23  ;;  %v964_v23 = vrot.slane %v962_v41, 5 }
  0x57   : > { %v957_v26 = vsel %vm2760_vm4, %v952_v16, %v956_v17  ;;  %v978_v16 = vrot.slane %v976_v46, 5  ;;  %v2021_v17 = vor.u32 %v2486_v62, %v2020_v61  ;;  %v1446_v61 = vshll.u32 %v3199_v43, 16  ;;  %v2560_v62 = vld [vmem:[%s3398_s1 + $0x200] sm:$0xff] }
  0x58   : > { %v1008_v54 = vunpack.c.l.b16 %v957_v26  ;;  %v1439_v26 = vrot.slane %v1437_v32, 4 }
  0x59   : > { %1228 = vmatpush.bf16.msra.mxu1 %v2536_v12  ;;  %1762 = vmatpush.bf16.msra.mxu0 %v3082_v40  ;;  %v1415_v12 = vor.u32 %v1414_v31, %v1411_v30  ;;  %v3185_v30 = vld [vmem:[%s2705_s9 + $0x28] sm:$0xf]  ;;  %v1435_v31 = vsel %vm2760_vm4, %v1430_v0, %v1434_v1 }
  0x5a   : > { %2579 = vmatpush.bf16.msra.mxu2 %v3082_v40  ;;  %v1451_v40 = vshrl.u32 %v3185_v30, 16  ;;  %v1454_v56 = vshll.u32 %v3185_v30, 16  ;;  %v1538_v41 = vunpack.c.l.b16 %v1435_v31 }
  0x5b   : > { %v1416_v57 = vrot.slane %v1415_v12, 4  ;;  %v965_v12 = vor.u32 %v964_v23, %v961_v29 }
  0x5c   : > { %551 = vmatmul.bf16.gmra.mxu1 %v2017_v4  ;;  %1080 = vmatmul.bf16.gmra.mxu0 %v1012_v48  ;;  %v2561_v4 = vld [vmem:[%s3398_s1 + $0x208] sm:$0xff]  ;;  %v1453_v45 = vrot.slane %v1451_v40, 4  ;;  %v1456_v46 = vrot.slane %v1454_v56, 5  ;;  %v2487_v40 = vld [vmem:[%s2705_s9 + $0x34] sm:$0xf0] }
  0x5d   : > { %1229 = vmatpush.bf16.msra.mxu1 %v2535_v50  ;;  %1763 = vmatpush.bf16.msra.mxu0 %v3132_v10  ;;  %v2242_v50 = vrot.slane %v2886_v24, 9  ;;  %v1119_v24 = vsel %vm2770_vm5, %v2243_v51, %v1118_v2  ;;  %v979_v2 = vor.u32 %v978_v16, %v975_v15  ;;  %v966_v51 = vrot.slane %v965_v12, 4 }
  0x5e   : > { %860 = vmatmul.bf16.gmra.mxu3 %v2161_v13  ;;  %v1162_v7 = vunpack.c.l.b16 %v1119_v24  ;;  %v1013_v13 = vpack.c.b16 %v1008_v54, %v1007_v52  ;;  %2580 = vmatpush.bf16.msra.mxu2 %v3132_v10  ;;  %v1457_v0 = vor.u32 %v1456_v46, %v1453_v45  ;;  %v1122_v24 = vrot.slane %v3005_v42, 5 }
  0x5f   : > { %714 = vmatmul.bf16.gmra.mxu2 %v638_v20  ;;  %v1115_v3 = vsel %vm2770_vm5, %v2242_v50, %v1114_v33  ;;  %v1421_v20 = vsel %vm2760_vm4, %v1416_v57, %v1420_v58  ;;  %v1440_v33 = vshll.u32 %v3182_v27, 16  ;;  %v3202_v50 = vld [vmem:[%s2705_s9 + $0x2c] sm:$0x1]  ;;  %v980_v54 = vrot.slane %v979_v2, 4 }
  0x60   : > { %v1161_v48 = vunpack.c.l.b16 %v1115_v3  ;;  %v1537_v37 = vunpack.c.l.b16 %v1421_v20  ;;  %v984_v57 = vrot.slane %v982_v21, 5  ;;  %v1460_v1 = vshll.u32 %v3202_v50, 16 }
  0x61   : > { %1230 = vmatpush.bf16.msra.mxu1 %v2534_v11  ;;  %1764 = vmatpush.bf16.msra.mxu0 %v3150_v60  ;;  %v3171_v11 = vld [vmem:[%s2705_s9 + $0x3c] sm:$0x1]  ;;  %v1442_v36 = vrot.slane %v1440_v33, 5  ;;  %v2244_v3 = vrot.slane %v2959_v18, 9  ;;  %v1458_v18 = vrot.slane %v1457_v0, 4  ;;  %v2245_v15 = vrot.slane %v2962_v25, 9 }
  0x62   : > { %v3179_v22 = vpack.c.b16 %v1162_v7, %v1161_v48  ;;  %v968_v35 = vshll.u32 %v3171_v11, 16  ;;  %2581 = vmatpush.bf16.msra.mxu2 %v3150_v60  ;;  %v1545_v10 = vpack.c.b16 %v1538_v41, %v1537_v37  ;;  %v985_v60 = vsel %vm2760_vm4, %v980_v54, %v984_v57  ;;  %v2024_v33 = vld [vmem:[%s2705_s9 + $0x30] sm:$0xf]  ;;  %v2541_v37 = vld [vmem:[%s2705_s9 + $0x24] sm:$0xf0] }
  0x63   : > { %v1443_v58 = vor.u32 %v1442_v36, %v1439_v26  ;;  %v1448_v48 = vrot.slane %v1446_v61, 5  ;;  %v1123_v7 = vsel %vm2770_vm5, %v2244_v3, %v1122_v24  ;;  %v1462_v42 = vrot.slane %v1460_v1, 5  ;;  %v2336_v36 = vld [vmem:[%s2705_s9 + $0x20] sm:$0xf] }
  0x64   : > { %v970_v52 = vrot.slane %v968_v35, 5  ;;  %v1126_v16 = vrot.slane %v3013_v49, 5  ;;  %v1010_v31 = vunpack.c.l.b16 %v985_v60  ;;  %v3230_v49 = vld [vmem:[%s2705_s9 + $0x30] sm:$0xf]  ;;  %v1652_v26 = vrot.slane %v3117_v6, 5 }
  0x65   : > { %1231 = vmatpush.bf16.msra.mxu1 %v2533_v9  ;;  %v2332_v9 = vld [vmem:[%s2705_s9 + $0x10] sm:$0xf]  ;;  %1765 = vmatpush.bf16.msra.mxu0 %v2561_v4  ;;  %v1444_v23 = vrot.slane %v1443_v58, 4  ;;  %v1463_v25 = vsel %vm2760_vm4, %v1458_v18, %v1462_v42  ;;  %v1465_v35 = vshrl.u32 %v3230_v49, 16  ;;  %v1468_v56 = vshll.u32 %v3230_v49, 16 }
  0x66   : > { %v971_v29 = vsel %vm2760_vm4, %v966_v51, %v970_v52  ;;  %2582 = vmatpush.bf16.msra.mxu2 %v2561_v4  ;;  %v1127_v32 = vsel %vm2770_vm5, %v2245_v15, %v1126_v16  ;;  %v1540_v46 = vunpack.c.l.b16 %v1463_v25  ;;  %v2427_v51 = vrot.slane %v3101_v63, 9 }
  0x67   : > { %v1009_v20 = vunpack.c.l.b16 %v971_v29  ;;  %v1164_v4 = vunpack.c.l.b16 %v1127_v32  ;;  %v1467_v52 = vrot.slane %v1465_v35, 4  ;;  %v1470_v54 = vrot.slane %v1468_v56, 5 }
  0x68   : > { %v2337_v61 = vor.u32 %v2541_v37, %v2336_v36  ;;  %v1653_v1 = vsel %vm2770_vm5, %v2427_v51, %v1652_v26  ;;  %v2246_v32 = vrot.slane %v3025_v5, 9  ;;  %v2311_v37 = vld [vmem:[%s2705_s9 + $0x44] sm:$0x1] }
  0x69   : > { %1232 = vmatpush.bf16.msra.mxu1 %v2532_v47  ;;  %v2333_v47 = vor.u32 %v2540_v53, %v2332_v9  ;;  %1766 = vmatpush.bf16.msra.mxu0 %v2560_v62  ;;  %v1449_v9 = vsel %vm2760_vm4, %v1444_v23, %v1448_v48  ;;  %v3233_v53 = vld [vmem:[%s2705_s9 + $0x38] sm:$0xf]  ;;  %v1014_v21 = vpack.c.b16 %v1010_v31, %v1009_v20  ;;  %v1696_v60 = vunpack.c.l.b16 %v1653_v1  ;;  %v3266_v20 = vld [vmem:[%s2705_s9 + $0x48] sm:$0xf]  ;;  %v2340_v31 = vld [vmem:[%s2705_s9 + $0x30] sm:$0xf] }
  0x6a   : > { %2583 = vmatpush.bf16.msra.mxu2 %v2560_v62  ;;  %v1479_v2 = vshrl.u32 %v3233_v53, 16  ;;  %v1482_v41 = vshll.u32 %v3233_v53, 16  ;;  %v1539_v45 = vunpack.c.l.b16 %v1449_v9  ;;  %v3250_v62 = vld [vmem:[%s2705_s9 + $0x3c] sm:$0x1]  ;;  %v1507_v35 = vshrl.u32 %v3266_v20, 16 }
  0x6b   : > { %v1488_v24 = vshll.u32 %v3250_v62, 16  ;;  %v1510_v56 = vshll.u32 %v3266_v20, 16 }
  0x6c   : > { %556 = vmatmul.bf16.gmra.mxu1 %v2021_v17  ;;  %1085 = vmatmul.bf16.gmra.mxu0 %v1013_v13  ;;  %v1163_v17 = vunpack.c.l.b16 %v1123_v7  ;;  %v1648_v13 = vrot.slane %v3114_v28, 5  ;;  %v2025_v28 = vor.u32 %v2487_v40, %v2024_v33  ;;  %v1481_v57 = vrot.slane %v1479_v2, 4 }
  0x6d   : > { %v1484_v58 = vrot.slane %v1482_v41, 5  ;;  %v1546_v6 = vpack.c.b16 %v1540_v46, %v1539_v45  ;;  %v1490_v18 = vrot.slane %v1488_v24, 5  ;;  %v1130_v33 = vrot.slane %v3074_v38, 5  ;;  %v2313_v41 = vld [vmem:[%s2705_s9 + $0x4c] sm:$0x1] }
  0x6e   : > { %1609 = vmatmul.bf16.vlgmr.msrb.gmra.mxu3 %v1545_v10  ;;  %v3235_v12 = vpack.c.b16 %v1164_v4, %v1163_v17  ;;  %v3247_v10 = vld [vmem:[%s2705_s9 + $0x34] sm:$0x1]  ;;  %v3263_v17 = vld [vmem:[%s2705_s9 + $0x40] sm:$0xf]  ;;  %v2247_v40 = vrot.slane %v3034_v14, 9  ;;  %v1134_v4 = vrot.slane %v3077_v39, 5 }
  0x6f   : > { %1379 = vmatmul.bf16.vlgmr.msrb.gmra.mxu2 %v2333_v47  ;;  %v2426_v47 = vrot.slane %v3097_v59, 9  ;;  %v1471_v59 = vor.u32 %v1470_v54, %v1467_v52  ;;  %v1474_v63 = vshll.u32 %v3247_v10, 16  ;;  %v1485_v3 = vor.u32 %v1484_v58, %v1481_v57 }
  0x70   : > { %v1493_v9 = vshrl.u32 %v3263_v17, 16  ;;  %v1496_v25 = vshll.u32 %v3263_v17, 16  ;;  %v1131_v5 = vsel %vm2770_vm5, %v2246_v32, %v1130_v33  ;;  %v1135_v14 = vsel %vm2770_vm5, %v2247_v40, %v1134_v4 }
  0x71   : > { %v1649_v0 = vsel %vm2770_vm5, %v2426_v47, %v1648_v13  ;;  %v1472_v23 = vrot.slane %v1471_v59, 4  ;;  %v1476_v48 = vrot.slane %v1474_v63, 5  ;;  %v1486_v7 = vrot.slane %v1485_v3, 4  ;;  %v2542_v13 = vld [vmem:[%s2705_s9 + $0x34] sm:$0xf0] }
  0x72   : > { %v1695_v29 = vunpack.c.l.b16 %v1649_v0  ;;  %v1165_v38 = vunpack.c.l.b16 %v1131_v5  ;;  %v1166_v39 = vunpack.c.l.b16 %v1135_v14  ;;  %v1498_v26 = vrot.slane %v1496_v25, 5 }
  0x73   : > { %v1477_v15 = vsel %vm2760_vm4, %v1472_v23, %v1476_v48  ;;  %v1491_v16 = vsel %vm2760_vm4, %v1486_v7, %v1490_v18  ;;  %v2341_v36 = vor.u32 %v2542_v13, %v2340_v31  ;;  %v1509_v45 = vrot.slane %v1507_v35, 4  ;;  %v2344_v18 = vld [vmem:[%s2705_s9 + $0x40] sm:$0xf] }
  0x74   : > { %v1703_v42 = vpack.c.b16 %v1696_v60, %v1695_v29  ;;  %v1541_v2 = vunpack.c.l.b16 %v1477_v15  ;;  %v1512_v46 = vrot.slane %v1510_v56, 5  ;;  %v2428_v47 = vrot.slane %v3182_v27, 9 }
  0x75   : > { %v3285_v51 = vpack.c.b16 %v1166_v39, %v1165_v38  ;;  %v1656_v54 = vrot.slane %v3199_v43, 5  ;;  %v2429_v57 = vrot.slane %v3185_v30, 9  ;;  %v1660_v58 = vrot.slane %v3202_v50, 5 }
  0x76   : > { %v1513_v0 = vor.u32 %v1512_v46, %v1509_v45  ;;  %v1516_v1 = vshll.u32 %v2313_v41, 16  ;;  %v2248_v60 = vrot.slane %v3121_v34, 9  ;;  %v1138_v23 = vrot.slane %v3171_v11, 5 }
  0x77   : > { %v1657_v27 = vsel %vm2770_vm5, %v2428_v47, %v1656_v54  ;;  %v1661_v43 = vsel %vm2770_vm5, %v2429_v57, %v1660_v58  ;;  %v2249_v48 = vrot.slane %v3124_v8, 9  ;;  %v1142_v7 = vrot.slane %v3175_v19, 5 }
  0x78   : > { %v1514_v50 = vrot.slane %v1513_v0, 4  ;;  %v1518_v63 = vrot.slane %v1516_v1, 5  ;;  %v1698_v3 = vunpack.c.l.b16 %v1661_v43  ;;  %v2430_v11 = vrot.slane %v3230_v49, 9 }
  0x79   : > { %v1143_v31 = vsel %vm2770_vm5, %v2249_v48, %v1142_v7  ;;  %v1664_v19 = vrot.slane %v3247_v10, 5  ;;  %v2431_v13 = vrot.slane %v3233_v53, 9  ;;  %v1672_v25 = vrot.slane %v2311_v37, 5 }
  0x7a   : > { %v1519_v29 = vsel %vm2760_vm4, %v1514_v50, %v1518_v63  ;;  %v1168_v40 = vunpack.c.l.b16 %v1143_v31  ;;  %v1676_v35 = vrot.slane %v2313_v41, 5  ;;  %v2432_v56 = vrot.slane %v3263_v17, 9 }
  0x7b   : > { %v1544_v44 = vunpack.c.l.b16 %v1519_v29 }
  0x7c   : > { %561 = vmatmul.bf16.gmra.mxu1 %v2025_v28  ;;  %1090 = vmatmul.bf16.gmra.mxu0 %v1014_v21  ;;  %v1542_v28 = vunpack.c.l.b16 %v1491_v16  ;;  %v1495_v21 = vrot.slane %v1493_v9, 4  ;;  %v1139_v16 = vsel %vm2770_vm5, %v2248_v60, %v1138_v23  ;;  %v1668_v9 = vrot.slane %v3250_v62, 5 }
  0x7d   : > { %v1167_v33 = vunpack.c.l.b16 %v1139_v16  ;;  %v1673_v49 = vsel %vm2770_vm5, %v2432_v56, %v1672_v25 }
  0x7e   : > { %1614 = vmatmul.bf16.gmra.mxu3 %v1546_v6  ;;  %v1547_v52 = vpack.c.b16 %v1542_v28, %v1541_v2  ;;  %v1502_v6 = vshll.u32 %v2311_v37, 16  ;;  %v2433_v2 = vrot.slane %v3266_v20, 9  ;;  %v1669_v28 = vsel %vm2770_vm5, %v2431_v13, %v1668_v9 }
  0x7f   : > { %1384 = vmatmul.bf16.gmra.mxu2 %v2337_v61  ;;  %v1499_v61 = vor.u32 %v1498_v26, %v1495_v21  ;;  %v1172_v4 = vpack.c.b16 %v1168_v40, %v1167_v33  ;;  %v1700_v62 = vunpack.c.l.b16 %v1669_v28  ;;  %v1701_v5 = vunpack.c.l.b16 %v1673_v49 }
  0x80   : > { %v1504_v59 = vrot.slane %v1502_v6, 5  ;;  %v1677_v53 = vsel %vm2770_vm5, %v2433_v2, %v1676_v35 }
  0x81   : > { %v1500_v30 = vrot.slane %v1499_v61, 4  ;;  %v1702_v14 = vunpack.c.l.b16 %v1677_v53 }
  0x83   : > { %v1505_v24 = vsel %vm2760_vm4, %v1500_v30, %v1504_v59  ;;  %v1706_v39 = vpack.c.b16 %v1702_v14, %v1701_v5 }
  0x84   : > { %v1543_v32 = vunpack.c.l.b16 %v1505_v24 }
  0x86   : > { %v1548_v8 = vpack.c.b16 %v1544_v44, %v1543_v32 }
  0x8c   : > { %1233 = vmatmul.bf16.vlgmr.msra.gmra.mxu1 %v3179_v22  ;;  %1767 = vmatmul.bf16.vlgmr.msra.gmra.mxu0 %v1703_v42  ;;  %v1697_v22 = vunpack.c.l.b16 %v1657_v27  ;;  %v2543_v42 = vld [vmem:[%s2705_s9 + $0x44] sm:$0xf0]  ;;  %s1959_s9 = sshll.u32 %s2623_s12, 3 }
  0x8d   : > { %v2345_v34 = vor.u32 %v2543_v42, %v2344_v18  ;;  %p193_p5 = scmp.lt.s32.totalorder %s1959_s9, 15 }
  0x8e   : > { %1619 = vmatmul.bf16.gmra.mxu3 %v1547_v52  ;;  %v1704_v15 = vpack.c.b16 %v1698_v3, %v1697_v22 }
  0x8f   : > { %1389 = vmatmul.bf16.gmra.mxu2 %v2341_v36  ;;  %s3410_s9 = smov (!%p193_p5, %s1959_s9), 15 }
  0x90   : > { %s1960_s16 = sshll.u32 %s3410_s9, 3 }
  0x91   : > { %s3359_s12 = scalar_lea.vmem %s3399_s2, %s1960_s16 }
  0x9c   : > { %1238 = vmatmul.bf16.gmra.mxu1 %v3235_v12  ;;  %1772 = vmatmul.bf16.gmra.mxu0 %v1704_v15  ;;  %v1665_v12 = vsel %vm2770_vm5, %v2430_v11, %v1664_v19 }
  0x9d   : > { %v1699_v10 = vunpack.c.l.b16 %v1665_v12 }
  0x9e   : > { %1624 = vmatmul.bf16.gmra.mxu3 %v1548_v8 }
  0x9f   : > { %1394 = vmatmul.bf16.gmra.mxu2 %v2345_v34  ;;  %v1705_v17 = vpack.c.b16 %v1700_v62, %v1699_v10 }
  0xa9   : > { %v456_v38 = vpop.f32.mrf.mxu1  ;;  %v446_v20 = vpop.f32.mrf.mxu0 }
  0xac   : > { %1243 = vmatmul.bf16.gmra.mxu1 %v3285_v51  ;;  %1777 = vmatmul.bf16.gmra.mxu0 %v1705_v17 }
  0xaf   : > { %1782 = vmatmul.bf16.vlgmr.msra.gmra.mxu2 %v1706_v39 }
  0xb1   : > { %v458_v26 = vpop.f32.mrf.mxu1  ;;  %v448_v36 = vpop.f32.mrf.mxu0 }
  0xb2   : > { %v700_v21 = vpop.f32.mrf.mxu2  ;;  %v846_v37 = vpop.f32.mrf.mxu3 }
  0xb9   : > { %v461_v45 = vpop.f32.mrf.mxu1  ;;  %v451_v55 = vpop.f32.mrf.mxu0 }
  0xba   : > { %v702_v41 = vpop.f32.mrf.mxu2  ;;  %v848_v46 = vpop.f32.mrf.mxu3 }
  0xbc   : > { %1248 = vmatmul.bf16.gmra.mxu1 %v1172_v4 }
  0xc1   : > { %v463_v52 = vpop.f32.mrf.mxu1  ;;  %v453_v54 = vpop.f32.mrf.mxu0 }
  0xc2   : > { %v705_v47 = vpop.f32.mrf.mxu2  ;;  %v3325_v57 = vpop.f32.mrf.mxu3 }
  0xc9   : > { %v547_v61 = vpop.f32.mrf.mxu1  ;;  %v1076_v6 = vpop.f32.mrf.mxu0 }
  0xca   : > { %v707_v58 = vpop.f32.mrf.mxu2  ;;  %v548_v51 = vadd.f32 %v547_v61, %v446_v20  ;;  %v3327_v1 = vpop.f32.mrf.mxu3 }
  0xcc   : > { %v720_v0 = vadd.f32 %v700_v21, %v548_v51 }
  0xce   : > { %v866_v62 = vadd.f32 %v846_v37, %v720_v0 }
  0xd0   : > { %v1096_v14 = vadd.f32 %v1076_v6, %v866_v62 }
  0xd1   : > { %v549_v43 = vpop.f32.mrf.mxu1  ;;  %v1078_v30 = vpop.f32.mrf.mxu0 }
  0xd2   : > { %v710_v27 = vpop.f32.mrf.mxu2  ;;  %v550_v59 = vadd.f32 %v549_v43, %v448_v36  ;;  %v3329_v63 = vpop.f32.mrf.mxu3 }
  0xd4   : > { %v721_v50 = vadd.f32 %v702_v41, %v550_v59 }
  0xd9   : > { %v552_v3 = vpop.f32.mrf.mxu1  ;;  %v1081_v24 = vpop.f32.mrf.mxu0 }
  0xda   : > { %v712_v22 = vpop.f32.mrf.mxu2  ;;  %v553_v29 = vadd.f32 %v552_v3, %v451_v55  ;;  %v3331_v48 = vpop.f32.mrf.mxu3 }
  0xdc   : > { %v722_v60 = vadd.f32 %v705_v47, %v553_v29 }
  0xe1   : > { %v554_v7 = vpop.f32.mrf.mxu1  ;;  %v3333_v18 = vpop.f32.mrf.mxu0 }
  0xe2   : > { %v715_v23 = vpop.f32.mrf.mxu2  ;;  %v555_v42 = vadd.f32 %v554_v7, %v453_v54  ;;  %v3337_v33 = vpop.f32.mrf.mxu3 }
  0xe4   : > { %v723_v15 = vadd.f32 %v707_v58, %v555_v42  ;;  %v868_v58 = vadd.f32 %v3325_v57, %v722_v60 }
  0xe6   : > { %v1098_v51 = vadd.f32 %v1081_v24, %v868_v58  ;;  %v869_v3 = vadd.f32 %v3327_v1, %v723_v15 }
  0xe8   : > { %v1099_v60 = vadd.f32 %v3333_v18, %v869_v3 }
  0xe9   : > { %v557_v31 = vpop.f32.mrf.mxu1  ;;  %v3335_v32 = vpop.f32.mrf.mxu0 }
  0xea   : > { %v717_v16 = vpop.f32.mrf.mxu2  ;;  %v558_v44 = vadd.f32 %v557_v31, %v456_v38  ;;  %v3345_v13 = vpop.f32.mrf.mxu3 }
  0xec   : > { %v3339_v40 = vadd.f32 %v710_v27, %v558_v44 }
  0xf1   : > { %v559_v4 = vpop.f32.mrf.mxu1  ;;  %v3341_v8 = vpop.f32.mrf.mxu0 }
  0xf2   : > { %v1380_v34 = vpop.f32.mrf.mxu2  ;;  %v560_v11 = vadd.f32 %v559_v4, %v458_v26  ;;  %v1610_v12 = vpop.f32.mrf.mxu3  ;;  %v867_v26 = vadd.f32 %v848_v46, %v721_v50 }
  0xf4   : > { %v3343_v19 = vadd.f32 %v712_v22, %v560_v11  ;;  %v1097_v37 = vadd.f32 %v1078_v30, %v867_v26  ;;  %v870_v11 = vadd.f32 %v3329_v63, %v3339_v40 }
  0xf9   : > { %v562_v25 = vpop.f32.mrf.mxu1  ;;  %v3347_v35 = vpop.f32.mrf.mxu0 }
  0xfa   : > { %v1382_v9 = vpop.f32.mrf.mxu2  ;;  %v563_v56 = vadd.f32 %v562_v25, %v461_v45  ;;  %v1612_v17 = vpop.f32.mrf.mxu3 }
  0xfc   : > { %v3349_v2 = vadd.f32 %v715_v23, %v563_v56  ;;  %v1100_v56 = vadd.f32 %v3335_v32, %v870_v11 }
 0x101   : > { %v564_v49 = vpop.f32.mrf.mxu1  ;;  %v3351_v53 = vpop.f32.mrf.mxu0 }
 0x102   : > { %v1385_v28 = vpop.f32.mrf.mxu2  ;;  %v565_v10 = vadd.f32 %v564_v49, %v463_v52  ;;  %v1615_v54 = vpop.f32.mrf.mxu3 }
 0x104   : > { %v3354_v5 = vadd.f32 %v717_v16, %v565_v10 }
 0x109   : > { %v1234_v38 = vpop.f32.mrf.mxu1  ;;  %v1768_v20 = vpop.f32.mrf.mxu0 }
 0x10a   : > { %v1254_v39 = vadd.f32 %v1234_v38, %v1096_v14  ;;  %v1387_v21 = vpop.f32.mrf.mxu2  ;;  %v1617_v7 = vpop.f32.mrf.mxu3 }
 0x10c   : > { %v1400_v36 = vadd.f32 %v1380_v34, %v1254_v39 }
 0x10e   : > { %v1630_v41 = vadd.f32 %v1610_v12, %v1400_v36 }
 0x110   : > { %v1788_v45 = vadd.f32 %v1768_v20, %v1630_v41 }
 0x111   : > { %v1236_v55 = vpop.f32.mrf.mxu1  ;;  %v1770_v47 = vpop.f32.mrf.mxu0 }
 0x112   : > { %1796 = vst [vmem:[%s3359_s12] sm:$0xff] %v1788_v45  ;;  %v1255_v52 = vadd.f32 %v1236_v55, %v1097_v37  ;;  %v1390_v61 = vpop.f32.mrf.mxu2  ;;  %v1817_v59 = vmul.f32 %v1788_v45, %v1788_v45  ;;  %v1620_v25 = vpop.f32.mrf.mxu3 }
 0x114   : > { %v1401_v46 = vadd.f32 %v1382_v9, %v1255_v52 }
 0x116   : > { %v1631_v6 = vadd.f32 %v1612_v17, %v1401_v46  ;;  %v871_v17 = vadd.f32 %v3331_v48, %v3343_v19 }
 0x118   : > { %v1789_v0 = vadd.f32 %v1770_v47, %v1631_v6  ;;  %v1101_v20 = vadd.f32 %v3341_v8, %v871_v17 }
 0x119   : > { %v1239_v27 = vpop.f32.mrf.mxu1  ;;  %v1773_v43 = vpop.f32.mrf.mxu0 }
 0x11a   : > { %1797 = vst [vmem:[%s3359_s12 + $0x8] sm:$0xff] %v1789_v0  ;;  %v1804_v30 = vadd.f32 %v1789_v0, %v1788_v45  ;;  %v1818_v50 = vmul.f32 %v1789_v0, %v1789_v0  ;;  %v1256_v22 = vadd.f32 %v1239_v27, %v1098_v51  ;;  %v1392_v57 = vpop.f32.mrf.mxu2  ;;  %v1622_v32 = vpop.f32.mrf.mxu3  ;;  %v872_v45 = vadd.f32 %v3337_v33, %v3349_v2 }
 0x11b   : > { %v873_v51 = vadd.f32 %v3345_v13, %v3354_v5 }
 0x11c   : > { %v1825_v29 = vadd.f32 %v1818_v50, %v1817_v59  ;;  %v1402_v23 = vadd.f32 %v1385_v28, %v1256_v22  ;;  %v1102_v52 = vadd.f32 %v3347_v35, %v872_v45 }
 0x11e   : > { %v1632_v42 = vadd.f32 %v1615_v54, %v1402_v23 }
 0x120   : > { %v1790_v16 = vadd.f32 %v1773_v43, %v1632_v42  ;;  %v1103_v43 = vadd.f32 %v3351_v53, %v873_v51 }
 0x121   : > { %v1241_v24 = vpop.f32.mrf.mxu1  ;;  %v1775_v31 = vpop.f32.mrf.mxu0 }
 0x122   : > { %1798 = vst [vmem:[%s3359_s12 + $0x10] sm:$0xff] %v1790_v16  ;;  %v1805_v44 = vadd.f32 %v1804_v30, %v1790_v16  ;;  %v1819_v34 = vmul.f32 %v1790_v16, %v1790_v16  ;;  %v1257_v4 = vadd.f32 %v1241_v24, %v1099_v60  ;;  %v1395_v18 = vpop.f32.mrf.mxu2  ;;  %v1625_v6 = vpop.f32.mrf.mxu3 }
 0x124   : > { %v1826_v9 = vadd.f32 %v1825_v29, %v1819_v34  ;;  %v1403_v1 = vadd.f32 %v1387_v21, %v1257_v4 }
 0x126   : > { %v1633_v15 = vadd.f32 %v1617_v7, %v1403_v1 }
 0x128   : > { %v1791_v12 = vadd.f32 %v1775_v31, %v1633_v15 }
 0x129   : > { %v1244_v28 = vpop.f32.mrf.mxu1  ;;  %v1778_v14 = vpop.f32.mrf.mxu0 }
 0x12a   : > { %1799 = vst [vmem:[%s3359_s12 + $0x18] sm:$0xff] %v1791_v12  ;;  %v1806_v49 = vadd.f32 %v1805_v44, %v1791_v12  ;;  %v1820_v10 = vmul.f32 %v1791_v12, %v1791_v12  ;;  %v1258_v62 = vadd.f32 %v1244_v28, %v1100_v56  ;;  %v1397_v37 = vpop.f32.mrf.mxu2  ;;  %v1627_v23 = vpop.f32.mrf.mxu3 }
 0x12c   : > { %v1827_v38 = vadd.f32 %v1826_v9, %v1820_v10  ;;  %v1404_v63 = vadd.f32 %v1390_v61, %v1258_v62 }
 0x12e   : > { %v1634_v40 = vadd.f32 %v1620_v25, %v1404_v63 }
 0x130   : > { %v1792_v39 = vadd.f32 %v1778_v14, %v1634_v40 }
 0x131   : > { %v1246_v21 = vpop.f32.mrf.mxu1  ;;  %v1780_v48 = vpop.f32.mrf.mxu0 }
 0x132   : > { %1800 = vst [vmem:[%s3359_s12 + $0x20] sm:$0xff] %v1792_v39  ;;  %v1807_v26 = vadd.f32 %v1806_v49, %v1792_v39  ;;  %v1821_v36 = vmul.f32 %v1792_v39, %v1792_v39  ;;  %v1259_v41 = vadd.f32 %v1246_v21, %v1101_v20  ;;  %v1783_v33 = vpop.f32.mrf.mxu2 }
 0x134   : > { %v1828_v55 = vadd.f32 %v1827_v38, %v1821_v36  ;;  %v1405_v47 = vadd.f32 %v1392_v57, %v1259_v41 }
 0x136   : > { %v1635_v19 = vadd.f32 %v1622_v32, %v1405_v47 }
 0x138   : > { %v1793_v8 = vadd.f32 %v1780_v48, %v1635_v19 }
 0x139   : > { %v1249_v54 = vpop.f32.mrf.mxu1 }
 0x13a   : > { %1801 = vst [vmem:[%s3359_s12 + $0x28] sm:$0xff] %v1793_v8  ;;  %v1808_v58 = vadd.f32 %v1807_v26, %v1793_v8  ;;  %v1822_v46 = vmul.f32 %v1793_v8, %v1793_v8  ;;  %v1260_v61 = vadd.f32 %v1249_v54, %v1102_v52  ;;  %v1785_v42 = vpop.f32.mrf.mxu2 }
 0x13c   : > { %v1829_v0 = vadd.f32 %v1828_v55, %v1822_v46  ;;  %v1406_v27 = vadd.f32 %v1395_v18, %v1260_v61 }
 0x13e   : > { %v1636_v2 = vadd.f32 %v1625_v6, %v1406_v27 }
 0x140   : > { %v1794_v59 = vadd.f32 %v1783_v33, %v1636_v2 }
 0x141   : > { %v1251_v35 = vpop.f32.mrf.mxu1 }
 0x142   : > { %1802 = vst [vmem:[%s3359_s12 + $0x30] sm:$0xff] %v1794_v59  ;;  %v1809_v30 = vadd.f32 %v1808_v58, %v1794_v59  ;;  %v1823_v50 = vmul.f32 %v1794_v59, %v1794_v59  ;;  %v1261_v22 = vadd.f32 %v1251_v35, %v1103_v43 }
 0x144   : > { %v1830_v3 = vadd.f32 %v1829_v0, %v1823_v50  ;;  %v1407_v29 = vadd.f32 %v1397_v37, %v1261_v22 }
 0x146   : > { %v1637_v7 = vadd.f32 %v1627_v23, %v1407_v29 }
 0x148   : > { %v1795_v13 = vadd.f32 %v1785_v42, %v1637_v7 }
 0x14a   : > { %1803 = vst [vmem:[%s3359_s12 + $0x38] sm:$0xff] %v1795_v13  ;;  %v1810_v5 = vadd.f32 %v1809_v30, %v1795_v13  ;;  %v1824_v57 = vmul.f32 %v1795_v13, %v1795_v13 }
 0x14c   : > { %v1811_v60 = vrot.slane %v1810_v5, 4  ;;  %v1831_v16 = vadd.f32 %v1830_v3, %v1824_v57 }
 0x14e   : > { %v1812_v24 = vadd.f32 %v1811_v60, %v1810_v5  ;;  %v1832_v53 = vrot.slane %v1831_v16, 4 }
 0x150   : > { %v1813_v31 = vrot.slane %v1812_v24, 2  ;;  %v1833_v44 = vadd.f32 %v1832_v53, %v1831_v16 }
 0x152   : > { %v1814_v34 = vadd.f32 %v1813_v31, %v1812_v24  ;;  %v1834_v4 = vrot.slane %v1833_v44, 2 }
 0x154   : > { %v1815_v11 = vrot.slane %v1814_v34, 1  ;;  %v1835_v9 = vadd.f32 %v1834_v4, %v1833_v44 }
 0x156   : > { %v1836_v1 = vrot.slane %v1835_v9, 1  ;;  %v1816_v15 = vadd.f32 %v1815_v11, %v1814_v34 }
 0x158   : > { %v1837_v25 = vadd.f32 %v1836_v1, %v1835_v9 }
 0x15a   : > { %v1839_v56 = vsel %vm1838_vm6, %v1816_v15, %v1837_v25 }
 0x15b   : > { %1840 = vst [vmem:[%s203_s23] sm:$0x3] %v1839_v56 }
 0x15c PF: > { %s14_s14 = sadd.s32 1, %s2631_s14   ;;  %s3405_s12 = smov %s2627_s13 }
 0x15d   : > { %p11_p6 = scmp.ge.s32.totalorder %s14_s14, 4   ;;  %s3406_s13 = smov %s3408_s15 }
 0x15f   :  { %13 = sbr.rel (!%p11_p6) target bundleno = 2 (0x2), region = 81 }

// kernel: resnet_layer_forward.10
= control target key start
LH: loop header
LB: loop body
LE: loop exit
PB: predicated region body
PF: predicated region fallthrough
CT: control target
= control target key end

     0   :  { %s2953_s18 = smov 0   ;;  %s2955_s19 = smov 0   ;;  %s3725_s0 = inlined_call_operand.vmem [shape: bf16[2,10,10,128], index: 0, kind: input, shape index: {}]   ;;  %s3726_s1 = inlined_call_operand.vmem [shape: bf16[9,128,128], index: 1, kind: input, shape index: {}]   ;;  %s3727_s2 = inlined_call_operand.vmem [shape: bf16[128,128], index: 2, kind: input, shape index: {}]   ;;  %s3728_s3 = inlined_call_operand.vmem [shape: bf16[128,128], index: 3, kind: input, shape index: {}]   ;;  %s3729_s4 = inlined_call_operand.vmem [shape: f32[128,128], index: 4, kind: output, shape index: {0}]   ;;  %s3730_s5 = inlined_call_operand.vmem [shape: f32[2,2,128], index: 5, kind: output, shape index: {1}]  }
   0x1   :  { %s2957_s20 = smov 0  }
   0x2 LB: > { %s28_s21 = sadd.s32 1, %s2917_s19  ;;  %p2185_p0 = scmp.ge.s32.totalorder %s2921_s20, 1  ;;  %s2921_s20 = sphi %s2957_s20, %s16_s20   ;;  %s2917_s19 = sphi %s2955_s19, %s3737_s19   ;;  %s2913_s18 = sphi %s2953_s18, %s3736_s18  }
   0x3   : > { %p30_p1 = scmp.ge.s32.totalorder %s28_s21, 2  ;;  %p221_p2 = scmp.lt.s32.totalorder %s2921_s20, 3 }
   0x5   : > { %s3739_s21 = smov (%p30_p1, %s28_s21), 0  ;;  %p222_p3 = pnand %p2185_p0, %p221_p2 }
   0x6   : > { %p261_p4 = scmp.lt.s32.totalorder (!%p222_p3), %s2913_s18, 1  ;;  %s2187_s22 = sshll.u32 (!%p222_p3), %s2913_s18, 3 }
   0x7   : > { %225 = sbr.rel (%p222_p3) target bundleno = 356 (0x164), region = 36  ;;  %p3049_p5 = scmp.lt.s32.totalorder (!%p222_p3), %s2187_s22, 15 }
   0xc   : > { %v2773_v0 = vld [vmem:[%s3728_s3 + $0x38] sm:$0xff]  ;;  %v2772_v2 = vld [vmem:[%s3728_s3 + $0x30] sm:$0xff]  ;;  %s2987_s30 = scalar_select %p261_p4, %s2913_s18, 1  ;;  %v2771_v4 = vld [vmem:[%s3728_s3 + $0x28] sm:$0xff]  ;;  %vm449_vm0 = vsmask.f32 3328 }
   0xd   : > { %v2793_v1 = vld [vmem:[%s3726_s1 + $0x78] sm:$0xff]  ;;  %2858 = vmatpush.bf16.msra.mxu2 %v2773_v0  ;;  %v2792_v3 = vld [vmem:[%s3726_s1 + $0x70] sm:$0xff]  ;;  %384 = vmatpush.bf16.msra.mxu0 %v2773_v0  ;;  %v2791_v5 = vld [vmem:[%s3726_s1 + $0x68] sm:$0xff]  ;;  %vm450_vm1 = vsmask.f32 7440  ;;  %s3741_s22 = smov (!%p3049_p5, %s2187_s22), 15 }
   0xe   : > { %2866 = vmatpush.bf16.msra.mxu3 %v2793_v1  ;;  %645 = vmatpush.bf16.msra.mxu1 %v2793_v1  ;;  %s2874_s6 = smul.u32 80, %s2987_s30  ;;  %v2770_v8 = vld [vmem:[%s3728_s3 + $0x20] sm:$0xff]  ;;  %v2769_v30 = vld [vmem:[%s3728_s3 + $0x18] sm:$0xff]  ;;  %v2768_v41 = vld [vmem:[%s3728_s3 + $0x10] sm:$0xff]  ;;  %s2188_s11 = sshll.u32 %s3741_s22, 2  ;;  %vm783_vm3 = vcmask 1042432  }
   0xf   : > { %v2790_v13 = vld [vmem:[%s3726_s1 + $0x60] sm:$0xff]  ;;  %v2789_v31 = vld [vmem:[%s3726_s1 + $0x58] sm:$0xff]  ;;  %v2788_v45 = vld [vmem:[%s3726_s1 + $0x50] sm:$0xff]  ;;  %s3115_s24 = scalar_lea.vmem %s3727_s2, %s2188_s11  ;;  %vm784_vm4 = vcmask 1046532   ;;  %vm2054_vm6 = vcmask 1040384  }
  0x10   : > { %s2999_s13 = scalar_lea.vmem %s3725_s0, %s2874_s6  ;;  %vm3062_vm2 = vmor %vm449_vm0, %vm450_vm1  ;;  %v2767_v59 = vld [vmem:[%s3728_s3 + $0x8] sm:$0xff] }
  0x11   : > { %2859 = vmatpush.bf16.msra.mxu2 %v2772_v2  ;;  %385 = vmatpush.bf16.msra.mxu0 %v2772_v2  ;;  %v3002_v6 = vld [vmem:[%s2999_s13 + $0x20] sm:$0xf]  ;;  %v3005_v7 = vld [vmem:[%s2999_s13 + $0x28] sm:$0xf]  ;;  %v3011_v9 = vld [vmem:[%s2999_s13 + $0x24] sm:$0x1] }
  0x12   : > { %2867 = vmatpush.bf16.msra.mxu3 %v2792_v3  ;;  %646 = vmatpush.bf16.msra.mxu1 %v2792_v3  ;;  %v509_v10 = vshrl.u32 %v3002_v6, 16  ;;  %v512_v11 = vshll.u32 %v3002_v6, 16  ;;  %v523_v12 = vshrl.u32 %v3005_v7, 16  ;;  %v3020_v14 = vld [vmem:[%s2999_s13 + $0x2c] sm:$0x1]  ;;  %v526_v15 = vshll.u32 %v3005_v7, 16  ;;  %vm3248_vm5 = vmor %vm783_vm3, %vm784_vm4 }
  0x13   : > { %v3024_v16 = vld [vmem:[%s2999_s13] sm:$0xf]  ;;  %v3028_v20 = vld [vmem:[%s2999_s13 + $0x8] sm:$0xf]  ;;  %v518_v21 = vshll.u32 %v3011_v9, 16  ;;  %v532_v33 = vshll.u32 %v3020_v14, 16 }
  0x14   : > { %v511_v17 = vrot.slane %v509_v10, 4  ;;  %v514_v18 = vrot.slane %v512_v11, 5  ;;  %v525_v19 = vrot.slane %v523_v12, 4  ;;  %v528_v22 = vrot.slane %v526_v15, 5  ;;  %v3034_v26 = vld [vmem:[%s2999_s13 + $0x4] sm:$0x1] }
  0x15   : > { %2860 = vmatpush.bf16.msra.mxu2 %v2771_v4  ;;  %386 = vmatpush.bf16.msra.mxu0 %v2771_v4  ;;  %v453_v23 = vshrl.u32 %v3024_v16, 16  ;;  %v456_v24 = vshll.u32 %v3024_v16, 16  ;;  %v3037_v27 = vld [vmem:[%s2999_s13 + $0xc] sm:$0x1]  ;;  %v467_v28 = vshrl.u32 %v3028_v20, 16  ;;  %v470_v29 = vshll.u32 %v3028_v20, 16 }
  0x16   : > { %2868 = vmatpush.bf16.msra.mxu3 %v2791_v5  ;;  %647 = vmatpush.bf16.msra.mxu1 %v2791_v5  ;;  %v515_v25 = vor.u32 %v514_v18, %v511_v17  ;;  %v529_v32 = vor.u32 %v528_v22, %v525_v19  ;;  %v462_v39 = vshll.u32 %v3034_v26, 16  ;;  %v476_v40 = vshll.u32 %v3037_v27, 16  ;;  %v3067_v49 = vld [vmem:[%s2999_s13 + $0x30] sm:$0xf]  ;;  %v3076_v50 = vld [vmem:[%s2999_s13 + $0x38] sm:$0xf] }
  0x17   : > { %v455_v34 = vrot.slane %v453_v23, 4  ;;  %v458_v35 = vrot.slane %v456_v24, 5  ;;  %v469_v36 = vrot.slane %v467_v28, 4  ;;  %v472_v37 = vrot.slane %v470_v29, 5  ;;  %v3079_v55 = vld [vmem:[%s2999_s13 + $0x10] sm:$0xf] }
  0x18   : > { %v516_v42 = vrot.slane %v515_v25, 4  ;;  %v520_v43 = vrot.slane %v518_v21, 5  ;;  %v530_v47 = vrot.slane %v529_v32, 4  ;;  %v534_v48 = vrot.slane %v532_v33, 5  ;;  %v3085_v58 = vld [vmem:[%s2999_s13 + $0x18] sm:$0xf] }
  0x19   : > { %2861 = vmatpush.bf16.msra.mxu2 %v2770_v8  ;;  %387 = vmatpush.bf16.msra.mxu0 %v2770_v8  ;;  %v459_v38 = vor.u32 %v458_v35, %v455_v34  ;;  %v473_v44 = vor.u32 %v472_v37, %v469_v36  ;;  %v464_v52 = vrot.slane %v462_v39, 5  ;;  %v478_v54 = vrot.slane %v476_v40, 5  ;;  %v2787_v60 = vld [vmem:[%s3726_s1 + $0x48] sm:$0xff]  ;;  %v2766_v8 = vld [vmem:[%s3728_s3] sm:$0xff]  ;;  %v2785_v15 = vld [vmem:[%s3726_s1 + $0x38] sm:$0xff] }
  0x1a   : > { %2869 = vmatpush.bf16.msra.mxu3 %v2790_v13  ;;  %648 = vmatpush.bf16.msra.mxu1 %v2790_v13  ;;  %v521_v56 = vsel %vm3062_vm2, %v516_v42, %v520_v43  ;;  %v537_v57 = vshrl.u32 %v3067_v49, 16  ;;  %v535_v61 = vsel %vm3062_vm2, %v530_v47, %v534_v48  ;;  %v540_v62 = vshll.u32 %v3067_v49, 16  ;;  %v2786_v13 = vld [vmem:[%s3726_s1 + $0x40] sm:$0xff]  ;;  %v3122_v24 = vld [vmem:[%s2999_s13 + $0x34] sm:$0x1]  ;;  %v2813_v43 = vld [vmem:[%s3726_s1 + $0xf8] sm:$0xff] }
  0x1b   : > { %v460_v51 = vrot.slane %v459_v38, 4  ;;  %v474_v53 = vrot.slane %v473_v44, 4  ;;  %v551_v63 = vshrl.u32 %v3076_v50, 16  ;;  %v554_v0 = vshll.u32 %v3076_v50, 16  ;;  %v3125_v25 = vld [vmem:[%s2999_s13 + $0x3c] sm:$0x1] }
  0x1c   : > { %v481_v1 = vshrl.u32 %v3079_v55, 16  ;;  %v484_v2 = vshll.u32 %v3079_v55, 16  ;;  %v495_v5 = vshrl.u32 %v3085_v58, 16  ;;  %v585_v10 = vunpack.c.l.b16 %v521_v56  ;;  %v2764_v34 = vld [vmem:[%s3115_s24 + $0x10] sm:$0xff]  ;;  %v3135_v36 = vld [vmem:[%s2999_s13 + $0x1c] sm:$0x1] }
  0x1d   : > { %2862 = vmatpush.bf16.msra.mxu2 %v2769_v30  ;;  %388 = vmatpush.bf16.msra.mxu0 %v2769_v30  ;;  %v465_v3 = vsel %vm3062_vm2, %v460_v51, %v464_v52  ;;  %v479_v4 = vsel %vm3062_vm2, %v474_v53, %v478_v54  ;;  %v586_v11 = vunpack.c.l.b16 %v535_v61  ;;  %v539_v12 = vrot.slane %v537_v57, 4  ;;  %v2801_v30 = vld [vmem:[%s3726_s1 + $0xb8] sm:$0xff]  ;;  %v2762_v37 = vld [vmem:[%s3115_s24] sm:$0xff]  ;;  %v2784_v48 = vld [vmem:[%s3726_s1 + $0x30] sm:$0xff] }
  0x1e   : > { %2870 = vmatpush.bf16.msra.mxu3 %v2789_v31  ;;  %649 = vmatpush.bf16.msra.mxu1 %v2789_v31  ;;  %v542_v17 = vrot.slane %v540_v62, 5  ;;  %v553_v18 = vrot.slane %v551_v63, 4  ;;  %v556_v19 = vrot.slane %v554_v0, 5  ;;  %v498_v21 = vshll.u32 %v3085_v58, 16  ;;  %v3131_v31 = vld [vmem:[%s2999_s13 + $0x14] sm:$0x1] }
  0x1f   : > { %v581_v22 = vunpack.c.l.b16 %v465_v3  ;;  %v582_v23 = vunpack.c.l.b16 %v479_v4  ;;  %v483_v28 = vrot.slane %v481_v1, 4  ;;  %v486_v29 = vrot.slane %v484_v2, 5  ;;  %v2821_v38 = vld [vmem:[%s3726_s1 + $0x138] sm:$0xff]  ;;  %v2800_v51 = vld [vmem:[%s3726_s1 + $0xb0] sm:$0xff]  ;;  %v2783_v0 = vld [vmem:[%s3726_s1 + $0x28] sm:$0xff] }
  0x20   : > { %v497_v32 = vrot.slane %v495_v5, 4  ;;  %v500_v33 = vrot.slane %v498_v21, 5  ;;  %v591_v35 = vpack.c.b16 %v586_v11, %v585_v10  ;;  %v543_v39 = vor.u32 %v542_v17, %v539_v12  ;;  %v2820_v54 = vld [vmem:[%s3726_s1 + $0x130] sm:$0xff]  ;;  %v2799_v1 = vld [vmem:[%s3726_s1 + $0xa8] sm:$0xff]  ;;  %v2782_v17 = vld [vmem:[%s3726_s1 + $0x20] sm:$0xff] }
  0x21   : > { %2863 = vmatpush.bf16.msra.mxu2 %v2768_v41  ;;  %389 = vmatpush.bf16.msra.mxu0 %v2768_v41  ;;  %v546_v40 = vshll.u32 %v3122_v24, 16  ;;  %v557_v41 = vor.u32 %v556_v19, %v553_v18  ;;  %v560_v42 = vshll.u32 %v3125_v25, 16  ;;  %v589_v44 = vpack.c.b16 %v582_v23, %v581_v22  ;;  %v2812_v61 = vld [vmem:[%s3726_s1 + $0xf0] sm:$0xff]  ;;  %v3167_v4 = vld [vmem:[%s2999_s13 + $0x8] sm:$0xf]  ;;  %v2798_v18 = vld [vmem:[%s3726_s1 + $0xa0] sm:$0xff] }
  0x22   : > { %2871 = vmatpush.bf16.msra.mxu3 %v2788_v45  ;;  %650 = vmatpush.bf16.msra.mxu1 %v2788_v45  ;;  %v487_v45 = vor.u32 %v486_v29, %v483_v28  ;;  %v490_v47 = vshll.u32 %v3131_v31, 16  ;;  %v501_v52 = vor.u32 %v500_v33, %v497_v32  ;;  %v504_v53 = vshll.u32 %v3135_v36, 16  ;;  %v3170_v5 = vld [vmem:[%s2999_s13 + $0x10] sm:$0xf]  ;;  %v2811_v12 = vld [vmem:[%s3726_s1 + $0xe8] sm:$0xff]  ;;  %v2810_v32 = vld [vmem:[%s3726_s1 + $0xe0] sm:$0xff] }
  0x23   : > { %v544_v56 = vrot.slane %v543_v39, 4  ;;  %v548_v57 = vrot.slane %v546_v40, 5  ;;  %v1086_v21 = vshll.u32 %v3167_v4, 16  ;;  %v1097_v22 = vshrl.u32 %v3170_v5, 16 }
  0x24   : > { %v488_v62 = vrot.slane %v487_v45, 4  ;;  %v492_v63 = vrot.slane %v490_v47, 5  ;;  %v502_v2 = vrot.slane %v501_v52, 4  ;;  %v506_v3 = vrot.slane %v504_v53, 5  ;;  %v3213_v45 = vld [vmem:[%s2999_s13 + $0x14] sm:$0x1] }
  0x25   : > { %2864 = vmatpush.bf16.msra.mxu2 %v2767_v59  ;;  %390 = vmatpush.bf16.msra.mxu0 %v2767_v59  ;;  %v558_v59 = vrot.slane %v557_v41, 4  ;;  %v549_v10 = vsel %vm3062_vm2, %v544_v56, %v548_v57  ;;  %v1100_v23 = vshll.u32 %v3170_v5, 16  ;;  %v1088_v39 = vrot.slane %v1086_v21, 5  ;;  %v2763_v47 = vld [vmem:[%s3115_s24 + $0x8] sm:$0xff]  ;;  %v2780_v53 = vld [vmem:[%s3726_s1 + $0x10] sm:$0xff]  ;;  %v2794_v21 = vld [vmem:[%s3726_s1 + $0x80] sm:$0xff] }
  0x26   : > { %2872 = vmatpush.bf16.msra.mxu3 %v2787_v60  ;;  %651 = vmatpush.bf16.msra.mxu1 %v2787_v60  ;;  %v562_v60 = vrot.slane %v560_v42, 5  ;;  %v507_v19 = vsel %vm3062_vm2, %v502_v2, %v506_v3  ;;  %v587_v28 = vunpack.c.l.b16 %v549_v10  ;;  %v1099_v40 = vrot.slane %v1097_v22, 4  ;;  %v2765_v42 = vld [vmem:[%s3115_s24 + $0x18] sm:$0xff]  ;;  %v2779_v3 = vld [vmem:[%s3726_s1 + $0x8] sm:$0xff] }
  0x27   : > { %v1102_v41 = vrot.slane %v1100_v23, 5  ;;  %v792_v2 = vrot.slane %v3037_v27, 5 }
  0x28   : > { %v563_v11 = vsel %vm3062_vm2, %v558_v59, %v562_v60  ;;  %v1106_v60 = vshll.u32 %v3213_v45, 16 }
  0x29   : > { %2865 = vmatpush.bf16.msra.mxu2 %v2766_v8  ;;  %391 = vmatpush.bf16.msra.mxu0 %v2766_v8  ;;  %v2819_v8 = vld [vmem:[%s3726_s1 + $0x128] sm:$0xff]  ;;  %v588_v29 = vunpack.c.l.b16 %v563_v11  ;;  %v1103_v59 = vor.u32 %v1102_v41, %v1099_v40  ;;  %v3253_v11 = vld [vmem:[%s2999_s13 + $0x18] sm:$0xf] }
  0x2a   : > { %2873 = vmatpush.bf16.msra.mxu3 %v2786_v13  ;;  %652 = vmatpush.bf16.msra.mxu1 %v2786_v13  ;;  %v493_v13 = vsel %vm3062_vm2, %v488_v62, %v492_v63  ;;  %v2816_v62 = vld [vmem:[%s3726_s1 + $0x110] sm:$0xff]  ;;  %v2336_v63 = vrot.slane %v3024_v16, 9  ;;  %v1108_v10 = vrot.slane %v1106_v60, 5  ;;  %v1111_v22 = vshrl.u32 %v3253_v11, 16  ;;  %v2841_v40 = vld [vmem:[%s3726_s1 + $0x1b8] sm:$0xff] }
  0x2b   : > { %v583_v33 = vunpack.c.l.b16 %v493_v13  ;;  %v1104_v27 = vrot.slane %v1103_v59, 4  ;;  %v2815_v13 = vld [vmem:[%s3726_s1 + $0x108] sm:$0xff]  ;;  %v1114_v23 = vshll.u32 %v3253_v11, 16 }
  0x2c   : > { %402 = vmatmul.bf16.vlgmr.msra.gmra.mxu2 %v2764_v34  ;;  %392 = vmatmul.bf16.vlgmr.msra.gmra.mxu0 %v2762_v37  ;;  %v584_v34 = vunpack.c.l.b16 %v507_v19  ;;  %v2797_v37 = vld [vmem:[%s3726_s1 + $0x98] sm:$0xff]  ;;  %v2778_v19 = vld [vmem:[%s3726_s1] sm:$0xff]  ;;  %v2426_v41 = vld [vmem:[%s2999_s13 + $0x8] sm:$0xf] }
  0x2d   : > { %746 = vmatpush.bf16.msrb.mxu2 %v2785_v15  ;;  %663 = vmatmul.bf16.vlgmr.msra.gmra.mxu3 %v591_v35  ;;  %v1083_v15 = vshrl.u32 %v3167_v4, 16  ;;  %v2781_v35 = vld [vmem:[%s3726_s1 + $0x18] sm:$0xff] }
  0x2e   : > { %899 = vmatpush.bf16.msrb.mxu3 %v2801_v30  ;;  %1275 = vmatpush.bf16.msrb.mxu1 %v2821_v38  ;;  %v2818_v30 = vld [vmem:[%s3726_s1 + $0x120] sm:$0xff]  ;;  %v590_v52 = vpack.c.b16 %v584_v34, %v583_v33 }
  0x2f   : > { %1045 = vmatpush.bf16.msrb.mxu0 %v2813_v43  ;;  %653 = vmatmul.bf16.vlgmr.msra.gmra.mxu1 %v589_v44  ;;  %v1085_v38 = vrot.slane %v1083_v15, 4  ;;  %v592_v43 = vpack.c.b16 %v588_v29, %v587_v28  ;;  %v3210_v44 = vld [vmem:[%s2999_s13 + $0xc] sm:$0x1]  ;;  %v2290_v28 = vld [vmem:[%s2999_s13] sm:$0xf] }
  0x30   : > { %v1092_v57 = vshll.u32 %v3210_v44, 16  ;;  %v2774_v29 = vld [vmem:[%s2999_s13 + $0x4] sm:$0xf0] }
  0x31   : > { %747 = vmatpush.bf16.msrb.mxu2 %v2784_v48  ;;  %v2817_v48 = vld [vmem:[%s3726_s1 + $0x118] sm:$0xff]  ;;  %v1089_v56 = vor.u32 %v1088_v39, %v1085_v38  ;;  %v2814_v39 = vld [vmem:[%s3726_s1 + $0x100] sm:$0xff] }
  0x32   : > { %900 = vmatpush.bf16.msrb.mxu3 %v2800_v51  ;;  %1276 = vmatpush.bf16.msrb.mxu1 %v2820_v54  ;;  %v2809_v51 = vld [vmem:[%s3726_s1 + $0xd8] sm:$0xff]  ;;  %v2796_v54 = vld [vmem:[%s3726_s1 + $0x90] sm:$0xff] }
  0x33   : > { %1046 = vmatpush.bf16.msrb.mxu0 %v2812_v61  ;;  %v2808_v61 = vld [vmem:[%s3726_s1 + $0xd0] sm:$0xff]  ;;  %v2829_v38 = vld [vmem:[%s3726_s1 + $0x178] sm:$0xff] }
  0x35   : > { %748 = vmatpush.bf16.msrb.mxu2 %v2783_v0  ;;  %v788_v0 = vrot.slane %v3034_v26, 5  ;;  %v1094_v26 = vrot.slane %v1092_v57, 5  ;;  %v1116_v57 = vrot.slane %v1114_v23, 5  ;;  %v2339_v23 = vrot.slane %v3085_v58, 9  ;;  %v2847_v58 = vld [vmem:[%s3726_s1 + $0x1e8] sm:$0xff] }
  0x36   : > { %901 = vmatpush.bf16.msrb.mxu3 %v2799_v1  ;;  %1277 = vmatpush.bf16.msrb.mxu1 %v2819_v8  ;;  %v2337_v1 = vrot.slane %v3028_v20, 9  ;;  %v2795_v8 = vld [vmem:[%s3726_s1 + $0x88] sm:$0xff]  ;;  %v1090_v20 = vrot.slane %v1089_v56, 4  ;;  %v2857_v56 = vld [vmem:[%s3726_s1 + $0x238] sm:$0xff] }
  0x37   : > { %1047 = vmatpush.bf16.msrb.mxu0 %v2811_v12  ;;  %v3256_v12 = vld [vmem:[%s2999_s13 + $0x20] sm:$0xf]  ;;  %v789_v15 = vsel %vm3248_vm5, %v2336_v63, %v788_v0  ;;  %v3316_v0 = vld [vmem:[%s2999_s13 + $0x24] sm:$0x1] }
  0x38   : > { %v1125_v33 = vshrl.u32 %v3256_v12, 16  ;;  %v1128_v34 = vshll.u32 %v3256_v12, 16 }
  0x39   : > { %749 = vmatpush.bf16.msrb.mxu2 %v2782_v17  ;;  %v793_v17 = vsel %vm3248_vm5, %v2337_v1, %v792_v2 }
  0x3a   : > { %902 = vmatpush.bf16.msrb.mxu3 %v2798_v18  ;;  %1278 = vmatpush.bf16.msrb.mxu1 %v2818_v30  ;;  %v2807_v18 = vld [vmem:[%s3726_s1 + $0xc8] sm:$0xff]  ;;  %v1095_v30 = vsel %vm3062_vm2, %v1090_v20, %v1094_v26  ;;  %v1130_v59 = vrot.slane %v1128_v34, 5  ;;  %v2840_v26 = vld [vmem:[%s3726_s1 + $0x1b0] sm:$0xff] }
  0x3b   : > { %1048 = vmatpush.bf16.msrb.mxu0 %v2810_v32  ;;  %v1109_v32 = vsel %vm3062_vm2, %v1104_v27, %v1108_v10  ;;  %v3351_v34 = vld [vmem:[%s2999_s13 + $0x28] sm:$0xf] }
  0x3c   : > { %407 = vmatmul.bf16.gmra.mxu2 %v2765_v42  ;;  %397 = vmatmul.bf16.gmra.mxu0 %v2763_v47  ;;  %v2340_v42 = vrot.slane %v3002_v6, 9  ;;  %v2341_v47 = vrot.slane %v3005_v7, 9  ;;  %v1113_v6 = vrot.slane %v1111_v22, 4  ;;  %v2849_v7 = vld [vmem:[%s3726_s1 + $0x1f8] sm:$0xff]  ;;  %v796_v22 = vrot.slane %v3131_v31, 5 }
  0x3d   : > { %750 = vmatpush.bf16.msrb.mxu2 %v2781_v35  ;;  %668 = vmatmul.bf16.gmra.mxu3 %v592_v43  ;;  %v835_v35 = vunpack.c.l.b16 %v789_v15  ;;  %v804_v43 = vrot.slane %v3011_v9, 5  ;;  %v3309_v9 = vld [vmem:[%s2999_s13 + $0x1c] sm:$0x1]  ;;  %v2848_v15 = vld [vmem:[%s3726_s1 + $0x1f0] sm:$0xff] }
  0x3e   : > { %903 = vmatpush.bf16.msrb.mxu3 %v2797_v37  ;;  %1279 = vmatpush.bf16.msrb.mxu1 %v2817_v48  ;;  %v836_v37 = vunpack.c.l.b16 %v793_v17  ;;  %v808_v48 = vrot.slane %v3020_v14, 5  ;;  %v1127_v14 = vrot.slane %v1125_v33, 4  ;;  %v1117_v27 = vor.u32 %v1116_v57, %v1113_v6 }
  0x3f   : > { %1049 = vmatpush.bf16.msrb.mxu0 %v2809_v51  ;;  %658 = vmatmul.bf16.gmra.mxu1 %v590_v52  ;;  %v2806_v51 = vld [vmem:[%s3726_s1 + $0xc0] sm:$0xff]  ;;  %v2802_v52 = vld [vmem:[%s2999_s13 + $0xc] sm:$0xf0]  ;;  %v805_v60 = vsel %vm3248_vm5, %v2340_v42, %v804_v43  ;;  %v1120_v10 = vshll.u32 %v3309_v9, 16  ;;  %v1142_v42 = vshll.u32 %v3351_v34, 16 }
  0x40   : > { %v843_v63 = vpack.c.b16 %v836_v37, %v835_v35  ;;  %v839_v1 = vunpack.c.l.b16 %v805_v60  ;;  %v1131_v17 = vor.u32 %v1130_v59, %v1127_v14  ;;  %v3354_v35 = vld [vmem:[%s2999_s13 + $0x30] sm:$0xf]  ;;  %v2825_v14 = vld [vmem:[%s3726_s1 + $0x158] sm:$0xff]  ;;  %v2342_v59 = vrot.slane %v3067_v49, 9 }
  0x41   : > { %751 = vmatpush.bf16.msrb.mxu2 %v2780_v53  ;;  %v1211_v53 = vunpack.c.l.b16 %v1095_v30  ;;  %v2839_v30 = vld [vmem:[%s3726_s1 + $0x1a8] sm:$0xff]  ;;  %v812_v60 = vrot.slane %v3122_v24, 5  ;;  %v2853_v24 = vld [vmem:[%s3726_s1 + $0x218] sm:$0xff] }
  0x42   : > { %904 = vmatpush.bf16.msrb.mxu3 %v2796_v54  ;;  %1280 = vmatpush.bf16.msrb.mxu1 %v2816_v62  ;;  %v1212_v54 = vunpack.c.l.b16 %v1109_v32  ;;  %v2291_v62 = vor.u32 %v2774_v29, %v2290_v28  ;;  %v800_v28 = vrot.slane %v3135_v36, 5  ;;  %v2827_v29 = vld [vmem:[%s3726_s1 + $0x168] sm:$0xff]  ;;  %v1118_v32 = vrot.slane %v1117_v27, 4 }
  0x43   : > { %1050 = vmatpush.bf16.msrb.mxu0 %v2808_v61  ;;  %v809_v61 = vsel %vm3248_vm5, %v2341_v47, %v808_v48  ;;  %v1132_v33 = vrot.slane %v1131_v17, 4  ;;  %v2855_v36 = vld [vmem:[%s3726_s1 + $0x228] sm:$0xff]  ;;  %v2846_v48 = vld [vmem:[%s3726_s1 + $0x1e0] sm:$0xff] }
  0x44   : > { %v840_v2 = vunpack.c.l.b16 %v809_v61  ;;  %v1219_v20 = vpack.c.b16 %v1212_v54, %v1211_v53  ;;  %v2854_v53 = vld [vmem:[%s3726_s1 + $0x220] sm:$0xff]  ;;  %v2294_v54 = vld [vmem:[%s2999_s13 + $0x10] sm:$0xf]  ;;  %v2343_v61 = vrot.slane %v3076_v50, 9  ;;  %v2845_v50 = vld [vmem:[%s3726_s1 + $0x1d8] sm:$0xff] }
  0x45   : > { %752 = vmatpush.bf16.msrb.mxu2 %v2779_v3  ;;  %v2427_v3 = vor.u32 %v2802_v52, %v2426_v41  ;;  %v1139_v41 = vshrl.u32 %v3351_v34, 16  ;;  %v1156_v52 = vshll.u32 %v3354_v35, 16  ;;  %v3405_v17 = vld [vmem:[%s2999_s13 + $0x2c] sm:$0x1] }
  0x46   : > { %905 = vmatpush.bf16.msrb.mxu3 %v2795_v8  ;;  %1281 = vmatpush.bf16.msrb.mxu1 %v2815_v13  ;;  %v2828_v8 = vld [vmem:[%s3726_s1 + $0x170] sm:$0xff]  ;;  %v3325_v13 = vpack.c.b16 %v840_v2, %v839_v1 }
  0x47   : > { %1051 = vmatpush.bf16.msrb.mxu0 %v2807_v18  ;;  %v1134_v18 = vshll.u32 %v3316_v0, 16 }
  0x49   : > { %753 = vmatpush.bf16.msrb.mxu2 %v2778_v19  ;;  %v2856_v19 = vld [vmem:[%s3726_s1 + $0x230] sm:$0xff]  ;;  %v1136_v31 = vrot.slane %v1134_v18, 5 }
  0x4a   : > { %906 = vmatpush.bf16.msrb.mxu3 %v2794_v21  ;;  %1282 = vmatpush.bf16.msrb.mxu1 %v2814_v39  ;;  %v2338_v21 = vrot.slane %v3079_v55, 9  ;;  %v1122_v55 = vrot.slane %v1120_v10, 5  ;;  %v2826_v39 = vld [vmem:[%s3726_s1 + $0x160] sm:$0xff]  ;;  %v3408_v18 = vld [vmem:[%s2999_s13 + $0x34] sm:$0x1] }
  0x4b   : > { %1052 = vmatpush.bf16.msrb.mxu0 %v2806_v51  ;;  %v1137_v47 = vsel %vm3062_vm2, %v1132_v33, %v1136_v31  ;;  %v1153_v51 = vshrl.u32 %v3354_v35, 16  ;;  %v1162_v31 = vshll.u32 %v3408_v18, 16 }
  0x4c   : > { %754 = vmatmul.bf16.vlgmr.msrb.gmra.mxu2 %v2291_v62  ;;  %v797_v37 = vsel %vm3248_vm5, %v2338_v21, %v796_v22  ;;  %v1123_v43 = vsel %vm3062_vm2, %v1118_v32, %v1122_v55  ;;  %v816_v62 = vrot.slane %v3125_v25, 5  ;;  %v1214_v2 = vunpack.c.l.b16 %v1137_v47 }
  0x4d   : > { %1433 = vmatpush.bf16.msra.mxu2 %v2829_v38  ;;  %907 = vmatmul.bf16.vlgmr.msrb.gmra.mxu3 %v843_v63  ;;  %v801_v38 = vsel %vm3248_vm5, %v2339_v23, %v800_v28  ;;  %v837_v6 = vunpack.c.l.b16 %v797_v37  ;;  %v2803_v63 = vld [vmem:[%s2999_s13 + $0x1c] sm:$0xf0]  ;;  %v1213_v1 = vunpack.c.l.b16 %v1123_v43  ;;  %v1155_v49 = vrot.slane %v1153_v51, 4  ;;  %v2824_v23 = vld [vmem:[%s3726_s1 + $0x150] sm:$0xff]  ;;  %v2823_v37 = vld [vmem:[%s3726_s1 + $0x148] sm:$0xff] }
  0x4e   : > { %1579 = vmatpush.bf16.msra.mxu3 %v2841_v40  ;;  %1967 = vmatpush.bf16.msra.mxu1 %v2857_v56  ;;  %v2838_v40 = vld [vmem:[%s3726_s1 + $0x1a0] sm:$0xff]  ;;  %v2775_v56 = vld [vmem:[%s2999_s13 + $0x14] sm:$0xf0]  ;;  %v838_v57 = vunpack.c.l.b16 %v801_v38  ;;  %v813_v25 = vsel %vm3248_vm5, %v2342_v59, %v812_v60  ;;  %v817_v27 = vsel %vm3248_vm5, %v2343_v61, %v816_v62  ;;  %v1148_v55 = vshll.u32 %v3405_v17, 16  ;;  %v2844_v38 = vld [vmem:[%s3726_s1 + $0x1d0] sm:$0xff] }
  0x4f   : > { %1809 = vmatpush.bf16.msra.mxu0 %v2849_v7  ;;  %1283 = vmatmul.bf16.vlgmr.msrb.gmra.mxu1 %v1219_v20  ;;  %v2430_v7 = vld [vmem:[%s2999_s13 + $0x18] sm:$0xf]  ;;  %v1144_v20 = vrot.slane %v1142_v42, 5  ;;  %v2295_v10 = vor.u32 %v2775_v56, %v2294_v54  ;;  %v842_v21 = vunpack.c.l.b16 %v817_v27  ;;  %v1220_v28 = vpack.c.b16 %v1214_v2, %v1213_v1  ;;  %v2834_v60 = vld [vmem:[%s3726_s1 + $0x180] sm:$0xff] }
  0x50   : > { %1053 = vmatmul.bf16.vlgmr.msrb.gmra.mxu0 %v2427_v3  ;;  %v2837_v3 = vld [vmem:[%s3726_s1 + $0x198] sm:$0xff]  ;;  %v2431_v22 = vor.u32 %v2803_v63, %v2430_v7  ;;  %v2521_v42 = vrot.slane %v3170_v5, 9  ;;  %v1150_v47 = vrot.slane %v1148_v55, 5  ;;  %v1164_v51 = vrot.slane %v1162_v31, 5  ;;  %v2822_v7 = vld [vmem:[%s3726_s1 + $0x140] sm:$0xff] }
  0x51   : > { %1434 = vmatpush.bf16.msra.mxu2 %v2828_v8  ;;  %v1141_v8 = vrot.slane %v1139_v41, 4  ;;  %v2520_v41 = vrot.slane %v3167_v4, 9  ;;  %v2851_v4 = vld [vmem:[%s3726_s1 + $0x208] sm:$0xff]  ;;  %v2842_v63 = vld [vmem:[%s3726_s1 + $0x1c0] sm:$0xff]  ;;  %v3491_v31 = vld [vmem:[%s2999_s13 + $0x18] sm:$0xf] }
  0x52   : > { %1580 = vmatpush.bf16.msra.mxu3 %v2840_v26  ;;  %1968 = vmatpush.bf16.msra.mxu1 %v2856_v19  ;;  %v1158_v26 = vrot.slane %v1156_v52, 5  ;;  %v841_v19 = vunpack.c.l.b16 %v813_v25  ;;  %v2843_v52 = vld [vmem:[%s3726_s1 + $0x1c8] sm:$0xff]  ;;  %v2298_v2 = vld [vmem:[%s2999_s13 + $0x20] sm:$0xf] }
  0x53   : > { %1810 = vmatpush.bf16.msra.mxu0 %v2848_v15  ;;  %v844_v15 = vpack.c.b16 %v838_v57, %v837_v6  ;;  %v1145_v32 = vor.u32 %v1144_v20, %v1141_v8  ;;  %v2434_v8 = vld [vmem:[%s2999_s13 + $0x28] sm:$0xf]  ;;  %v2804_v20 = vld [vmem:[%s2999_s13 + $0x2c] sm:$0xf0]  ;;  %v2850_v55 = vld [vmem:[%s3726_s1 + $0x200] sm:$0xff] }
  0x54   : > { %v1159_v33 = vor.u32 %v1158_v26, %v1155_v49 }
  0x55   : > { %1435 = vmatpush.bf16.msra.mxu2 %v2827_v29  ;;  %v2836_v29 = vld [vmem:[%s3726_s1 + $0x190] sm:$0xff]  ;;  %v1146_v43 = vrot.slane %v1145_v32, 4 }
  0x56   : > { %1581 = vmatpush.bf16.msra.mxu3 %v2839_v30  ;;  %1969 = vmatpush.bf16.msra.mxu1 %v2855_v36  ;;  %v3416_v30 = vpack.c.b16 %v842_v21, %v841_v19  ;;  %v1326_v36 = vrot.slane %v3213_v45, 5  ;;  %v3435_v45 = vld [vmem:[%s2999_s13 + $0x40] sm:$0xf]  ;;  %v2435_v21 = vor.u32 %v2804_v20, %v2434_v8 }
  0x57   : > { %1811 = vmatpush.bf16.msra.mxu0 %v2847_v58  ;;  %v1322_v58 = vrot.slane %v3210_v44, 5  ;;  %v2835_v44 = vld [vmem:[%s3726_s1 + $0x188] sm:$0xff]  ;;  %v1181_v6 = vshrl.u32 %v3435_v45, 16  ;;  %v1184_v57 = vshll.u32 %v3435_v45, 16  ;;  %v1151_v61 = vsel %vm3062_vm2, %v1146_v43, %v1150_v47 }
  0x58   : > { %v1327_v56 = vsel %vm3248_vm5, %v2521_v42, %v1326_v36  ;;  %v1215_v25 = vunpack.c.l.b16 %v1151_v61  ;;  %v1330_v42 = vrot.slane %v3309_v9, 5  ;;  %v1634_v43 = vshll.u32 %v3491_v31, 16 }
  0x59   : > { %1436 = vmatpush.bf16.msra.mxu2 %v2826_v39  ;;  %v3429_v39 = vld [vmem:[%s2999_s13 + $0x38] sm:$0xf]  ;;  %v1323_v5 = vsel %vm3248_vm5, %v2520_v41, %v1322_v58  ;;  %v1370_v59 = vunpack.c.l.b16 %v1327_v56  ;;  %v2522_v41 = vrot.slane %v3253_v11, 9  ;;  %v2523_v47 = vrot.slane %v3256_v12, 9 }
  0x5a   : > { %1582 = vmatpush.bf16.msra.mxu3 %v2838_v40  ;;  %1970 = vmatpush.bf16.msra.mxu1 %v2854_v53  ;;  %v2852_v40 = vld [vmem:[%s3726_s1 + $0x210] sm:$0xff]  ;;  %v1167_v53 = vshrl.u32 %v3429_v39, 16  ;;  %v1170_v54 = vshll.u32 %v3429_v39, 16  ;;  %v1636_v56 = vrot.slane %v1634_v43, 5 }
  0x5b   : > { %1812 = vmatpush.bf16.msra.mxu0 %v2846_v48  ;;  %v1160_v48 = vrot.slane %v1159_v33, 4  ;;  %v3487_v33 = vld [vmem:[%s2999_s13 + $0x10] sm:$0xf] }
  0x5c   : > { %759 = vmatmul.bf16.gmra.mxu2 %v2295_v10  ;;  %v1169_v49 = vrot.slane %v1167_v53, 4  ;;  %v1172_v26 = vrot.slane %v1170_v54, 5  ;;  %v3476_v10 = vld [vmem:[%s2999_s13 + $0x3c] sm:$0x1] }
  0x5d   : > { %1437 = vmatpush.bf16.msra.mxu2 %v2825_v14  ;;  %912 = vmatmul.bf16.gmra.mxu3 %v844_v15  ;;  %v1369_v14 = vunpack.c.l.b16 %v1323_v5  ;;  %v1165_v62 = vsel %vm3062_vm2, %v1160_v48, %v1164_v51  ;;  %v3479_v15 = vld [vmem:[%s2999_s13 + $0x44] sm:$0x1]  ;;  %v1334_v48 = vrot.slane %v3316_v0, 5  ;;  %v1331_v51 = vsel %vm3248_vm5, %v2522_v41, %v1330_v42  ;;  %v2577_v5 = vld [vmem:[%s2999_s13 + $0x14] sm:$0x1] }
  0x5e   : > { %1583 = vmatpush.bf16.msra.mxu3 %v2837_v3  ;;  %1971 = vmatpush.bf16.msra.mxu1 %v2853_v24  ;;  %v2776_v3 = vld [vmem:[%s2999_s13 + $0x24] sm:$0xf0]  ;;  %v1186_v24 = vrot.slane %v1184_v57, 5  ;;  %v1216_v27 = vunpack.c.l.b16 %v1165_v62  ;;  %v1371_v9 = vunpack.c.l.b16 %v1331_v51  ;;  %v1338_v51 = vrot.slane %v3405_v17, 5 }
  0x5f   : > { %1813 = vmatpush.bf16.msra.mxu0 %v2845_v50  ;;  %1288 = vmatmul.bf16.gmra.mxu1 %v1220_v28  ;;  %v3469_v1 = vpack.c.b16 %v1370_v59, %v1369_v14  ;;  %v1183_v50 = vrot.slane %v1181_v6, 4  ;;  %v2299_v19 = vor.u32 %v2776_v3, %v2298_v2  ;;  %v1335_v11 = vsel %vm3248_vm5, %v2523_v47, %v1334_v48  ;;  %v2579_v6 = vld [vmem:[%s2999_s13 + $0x1c] sm:$0x1]  ;;  %v2777_v14 = vld [vmem:[%s2999_s13 + $0x34] sm:$0xf0] }
  0x60   : > { %1058 = vmatmul.bf16.gmra.mxu0 %v2431_v22  ;;  %v1173_v22 = vor.u32 %v1172_v26, %v1169_v49  ;;  %v1221_v32 = vpack.c.b16 %v1216_v27, %v1215_v25  ;;  %v1372_v54 = vunpack.c.l.b16 %v1335_v11  ;;  %v2438_v59 = vld [vmem:[%s2999_s13 + $0x38] sm:$0xf]  ;;  %v1626_v2 = vshll.u32 %v2577_v5, 16 }
  0x61   : > { %1438 = vmatpush.bf16.msra.mxu2 %v2824_v23  ;;  %v1176_v23 = vshll.u32 %v3476_v10, 16  ;;  %v1187_v28 = vor.u32 %v1186_v24, %v1183_v50  ;;  %v1640_v8 = vshll.u32 %v2579_v6, 16  ;;  %v2830_v47 = vld [vmem:[%s2999_s13 + $0x14] sm:$0xf0]  ;;  %v2524_v48 = vrot.slane %v3351_v34, 9 }
  0x62   : > { %1584 = vmatpush.bf16.msra.mxu3 %v2836_v29  ;;  %1972 = vmatpush.bf16.msra.mxu1 %v2852_v40  ;;  %v1190_v29 = vshll.u32 %v3479_v15, 16  ;;  %v1174_v58 = vrot.slane %v1173_v22, 4  ;;  %v1620_v40 = vshll.u32 %v3487_v33, 16  ;;  %v3511_v57 = vpack.c.b16 %v1372_v54, %v1371_v9  ;;  %v2581_v54 = vld [vmem:[%s2999_s13 + $0x24] sm:$0x1] }
  0x63   : > { %1814 = vmatpush.bf16.msra.mxu0 %v2844_v38  ;;  %v1178_v36 = vrot.slane %v1176_v23, 5  ;;  %v1628_v24 = vrot.slane %v1626_v2, 5  ;;  %v1642_v27 = vrot.slane %v1640_v8, 5  ;;  %v2704_v23 = vrot.slane %v3487_v33, 9 }
  0x64   : > { %v1192_v38 = vrot.slane %v1190_v29, 5  ;;  %v1622_v53 = vrot.slane %v1620_v40, 5  ;;  %v1856_v29 = vrot.slane %v2577_v5, 5  ;;  %v2525_v11 = vrot.slane %v3354_v35, 9 }
  0x65   : > { %1439 = vmatpush.bf16.msra.mxu2 %v2823_v37  ;;  %v1188_v37 = vrot.slane %v1187_v28, 4  ;;  %v1342_v9 = vrot.slane %v3408_v18, 5  ;;  %v1654_v35 = vshll.u32 %v2581_v54, 16 }
  0x66   : > { %1585 = vmatpush.bf16.msra.mxu3 %v2835_v44  ;;  %1973 = vmatpush.bf16.msra.mxu1 %v2851_v4  ;;  %v1617_v44 = vshrl.u32 %v3487_v33, 16  ;;  %v1179_v4 = vsel %vm3062_vm2, %v1174_v58, %v1178_v36  ;;  %v1857_v33 = vsel %vm3248_vm5, %v2704_v23, %v1856_v29  ;;  %v2614_v23 = vld [vmem:[%s2999_s13 + $0x20] sm:$0xf] }
  0x67   : > { %1815 = vmatpush.bf16.msra.mxu0 %v2843_v52  ;;  %v1193_v12 = vsel %vm3062_vm2, %v1188_v37, %v1192_v38  ;;  %v1217_v61 = vunpack.c.l.b16 %v1179_v4  ;;  %v2583_v4 = vld [vmem:[%s2999_s13 + $0x2c] sm:$0x1]  ;;  %v1343_v5 = vsel %vm3248_vm5, %v2525_v11, %v1342_v9 }
  0x68   : > { %v1619_v52 = vrot.slane %v1617_v44, 4  ;;  %v1218_v62 = vunpack.c.l.b16 %v1193_v12  ;;  %v1339_v12 = vsel %vm3248_vm5, %v2524_v48, %v1338_v51  ;;  %v1374_v17 = vunpack.c.l.b16 %v1343_v5 }
  0x69   : > { %1440 = vmatpush.bf16.msra.mxu2 %v2822_v7  ;;  %v2302_v7 = vld [vmem:[%s2999_s13 + $0x30] sm:$0xf]  ;;  %v1373_v34 = vunpack.c.l.b16 %v1339_v12  ;;  %v1668_v18 = vshll.u32 %v2583_v4, 16 }
  0x6a   : > { %1586 = vmatpush.bf16.msra.mxu3 %v2834_v60  ;;  %1974 = vmatpush.bf16.msra.mxu1 %v2850_v55  ;;  %v2805_v60 = vld [vmem:[%s2999_s13 + $0x3c] sm:$0xf0]  ;;  %v2303_v20 = vor.u32 %v2777_v14, %v2302_v7  ;;  %v1222_v26 = vpack.c.b16 %v1218_v62, %v1217_v61  ;;  %v1656_v62 = vrot.slane %v1654_v35, 5 }
  0x6b   : > { %1816 = vmatpush.bf16.msra.mxu0 %v2842_v63  ;;  %v1623_v63 = vor.u32 %v1622_v53, %v1619_v52  ;;  %v2439_v49 = vor.u32 %v2805_v60, %v2438_v59  ;;  %v1903_v52 = vunpack.c.l.b16 %v1857_v33  ;;  %v3550_v59 = vpack.c.b16 %v1374_v17, %v1373_v34  ;;  %v3554_v60 = vld [vmem:[%s2999_s13 + $0x30] sm:$0xf]  ;;  %v2588_v17 = vld [vmem:[%s2999_s13 + $0x40] sm:$0xf] }
  0x6c   : > { %764 = vmatmul.bf16.gmra.mxu2 %v2299_v19  ;;  %v3519_v19 = vld [vmem:[%s2999_s13 + $0x20] sm:$0xf]  ;;  %v1670_v2 = vrot.slane %v1668_v18, 5  ;;  %v1346_v33 = vrot.slane %v3476_v10, 5  ;;  %v2708_v5 = vrot.slane %v3554_v60, 9 }
  0x6d   : > { %917 = vmatmul.bf16.gmra.mxu3 %v3325_v13  ;;  %v1631_v13 = vshrl.u32 %v3491_v31, 16  ;;  %v1624_v50 = vrot.slane %v1623_v63, 4  ;;  %v1645_v55 = vshrl.u32 %v3519_v19, 16  ;;  %v1648_v58 = vshll.u32 %v3519_v19, 16 }
  0x6e   : > { %v2706_v8 = vrot.slane %v3519_v19, 9  ;;  %v2831_v19 = vld [vmem:[%s2999_s13 + $0x24] sm:$0xf0] }
  0x6f   : > { %1293 = vmatmul.bf16.gmra.mxu1 %v1221_v32  ;;  %v1633_v0 = vrot.slane %v1631_v13, 4  ;;  %v1629_v22 = vsel %vm3062_vm2, %v1624_v50, %v1628_v24  ;;  %v2705_v32 = vrot.slane %v3491_v31, 9  ;;  %v2610_v31 = vld [vmem:[%s2999_s13 + $0x10] sm:$0xf]  ;;  %v1647_v41 = vrot.slane %v1645_v55, 4 }
  0x70   : > { %1063 = vmatmul.bf16.gmra.mxu0 %v2435_v21  ;;  %v3522_v21 = vld [vmem:[%s2999_s13 + $0x28] sm:$0xf]  ;;  %v1745_v38 = vunpack.c.l.b16 %v1629_v22  ;;  %v1650_v42 = vrot.slane %v1648_v58, 5  ;;  %v1676_v50 = vshll.u32 %v3554_v60, 16  ;;  %v2585_v58 = vld [vmem:[%s2999_s13 + $0x34] sm:$0x1] }
  0x71   : > { %v1637_v3 = vor.u32 %v1636_v56, %v1633_v0  ;;  %v1659_v36 = vshrl.u32 %v3522_v21, 16  ;;  %v1662_v37 = vshll.u32 %v3522_v21, 16  ;;  %v2611_v0 = vor.u32 %v2830_v47, %v2610_v31 }
  0x72   : > { %v1350_v31 = vrot.slane %v3479_v15, 5  ;;  %v1682_v47 = vshll.u32 %v2585_v58, 16 }
  0x73   : > { %v1638_v25 = vrot.slane %v1637_v3, 4  ;;  %v1661_v13 = vrot.slane %v1659_v36, 4  ;;  %v1664_v43 = vrot.slane %v1662_v37, 5  ;;  %v2586_v3 = vld [vmem:[%s2999_s13 + $0x38] sm:$0xf] }
  0x74   : > { %v1687_v24 = vshrl.u32 %v2586_v3, 16 }
  0x75   : > { %v1643_v28 = vsel %vm3062_vm2, %v1638_v25, %v1642_v27  ;;  %v1665_v7 = vor.u32 %v1664_v43, %v1661_v13  ;;  %v1690_v25 = vshll.u32 %v2586_v3, 16 }
  0x76   : > { %v1746_v44 = vunpack.c.l.b16 %v1643_v28  ;;  %v1689_v36 = vrot.slane %v1687_v24, 4 }
  0x77   : > { %v1666_v63 = vrot.slane %v1665_v7, 4  ;;  %v1692_v37 = vrot.slane %v1690_v25, 5  ;;  %v2589_v25 = vld [vmem:[%s2999_s13 + $0x44] sm:$0x1] }
  0x78   : > { %v1753_v56 = vpack.c.b16 %v1746_v44, %v1745_v38  ;;  %v2587_v38 = vld [vmem:[%s2999_s13 + $0x3c] sm:$0x1]  ;;  %v2526_v44 = vrot.slane %v3429_v39, 9 }
  0x79   : > { %v1671_v22 = vsel %vm3062_vm2, %v1666_v63, %v1670_v2  ;;  %v1693_v11 = vor.u32 %v1692_v37, %v1689_v36  ;;  %v1696_v9 = vshll.u32 %v2587_v38, 16  ;;  %v1876_v34 = vrot.slane %v2587_v38, 5  ;;  %v2618_v63 = vld [vmem:[%s2999_s13 + $0x30] sm:$0xf]  ;;  %v2832_v2 = vld [vmem:[%s2999_s13 + $0x34] sm:$0xf0] }
  0x7a   : > { %v1748_v55 = vunpack.c.l.b16 %v1671_v22  ;;  %v1347_v48 = vsel %vm3248_vm5, %v2526_v44, %v1346_v33  ;;  %v2619_v22 = vor.u32 %v2832_v2, %v2618_v63 }
  0x7b   : > { %v1375_v39 = vunpack.c.l.b16 %v1347_v48  ;;  %v1698_v12 = vrot.slane %v1696_v9, 5  ;;  %v2833_v9 = vld [vmem:[%s2999_s13 + $0x44] sm:$0xf0] }
  0x7c   : > { %769 = vmatmul.bf16.gmra.mxu2 %v2303_v20  ;;  %v1864_v20 = vrot.slane %v2581_v54, 5  ;;  %v1684_v54 = vrot.slane %v1682_v47, 5 }
  0x7d   : > { %922 = vmatmul.bf16.gmra.mxu3 %v3416_v30  ;;  %v1860_v30 = vrot.slane %v2579_v6, 5  ;;  %v1651_v6 = vor.u32 %v1650_v42, %v1647_v41  ;;  %v2615_v41 = vor.u32 %v2831_v19, %v2614_v23 }
  0x7f   : > { %1298 = vmatmul.bf16.gmra.mxu1 %v1222_v26  ;;  %v1861_v40 = vsel %vm3248_vm5, %v2705_v32, %v1860_v30  ;;  %v1652_v61 = vrot.slane %v1651_v6, 4  ;;  %v1868_v26 = vrot.slane %v2583_v4, 5  ;;  %v1678_v32 = vrot.slane %v1676_v50, 5  ;;  %v2590_v6 = vld [vmem:[%s2999_s13 + $0x48] sm:$0xf] }
  0x80   : > { %1068 = vmatmul.bf16.gmra.mxu0 %v2439_v49  ;;  %v1904_v53 = vunpack.c.l.b16 %v1861_v40  ;;  %v2707_v49 = vrot.slane %v3522_v21, 9  ;;  %v1865_v21 = vsel %vm3248_vm5, %v2706_v8, %v1864_v20  ;;  %v2527_v40 = vrot.slane %v3435_v45, 9 }
  0x81   : > { %v1657_v27 = vsel %vm3062_vm2, %v1652_v61, %v1656_v62  ;;  %v1905_v42 = vunpack.c.l.b16 %v1865_v21  ;;  %v1694_v4 = vrot.slane %v1693_v11, 4  ;;  %v1715_v61 = vshrl.u32 %v2590_v6, 16  ;;  %v2622_v11 = vld [vmem:[%s2999_s13 + $0x40] sm:$0xf] }
  0x82   : > { %v1911_v14 = vpack.c.b16 %v1904_v53, %v1903_v52  ;;  %v1869_v28 = vsel %vm3248_vm5, %v2707_v49, %v1868_v26  ;;  %v1747_v30 = vunpack.c.l.b16 %v1657_v27  ;;  %v1351_v51 = vsel %vm3248_vm5, %v2527_v40, %v1350_v31  ;;  %v2591_v27 = vld [vmem:[%s2999_s13 + $0x4c] sm:$0x1]  ;;  %s2190_s13 = sshll.u32 %s3741_s22, 3  ;;  %s2191_s22 = sshll.u32 %s2987_s30, 1 }
  0x83   : > { %v1906_v13 = vunpack.c.l.b16 %v1869_v28  ;;  %v1376_v52 = vunpack.c.l.b16 %v1351_v51  ;;  %v1718_v62 = vshll.u32 %v2590_v6, 16  ;;  %v1717_v50 = vrot.slane %v1715_v61, 4  ;;  %s3674_s23 = scalar_lea.vmem %s3729_s4, %s2190_s13  ;;  %s286_s27 = scalar_lea.vmem %s3730_s5, %s2191_s22 }
  0x84   : > { %v1754_v10 = vpack.c.b16 %v1748_v55, %v1747_v30  ;;  %v1724_v30 = vshll.u32 %v2591_v27, 16  ;;  %v2710_v40 = vrot.slane %v2588_v17, 9  ;;  %v1880_v31 = vrot.slane %v2589_v25, 5 }
  0x85   : > { %v1912_v45 = vpack.c.b16 %v1906_v13, %v1905_v42  ;;  %v3581_v15 = vpack.c.b16 %v1376_v52, %v1375_v39  ;;  %v1720_v24 = vrot.slane %v1718_v62, 5  ;;  %v1884_v42 = vrot.slane %v2591_v27, 5 }
  0x86   : > { %v1726_v38 = vrot.slane %v1724_v30, 5  ;;  %v1881_v48 = vsel %vm3248_vm5, %v2710_v40, %v1880_v31 }
  0x8c   : > { %1441 = vmatmul.bf16.vlgmr.msra.gmra.mxu2 %v3469_v1  ;;  %v1673_v1 = vshrl.u32 %v3554_v60, 16  ;;  %v1704_v60 = vshll.u32 %v2588_v17, 16 }
  0x8d   : > { %1587 = vmatmul.bf16.vlgmr.msra.gmra.mxu3 %v2611_v0  ;;  %v1872_v0 = vrot.slane %v2585_v58, 5 }
  0x8e   : > { %v1675_v29 = vrot.slane %v1673_v1, 4  ;;  %v1706_v1 = vrot.slane %v1704_v60, 5 }
  0x8f   : > { %1975 = vmatmul.bf16.vlgmr.msra.gmra.mxu1 %v1911_v14  ;;  %v1873_v7 = vsel %vm3248_vm5, %v2708_v5, %v1872_v0  ;;  %v1701_v14 = vshrl.u32 %v2588_v17, 16 }
  0x90   : > { %1817 = vmatmul.bf16.vlgmr.msra.gmra.mxu0 %v1753_v56  ;;  %v1679_v43 = vor.u32 %v1678_v32, %v1675_v29  ;;  %v2709_v56 = vrot.slane %v2586_v3, 9  ;;  %v1907_v20 = vunpack.c.l.b16 %v1873_v7  ;;  %v1710_v29 = vshll.u32 %v2589_v25, 16 }
  0x91   : > { %v1703_v26 = vrot.slane %v1701_v14, 4  ;;  %v1721_v32 = vor.u32 %v1720_v24, %v1717_v50 }
  0x92   : > { %v1680_v53 = vrot.slane %v1679_v43, 4  ;;  %v1877_v18 = vsel %vm3248_vm5, %v2709_v56, %v1876_v34  ;;  %v1712_v36 = vrot.slane %v1710_v29, 5 }
  0x93   : > { %v1908_v49 = vunpack.c.l.b16 %v1877_v18  ;;  %v1707_v28 = vor.u32 %v1706_v1, %v1703_v26  ;;  %v1722_v37 = vrot.slane %v1721_v32, 4 }
  0x94   : > { %v1685_v35 = vsel %vm3062_vm2, %v1680_v53, %v1684_v54 }
  0x95   : > { %v1749_v3 = vunpack.c.l.b16 %v1685_v35  ;;  %v1913_v19 = vpack.c.b16 %v1908_v49, %v1907_v20  ;;  %v1708_v58 = vrot.slane %v1707_v28, 4  ;;  %v1727_v43 = vsel %vm3062_vm2, %v1722_v37, %v1726_v38 }
  0x96   : > { %v1752_v52 = vunpack.c.l.b16 %v1727_v43 }
  0x9c   : > { %1446 = vmatmul.bf16.gmra.mxu2 %v3511_v57  ;;  %v1699_v57 = vsel %vm3062_vm2, %v1694_v4, %v1698_v12  ;;  %v2623_v4 = vor.u32 %v2833_v9, %v2622_v11 }
  0x9d   : > { %1592 = vmatmul.bf16.gmra.mxu3 %v2615_v41  ;;  %v1750_v8 = vunpack.c.l.b16 %v1699_v57  ;;  %v2711_v41 = vrot.slane %v2590_v6, 9 }
  0x9f   : > { %1980 = vmatmul.bf16.gmra.mxu1 %v1912_v45  ;;  %v1755_v23 = vpack.c.b16 %v1750_v8, %v1749_v3  ;;  %v1885_v51 = vsel %vm3248_vm5, %v2711_v41, %v1884_v42 }
  0xa0   : > { %1822 = vmatmul.bf16.gmra.mxu0 %v1754_v10  ;;  %v1909_v10 = vunpack.c.l.b16 %v1881_v48  ;;  %v1910_v45 = vunpack.c.l.b16 %v1885_v51 }
  0xa2   : > { %v1914_v5 = vpack.c.b16 %v1910_v45, %v1909_v10 }
  0xa9   : > { %v3599_v21 = vpop.f32.mrf.mxu0 }
  0xac   : > { %v3601_v55 = vpop.f32.mrf.mxu1  ;;  %1451 = vmatmul.bf16.gmra.mxu2 %v3550_v59  ;;  %v1713_v59 = vsel %vm3062_vm2, %v1708_v58, %v1712_v36 }
  0xad   : > { %1597 = vmatmul.bf16.gmra.mxu3 %v2619_v22  ;;  %v1751_v39 = vunpack.c.l.b16 %v1713_v59 }
  0xaf   : > { %1985 = vmatmul.bf16.gmra.mxu1 %v1913_v19  ;;  %v3604_v44 = vpop.f32.mrf.mxu2  ;;  %v1756_v46 = vpack.c.b16 %v1752_v52, %v1751_v39 }
  0xb0   : > { %1827 = vmatmul.bf16.gmra.mxu0 %v1755_v23  ;;  %v3606_v33 = vpop.f32.mrf.mxu3 }
  0xb1   : > { %v3608_v13 = vpop.f32.mrf.mxu0 }
  0xb4   : > { %v656_v47 = vpop.f32.mrf.mxu1 }
  0xb7   : > { %v3620_v53 = vpop.f32.mrf.mxu2 }
  0xb8   : > { %v3622_v54 = vpop.f32.mrf.mxu3 }
  0xb9   : > { %v3624_v12 = vpop.f32.mrf.mxu0 }
  0xbc   : > { %v659_v0 = vpop.f32.mrf.mxu1  ;;  %1456 = vmatmul.bf16.gmra.mxu2 %v3581_v15 }
  0xbd   : > { %1602 = vmatmul.bf16.gmra.mxu3 %v2623_v4 }
  0xbf   : > { %1990 = vmatmul.bf16.gmra.mxu1 %v1914_v5  ;;  %v3627_v16 = vpop.f32.mrf.mxu2 }
  0xc0   : > { %1832 = vmatmul.bf16.gmra.mxu0 %v1756_v46  ;;  %v3629_v56 = vpop.f32.mrf.mxu3 }
  0xc1   : > { %v3631_v34 = vpop.f32.mrf.mxu0 }
  0xc4   : > { %v661_v17 = vpop.f32.mrf.mxu1 }
  0xc7   : > { %v3633_v6 = vpop.f32.mrf.mxu2 }
  0xc8   : > { %v3635_v35 = vpop.f32.mrf.mxu3 }
  0xcc   : > { %v1284_v7 = vpop.f32.mrf.mxu1 }
  0xcd   : > { %v1054_v57 = vpop.f32.mrf.mxu0 }
  0xcf   : > { %v755_v18 = vpop.f32.mrf.mxu2 }
  0xd0   : > { %v908_v14 = vpop.f32.mrf.mxu3  ;;  %v756_v36 = vadd.f32 %v755_v18, %v3601_v55 }
  0xd2   : > { %v928_v40 = vadd.f32 %v908_v14, %v756_v36 }
  0xd4   : > { %v1286_v15 = vpop.f32.mrf.mxu1  ;;  %v1074_v42 = vadd.f32 %v1054_v57, %v928_v40 }
  0xd5   : > { %v1056_v60 = vpop.f32.mrf.mxu0 }
  0xd6   : > { %v1304_v11 = vadd.f32 %v1284_v7, %v1074_v42 }
  0xd7   : > { %v757_v61 = vpop.f32.mrf.mxu2 }
  0xd8   : > { %v910_v62 = vpop.f32.mrf.mxu3  ;;  %v758_v59 = vadd.f32 %v757_v61, %v656_v47 }
  0xda   : > { %v929_v51 = vadd.f32 %v910_v62, %v758_v59 }
  0xdc   : > { %v1289_v2 = vpop.f32.mrf.mxu1  ;;  %v1075_v55 = vadd.f32 %v1056_v60, %v929_v51 }
  0xdd   : > { %v1059_v63 = vpop.f32.mrf.mxu0 }
  0xde   : > { %v1305_v36 = vadd.f32 %v1286_v15, %v1075_v55 }
  0xdf   : > { %v760_v3 = vpop.f32.mrf.mxu2 }
  0xe0   : > { %v913_v8 = vpop.f32.mrf.mxu3  ;;  %v761_v10 = vadd.f32 %v760_v3, %v659_v0 }
  0xe2   : > { %v930_v18 = vadd.f32 %v913_v8, %v761_v10 }
  0xe4   : > { %v3637_v49 = vpop.f32.mrf.mxu1  ;;  %v1076_v61 = vadd.f32 %v1059_v63, %v930_v18 }
  0xe5   : > { %v1061_v20 = vpop.f32.mrf.mxu0 }
  0xe6   : > { %v1306_v59 = vadd.f32 %v1289_v2, %v1076_v61 }
  0xe7   : > { %v762_v26 = vpop.f32.mrf.mxu2 }
  0xe8   : > { %v915_v1 = vpop.f32.mrf.mxu3  ;;  %v763_v0 = vadd.f32 %v762_v26, %v661_v17 }
  0xea   : > { %v931_v15 = vadd.f32 %v915_v1, %v763_v0 }
  0xec   : > { %v3641_v24 = vpop.f32.mrf.mxu1 }
  0xed   : > { %v3639_v50 = vpop.f32.mrf.mxu0 }
  0xef   : > { %v765_v25 = vpop.f32.mrf.mxu2 }
  0xf0   : > { %v3643_v27 = vpop.f32.mrf.mxu3 }
  0xf4   : > { %v3647_v23 = vpop.f32.mrf.mxu1 }
  0xf5   : > { %v3645_v22 = vpop.f32.mrf.mxu0 }
  0xf7   : > { %v3649_v19 = vpop.f32.mrf.mxu2 }
  0xf8   : > { %v3651_v28 = vpop.f32.mrf.mxu3 }
  0xfc   : > { %v3655_v32 = vpop.f32.mrf.mxu1 }
  0xfd   : > { %v3653_v29 = vpop.f32.mrf.mxu0 }
  0xff   : > { %v3657_v30 = vpop.f32.mrf.mxu2 }
 0x100   : > { %v3659_v58 = vpop.f32.mrf.mxu3 }
 0x104   : > { %v3664_v38 = vpop.f32.mrf.mxu1 }
 0x105   : > { %v3662_v37 = vpop.f32.mrf.mxu0 }
 0x107   : > { %v3666_v31 = vpop.f32.mrf.mxu2 }
 0x108   : > { %v3668_v41 = vpop.f32.mrf.mxu3 }
 0x10c   : > { %v1976_v48 = vpop.f32.mrf.mxu1 }
 0x10d   : > { %v1818_v43 = vpop.f32.mrf.mxu0 }
 0x10f   : > { %v1442_v9 = vpop.f32.mrf.mxu2 }
 0x110   : > { %v1588_v39 = vpop.f32.mrf.mxu3  ;;  %v1462_v52 = vadd.f32 %v1442_v9, %v1304_v11  ;;  %v1077_v9 = vadd.f32 %v1061_v20, %v931_v15 }
 0x112   : > { %v1608_v45 = vadd.f32 %v1588_v39, %v1462_v52 }
 0x114   : > { %v1978_v46 = vpop.f32.mrf.mxu1  ;;  %v1838_v5 = vadd.f32 %v1818_v43, %v1608_v45 }
 0x115   : > { %v1820_v4 = vpop.f32.mrf.mxu0 }
 0x116   : > { %v1996_v14 = vadd.f32 %v1976_v48, %v1838_v5  ;;  %v768_v5 = vadd.f32 %v3649_v19, %v3622_v54  ;;  %v771_v54 = vadd.f32 %v3657_v30, %v3629_v56 }
 0x117   : > { %v1444_v47 = vpop.f32.mrf.mxu2 }
 0x118   : > { %v1590_v57 = vpop.f32.mrf.mxu3  ;;  %v2004_v7 = vadd.f32 %v1996_v14, %v3599_v21  ;;  %v1463_v60 = vadd.f32 %v1444_v47, %v1305_v36  ;;  %v766_v21 = vadd.f32 %v765_v25, %v3606_v33 }
 0x11a   : > { %2012 = vst [vmem:[%s3674_s23] sm:$0xff] %v2004_v7  ;;  %v1609_v62 = vadd.f32 %v1590_v57, %v1463_v60  ;;  %v2033_v39 = vmul.f32 %v2004_v7, %v2004_v7  ;;  %v932_v2 = vadd.f32 %v3643_v27, %v766_v21 }
 0x11c   : > { %v1981_v8 = vpop.f32.mrf.mxu1  ;;  %v1839_v40 = vadd.f32 %v1820_v4, %v1609_v62  ;;  %v1307_v4 = vadd.f32 %v3637_v49, %v1077_v9  ;;  %v1078_v25 = vadd.f32 %v3639_v50, %v932_v2  ;;  %v933_v49 = vadd.f32 %v3651_v28, %v768_v5 }
 0x11d   : > { %v1823_v3 = vpop.f32.mrf.mxu0 }
 0x11e   : > { %v1997_v42 = vadd.f32 %v1978_v46, %v1839_v40  ;;  %v1079_v19 = vadd.f32 %v3645_v22, %v933_v49 }
 0x11f   : > { %v1447_v43 = vpop.f32.mrf.mxu2 }
 0x120   : > { %v1593_v48 = vpop.f32.mrf.mxu3  ;;  %v2005_v51 = vadd.f32 %v1997_v42, %v3608_v13  ;;  %v1464_v11 = vadd.f32 %v1447_v43, %v1306_v59  ;;  %v934_v42 = vadd.f32 %v3659_v58, %v771_v54  ;;  %v1309_v43 = vadd.f32 %v3647_v23, %v1079_v19 }
 0x122   : > { %2013 = vst [vmem:[%s3674_s23 + $0x8] sm:$0xff] %v2005_v51  ;;  %v2020_v17 = vadd.f32 %v2005_v51, %v2004_v7  ;;  %v2034_v63 = vmul.f32 %v2005_v51, %v2005_v51  ;;  %v1610_v26 = vadd.f32 %v1593_v48, %v1464_v11  ;;  %v1080_v22 = vadd.f32 %v3653_v29, %v934_v42 }
 0x123   : > { %v773_v11 = vadd.f32 %v3666_v31, %v3635_v35 }
 0x124   : > { %v2041_v55 = vadd.f32 %v2034_v63, %v2033_v39  ;;  %v1840_v10 = vadd.f32 %v1823_v3, %v1610_v26  ;;  %v1983_v1 = vpop.f32.mrf.mxu1  ;;  %v1310_v26 = vadd.f32 %v3655_v32, %v1080_v22 }
 0x125   : > { %v1825_v52 = vpop.f32.mrf.mxu0  ;;  %v935_v23 = vadd.f32 %v3668_v41, %v773_v11 }
 0x126   : > { %v1998_v45 = vadd.f32 %v1981_v8, %v1840_v10 }
 0x127   : > { %v1449_v13 = vpop.f32.mrf.mxu2  ;;  %v1081_v35 = vadd.f32 %v3662_v37, %v935_v23 }
 0x128   : > { %v1595_v46 = vpop.f32.mrf.mxu3  ;;  %v2006_v20 = vadd.f32 %v1998_v45, %v3624_v12  ;;  %v1465_v33 = vadd.f32 %v1449_v13, %v1307_v4  ;;  %v1308_v12 = vadd.f32 %v3641_v24, %v1078_v25 }
 0x129   : > { %v1311_v32 = vadd.f32 %v3664_v38, %v1081_v35 }
 0x12a   : > { %2014 = vst [vmem:[%s3674_s23 + $0x10] sm:$0xff] %v2006_v20  ;;  %v2021_v18 = vadd.f32 %v2020_v17, %v2006_v20  ;;  %v2035_v14 = vmul.f32 %v2006_v20, %v2006_v20  ;;  %v1611_v36 = vadd.f32 %v1595_v46, %v1465_v33 }
 0x12c   : > { %v2042_v47 = vadd.f32 %v2041_v55, %v2035_v14  ;;  %v1841_v27 = vadd.f32 %v1825_v52, %v1611_v36  ;;  %v1986_v60 = vpop.f32.mrf.mxu1 }
 0x12d   : > { %v1828_v57 = vpop.f32.mrf.mxu0 }
 0x12e   : > { %v1999_v7 = vadd.f32 %v1983_v1, %v1841_v27 }
 0x12f   : > { %v1452_v0 = vpop.f32.mrf.mxu2 }
 0x130   : > { %v1598_v61 = vpop.f32.mrf.mxu3  ;;  %v2007_v50 = vadd.f32 %v1999_v7, %v3631_v34  ;;  %v1466_v62 = vadd.f32 %v1452_v0, %v1308_v12 }
 0x132   : > { %2015 = vst [vmem:[%s3674_s23 + $0x18] sm:$0xff] %v2007_v50  ;;  %v2022_v3 = vadd.f32 %v2021_v18, %v2007_v50  ;;  %v2036_v8 = vmul.f32 %v2007_v50, %v2007_v50  ;;  %v1612_v40 = vadd.f32 %v1598_v61, %v1466_v62 }
 0x134   : > { %v2043_v28 = vadd.f32 %v2042_v47, %v2036_v8  ;;  %v1842_v15 = vadd.f32 %v1828_v57, %v1612_v40  ;;  %v1988_v30 = vpop.f32.mrf.mxu1 }
 0x135   : > { %v1830_v59 = vpop.f32.mrf.mxu0 }
 0x136   : > { %v2000_v24 = vadd.f32 %v1986_v60, %v1842_v15 }
 0x137   : > { %v1454_v34 = vpop.f32.mrf.mxu2 }
 0x138   : > { %v1600_v48 = vpop.f32.mrf.mxu3  ;;  %v2008_v51 = vadd.f32 %v2000_v24, %v3604_v44  ;;  %v1467_v56 = vadd.f32 %v1454_v34, %v1309_v43 }
 0x13a   : > { %2016 = vst [vmem:[%s3674_s23 + $0x20] sm:$0xff] %v2008_v51  ;;  %v2023_v9 = vadd.f32 %v2022_v3, %v2008_v51  ;;  %v2037_v21 = vmul.f32 %v2008_v51, %v2008_v51  ;;  %v1613_v58 = vadd.f32 %v1600_v48, %v1467_v56 }
 0x13c   : > { %v2044_v39 = vadd.f32 %v2043_v28, %v2037_v21  ;;  %v1843_v17 = vadd.f32 %v1830_v59, %v1613_v58  ;;  %v1991_v45 = vpop.f32.mrf.mxu1 }
 0x13d   : > { %v1833_v10 = vpop.f32.mrf.mxu0 }
 0x13e   : > { %v2001_v63 = vadd.f32 %v1988_v30, %v1843_v17 }
 0x13f   : > { %v1457_v44 = vpop.f32.mrf.mxu2 }
 0x140   : > { %v1603_v52 = vpop.f32.mrf.mxu3  ;;  %v2009_v29 = vadd.f32 %v2001_v63, %v3620_v53  ;;  %v1468_v55 = vadd.f32 %v1457_v44, %v1310_v26 }
 0x142   : > { %2017 = vst [vmem:[%s3674_s23 + $0x28] sm:$0xff] %v2009_v29  ;;  %v2024_v31 = vadd.f32 %v2023_v9, %v2009_v29  ;;  %v2038_v1 = vmul.f32 %v2009_v29, %v2009_v29  ;;  %v1614_v2 = vadd.f32 %v1603_v52, %v1468_v55 }
 0x144   : > { %v2045_v4 = vadd.f32 %v2044_v39, %v2038_v1  ;;  %v1844_v13 = vadd.f32 %v1833_v10, %v1614_v2  ;;  %v1993_v47 = vpop.f32.mrf.mxu1 }
 0x145   : > { %v1835_v18 = vpop.f32.mrf.mxu0 }
 0x146   : > { %v2002_v41 = vadd.f32 %v1991_v45, %v1844_v13 }
 0x147   : > { %v1459_v46 = vpop.f32.mrf.mxu2 }
 0x148   : > { %v2010_v20 = vadd.f32 %v2002_v41, %v3627_v16  ;;  %v1469_v53 = vadd.f32 %v1459_v46, %v1311_v32  ;;  %v1605_v33 = vpop.f32.mrf.mxu3 }
 0x14a   : > { %2018 = vst [vmem:[%s3674_s23 + $0x30] sm:$0xff] %v2010_v20  ;;  %v2025_v25 = vadd.f32 %v2024_v31, %v2010_v20  ;;  %v2039_v5 = vmul.f32 %v2010_v20, %v2010_v20  ;;  %v1615_v37 = vadd.f32 %v1605_v33, %v1469_v53 }
 0x14c   : > { %v2046_v14 = vadd.f32 %v2045_v4, %v2039_v5  ;;  %v1845_v36 = vadd.f32 %v1835_v18, %v1615_v37 }
 0x14e   : > { %v2003_v27 = vadd.f32 %v1993_v47, %v1845_v36 }
 0x150   : > { %v2011_v57 = vadd.f32 %v2003_v27, %v3633_v6 }
 0x152   : > { %2019 = vst [vmem:[%s3674_s23 + $0x38] sm:$0xff] %v2011_v57  ;;  %v2026_v49 = vadd.f32 %v2025_v25, %v2011_v57  ;;  %v2040_v38 = vmul.f32 %v2011_v57, %v2011_v57 }
 0x154   : > { %v2027_v7 = vrot.slane %v2026_v49, 4  ;;  %v2047_v60 = vadd.f32 %v2046_v14, %v2040_v38 }
 0x156   : > { %v2028_v16 = vadd.f32 %v2027_v7, %v2026_v49  ;;  %v2048_v12 = vrot.slane %v2047_v60, 4 }
 0x158   : > { %v2029_v0 = vrot.slane %v2028_v16, 2  ;;  %v2049_v61 = vadd.f32 %v2048_v12, %v2047_v60 }
 0x15a   : > { %v2030_v50 = vadd.f32 %v2029_v0, %v2028_v16  ;;  %v2050_v62 = vrot.slane %v2049_v61, 2 }
 0x15c   : > { %v2031_v54 = vrot.slane %v2030_v50, 1  ;;  %v2051_v19 = vadd.f32 %v2050_v62, %v2049_v61 }
 0x15e   : > { %v2052_v3 = vrot.slane %v2051_v19, 1  ;;  %v2032_v6 = vadd.f32 %v2031_v54, %v2030_v50 }
 0x160   : > { %v2053_v8 = vadd.f32 %v2052_v3, %v2051_v19 }
 0x162   : > { %v2055_v40 = vsel %vm2054_vm6, %v2032_v6, %v2053_v8 }
 0x163   : > { %2056 = vst [vmem:[%s286_s27] sm:$0x3] %v2055_v40 }
 0x164 PF: > { %s16_s20 = sadd.s32 1, %s2921_s20   ;;  %s3736_s18 = smov %s2917_s19 }
 0x165   : > { %p13_p6 = scmp.ge.s32.totalorder %s16_s20, 4   ;;  %s3737_s19 = smov %s3739_s21 }
 0x167   :  { %15 = sbr.rel (!%p13_p6) target bundleno = 2 (0x2), region = 92 }

// kernel: resnet_layer_forward.15
= control target key start
LH: loop header
LB: loop body
LE: loop exit
PB: predicated region body
PF: predicated region fallthrough
CT: control target
= control target key end

     0   :  { %s412_s18 = smov 0   ;;  %s448_s0 = inlined_call_operand.vmem [shape: f32[128,128], index: 0, kind: input, shape index: {}]   ;;  %s449_s1 = inlined_call_operand.vmem [shape: f32[1,128], index: 1, kind: input, shape index: {}]   ;;  %s450_s2 = inlined_call_operand.vmem [shape: f32[1,128], index: 2, kind: input, shape index: {}]   ;;  %s451_s3 = inlined_call_operand.vmem [shape: f32[1,128], index: 3, kind: input, shape index: {}]   ;;  %s452_s4 = inlined_call_operand.vmem [shape: f32[1,128], index: 4, kind: input, shape index: {}]   ;;  %s453_s5 = inlined_call_operand.vmem [shape: f32[128,128], index: 5, kind: output, shape index: {}]  }
   0x1 LB: > { %s353_s19 = sadd.s32 4294967295, %s380_s18   ;;  %p357_p0 = scmp.ge.s32.totalorder %s380_s18, 1  ;;  %s380_s18 = sphi %s412_s18, %s15_s18  }
   0x2   : > { %p188_p1 = scmp.lt.s32.totalorder %s380_s18, 3 }
   0x4   : > { %p189_p2 = pnand %p357_p0, %p188_p1 }
   0x5   : > { %s358_s24 = sshll.u32 (!%p189_p2), %s353_s19, 3 }
   0x6   : > { %192 = sbr.rel (%p189_p2) target bundleno = 60 (0x3c), region = 40  ;;  %p217_p3 = scmp.lt.s32.totalorder (!%p189_p2), %s358_s24, 15 }
   0xb   : > { %v228_v0 = vld [vmem:[%s449_s1] sm:$0x1]  ;;  %s455_s24 = smov (!%p217_p3, %s358_s24), 15 }
   0xc   : > { %v230_v1 = vld [vmem:[%s450_s2] sm:$0x1]  ;;  %v229_v2 = vmul.f32 0.0078125, %v228_v0  ;;  %s359_s25 = sshll.u32 %s455_s24, 3 }
   0xd   : > { %v231_v3 = vmul.f32 0.0078125, %v230_v1  ;;  %v235_v13 = vld [vmem:[%s451_s3] sm:$0x1]  ;;  %s220_s30 = scalar_lea.vmem %s448_s0, %s359_s25  ;;  %s226_s10 = scalar_lea.vmem %s453_s5, %s359_s25 }
   0xe   : > { %v232_v4 = vmul.f32 %v229_v2, %v229_v2  ;;  %v248_v17 = vld [vmem:[%s452_s4] sm:$0x1]  ;;  %v252_v19 = vld [vmem:[%s220_s30 + $0x8] sm:$0xff]  ;;  %v253_v20 = vld [vmem:[%s220_s30 + $0x10] sm:$0xff] }
   0xf   : > { %v251_v18 = vld [vmem:[%s220_s30] sm:$0xff]  ;;  %v254_v23 = vld [vmem:[%s220_s30 + $0x18] sm:$0xff]  ;;  %v256_v25 = vld [vmem:[%s220_s30 + $0x28] sm:$0xff] }
  0x10   : > { %v233_v5 = vsub.f32 %v231_v3, %v232_v4  ;;  %v255_v24 = vld [vmem:[%s220_s30 + $0x20] sm:$0xff]  ;;  %v257_v26 = vld [vmem:[%s220_s30 + $0x30] sm:$0xff]  ;;  %v258_v31 = vld [vmem:[%s220_s30 + $0x38] sm:$0xff] }
  0x12   : > { %v234_v6 = vmax.f32 %v233_v5, 0.0 }
  0x14   : > { %v236_v7 = vadd.f32 0.001, %v234_v6 }
  0x16   : > { %372 = vrsqrt.f32 %v236_v7  ;;  %vm243_vm0 = vweird.f32 %v236_v7 }
  0x1c   : > { %v373_v8 = vpop.eup %372 }
  0x1d   : > { %v238_v9 = vmul.f32 %v373_v8, %v236_v7  ;;  %vm244_vm1 = vweird.f32 %v373_v8 }
  0x1e   : > { %vm245_vm2 = vmor %vm243_vm0, %vm244_vm1 }
  0x1f   : > { %v239_v10 = vmul.f32 %v373_v8, %v238_v9 }
  0x21   : > { %v240_v11 = vmul.f32 0.5, %v239_v10 }
  0x23   : > { %v241_v12 = vsub.f32 1.5, %v240_v11 }
  0x25   : > { %v242_v14 = vmul.f32 %v373_v8, %v241_v12 }
  0x27   : > { %v246_v15 = vsel %vm245_vm2, %v373_v8, %v242_v14 }
  0x28   : > { %v247_v16 = vmul.f32 %v246_v15, %v235_v13 }
  0x2a   : > { %v249_v21 = vmul.f32 %v247_v16, %v229_v2  ;;  %v260_v22 = vperm.slane %v247_v16, 0 }
  0x2c   : > { %v250_v27 = vsub.f32 %v248_v17, %v249_v21  ;;  %v262_v28 = vmul.f32 %v260_v22, %v251_v18  ;;  %v263_v29 = vmul.f32 %v260_v22, %v252_v19  ;;  %v264_v30 = vmul.f32 %v260_v22, %v253_v20 }
  0x2d   : > { %v265_v32 = vmul.f32 %v260_v22, %v254_v23  ;;  %v266_v33 = vmul.f32 %v260_v22, %v255_v24  ;;  %v267_v34 = vmul.f32 %v260_v22, %v256_v25  ;;  %v268_v36 = vmul.f32 %v260_v22, %v257_v26 }
  0x2e   : > { %v271_v35 = vperm.slane %v250_v27, 0  ;;  %v269_v37 = vmul.f32 %v260_v22, %v258_v31 }
  0x30   : > { %v273_v38 = vadd.f32 %v271_v35, %v262_v28  ;;  %v274_v39 = vadd.f32 %v271_v35, %v263_v29  ;;  %v275_v40 = vadd.f32 %v271_v35, %v264_v30  ;;  %v276_v41 = vadd.f32 %v271_v35, %v265_v32 }
  0x31   : > { %v277_v42 = vadd.f32 %v271_v35, %v266_v33  ;;  %v278_v43 = vadd.f32 %v271_v35, %v267_v34  ;;  %v279_v47 = vadd.f32 %v271_v35, %v268_v36  ;;  %v280_v49 = vadd.f32 %v271_v35, %v269_v37 }
  0x32   : > { %v281_v44 = vmax.f32 %v273_v38, 0.0  ;;  %v282_v45 = vmax.f32 %v274_v39, 0.0  ;;  %v283_v46 = vmax.f32 %v275_v40, 0.0  ;;  %v284_v48 = vmax.f32 %v276_v41, 0.0 }
  0x33   : > { %v285_v50 = vmax.f32 %v277_v42, 0.0  ;;  %v286_v51 = vmax.f32 %v278_v43, 0.0  ;;  %v287_v52 = vmax.f32 %v279_v47, 0.0  ;;  %v288_v53 = vmax.f32 %v280_v49, 0.0 }
  0x34   : > { %289 = vst [vmem:[%s226_s10] sm:$0xff] %v281_v44 }
  0x35   : > { %290 = vst [vmem:[%s226_s10 + $0x8] sm:$0xff] %v282_v45 }
  0x36   : > { %291 = vst [vmem:[%s226_s10 + $0x10] sm:$0xff] %v283_v46 }
  0x37   : > { %292 = vst [vmem:[%s226_s10 + $0x18] sm:$0xff] %v284_v48 }
  0x38   : > { %293 = vst [vmem:[%s226_s10 + $0x20] sm:$0xff] %v285_v50 }
  0x39   : > { %294 = vst [vmem:[%s226_s10 + $0x28] sm:$0xff] %v286_v51 }
  0x3a   : > { %295 = vst [vmem:[%s226_s10 + $0x30] sm:$0xff] %v287_v52 }
  0x3b   : > { %296 = vst [vmem:[%s226_s10 + $0x38] sm:$0xff] %v288_v53 }
  0x3c PF: > { %s15_s18 = sadd.s32 1, %s380_s18  }
  0x3d   : > { %p12_p4 = scmp.ge.s32.totalorder %s15_s18, 4  }
  0x3f   :  { %14 = sbr.rel (!%p12_p4) target bundleno = 1 (0x1), region = 70 }

// kernel: resnet_layer_forward.14
= control target key start
LH: loop header
LB: loop body
LE: loop exit
PB: predicated region body
PF: predicated region fallthrough
CT: control target
= control target key end

     0   :  { %s2744_s15 = smov 0   ;;  %s2746_s16 = smov 0   ;;  %s3504_s0 = inlined_call_operand.vmem [shape: bf16[2,10,10,128], index: 0, kind: input, shape index: {}]   ;;  %s3505_s1 = inlined_call_operand.vmem [shape: bf16[9,128,128], index: 1, kind: input, shape index: {}]   ;;  %s3506_s2 = inlined_call_operand.vmem [shape: f32[128,128], index: 2, kind: input, shape index: {}]   ;;  %s3507_s3 = inlined_call_operand.vmem [shape: f32[128,128], index: 3, kind: output, shape index: {0}]   ;;  %s3508_s4 = inlined_call_operand.vmem [shape: f32[2,2,128], index: 4, kind: output, shape index: {1}]  }
   0x1   :  { %s2748_s17 = smov 0  }
   0x2 LB: > { %s27_s18 = sadd.s32 1, %s2713_s16  ;;  %p2041_p0 = scmp.ge.s32.totalorder %s2717_s17, 1  ;;  %s2717_s17 = sphi %s2748_s17, %s15_s17   ;;  %s2713_s16 = sphi %s2746_s16, %s3514_s16   ;;  %s2709_s15 = sphi %s2744_s15, %s3513_s15  }
   0x3   : > { %p29_p1 = scmp.ge.s32.totalorder %s27_s18, 2  ;;  %p196_p2 = scmp.lt.s32.totalorder %s2717_s17, 3 }
   0x5   : > { %s3516_s18 = smov (%p29_p1, %s27_s18), 0  ;;  %p197_p3 = pnand %p2041_p0, %p196_p2 }
   0x6   : > { %p234_p4 = scmp.lt.s32.totalorder (!%p197_p3), %s2709_s15, 1 }
   0x7   : > { %200 = sbr.rel (%p197_p3) target bundleno = 350 (0x15e), region = 32 }
   0xc   : > { %v2589_v0 = vld [vmem:[%s3505_s1 + $0x78] sm:$0xff]  ;;  %v2588_v2 = vld [vmem:[%s3505_s1 + $0x70] sm:$0xff]  ;;  %s2775_s25 = scalar_select %p234_p4, %s2709_s15, 1  ;;  %v2587_v6 = vld [vmem:[%s3505_s1 + $0x68] sm:$0xff]  ;;  %vm297_vm0 = vsmask.f32 3328 }
   0xd   : > { %v2597_v1 = vld [vmem:[%s3505_s1 + $0xb8] sm:$0xff]  ;;  %2654 = vmatpush.bf16.msra.mxu1 %v2589_v0  ;;  %493 = vmatpush.bf16.msra.mxu0 %v2589_v0  ;;  %v2596_v3 = vld [vmem:[%s3505_s1 + $0xb0] sm:$0xff]  ;;  %v2595_v7 = vld [vmem:[%s3505_s1 + $0xa8] sm:$0xff]  ;;  %vm298_vm1 = vsmask.f32 7440  ;;  %vm631_vm2 = vcmask 1042432  }
   0xe   : > { %747 = vmatpush.bf16.msra.mxu2 %v2597_v1  ;;  %v2609_v4 = vld [vmem:[%s3505_s1 + $0xf8] sm:$0xff]  ;;  %s2670_s30 = smul.u32 80, %s2775_s25  ;;  %v2608_v5 = vld [vmem:[%s3505_s1 + $0xf0] sm:$0xff]  ;;  %v2586_v11 = vld [vmem:[%s3505_s1 + $0x60] sm:$0xff]  ;;  %vm632_vm3 = vcmask 1046532   ;;  %s2047_s7 = sshll.u32 %s2775_s25, 1 }
   0xf   : > { %893 = vmatpush.bf16.msra.mxu3 %v2609_v4  ;;  %v2607_v17 = vld [vmem:[%s3505_s1 + $0xe8] sm:$0xff]  ;;  %v2594_v20 = vld [vmem:[%s3505_s1 + $0xa0] sm:$0xff]  ;;  %v2585_v38 = vld [vmem:[%s3505_s1 + $0x58] sm:$0xff]  ;;  %vm1910_vm6 = vcmask 1040384   ;;  %s259_s10 = scalar_lea.vmem %s3508_s4, %s2047_s7 }
  0x10   : > { %s2796_s13 = scalar_lea.vmem %s3504_s0, %s2670_s30  ;;  %v2606_v34 = vld [vmem:[%s3505_s1 + $0xe0] sm:$0xff]  ;;  %v2593_v43 = vld [vmem:[%s3505_s1 + $0x98] sm:$0xff]  ;;  %vm2851_vm4 = vmor %vm297_vm0, %vm298_vm1 }
  0x11   : > { %2655 = vmatpush.bf16.msra.mxu1 %v2588_v2  ;;  %494 = vmatpush.bf16.msra.mxu0 %v2588_v2  ;;  %v2799_v8 = vld [vmem:[%s2796_s13 + $0x20] sm:$0xf]  ;;  %v2802_v9 = vld [vmem:[%s2796_s13 + $0x24] sm:$0x1]  ;;  %v2805_v10 = vld [vmem:[%s2796_s13 + $0x28] sm:$0xf] }
  0x12   : > { %748 = vmatpush.bf16.msra.mxu2 %v2596_v3  ;;  %v2811_v12 = vld [vmem:[%s2796_s13 + $0x2c] sm:$0x1]  ;;  %v357_v13 = vshrl.u32 %v2799_v8, 16  ;;  %v360_v14 = vshll.u32 %v2799_v8, 16  ;;  %v366_v15 = vshll.u32 %v2802_v9, 16  ;;  %v371_v16 = vshrl.u32 %v2805_v10, 16  ;;  %vm2861_vm5 = vmor %vm631_vm2, %vm632_vm3 }
  0x13   : > { %894 = vmatpush.bf16.msra.mxu3 %v2608_v5  ;;  %v374_v18 = vshll.u32 %v2805_v10, 16  ;;  %v2822_v19 = vld [vmem:[%s2796_s13] sm:$0xf]  ;;  %v266_v24 = vld [vmem:[%s2796_s13 + $0x4] sm:$0x1]  ;;  %v380_v26 = vshll.u32 %v2811_v12, 16 }
  0x14   : > { %v359_v21 = vrot.slane %v357_v13, 4  ;;  %v362_v22 = vrot.slane %v360_v14, 5  ;;  %v373_v23 = vrot.slane %v371_v16, 4  ;;  %v2830_v27 = vld [vmem:[%s2796_s13 + $0x8] sm:$0xf]  ;;  %v368_v30 = vrot.slane %v366_v15, 5 }
  0x15   : > { %2656 = vmatpush.bf16.msra.mxu1 %v2587_v6  ;;  %495 = vmatpush.bf16.msra.mxu0 %v2587_v6  ;;  %v376_v25 = vrot.slane %v374_v18, 5  ;;  %v2833_v28 = vld [vmem:[%s2796_s13 + $0xc] sm:$0x1]  ;;  %v301_v31 = vshrl.u32 %v2822_v19, 16  ;;  %v304_v32 = vshll.u32 %v2822_v19, 16  ;;  %v310_v35 = vshll.u32 %v266_v24, 16 }
  0x16   : > { %749 = vmatpush.bf16.msra.mxu2 %v2595_v7  ;;  %v363_v29 = vor.u32 %v362_v22, %v359_v21  ;;  %v315_v36 = vshrl.u32 %v2830_v27, 16  ;;  %v318_v37 = vshll.u32 %v2830_v27, 16  ;;  %v324_v42 = vshll.u32 %v2833_v28, 16  ;;  %v2605_v54 = vld [vmem:[%s3505_s1 + $0xd8] sm:$0xff]  ;;  %v2866_v56 = vld [vmem:[%s2796_s13 + $0x30] sm:$0xf] }
  0x17   : > { %895 = vmatpush.bf16.msra.mxu3 %v2607_v17  ;;  %v377_v33 = vor.u32 %v376_v25, %v373_v23  ;;  %v303_v40 = vrot.slane %v301_v31, 4  ;;  %v306_v41 = vrot.slane %v304_v32, 5  ;;  %v382_v46 = vrot.slane %v380_v26, 5  ;;  %v2584_v57 = vld [vmem:[%s3505_s1 + $0x50] sm:$0xff]  ;;  %v2881_v2 = vld [vmem:[%s2796_s13 + $0x38] sm:$0xf] }
  0x18   : > { %v364_v39 = vrot.slane %v363_v29, 4  ;;  %v317_v47 = vrot.slane %v315_v36, 4  ;;  %v320_v48 = vrot.slane %v318_v37, 5  ;;  %v2144_v50 = vrot.slane %v2822_v19, 9  ;;  %v2592_v61 = vld [vmem:[%s3505_s1 + $0x90] sm:$0xff]  ;;  %v2583_v13 = vld [vmem:[%s3505_s1 + $0x48] sm:$0xff] }
  0x19   : > { %2657 = vmatpush.bf16.msra.mxu1 %v2586_v11  ;;  %496 = vmatpush.bf16.msra.mxu0 %v2586_v11  ;;  %v378_v45 = vrot.slane %v377_v33, 4  ;;  %v307_v49 = vor.u32 %v306_v41, %v303_v40  ;;  %v636_v51 = vrot.slane %v266_v24, 5  ;;  %v312_v52 = vrot.slane %v310_v35, 5  ;;  %v2890_v6 = vld [vmem:[%s2796_s13 + $0x10] sm:$0xf]  ;;  %v2591_v16 = vld [vmem:[%s3505_s1 + $0x88] sm:$0xff] }
  0x1a   : > { %750 = vmatpush.bf16.msra.mxu2 %v2594_v20  ;;  %v321_v53 = vor.u32 %v320_v48, %v317_v47  ;;  %v369_v58 = vsel %vm2851_vm4, %v364_v39, %v368_v30  ;;  %v326_v60 = vrot.slane %v324_v42, 5  ;;  %v2145_v0 = vrot.slane %v2830_v27, 9  ;;  %v2604_v11 = vld [vmem:[%s3505_s1 + $0xd0] sm:$0xff]  ;;  %v2918_v23 = vld [vmem:[%s2796_s13 + $0x18] sm:$0xf]  ;;  %v2603_v31 = vld [vmem:[%s3505_s1 + $0xc8] sm:$0xff] }
  0x1b   : > { %896 = vmatpush.bf16.msra.mxu3 %v2606_v34  ;;  %v308_v59 = vrot.slane %v307_v49, 4  ;;  %v383_v62 = vsel %vm2851_vm4, %v378_v45, %v382_v46  ;;  %v640_v1 = vrot.slane %v2833_v28, 5  ;;  %v2885_v3 = vsel %vm2861_vm5, %v2144_v50, %v636_v51  ;;  %v2914_v21 = vld [vmem:[%s2796_s13 + $0x34] sm:$0x1]  ;;  %v2922_v26 = vld [vmem:[%s2796_s13 + $0x3c] sm:$0x1] }
  0x1c   : > { %v322_v63 = vrot.slane %v321_v53, 4  ;;  %v385_v4 = vshrl.u32 %v2866_v56, 16  ;;  %v388_v5 = vshll.u32 %v2866_v56, 16  ;;  %v2900_v14 = vunpack.c.l.b16 %v369_v58  ;;  %v2929_v34 = vld [vmem:[%s2796_s13 + $0x14] sm:$0x1]  ;;  %v2582_v36 = vld [vmem:[%s3505_s1 + $0x40] sm:$0xff] }
  0x1d   : > { %2658 = vmatpush.bf16.msra.mxu1 %v2585_v38  ;;  %497 = vmatpush.bf16.msra.mxu0 %v2585_v38  ;;  %v313_v7 = vsel %vm2851_vm4, %v308_v59, %v312_v52  ;;  %v2902_v15 = vunpack.c.l.b16 %v383_v62  ;;  %v399_v18 = vshrl.u32 %v2881_v2, 16  ;;  %v641_v19 = vsel %vm2861_vm5, %v2145_v0, %v640_v1  ;;  %v2581_v41 = vld [vmem:[%s3505_s1 + $0x38] sm:$0xff]  ;;  %v2590_v42 = vld [vmem:[%s3505_s1 + $0x80] sm:$0xff]  ;;  %v2234_v59 = vld [vmem:[%s2796_s13 + $0x8] sm:$0xf] }
  0x1e   : > { %751 = vmatpush.bf16.msra.mxu2 %v2593_v43  ;;  %v327_v17 = vsel %vm2851_vm4, %v322_v63, %v326_v60  ;;  %v683_v20 = vunpack.c.l.b16 %v2885_v3  ;;  %v402_v22 = vshll.u32 %v2881_v2, 16  ;;  %v329_v24 = vshrl.u32 %v2890_v6, 16  ;;  %v2945_v46 = vld [vmem:[%s2796_s13 + $0x1c] sm:$0x1]  ;;  %v2598_v60 = vld [vmem:[%s2796_s13 + $0xc] sm:$0xf0] }
  0x1f   : > { %897 = vmatpush.bf16.msra.mxu3 %v2605_v54  ;;  %v429_v25 = vunpack.c.l.b16 %v313_v7  ;;  %v387_v27 = vrot.slane %v385_v4, 4  ;;  %v390_v28 = vrot.slane %v388_v5, 5  ;;  %v332_v29 = vshll.u32 %v2890_v6, 16  ;;  %v2617_v47 = vld [vmem:[%s3505_s1 + $0x138] sm:$0xff]  ;;  %v2602_v62 = vld [vmem:[%s3505_s1 + $0xc0] sm:$0xff]  ;;  %v2580_v1 = vld [vmem:[%s3505_s1 + $0x30] sm:$0xff] }
  0x20   : > { %v430_v30 = vunpack.c.l.b16 %v327_v17  ;;  %v401_v32 = vrot.slane %v399_v18, 4  ;;  %v404_v33 = vrot.slane %v402_v22, 5  ;;  %v331_v35 = vrot.slane %v329_v24, 4  ;;  %v2637_v49 = vld [vmem:[%s3505_s1 + $0x1b8] sm:$0xff]  ;;  %v2616_v5 = vld [vmem:[%s3505_s1 + $0x130] sm:$0xff] }
  0x21   : > { %2659 = vmatpush.bf16.msra.mxu1 %v2584_v57  ;;  %498 = vmatpush.bf16.msra.mxu0 %v2584_v57  ;;  %v684_v37 = vunpack.c.l.b16 %v641_v19  ;;  %v334_v38 = vrot.slane %v332_v29, 5  ;;  %v343_v39 = vshrl.u32 %v2918_v23, 16  ;;  %v346_v40 = vshll.u32 %v2918_v23, 16  ;;  %v2645_v4 = vld [vmem:[%s3505_s1 + $0x1f8] sm:$0xff]  ;;  %v2977_v24 = vld [vmem:[%s2796_s13 + $0x8] sm:$0xf] }
  0x22   : > { %752 = vmatpush.bf16.msra.mxu2 %v2592_v61  ;;  %v394_v43 = vshll.u32 %v2914_v21, 16  ;;  %v408_v45 = vshll.u32 %v2922_v26, 16  ;;  %v391_v48 = vor.u32 %v390_v28, %v387_v27  ;;  %v338_v50 = vshll.u32 %v2929_v34, 16  ;;  %v2985_v29 = vld [vmem:[%s2796_s13 + $0x10] sm:$0xf] }
  0x23   : > { %898 = vmatpush.bf16.msra.mxu3 %v2604_v11  ;;  %v345_v51 = vrot.slane %v343_v39, 4  ;;  %v348_v52 = vrot.slane %v346_v40, 5  ;;  %v439_v53 = vpack.c.b16 %v2902_v15, %v2900_v14  ;;  %v437_v54 = vpack.c.b16 %v430_v30, %v429_v25  ;;  %v2636_v15 = vld [vmem:[%s3505_s1 + $0x1b0] sm:$0xff]  ;;  %v2579_v25 = vld [vmem:[%s3505_s1 + $0x28] sm:$0xff]  ;;  %v2578_v40 = vld [vmem:[%s3505_s1 + $0x20] sm:$0xff] }
  0x24   : > { %v405_v57 = vor.u32 %v404_v33, %v401_v32  ;;  %v335_v58 = vor.u32 %v334_v38, %v331_v35  ;;  %v691_v61 = vpack.c.b16 %v684_v37, %v683_v20  ;;  %v352_v0 = vshll.u32 %v2945_v46, 16  ;;  %v2615_v30 = vld [vmem:[%s3505_s1 + $0x128] sm:$0xff] }
  0x25   : > { %2660 = vmatpush.bf16.msra.mxu1 %v2583_v13  ;;  %499 = vmatpush.bf16.msra.mxu0 %v2583_v13  ;;  %v349_v63 = vor.u32 %v348_v52, %v345_v51  ;;  %v396_v3 = vrot.slane %v394_v43, 5  ;;  %v392_v7 = vrot.slane %v391_v48, 4  ;;  %v410_v11 = vrot.slane %v408_v45, 5 }
  0x26   : > { %753 = vmatpush.bf16.msra.mxu2 %v2591_v16  ;;  %v340_v13 = vrot.slane %v338_v50, 5  ;;  %v2235_v14 = vor.u32 %v2598_v60, %v2234_v59  ;;  %v406_v16 = vrot.slane %v405_v57, 4  ;;  %v336_v17 = vrot.slane %v335_v58, 4  ;;  %v2577_v59 = vld [vmem:[%s3505_s1 + $0x18] sm:$0xff]  ;;  %v3031_v60 = vld [vmem:[%s2796_s13 + $0x14] sm:$0x1] }
  0x27   : > { %899 = vmatpush.bf16.msra.mxu3 %v2603_v31  ;;  %v2146_v18 = vrot.slane %v2890_v6, 9  ;;  %v644_v19 = vrot.slane %v2929_v34, 5  ;;  %v350_v20 = vrot.slane %v349_v63, 4  ;;  %v354_v22 = vrot.slane %v352_v0, 5  ;;  %v2644_v6 = vld [vmem:[%s3505_s1 + $0x1f0] sm:$0xff] }
  0x28   : > { %v2147_v27 = vrot.slane %v2918_v23, 9  ;;  %v648_v28 = vrot.slane %v2945_v46, 5  ;;  %v397_v31 = vsel %vm2851_vm4, %v392_v7, %v396_v3  ;;  %v2635_v23 = vld [vmem:[%s3505_s1 + $0x1a8] sm:$0xff]  ;;  %v411_v32 = vsel %vm2851_vm4, %v406_v16, %v410_v11  ;;  %v2614_v46 = vld [vmem:[%s3505_s1 + $0x120] sm:$0xff]  ;;  %v2238_v3 = vld [vmem:[%s2796_s13 + $0x18] sm:$0xf] }
  0x29   : > { %2661 = vmatpush.bf16.msra.mxu1 %v2582_v36  ;;  %500 = vmatpush.bf16.msra.mxu0 %v2582_v36  ;;  %v341_v33 = vsel %vm2851_vm4, %v336_v17, %v340_v13  ;;  %v645_v34 = vsel %vm2861_vm5, %v2146_v18, %v644_v19  ;;  %v931_v35 = vshrl.u32 %v2977_v24, 16  ;;  %v355_v36 = vsel %vm2851_vm4, %v350_v20, %v354_v22  ;;  %v2576_v13 = vld [vmem:[%s3505_s1 + $0x10] sm:$0xff]  ;;  %v2633_v17 = vld [vmem:[%s3505_s1 + $0x198] sm:$0xff] }
  0x2a   : > { %754 = vmatpush.bf16.msra.mxu2 %v2590_v42  ;;  %v934_v37 = vshll.u32 %v2977_v24, 16  ;;  %v945_v38 = vshrl.u32 %v2985_v29, 16  ;;  %v948_v39 = vshll.u32 %v2985_v29, 16  ;;  %v2643_v42 = vld [vmem:[%s3505_s1 + $0x1e8] sm:$0xff]  ;;  %v435_v43 = vunpack.c.l.b16 %v397_v31  ;;  %v3050_v18 = vld [vmem:[%s2796_s13 + $0x18] sm:$0xf] }
  0x2b   : > { %900 = vmatpush.bf16.msra.mxu3 %v2602_v62  ;;  %v436_v45 = vunpack.c.l.b16 %v411_v32  ;;  %v431_v48 = vunpack.c.l.b16 %v341_v33  ;;  %v685_v50 = vunpack.c.l.b16 %v645_v34  ;;  %v933_v51 = vrot.slane %v931_v35, 4  ;;  %v2632_v32 = vld [vmem:[%s3505_s1 + $0x190] sm:$0xff]  ;;  %v2611_v33 = vld [vmem:[%s3505_s1 + $0x108] sm:$0xff] }
  0x2c   : > { %511 = vmatmul.bf16.vlgmr.msra.gmra.mxu1 %v439_v53  ;;  %501 = vmatmul.bf16.vlgmr.msra.gmra.mxu0 %v437_v54  ;;  %v3025_v53 = vld [vmem:[%s2796_s13 + $0xc] sm:$0x1]  ;;  %v936_v54 = vrot.slane %v934_v37, 5  ;;  %v947_v57 = vrot.slane %v945_v38, 4  ;;  %v950_v58 = vrot.slane %v948_v39, 5  ;;  %v954_v11 = vshll.u32 %v3031_v60, 16 }
  0x2d   : > { %594 = vmatpush.bf16.msrb.mxu1 %v2581_v41  ;;  %1123 = vmatpush.bf16.msrb.mxu0 %v2617_v47  ;;  %v649_v41 = vsel %vm2861_vm5, %v2147_v27, %v648_v28  ;;  %v2634_v47 = vld [vmem:[%s3505_s1 + $0x1a0] sm:$0xff]  ;;  %v440_v62 = vpack.c.b16 %v436_v45, %v435_v43  ;;  %v940_v0 = vshll.u32 %v3025_v53, 16  ;;  %v2575_v28 = vld [vmem:[%s3505_s1 + $0x8] sm:$0xff]  ;;  %v2149_v31 = vrot.slane %v2805_v10, 9 }
  0x2e   : > { %1427 = vmatpush.bf16.msrb.mxu2 %v2637_v49  ;;  %901 = vmatmul.bf16.vlgmr.msra.gmra.mxu3 %v2235_v14  ;;  %v432_v49 = vunpack.c.l.b16 %v355_v36  ;;  %v686_v52 = vunpack.c.l.b16 %v649_v41  ;;  %v951_v7 = vor.u32 %v950_v58, %v947_v57  ;;  %v2612_v14 = vld [vmem:[%s3505_s1 + $0x110] sm:$0xff]  ;;  %v956_v22 = vrot.slane %v954_v11, 5  ;;  %v2642_v27 = vld [vmem:[%s3505_s1 + $0x1e0] sm:$0xff] }
  0x2f   : > { %755 = vmatmul.bf16.vlgmr.msra.gmra.mxu2 %v691_v61  ;;  %1657 = vmatpush.bf16.msrb.mxu3 %v2645_v4  ;;  %v2613_v61 = vld [vmem:[%s3505_s1 + $0x118] sm:$0xff]  ;;  %v2599_v4 = vld [vmem:[%s2796_s13 + $0x1c] sm:$0xf0]  ;;  %v942_v16 = vrot.slane %v940_v0, 5  ;;  %v959_v34 = vshrl.u32 %v3050_v18, 16 }
  0x30   : > { %v438_v63 = vpack.c.b16 %v432_v49, %v431_v48  ;;  %v952_v20 = vrot.slane %v951_v7, 4  ;;  %v2574_v37 = vld [vmem:[%s3505_s1] sm:$0xff]  ;;  %v3101_v48 = vld [vmem:[%s3505_s1 + $0x238] sm:$0xff]  ;;  %v2600_v11 = vld [vmem:[%s2796_s13 + $0x2c] sm:$0xf0] }
  0x31   : > { %595 = vmatpush.bf16.msrb.mxu1 %v2580_v1  ;;  %1124 = vmatpush.bf16.msrb.mxu0 %v2616_v5  ;;  %v692_v1 = vpack.c.b16 %v686_v52, %v685_v50  ;;  %v937_v5 = vor.u32 %v936_v54, %v933_v51  ;;  %v2610_v41 = vld [vmem:[%s3505_s1 + $0x100] sm:$0xff]  ;;  %v961_v43 = vrot.slane %v959_v34, 4  ;;  %v2570_v54 = vld [vmem:[%s2796_s13 + $0x4] sm:$0xf0]  ;;  %v660_v34 = vrot.slane %v2914_v21, 5 }
  0x32   : > { %1428 = vmatpush.bf16.msrb.mxu2 %v2636_v15  ;;  %v2239_v15 = vor.u32 %v2599_v4, %v2238_v3  ;;  %v957_v36 = vsel %vm2851_vm4, %v952_v20, %v956_v22  ;;  %v3104_v49 = vld [vmem:[%s2796_s13 + $0x24] sm:$0x1]  ;;  %v2098_v52 = vld [vmem:[%s2796_s13] sm:$0xf]  ;;  %v2242_v3 = vld [vmem:[%s2796_s13 + $0x28] sm:$0xf] }
  0x33   : > { %1658 = vmatpush.bf16.msrb.mxu3 %v2644_v6  ;;  %v938_v19 = vrot.slane %v937_v5, 4  ;;  %v2148_v6 = vrot.slane %v2799_v8, 9  ;;  %v962_v8 = vshll.u32 %v3050_v18, 16  ;;  %v2099_v0 = vor.u32 %v2570_v54, %v2098_v52  ;;  %v3116_v5 = vld [vmem:[%s2796_s13 + $0x28] sm:$0xf] }
  0x34   : > { %v2631_v20 = vld [vmem:[%s3505_s1 + $0x188] sm:$0xff]  ;;  %v987_v22 = vshrl.u32 %v3116_v5, 16  ;;  %v2571_v52 = vld [vmem:[%s2796_s13 + $0x14] sm:$0xf0] }
  0x35   : > { %596 = vmatpush.bf16.msrb.mxu1 %v2579_v25  ;;  %1125 = vmatpush.bf16.msrb.mxu0 %v2615_v30  ;;  %v3053_v25 = vld [vmem:[%s2796_s13 + $0x20] sm:$0xf]  ;;  %v652_v30 = vrot.slane %v2802_v9, 5  ;;  %v2641_v9 = vld [vmem:[%s3505_s1 + $0x1d8] sm:$0xff]  ;;  %v943_v35 = vsel %vm2851_vm4, %v938_v19, %v942_v16  ;;  %v964_v45 = vrot.slane %v962_v8, 5  ;;  %v2623_v16 = vld [vmem:[%s3505_s1 + $0x168] sm:$0xff] }
  0x36   : > { %1429 = vmatpush.bf16.msrb.mxu2 %v2635_v23  ;;  %v656_v23 = vrot.slane %v2811_v12, 5  ;;  %v973_v10 = vshrl.u32 %v3053_v25, 16  ;;  %v976_v12 = vshll.u32 %v3053_v25, 16  ;;  %v2151_v8 = vrot.slane %v2881_v2, 9  ;;  %v2639_v2 = vld [vmem:[%s3505_s1 + $0x1c8] sm:$0xff] }
  0x37   : > { %1659 = vmatpush.bf16.msrb.mxu3 %v2643_v42  ;;  %v653_v38 = vsel %vm2861_vm5, %v2148_v6, %v652_v30  ;;  %v3096_v42 = vld [vmem:[%s2796_s13 + $0x1c] sm:$0x1] }
  0x38   : > { %v657_v39 = vsel %vm2861_vm5, %v2149_v31, %v656_v23  ;;  %v975_v50 = vrot.slane %v973_v10, 4  ;;  %v978_v51 = vrot.slane %v976_v12, 5  ;;  %v687_v57 = vunpack.c.l.b16 %v653_v38  ;;  %v3141_v23 = vld [vmem:[%s3505_s1 + $0x228] sm:$0xff]  ;;  %v2630_v10 = vld [vmem:[%s3505_s1 + $0x180] sm:$0xff] }
  0x39   : > { %597 = vmatpush.bf16.msrb.mxu1 %v2578_v40  ;;  %1126 = vmatpush.bf16.msrb.mxu0 %v2614_v46  ;;  %v2625_v40 = vld [vmem:[%s3505_s1 + $0x178] sm:$0xff]  ;;  %v1059_v46 = vunpack.c.l.b16 %v943_v35  ;;  %v688_v58 = vunpack.c.l.b16 %v657_v39  ;;  %v2622_v12 = vld [vmem:[%s3505_s1 + $0x160] sm:$0xff]  ;;  %v989_v35 = vrot.slane %v987_v22, 4  ;;  %v3165_v38 = vld [vmem:[%s2796_s13 + $0x2c] sm:$0x1] }
  0x3a   : > { %1430 = vmatpush.bf16.msrb.mxu2 %v2634_v47  ;;  %v1060_v47 = vunpack.c.l.b16 %v957_v36  ;;  %v979_v4 = vor.u32 %v978_v51, %v975_v50  ;;  %v3168_v39 = vld [vmem:[%s2796_s13 + $0x34] sm:$0x1]  ;;  %v2621_v50 = vld [vmem:[%s3505_s1 + $0x158] sm:$0xff]  ;;  %v996_v54 = vshll.u32 %v3165_v38, 16 }
  0x3b   : > { %1660 = vmatpush.bf16.msrb.mxu3 %v2642_v27  ;;  %v693_v7 = vpack.c.b16 %v688_v58, %v687_v57  ;;  %v990_v27 = vshll.u32 %v3116_v5, 16  ;;  %v1010_v58 = vshll.u32 %v3168_v39, 16  ;;  %v2246_v22 = vld [vmem:[%s2796_s13 + $0x38] sm:$0xf] }
  0x3c   : > { %516 = vmatmul.bf16.gmra.mxu1 %v440_v62  ;;  %506 = vmatmul.bf16.gmra.mxu0 %v438_v63  ;;  %v965_v62 = vor.u32 %v964_v45, %v961_v43  ;;  %v982_v63 = vshll.u32 %v3104_v49, 16  ;;  %v980_v6 = vrot.slane %v979_v4, 4  ;;  %v2102_v45 = vld [vmem:[%s2796_s13 + $0x10] sm:$0xf] }
  0x3d   : > { %598 = vmatpush.bf16.msrb.mxu1 %v2577_v59  ;;  %1127 = vmatpush.bf16.msrb.mxu0 %v2613_v61  ;;  %v968_v59 = vshll.u32 %v3096_v42, 16  ;;  %v2624_v61 = vld [vmem:[%s3505_s1 + $0x170] sm:$0xff]  ;;  %v2103_v4 = vor.u32 %v2571_v52, %v2102_v45 }
  0x3e   : > { %1431 = vmatpush.bf16.msrb.mxu2 %v2633_v17  ;;  %906 = vmatmul.bf16.gmra.mxu3 %v2239_v15  ;;  %v966_v17 = vrot.slane %v965_v62, 4  ;;  %v984_v19 = vrot.slane %v982_v63, 5  ;;  %v3192_v63 = vld [vmem:[%s2796_s13 + $0x18] sm:$0xf] }
  0x3f   : > { %760 = vmatmul.bf16.gmra.mxu2 %v692_v1  ;;  %1661 = vmatpush.bf16.msrb.mxu3 %v2641_v9  ;;  %v1067_v1 = vpack.c.b16 %v1060_v47, %v1059_v46  ;;  %v970_v15 = vrot.slane %v968_v59, 5  ;;  %v664_v9 = vrot.slane %v2922_v26, 5  ;;  %v3188_v59 = vld [vmem:[%s2796_s13 + $0x10] sm:$0xf] }
  0x40   : > { %v985_v26 = vsel %vm2851_vm4, %v980_v6, %v984_v19  ;;  %v1482_v19 = vshll.u32 %v3192_v63, 16  ;;  %v3208_v6 = vld [vmem:[%s2796_s13 + $0x1c] sm:$0x1] }
  0x41   : > { %599 = vmatpush.bf16.msrb.mxu1 %v2576_v13  ;;  %1128 = vmatpush.bf16.msrb.mxu0 %v2612_v14  ;;  %v3122_v13 = vld [vmem:[%s3505_s1 + $0x230] sm:$0xff]  ;;  %v971_v21 = vsel %vm2851_vm4, %v966_v17, %v970_v15  ;;  %v665_v43 = vsel %vm2861_vm5, %v2151_v8, %v664_v9  ;;  %v1062_v47 = vunpack.c.l.b16 %v985_v26  ;;  %v998_v15 = vrot.slane %v996_v54, 5  ;;  %v3215_v8 = vld [vmem:[%s2796_s13 + $0x40] sm:$0xf]  ;;  %v2619_v9 = vld [vmem:[%s3505_s1 + $0x148] sm:$0xff] }
  0x42   : > { %1432 = vmatpush.bf16.msrb.mxu2 %v2632_v32  ;;  %v3125_v14 = vld [vmem:[%s2796_s13 + $0x30] sm:$0xf]  ;;  %v1061_v46 = vunpack.c.l.b16 %v971_v21  ;;  %v690_v62 = vunpack.c.l.b16 %v665_v43  ;;  %v1012_v17 = vrot.slane %v1010_v58, 5  ;;  %v1029_v45 = vshrl.u32 %v3215_v8, 16 }
  0x43   : > { %v1001_v30 = vshrl.u32 %v3125_v14, 16  ;;  %v1004_v31 = vshll.u32 %v3125_v14, 16  ;;  %v2640_v32 = vld [vmem:[%s3505_s1 + $0x1d0] sm:$0xff] }
  0x44   : > { %1662 = vmatpush.bf16.msrb.mxu3 %v2640_v32 }
  0x45   : > { %600 = vmatpush.bf16.msrb.mxu1 %v2575_v28  ;;  %1129 = vmatpush.bf16.msrb.mxu0 %v2611_v33  ;;  %v2243_v28 = vor.u32 %v2600_v11, %v2242_v3  ;;  %v2150_v33 = vrot.slane %v2866_v56, 9  ;;  %v992_v56 = vrot.slane %v990_v27, 5  ;;  %v1003_v36 = vrot.slane %v1001_v30, 4  ;;  %v2620_v11 = vld [vmem:[%s3505_s1 + $0x150] sm:$0xff]  ;;  %v2601_v27 = vld [vmem:[%s2796_s13 + $0x3c] sm:$0xf0] }
  0x46   : > { %1433 = vmatpush.bf16.msrb.mxu2 %v2631_v20  ;;  %v1479_v3 = vshrl.u32 %v3192_v63, 16 }
  0x47   : > { %v993_v51 = vor.u32 %v992_v56, %v989_v35  ;;  %v1484_v56 = vrot.slane %v1482_v19, 5  ;;  %v3266_v19 = vld [vmem:[%s2796_s13 + $0x44] sm:$0x1] }
  0x48   : > { %1663 = vmatpush.bf16.msrb.mxu3 %v2639_v2  ;;  %v1481_v32 = vrot.slane %v1479_v3, 4  ;;  %v1174_v2 = vrot.slane %v3031_v60, 5  ;;  %v3241_v60 = vld [vmem:[%s3505_s1 + $0x210] sm:$0xff] }
  0x49   : > { %601 = vmatpush.bf16.msrb.mxu1 %v2574_v37  ;;  %1130 = vmatpush.bf16.msrb.mxu0 %v2610_v41  ;;  %v1006_v37 = vrot.slane %v1004_v31, 5  ;;  %v661_v41 = vsel %vm2861_vm5, %v2150_v33, %v660_v34  ;;  %v1170_v33 = vrot.slane %v3025_v53, 5  ;;  %v3212_v34 = vld [vmem:[%s2796_s13 + $0x38] sm:$0xf]  ;;  %v2638_v53 = vld [vmem:[%s3505_s1 + $0x1c0] sm:$0xff] }
  0x4a   : > { %1434 = vmatpush.bf16.msrb.mxu2 %v2630_v10  ;;  %v3223_v10 = vld [vmem:[%s3505_s1 + $0x218] sm:$0xff]  ;;  %v1485_v43 = vor.u32 %v1484_v56, %v1481_v32 }
  0x4b   : > { %v1007_v57 = vor.u32 %v1006_v37, %v1003_v36  ;;  %v1488_v36 = vshll.u32 %v3208_v6, 16  ;;  %v1015_v37 = vshrl.u32 %v3212_v34, 16 }
  0x4c   : > { %602 = vmatmul.bf16.vlgmr.msrb.gmra.mxu1 %v2099_v0  ;;  %1131 = vmatmul.bf16.vlgmr.msrb.gmra.mxu0 %v1067_v1  ;;  %v1465_v0 = vshrl.u32 %v3188_v59, 16  ;;  %v1468_v1 = vshll.u32 %v3188_v59, 16 }
  0x4d   : > { %1281 = vmatpush.bf16.msra.mxu1 %v2625_v40  ;;  %1815 = vmatpush.bf16.msra.mxu0 %v3101_v48  ;;  %v3173_v40 = vld [vmem:[%s3505_s1 + $0x220] sm:$0xff] }
  0x4e   : > { %911 = vmatmul.bf16.gmra.mxu3 %v2243_v28  ;;  %2662 = vmatpush.bf16.msra.mxu2 %v3101_v48  ;;  %v1068_v48 = vpack.c.b16 %v1062_v47, %v1061_v46  ;;  %v3205_v28 = vld [vmem:[%s2796_s13 + $0x14] sm:$0x1]  ;;  %v1467_v30 = vrot.slane %v1465_v0, 4  ;;  %v1470_v31 = vrot.slane %v1468_v1, 5  ;;  %v1032_v46 = vshll.u32 %v3215_v8, 16  ;;  %v2618_v47 = vld [vmem:[%s3505_s1 + $0x140] sm:$0xff] }
  0x4f   : > { %765 = vmatmul.bf16.gmra.mxu2 %v693_v7  ;;  %v994_v7 = vrot.slane %v993_v51, 4  ;;  %v1474_v35 = vshll.u32 %v3205_v28, 16  ;;  %1664 = vmatpush.bf16.msrb.mxu3 %v2638_v53  ;;  %v2329_v51 = vrot.slane %v2985_v29, 9  ;;  %v1486_v0 = vrot.slane %v1485_v43, 4  ;;  %v2626_v53 = vld [vmem:[%s2796_s13 + $0x14] sm:$0xf0] }
  0x50   : > { %v1490_v1 = vrot.slane %v1488_v36, 5  ;;  %v1017_v29 = vrot.slane %v1015_v37, 4  ;;  %v3290_v43 = vld [vmem:[%s2796_s13 + $0x24] sm:$0x1] }
  0x51   : > { %1282 = vmatpush.bf16.msra.mxu1 %v2624_v61  ;;  %1816 = vmatpush.bf16.msra.mxu0 %v3122_v13  ;;  %v689_v61 = vunpack.c.l.b16 %v661_v41  ;;  %v999_v21 = vsel %vm2851_vm4, %v994_v7, %v998_v15  ;;  %v1018_v41 = vshll.u32 %v3212_v34, 16  ;;  %v1476_v58 = vrot.slane %v1474_v35, 5 }
  0x52   : > { %2663 = vmatpush.bf16.msra.mxu2 %v3122_v13  ;;  %v2247_v13 = vor.u32 %v2601_v27, %v2246_v22  ;;  %v1063_v52 = vunpack.c.l.b16 %v999_v21  ;;  %v1031_v15 = vrot.slane %v1029_v45, 4  ;;  %v3273_v27 = vld [vmem:[%s2796_s13 + $0x20] sm:$0xf]  ;;  %v1038_v21 = vshll.u32 %v3266_v19, 16 }
  0x53   : > { %v694_v20 = vpack.c.b16 %v690_v62, %v689_v61  ;;  %v2106_v61 = vld [vmem:[%s2796_s13 + $0x20] sm:$0xf]  ;;  %v2572_v62 = vld [vmem:[%s2796_s13 + $0x24] sm:$0xf0]  ;;  %v1493_v32 = vshrl.u32 %v3273_v27, 16 }
  0x55   : > { %1283 = vmatpush.bf16.msra.mxu1 %v2623_v16  ;;  %1817 = vmatpush.bf16.msra.mxu0 %v3141_v23  ;;  %v1008_v16 = vrot.slane %v1007_v57, 4 }
  0x56   : > { %2664 = vmatpush.bf16.msra.mxu2 %v3141_v23  ;;  %v1020_v23 = vrot.slane %v1018_v41, 5 }
  0x57   : > { %v1013_v26 = vsel %vm2851_vm4, %v1008_v16, %v1012_v17  ;;  %v1034_v16 = vrot.slane %v1032_v46, 5  ;;  %v2107_v17 = vor.u32 %v2572_v62, %v2106_v61  ;;  %v1502_v61 = vshll.u32 %v3290_v43, 16  ;;  %v2646_v62 = vld [vmem:[%s3505_s1 + $0x200] sm:$0xff] }
  0x58   : > { %v1064_v54 = vunpack.c.l.b16 %v1013_v26  ;;  %v1495_v26 = vrot.slane %v1493_v32, 4 }
  0x59   : > { %1284 = vmatpush.bf16.msra.mxu1 %v2622_v12  ;;  %1818 = vmatpush.bf16.msra.mxu0 %v3173_v40  ;;  %v1471_v12 = vor.u32 %v1470_v31, %v1467_v30  ;;  %v3276_v30 = vld [vmem:[%s2796_s13 + $0x28] sm:$0xf]  ;;  %v1491_v31 = vsel %vm2851_vm4, %v1486_v0, %v1490_v1 }
  0x5a   : > { %2665 = vmatpush.bf16.msra.mxu2 %v3173_v40  ;;  %v1507_v40 = vshrl.u32 %v3276_v30, 16  ;;  %v1510_v56 = vshll.u32 %v3276_v30, 16  ;;  %v1594_v41 = vunpack.c.l.b16 %v1491_v31 }
  0x5b   : > { %v1472_v57 = vrot.slane %v1471_v12, 4  ;;  %v1021_v12 = vor.u32 %v1020_v23, %v1017_v29 }
  0x5c   : > { %607 = vmatmul.bf16.gmra.mxu1 %v2103_v4  ;;  %1136 = vmatmul.bf16.gmra.mxu0 %v1068_v48  ;;  %v2647_v4 = vld [vmem:[%s3505_s1 + $0x208] sm:$0xff]  ;;  %v1509_v45 = vrot.slane %v1507_v40, 4  ;;  %v1512_v46 = vrot.slane %v1510_v56, 5  ;;  %v2573_v40 = vld [vmem:[%s2796_s13 + $0x34] sm:$0xf0] }
  0x5d   : > { %1285 = vmatpush.bf16.msra.mxu1 %v2621_v50  ;;  %1819 = vmatpush.bf16.msra.mxu0 %v3223_v10  ;;  %v2328_v50 = vrot.slane %v2977_v24, 9  ;;  %v1175_v24 = vsel %vm2861_vm5, %v2329_v51, %v1174_v2  ;;  %v1035_v2 = vor.u32 %v1034_v16, %v1031_v15  ;;  %v1022_v51 = vrot.slane %v1021_v12, 4 }
  0x5e   : > { %916 = vmatmul.bf16.gmra.mxu3 %v2247_v13  ;;  %v1218_v7 = vunpack.c.l.b16 %v1175_v24  ;;  %v1069_v13 = vpack.c.b16 %v1064_v54, %v1063_v52  ;;  %2666 = vmatpush.bf16.msra.mxu2 %v3223_v10  ;;  %v1513_v0 = vor.u32 %v1512_v46, %v1509_v45  ;;  %v1178_v24 = vrot.slane %v3096_v42, 5 }
  0x5f   : > { %770 = vmatmul.bf16.gmra.mxu2 %v694_v20  ;;  %v1171_v3 = vsel %vm2861_vm5, %v2328_v50, %v1170_v33  ;;  %v1477_v20 = vsel %vm2851_vm4, %v1472_v57, %v1476_v58  ;;  %v1496_v33 = vshll.u32 %v3273_v27, 16  ;;  %v3293_v50 = vld [vmem:[%s2796_s13 + $0x2c] sm:$0x1]  ;;  %v1036_v54 = vrot.slane %v1035_v2, 4 }
  0x60   : > { %v1217_v48 = vunpack.c.l.b16 %v1171_v3  ;;  %v1593_v37 = vunpack.c.l.b16 %v1477_v20  ;;  %v1040_v57 = vrot.slane %v1038_v21, 5  ;;  %v1516_v1 = vshll.u32 %v3293_v50, 16 }
  0x61   : > { %1286 = vmatpush.bf16.msra.mxu1 %v2620_v11  ;;  %1820 = vmatpush.bf16.msra.mxu0 %v3241_v60  ;;  %v3262_v11 = vld [vmem:[%s2796_s13 + $0x3c] sm:$0x1]  ;;  %v1498_v36 = vrot.slane %v1496_v33, 5  ;;  %v2330_v3 = vrot.slane %v3050_v18, 9  ;;  %v1514_v18 = vrot.slane %v1513_v0, 4  ;;  %v2331_v15 = vrot.slane %v3053_v25, 9 }
  0x62   : > { %v3270_v22 = vpack.c.b16 %v1218_v7, %v1217_v48  ;;  %v1024_v35 = vshll.u32 %v3262_v11, 16  ;;  %2667 = vmatpush.bf16.msra.mxu2 %v3241_v60  ;;  %v1601_v10 = vpack.c.b16 %v1594_v41, %v1593_v37  ;;  %v1041_v60 = vsel %vm2851_vm4, %v1036_v54, %v1040_v57  ;;  %v2110_v33 = vld [vmem:[%s2796_s13 + $0x30] sm:$0xf]  ;;  %v2627_v37 = vld [vmem:[%s2796_s13 + $0x24] sm:$0xf0] }
  0x63   : > { %v1499_v58 = vor.u32 %v1498_v36, %v1495_v26  ;;  %v1504_v48 = vrot.slane %v1502_v61, 5  ;;  %v1179_v7 = vsel %vm2861_vm5, %v2330_v3, %v1178_v24  ;;  %v1518_v42 = vrot.slane %v1516_v1, 5  ;;  %v2422_v36 = vld [vmem:[%s2796_s13 + $0x20] sm:$0xf] }
  0x64   : > { %v1026_v52 = vrot.slane %v1024_v35, 5  ;;  %v1182_v16 = vrot.slane %v3104_v49, 5  ;;  %v1066_v31 = vunpack.c.l.b16 %v1041_v60  ;;  %v3321_v49 = vld [vmem:[%s2796_s13 + $0x30] sm:$0xf]  ;;  %v1708_v26 = vrot.slane %v3208_v6, 5 }
  0x65   : > { %1287 = vmatpush.bf16.msra.mxu1 %v2619_v9  ;;  %v2418_v9 = vld [vmem:[%s2796_s13 + $0x10] sm:$0xf]  ;;  %1821 = vmatpush.bf16.msra.mxu0 %v2647_v4  ;;  %v1500_v23 = vrot.slane %v1499_v58, 4  ;;  %v1519_v25 = vsel %vm2851_vm4, %v1514_v18, %v1518_v42  ;;  %v1521_v35 = vshrl.u32 %v3321_v49, 16  ;;  %v1524_v56 = vshll.u32 %v3321_v49, 16 }
  0x66   : > { %v1027_v29 = vsel %vm2851_vm4, %v1022_v51, %v1026_v52  ;;  %2668 = vmatpush.bf16.msra.mxu2 %v2647_v4  ;;  %v1183_v32 = vsel %vm2861_vm5, %v2331_v15, %v1182_v16  ;;  %v1596_v46 = vunpack.c.l.b16 %v1519_v25  ;;  %v2513_v51 = vrot.slane %v3192_v63, 9 }
  0x67   : > { %v1065_v20 = vunpack.c.l.b16 %v1027_v29  ;;  %v1220_v4 = vunpack.c.l.b16 %v1183_v32  ;;  %v1523_v52 = vrot.slane %v1521_v35, 4  ;;  %v1526_v54 = vrot.slane %v1524_v56, 5 }
  0x68   : > { %v2423_v61 = vor.u32 %v2627_v37, %v2422_v36  ;;  %v1709_v1 = vsel %vm2861_vm5, %v2513_v51, %v1708_v26  ;;  %v2332_v32 = vrot.slane %v3116_v5, 9  ;;  %v2397_v37 = vld [vmem:[%s2796_s13 + $0x44] sm:$0x1] }
  0x69   : > { %1288 = vmatpush.bf16.msra.mxu1 %v2618_v47  ;;  %v2419_v47 = vor.u32 %v2626_v53, %v2418_v9  ;;  %1822 = vmatpush.bf16.msra.mxu0 %v2646_v62  ;;  %v1505_v9 = vsel %vm2851_vm4, %v1500_v23, %v1504_v48  ;;  %v3324_v53 = vld [vmem:[%s2796_s13 + $0x38] sm:$0xf]  ;;  %v1070_v21 = vpack.c.b16 %v1066_v31, %v1065_v20  ;;  %v1752_v60 = vunpack.c.l.b16 %v1709_v1  ;;  %v3357_v20 = vld [vmem:[%s2796_s13 + $0x48] sm:$0xf]  ;;  %v2426_v31 = vld [vmem:[%s2796_s13 + $0x30] sm:$0xf] }
  0x6a   : > { %2669 = vmatpush.bf16.msra.mxu2 %v2646_v62  ;;  %v1535_v2 = vshrl.u32 %v3324_v53, 16  ;;  %v1538_v41 = vshll.u32 %v3324_v53, 16  ;;  %v1595_v45 = vunpack.c.l.b16 %v1505_v9  ;;  %v3341_v62 = vld [vmem:[%s2796_s13 + $0x3c] sm:$0x1]  ;;  %v1563_v35 = vshrl.u32 %v3357_v20, 16 }
  0x6b   : > { %v1544_v24 = vshll.u32 %v3341_v62, 16  ;;  %v1566_v56 = vshll.u32 %v3357_v20, 16 }
  0x6c   : > { %612 = vmatmul.bf16.gmra.mxu1 %v2107_v17  ;;  %1141 = vmatmul.bf16.gmra.mxu0 %v1069_v13  ;;  %v1219_v17 = vunpack.c.l.b16 %v1179_v7  ;;  %v1704_v13 = vrot.slane %v3205_v28, 5  ;;  %v2111_v28 = vor.u32 %v2573_v40, %v2110_v33  ;;  %v1537_v57 = vrot.slane %v1535_v2, 4 }
  0x6d   : > { %v1540_v58 = vrot.slane %v1538_v41, 5  ;;  %v1602_v6 = vpack.c.b16 %v1596_v46, %v1595_v45  ;;  %v1546_v18 = vrot.slane %v1544_v24, 5  ;;  %v1186_v33 = vrot.slane %v3165_v38, 5  ;;  %v2399_v41 = vld [vmem:[%s2796_s13 + $0x4c] sm:$0x1] }
  0x6e   : > { %1665 = vmatmul.bf16.vlgmr.msrb.gmra.mxu3 %v1601_v10  ;;  %v3326_v12 = vpack.c.b16 %v1220_v4, %v1219_v17  ;;  %v3338_v10 = vld [vmem:[%s2796_s13 + $0x34] sm:$0x1]  ;;  %v3354_v17 = vld [vmem:[%s2796_s13 + $0x40] sm:$0xf]  ;;  %v2333_v40 = vrot.slane %v3125_v14, 9  ;;  %v1190_v4 = vrot.slane %v3168_v39, 5 }
  0x6f   : > { %1435 = vmatmul.bf16.vlgmr.msrb.gmra.mxu2 %v2419_v47  ;;  %v2512_v47 = vrot.slane %v3188_v59, 9  ;;  %v1527_v59 = vor.u32 %v1526_v54, %v1523_v52  ;;  %v1530_v63 = vshll.u32 %v3338_v10, 16  ;;  %v1541_v3 = vor.u32 %v1540_v58, %v1537_v57 }
  0x70   : > { %v1549_v9 = vshrl.u32 %v3354_v17, 16  ;;  %v1552_v25 = vshll.u32 %v3354_v17, 16  ;;  %v1187_v5 = vsel %vm2861_vm5, %v2332_v32, %v1186_v33  ;;  %v1191_v14 = vsel %vm2861_vm5, %v2333_v40, %v1190_v4 }
  0x71   : > { %v1705_v0 = vsel %vm2861_vm5, %v2512_v47, %v1704_v13  ;;  %v1528_v23 = vrot.slane %v1527_v59, 4  ;;  %v1532_v48 = vrot.slane %v1530_v63, 5  ;;  %v1542_v7 = vrot.slane %v1541_v3, 4  ;;  %v2628_v13 = vld [vmem:[%s2796_s13 + $0x34] sm:$0xf0] }
  0x72   : > { %v1751_v29 = vunpack.c.l.b16 %v1705_v0  ;;  %v1221_v38 = vunpack.c.l.b16 %v1187_v5  ;;  %v1222_v39 = vunpack.c.l.b16 %v1191_v14  ;;  %v1554_v26 = vrot.slane %v1552_v25, 5 }
  0x73   : > { %v1533_v15 = vsel %vm2851_vm4, %v1528_v23, %v1532_v48  ;;  %v1547_v16 = vsel %vm2851_vm4, %v1542_v7, %v1546_v18  ;;  %v2427_v36 = vor.u32 %v2628_v13, %v2426_v31  ;;  %v1565_v45 = vrot.slane %v1563_v35, 4  ;;  %v2430_v18 = vld [vmem:[%s2796_s13 + $0x40] sm:$0xf] }
  0x74   : > { %v1759_v42 = vpack.c.b16 %v1752_v60, %v1751_v29  ;;  %v1597_v2 = vunpack.c.l.b16 %v1533_v15  ;;  %v1568_v46 = vrot.slane %v1566_v56, 5  ;;  %v2514_v47 = vrot.slane %v3273_v27, 9 }
  0x75   : > { %v3376_v51 = vpack.c.b16 %v1222_v39, %v1221_v38  ;;  %v1712_v54 = vrot.slane %v3290_v43, 5  ;;  %v2515_v57 = vrot.slane %v3276_v30, 9  ;;  %v1716_v58 = vrot.slane %v3293_v50, 5 }
  0x76   : > { %v1569_v0 = vor.u32 %v1568_v46, %v1565_v45  ;;  %v1572_v1 = vshll.u32 %v2399_v41, 16  ;;  %v2334_v60 = vrot.slane %v3212_v34, 9  ;;  %v1194_v23 = vrot.slane %v3262_v11, 5 }
  0x77   : > { %v1713_v27 = vsel %vm2861_vm5, %v2514_v47, %v1712_v54  ;;  %v1717_v43 = vsel %vm2861_vm5, %v2515_v57, %v1716_v58  ;;  %v2335_v48 = vrot.slane %v3215_v8, 9  ;;  %v1198_v7 = vrot.slane %v3266_v19, 5 }
  0x78   : > { %v1570_v50 = vrot.slane %v1569_v0, 4  ;;  %v1574_v63 = vrot.slane %v1572_v1, 5  ;;  %v1754_v3 = vunpack.c.l.b16 %v1717_v43  ;;  %v2516_v11 = vrot.slane %v3321_v49, 9 }
  0x79   : > { %v1199_v31 = vsel %vm2861_vm5, %v2335_v48, %v1198_v7  ;;  %v1720_v19 = vrot.slane %v3338_v10, 5  ;;  %v2517_v13 = vrot.slane %v3324_v53, 9  ;;  %v1728_v25 = vrot.slane %v2397_v37, 5 }
  0x7a   : > { %v1575_v29 = vsel %vm2851_vm4, %v1570_v50, %v1574_v63  ;;  %v1224_v40 = vunpack.c.l.b16 %v1199_v31  ;;  %v1732_v35 = vrot.slane %v2399_v41, 5  ;;  %v2518_v56 = vrot.slane %v3354_v17, 9 }
  0x7b   : > { %v1600_v44 = vunpack.c.l.b16 %v1575_v29 }
  0x7c   : > { %617 = vmatmul.bf16.gmra.mxu1 %v2111_v28  ;;  %1146 = vmatmul.bf16.gmra.mxu0 %v1070_v21  ;;  %v1598_v28 = vunpack.c.l.b16 %v1547_v16  ;;  %v1551_v21 = vrot.slane %v1549_v9, 4  ;;  %v1195_v16 = vsel %vm2861_vm5, %v2334_v60, %v1194_v23  ;;  %v1724_v9 = vrot.slane %v3341_v62, 5 }
  0x7d   : > { %v1223_v33 = vunpack.c.l.b16 %v1195_v16  ;;  %v1729_v49 = vsel %vm2861_vm5, %v2518_v56, %v1728_v25 }
  0x7e   : > { %1670 = vmatmul.bf16.gmra.mxu3 %v1602_v6  ;;  %v1603_v52 = vpack.c.b16 %v1598_v28, %v1597_v2  ;;  %v1558_v6 = vshll.u32 %v2397_v37, 16  ;;  %v2519_v2 = vrot.slane %v3357_v20, 9  ;;  %v1725_v28 = vsel %vm2861_vm5, %v2517_v13, %v1724_v9 }
  0x7f   : > { %1440 = vmatmul.bf16.gmra.mxu2 %v2423_v61  ;;  %v1555_v61 = vor.u32 %v1554_v26, %v1551_v21  ;;  %v1228_v4 = vpack.c.b16 %v1224_v40, %v1223_v33  ;;  %v1756_v62 = vunpack.c.l.b16 %v1725_v28  ;;  %v1757_v5 = vunpack.c.l.b16 %v1729_v49 }
  0x80   : > { %v1560_v59 = vrot.slane %v1558_v6, 5  ;;  %v1733_v53 = vsel %vm2861_vm5, %v2519_v2, %v1732_v35 }
  0x81   : > { %v1556_v30 = vrot.slane %v1555_v61, 4  ;;  %v1758_v14 = vunpack.c.l.b16 %v1733_v53 }
  0x83   : > { %v1561_v24 = vsel %vm2851_vm4, %v1556_v30, %v1560_v59  ;;  %v1762_v39 = vpack.c.b16 %v1758_v14, %v1757_v5 }
  0x84   : > { %v1599_v32 = vunpack.c.l.b16 %v1561_v24 }
  0x86   : > { %v1604_v8 = vpack.c.b16 %v1600_v44, %v1599_v32 }
  0x8c   : > { %1289 = vmatmul.bf16.vlgmr.msra.gmra.mxu1 %v3270_v22  ;;  %1823 = vmatmul.bf16.vlgmr.msra.gmra.mxu0 %v1759_v42  ;;  %v1753_v22 = vunpack.c.l.b16 %v1713_v27  ;;  %v2629_v42 = vld [vmem:[%s2796_s13 + $0x44] sm:$0xf0]  ;;  %s2043_s13 = sshll.u32 %s2709_s15, 3 }
  0x8d   : > { %v2431_v34 = vor.u32 %v2629_v42, %v2430_v18  ;;  %p241_p5 = scmp.lt.s32.totalorder %s2043_s13, 15 }
  0x8e   : > { %1675 = vmatmul.bf16.gmra.mxu3 %v1603_v52  ;;  %v1760_v15 = vpack.c.b16 %v1754_v3, %v1753_v22 }
  0x8f   : > { %1445 = vmatmul.bf16.gmra.mxu2 %v2427_v36  ;;  %s3518_s13 = smov (!%p241_p5, %s2043_s13), 15 }
  0x90   : > { %s2044_s27 = sshll.u32 %s3518_s13, 3 }
  0x91   : > { %s3453_s29 = scalar_lea.vmem %s3506_s2, %s2044_s27  ;;  %s3459_s6 = scalar_lea.vmem %s3507_s3, %s2044_s27 }
  0x9c   : > { %1294 = vmatmul.bf16.gmra.mxu1 %v3326_v12  ;;  %1828 = vmatmul.bf16.gmra.mxu0 %v1760_v15  ;;  %v1721_v12 = vsel %vm2861_vm5, %v2516_v11, %v1720_v19 }
  0x9d   : > { %v1755_v10 = vunpack.c.l.b16 %v1721_v12 }
  0x9e   : > { %1680 = vmatmul.bf16.gmra.mxu3 %v1604_v8 }
  0x9f   : > { %1450 = vmatmul.bf16.gmra.mxu2 %v2431_v34  ;;  %v1761_v17 = vpack.c.b16 %v1756_v62, %v1755_v10 }
  0xa9   : > { %v512_v38 = vpop.f32.mrf.mxu1  ;;  %v502_v20 = vpop.f32.mrf.mxu0 }
  0xac   : > { %1299 = vmatmul.bf16.gmra.mxu1 %v3376_v51  ;;  %1833 = vmatmul.bf16.gmra.mxu0 %v1761_v17 }
  0xaf   : > { %1838 = vmatmul.bf16.vlgmr.msra.gmra.mxu2 %v1762_v39 }
  0xb1   : > { %v514_v26 = vpop.f32.mrf.mxu1  ;;  %v504_v36 = vpop.f32.mrf.mxu0 }
  0xb2   : > { %v756_v21 = vpop.f32.mrf.mxu2  ;;  %v902_v37 = vpop.f32.mrf.mxu3 }
  0xb9   : > { %v517_v45 = vpop.f32.mrf.mxu1  ;;  %v507_v55 = vpop.f32.mrf.mxu0 }
  0xba   : > { %v758_v41 = vpop.f32.mrf.mxu2  ;;  %v3416_v46 = vpop.f32.mrf.mxu3 }
  0xbc   : > { %1304 = vmatmul.bf16.gmra.mxu1 %v1228_v4 }
  0xc1   : > { %v519_v52 = vpop.f32.mrf.mxu1  ;;  %v509_v54 = vpop.f32.mrf.mxu0 }
  0xc2   : > { %v761_v47 = vpop.f32.mrf.mxu2  ;;  %v3418_v57 = vpop.f32.mrf.mxu3 }
  0xc9   : > { %v603_v61 = vpop.f32.mrf.mxu1  ;;  %v1132_v51 = vpop.f32.mrf.mxu0 }
  0xca   : > { %v763_v58 = vpop.f32.mrf.mxu2  ;;  %v604_v6 = vadd.f32 %v603_v61, %v502_v20  ;;  %v3420_v1 = vpop.f32.mrf.mxu3 }
  0xcc   : > { %v776_v0 = vadd.f32 %v756_v21, %v604_v6 }
  0xce   : > { %v922_v62 = vadd.f32 %v902_v37, %v776_v0 }
  0xd0   : > { %v1152_v14 = vadd.f32 %v1132_v51, %v922_v62 }
  0xd1   : > { %v605_v43 = vpop.f32.mrf.mxu1  ;;  %v1134_v30 = vpop.f32.mrf.mxu0 }
  0xd2   : > { %v766_v27 = vpop.f32.mrf.mxu2  ;;  %v606_v59 = vadd.f32 %v605_v43, %v504_v36  ;;  %v3422_v63 = vpop.f32.mrf.mxu3 }
  0xd4   : > { %v777_v50 = vadd.f32 %v758_v41, %v606_v59  ;;  %v1852_v41 = vld [vmem:[%s3453_s29] sm:$0xff] }
  0xd9   : > { %v608_v3 = vpop.f32.mrf.mxu1  ;;  %v1137_v24 = vpop.f32.mrf.mxu0 }
  0xda   : > { %v768_v22 = vpop.f32.mrf.mxu2  ;;  %v609_v29 = vadd.f32 %v608_v3, %v507_v55  ;;  %v3424_v48 = vpop.f32.mrf.mxu3 }
  0xdc   : > { %v778_v60 = vadd.f32 %v761_v47, %v609_v29 }
  0xde   : > { %v924_v61 = vadd.f32 %v3418_v57, %v778_v60 }
  0xe0   : > { %v1154_v43 = vadd.f32 %v1137_v24, %v924_v61  ;;  %v1854_v24 = vld [vmem:[%s3453_s29 + $0x10] sm:$0xff] }
  0xe1   : > { %v610_v7 = vpop.f32.mrf.mxu1  ;;  %v3426_v18 = vpop.f32.mrf.mxu0 }
  0xe2   : > { %v771_v23 = vpop.f32.mrf.mxu2  ;;  %v611_v42 = vadd.f32 %v610_v7, %v509_v54  ;;  %v3430_v33 = vpop.f32.mrf.mxu3 }
  0xe4   : > { %v779_v15 = vadd.f32 %v763_v58, %v611_v42 }
  0xe6   : > { %v925_v29 = vadd.f32 %v3420_v1, %v779_v15 }
  0xe9   : > { %v613_v31 = vpop.f32.mrf.mxu1  ;;  %v3428_v32 = vpop.f32.mrf.mxu0 }
  0xea   : > { %v773_v16 = vpop.f32.mrf.mxu2  ;;  %v614_v44 = vadd.f32 %v613_v31, %v512_v38  ;;  %v3438_v13 = vpop.f32.mrf.mxu3 }
  0xec   : > { %v3432_v40 = vadd.f32 %v766_v27, %v614_v44  ;;  %v1853_v27 = vld [vmem:[%s3453_s29 + $0x8] sm:$0xff] }
  0xee   : > { %v926_v1 = vadd.f32 %v3422_v63, %v3432_v40 }
  0xf1   : > { %v615_v4 = vpop.f32.mrf.mxu1  ;;  %v3434_v8 = vpop.f32.mrf.mxu0 }
  0xf2   : > { %v1436_v34 = vpop.f32.mrf.mxu2  ;;  %v616_v11 = vadd.f32 %v615_v4, %v514_v26  ;;  %v1666_v12 = vpop.f32.mrf.mxu3  ;;  %v923_v26 = vadd.f32 %v3416_v46, %v777_v50 }
  0xf4   : > { %v3436_v19 = vadd.f32 %v768_v22, %v616_v11 }
  0xf6   : > { %v927_v63 = vadd.f32 %v3424_v48, %v3436_v19 }
  0xf9   : > { %v618_v25 = vpop.f32.mrf.mxu1  ;;  %v3440_v35 = vpop.f32.mrf.mxu0 }
  0xfa   : > { %v1438_v9 = vpop.f32.mrf.mxu2  ;;  %v619_v56 = vadd.f32 %v618_v25, %v517_v45  ;;  %v1668_v17 = vpop.f32.mrf.mxu3  ;;  %v1153_v45 = vadd.f32 %v1134_v30, %v923_v26 }
  0xfc   : > { %v3442_v2 = vadd.f32 %v771_v23, %v619_v56 }
  0xfe   : > { %v928_v48 = vadd.f32 %v3430_v33, %v3442_v2 }
 0x101   : > { %v620_v49 = vpop.f32.mrf.mxu1  ;;  %v3445_v53 = vpop.f32.mrf.mxu0 }
 0x102   : > { %v1441_v28 = vpop.f32.mrf.mxu2  ;;  %v621_v10 = vadd.f32 %v620_v49, %v519_v52  ;;  %v1671_v58 = vpop.f32.mrf.mxu3 }
 0x104   : > { %v3447_v5 = vadd.f32 %v773_v16, %v621_v10 }
 0x106   : > { %v929_v33 = vadd.f32 %v3438_v13, %v3447_v5 }
 0x109   : > { %v1290_v38 = vpop.f32.mrf.mxu1  ;;  %v1824_v20 = vpop.f32.mrf.mxu0 }
 0x10a   : > { %v1310_v39 = vadd.f32 %v1290_v38, %v1152_v14  ;;  %v1443_v21 = vpop.f32.mrf.mxu2  ;;  %v1673_v60 = vpop.f32.mrf.mxu3  ;;  %v1855_v14 = vld [vmem:[%s3453_s29 + $0x18] sm:$0xff] }
 0x10c   : > { %v1456_v36 = vadd.f32 %v1436_v34, %v1310_v39  ;;  %v1155_v34 = vadd.f32 %v3426_v18, %v925_v29  ;;  %v1156_v18 = vadd.f32 %v3428_v32, %v926_v1  ;;  %v1157_v32 = vadd.f32 %v3434_v8, %v927_v63  ;;  %v1859_v1 = vld [vmem:[%s3453_s29 + $0x38] sm:$0xff] }
 0x10d   : > { %v1158_v8 = vadd.f32 %v3440_v35, %v928_v48  ;;  %v1159_v35 = vadd.f32 %v3445_v53, %v929_v33 }
 0x10e   : > { %v1686_v37 = vadd.f32 %v1666_v12, %v1456_v36 }
 0x110   : > { %v1844_v55 = vadd.f32 %v1824_v20, %v1686_v37 }
 0x111   : > { %v1292_v47 = vpop.f32.mrf.mxu1  ;;  %v1826_v46 = vpop.f32.mrf.mxu0 }
 0x112   : > { %v1860_v52 = vadd.f32 %v1852_v41, %v1844_v55  ;;  %v1311_v54 = vadd.f32 %v1292_v47, %v1153_v45  ;;  %v1446_v6 = vpop.f32.mrf.mxu2  ;;  %v1676_v62 = vpop.f32.mrf.mxu3  ;;  %v1856_v55 = vld [vmem:[%s3453_s29 + $0x20] sm:$0xff] }
 0x114   : > { %1868 = vst [vmem:[%s3459_s6] sm:$0xff] %v1860_v52  ;;  %v1457_v51 = vadd.f32 %v1438_v9, %v1311_v54  ;;  %v1889_v23 = vmul.f32 %v1860_v52, %v1860_v52 }
 0x116   : > { %v1687_v0 = vadd.f32 %v1668_v17, %v1457_v51 }
 0x118   : > { %v1845_v30 = vadd.f32 %v1826_v46, %v1687_v0 }
 0x119   : > { %v1295_v59 = vpop.f32.mrf.mxu1  ;;  %v1829_v50 = vpop.f32.mrf.mxu0 }
 0x11a   : > { %v1861_v22 = vadd.f32 %v1853_v27, %v1845_v30  ;;  %v1312_v3 = vadd.f32 %v1295_v59, %v1154_v43  ;;  %v1448_v44 = vpop.f32.mrf.mxu2  ;;  %v1678_v46 = vpop.f32.mrf.mxu3  ;;  %v1857_v30 = vld [vmem:[%s3453_s29 + $0x28] sm:$0xff] }
 0x11c   : > { %1869 = vst [vmem:[%s3459_s6 + $0x8] sm:$0xff] %v1861_v22  ;;  %v1876_v7 = vadd.f32 %v1861_v22, %v1860_v52  ;;  %v1890_v42 = vmul.f32 %v1861_v22, %v1861_v22  ;;  %v1458_v57 = vadd.f32 %v1441_v28, %v1312_v3 }
 0x11e   : > { %v1897_v16 = vadd.f32 %v1890_v42, %v1889_v23  ;;  %v1688_v31 = vadd.f32 %v1671_v58, %v1458_v57 }
 0x120   : > { %v1846_v4 = vadd.f32 %v1829_v50, %v1688_v31 }
 0x121   : > { %v1297_v11 = vpop.f32.mrf.mxu1  ;;  %v1831_v9 = vpop.f32.mrf.mxu0 }
 0x122   : > { %v1862_v25 = vadd.f32 %v1854_v24, %v1846_v4  ;;  %v1313_v56 = vadd.f32 %v1297_v11, %v1155_v34  ;;  %v1451_v38 = vpop.f32.mrf.mxu2  ;;  %v1681_v29 = vpop.f32.mrf.mxu3 }
 0x124   : > { %1870 = vst [vmem:[%s3459_s6 + $0x10] sm:$0xff] %v1862_v25  ;;  %v1877_v15 = vadd.f32 %v1876_v7, %v1862_v25  ;;  %v1891_v12 = vmul.f32 %v1862_v25, %v1862_v25  ;;  %v1459_v28 = vadd.f32 %v1443_v21, %v1313_v56 }
 0x126   : > { %v1898_v49 = vadd.f32 %v1897_v16, %v1891_v12  ;;  %v1689_v10 = vadd.f32 %v1673_v60, %v1459_v28  ;;  %v1858_v16 = vld [vmem:[%s3453_s29 + $0x30] sm:$0xff] }
 0x128   : > { %v1847_v17 = vadd.f32 %v1831_v9, %v1689_v10 }
 0x129   : > { %v1300_v20 = vpop.f32.mrf.mxu1  ;;  %v1834_v36 = vpop.f32.mrf.mxu0 }
 0x12a   : > { %v1863_v39 = vadd.f32 %v1855_v14, %v1847_v17  ;;  %v1314_v26 = vadd.f32 %v1300_v20, %v1156_v18  ;;  %v1453_v61 = vpop.f32.mrf.mxu2  ;;  %v1683_v5 = vpop.f32.mrf.mxu3 }
 0x12c   : > { %1871 = vst [vmem:[%s3459_s6 + $0x18] sm:$0xff] %v1863_v39  ;;  %v1878_v40 = vadd.f32 %v1877_v15, %v1863_v39  ;;  %v1892_v21 = vmul.f32 %v1863_v39, %v1863_v39  ;;  %v1460_v37 = vadd.f32 %v1446_v6, %v1314_v26 }
 0x12e   : > { %v1899_v41 = vadd.f32 %v1898_v49, %v1892_v21  ;;  %v1690_v45 = vadd.f32 %v1676_v62, %v1460_v37 }
 0x130   : > { %v1848_v47 = vadd.f32 %v1834_v36, %v1690_v45 }
 0x131   : > { %v1302_v52 = vpop.f32.mrf.mxu1  ;;  %v1836_v0 = vpop.f32.mrf.mxu0 }
 0x132   : > { %v1864_v54 = vadd.f32 %v1856_v55, %v1848_v47  ;;  %v1315_v58 = vadd.f32 %v1302_v52, %v1157_v32  ;;  %v1839_v42 = vpop.f32.mrf.mxu2 }
 0x134   : > { %1872 = vst [vmem:[%s3459_s6 + $0x20] sm:$0xff] %v1864_v54  ;;  %v1879_v19 = vadd.f32 %v1878_v40, %v1864_v54  ;;  %v1893_v51 = vmul.f32 %v1864_v54, %v1864_v54  ;;  %v1461_v6 = vadd.f32 %v1448_v44, %v1315_v58 }
 0x136   : > { %v1900_v27 = vadd.f32 %v1899_v41, %v1893_v51  ;;  %v1691_v43 = vadd.f32 %v1678_v46, %v1461_v6 }
 0x138   : > { %v1849_v59 = vadd.f32 %v1836_v0, %v1691_v43 }
 0x139   : > { %v1305_v50 = vpop.f32.mrf.mxu1 }
 0x13a   : > { %v1865_v22 = vadd.f32 %v1857_v30, %v1849_v59  ;;  %v1316_v3 = vadd.f32 %v1305_v50, %v1158_v8  ;;  %v1841_v56 = vpop.f32.mrf.mxu2 }
 0x13c   : > { %1873 = vst [vmem:[%s3459_s6 + $0x28] sm:$0xff] %v1865_v22  ;;  %v1880_v2 = vadd.f32 %v1879_v19, %v1865_v22  ;;  %v1894_v23 = vmul.f32 %v1865_v22, %v1865_v22  ;;  %v1462_v7 = vadd.f32 %v1451_v38, %v1316_v3 }
 0x13e   : > { %v1901_v57 = vadd.f32 %v1900_v27, %v1894_v23  ;;  %v1692_v60 = vadd.f32 %v1681_v29, %v1462_v7 }
 0x140   : > { %v1850_v31 = vadd.f32 %v1839_v42, %v1692_v60 }
 0x141   : > { %v1307_v44 = vpop.f32.mrf.mxu1 }
 0x142   : > { %v1866_v24 = vadd.f32 %v1858_v16, %v1850_v31  ;;  %v1317_v34 = vadd.f32 %v1307_v44, %v1159_v35 }
 0x144   : > { %1874 = vst [vmem:[%s3459_s6 + $0x30] sm:$0xff] %v1866_v24  ;;  %v1881_v4 = vadd.f32 %v1880_v2, %v1866_v24  ;;  %v1895_v11 = vmul.f32 %v1866_v24, %v1866_v24  ;;  %v1463_v13 = vadd.f32 %v1453_v61, %v1317_v34 }
 0x146   : > { %v1902_v9 = vadd.f32 %v1901_v57, %v1895_v11  ;;  %v1693_v25 = vadd.f32 %v1683_v5, %v1463_v13 }
 0x148   : > { %v1851_v15 = vadd.f32 %v1841_v56, %v1693_v25 }
 0x14a   : > { %v1867_v12 = vadd.f32 %v1859_v1, %v1851_v15 }
 0x14c   : > { %1875 = vst [vmem:[%s3459_s6 + $0x38] sm:$0xff] %v1867_v12  ;;  %v1882_v28 = vadd.f32 %v1881_v4, %v1867_v12  ;;  %v1896_v53 = vmul.f32 %v1867_v12, %v1867_v12 }
 0x14e   : > { %v1883_v49 = vrot.slane %v1882_v28, 4  ;;  %v1903_v10 = vadd.f32 %v1902_v9, %v1896_v53 }
 0x150   : > { %v1884_v62 = vadd.f32 %v1883_v49, %v1882_v28  ;;  %v1904_v14 = vrot.slane %v1903_v10, 4 }
 0x152   : > { %v1885_v18 = vrot.slane %v1884_v62, 2  ;;  %v1905_v17 = vadd.f32 %v1904_v14, %v1903_v10 }
 0x154   : > { %v1886_v38 = vadd.f32 %v1885_v18, %v1884_v62  ;;  %v1906_v20 = vrot.slane %v1905_v17, 2 }
 0x156   : > { %v1887_v39 = vrot.slane %v1886_v38, 1  ;;  %v1907_v26 = vadd.f32 %v1906_v20, %v1905_v17 }
 0x158   : > { %v1908_v36 = vrot.slane %v1907_v26, 1  ;;  %v1888_v63 = vadd.f32 %v1887_v39, %v1886_v38 }
 0x15a   : > { %v1909_v40 = vadd.f32 %v1908_v36, %v1907_v26 }
 0x15c   : > { %v1911_v21 = vsel %vm1910_vm6, %v1888_v63, %v1909_v40 }
 0x15d   : > { %1912 = vst [vmem:[%s259_s10] sm:$0x3] %v1911_v21 }
 0x15e PF: > { %s15_s17 = sadd.s32 1, %s2717_s17   ;;  %s3513_s15 = smov %s2713_s16 }
 0x15f   : > { %p12_p6 = scmp.ge.s32.totalorder %s15_s17, 4   ;;  %s3514_s16 = smov %s3516_s18 }
 0x161   :  { %14 = sbr.rel (!%p12_p6) target bundleno = 2 (0x2), region = 88 }

</bundles_post_ra>
